<compile_context>
chip_gen: v5e
topology: v5e:2x2
jax: 0.10.0
libtpu: 0.0.40
codegen_flags: <defaults>
</compile_context>

<pallas_src>
import functools
import math

import jax
import jax.numpy as jnp
from jax.experimental import pallas as pl
from jax.experimental.pallas import tpu as pltpu

_CompilerParams = getattr(pltpu, "CompilerParams", None) or getattr(
    pltpu, "TPUCompilerParams")


def _round_up(a, b):
    return (a + b - 1) // b * b


@functools.lru_cache(maxsize=None)
def _tpu_vmem_capacity_bytes():
    try:
        return int(pltpu.get_tpu_info().vmem_capacity_bytes)
    except Exception:
        return 128 << 20          # assume v5e/v6e-class if the query fails


def _vmem_limit_bytes():
    # Explicit scoped-VMEM limit (v5e default is 16 MiB); keep headroom on
    # v7x's 64 MiB physical VMEM.
    return int(min(64 << 20, (_tpu_vmem_capacity_bytes() * 3) // 4))


def _default_conv_tile_n():
    # Bigger row tiles amortize per-grid-step overhead on the DMA-bound patch
    # stream (v5e/v6e, 128 MiB VMEM); cap on small-VMEM chips (v7x, 64 MiB).
    return 256 if _tpu_vmem_capacity_bytes() <= (64 << 20) else 512


# ----------------------------------------------------------------------------
# Pallas kernel 1: row-tiled  relu(X @ Wt + b)     (conv1 / conv2 post-im2col)
# ----------------------------------------------------------------------------
def _matmul_relu_kernel(x_ref, wt_ref, b_ref, o_ref):
    y = jnp.dot(x_ref[...], wt_ref[...],
                preferred_element_type=jnp.float32) + b_ref[...]
    o_ref[...] = jnp.maximum(y, 0.0).astype(o_ref.dtype)


def pallas_matmul_relu(x, wt, b, *, tile_n=None, out_dtype=jnp.bfloat16):
    """relu(x @ wt + b); x:(N,K) bf16, wt:(K,M) bf16, b:(1,M) f32 -> (N,M)."""
    if tile_n is None:
        tile_n = _default_conv_tile_n()
    N, K = x.shape
    M = wt.shape[1]
    if N >= tile_n:
        n_pad, tn = _round_up(N, tile_n), tile_n
    else:
        n_pad = _round_up(N, 16)          # bf16 sublane packing
        tn = n_pad
    if n_pad != N:
        x = jnp.pad(x, ((0, n_pad - N), (0, 0)))
    out = pl.pallas_call(
        _matmul_relu_kernel,
        out_shape=jax.ShapeDtypeStruct((n_pad, M), out_dtype),
        grid_spec=pltpu.PrefetchScalarGridSpec(
            num_scalar_prefetch=0,
            grid=(n_pad // tn,),
            in_specs=[
                pl.BlockSpec((tn, K), lambda i: (i, 0)),   # patch rows (tiled)
                pl.BlockSpec((K, M), lambda i: (0, 0)),    # weight (resident)
                pl.BlockSpec((1, M), lambda i: (0, 0)),    # bias
            ],
            out_specs=pl.BlockSpec((tn, M), lambda i: (i, 0)),
        ),
        compiler_params=_CompilerParams(
            dimension_semantics=("parallel",),
            vmem_limit_bytes=_vmem_limit_bytes()),
    )(x, wt, b)
    return out[:N] if n_pad != N else out


# ----------------------------------------------------------------------------
# Pallas kernel 2: fused conv3 + TwoSidedReLU + fc1 + TwoSidedReLU + fc2.
#
#   Grid = (batch tiles [parallel], 16 conv3 output positions [arbitrary]).
#   For each position p:
#       c3      = relu(patch3[p] @ W3_stk + b3_stk)          (tb, 256)
#       h_acc  += c3 @ W1_stk[p*256:(p+1)*256, :]             (tb, 1024)
#   At p == 15:
#       out     = relu(h_acc + b1_stk) @ W2t + b2             (tb, 128)
#   (fc1's columns were permuted to NHWC (h, w, c) order at prep time, so its
#    K axis decomposes exactly into the 16 conv3 output positions.)
# ----------------------------------------------------------------------------
def _conv3_fc_kernel(p3_ref, w3_ref, b3_ref, w1_ref, b1_ref, w2_ref, b2_ref,
                     o_ref, h_acc):
    p = pl.program_id(1)

    @pl.when(p == 0)
    def _():
        h_acc[...] = jnp.zeros_like(h_acc)

    c3 = jnp.maximum(
        jnp.dot(p3_ref[0], w3_ref[...],
                preferred_element_type=jnp.float32) + b3_ref[...], 0.0)
    h_acc[...] += jnp.dot(c3.astype(w1_ref.dtype), w1_ref[...],
                          preferred_element_type=jnp.float32)

    @pl.when(p == pl.num_programs(1) - 1)
    def _():
        h = jnp.maximum(h_acc[...] + b1_ref[...], 0.0).astype(w2_ref.dtype)
        o_ref[...] = (jnp.dot(h, w2_ref[...],
                              preferred_element_type=jnp.float32)
                      + b2_ref[...])


def pallas_conv3_fc_fused(p3, w3t, b3, w1t, b1, w2t, b2, *, tile_b=256):
    """p3:(16, B, 3200) bf16 position-major conv3 patches -> (B, 128) f32."""
    P, B, K3 = p3.shape
    M3 = w3t.shape[1]        # 256
    H = w1t.shape[1]         # 1024
    M = w2t.shape[1]         # 128
    if B >= tile_b:
        b_pad, tb = _round_up(B, tile_b), tile_b
    else:
        b_pad = _round_up(B, 16)          # bf16 sublane packing
        tb = b_pad
    if b_pad != B:
        p3 = jnp.pad(p3, ((0, 0), (0, b_pad - B), (0, 0)))
    out = pl.pallas_call(
        _conv3_fc_kernel,
        out_shape=jax.ShapeDtypeStruct((b_pad, M), jnp.float32),
        grid_spec=pltpu.PrefetchScalarGridSpec(
            num_scalar_prefetch=0,
            grid=(b_pad // tb, P),
            in_specs=[
                pl.BlockSpec((1, tb, K3), lambda i, p: (p, i, 0)),  # conv3 patches
                pl.BlockSpec((K3, M3), lambda i, p: (0, 0)),        # conv3 weight
                pl.BlockSpec((1, M3), lambda i, p: (0, 0)),         # conv3 bias
                pl.BlockSpec((M3, H), lambda i, p: (p, 0)),         # fc1 K-slab
                pl.BlockSpec((1, H), lambda i, p: (0, 0)),          # fc1 bias
                pl.BlockSpec((H, M), lambda i, p: (0, 0)),          # fc2 weight
                pl.BlockSpec((1, M), lambda i, p: (0, 0)),          # fc2 bias
            ],
            out_specs=pl.BlockSpec((tb, M), lambda i, p: (i, 0)),
            scratch_shapes=[pltpu.VMEM((tb, H), jnp.float32)],
        ),
        compiler_params=_CompilerParams(
            dimension_semantics=("parallel", "arbitrary"),
            vmem_limit_bytes=_vmem_limit_bytes()),
    )(p3, w3t, b3, w1t, b1, w2t, b2)
    return out[:B] if b_pad != B else out


# ----------------------------------------------------------------------------
# Plain-JAX glue: channels-last im2col.  Feature order = (kh, kw, C), matching
# the prepared weight layout.  Returns (B*oh*ow, kh*kw*C) row-major in
# (b, oh, ow) order.
# ----------------------------------------------------------------------------
def im2col_nhwc(x, kh, kw, stride, pad):
    if pad:
        x = jnp.pad(x, ((0, 0), (pad, pad), (pad, pad), (0, 0)))
    B, H, W, C = x.shape
    oh = (H - kh) // stride + 1
    ow = (W - kw) // stride + 1
    cols = []
    for i in range(kh):
        for j in range(kw):
            cols.append(x[:, i:i + stride * (oh - 1) + 1:stride,
                          j:j + stride * (ow - 1) + 1:stride, :])
    patches = jnp.stack(cols, axis=3)            # (B, oh, ow, kh*kw, C)
    return patches.reshape(B * oh * ow, kh * kw * C), oh, ow


# ----------------------------------------------------------------------------
# Parameters: raw (PyTorch-layout) init + one-time prep (permute, +/- stack,
# fold NormConv2d scale, pad lanes, transpose, cast to bf16).
# ----------------------------------------------------------------------------
def init_params(key):
    ks = jax.random.split(key, 10)

    def kaiming_conv(k, shape):                   # mode='fan_out', relu
        cout, _, kh, kw = shape
        std = math.sqrt(2.0 / (cout * kh * kw))
        return std * jax.random.normal(k, shape, jnp.float32)

    def linear_w(k, shape):
        fan_in = shape[1]
        return jax.random.normal(k, shape, jnp.float32) / math.sqrt(fan_in)

    return {
        "conv1_w": kaiming_conv(ks[0], (32, 1, 8, 8)),
        "conv1_b": 0.01 * jax.random.normal(ks[1], (32,), jnp.float32),
        "conv2_w": kaiming_conv(ks[2], (64, 64, 6, 6)),
        "conv2_b": 0.01 * jax.random.normal(ks[3], (64,), jnp.float32),
        "conv3_w": kaiming_conv(ks[4], (128, 128, 5, 5)),
        "conv3_b": 0.01 * jax.random.normal(ks[5], (128,), jnp.float32),
        "fc1_w": linear_w(ks[6], (512, 4096)),
        "fc1_b": 0.01 * jax.random.normal(ks[7], (512,), jnp.float32),
        "fc2_w": linear_w(ks[8], (128, 1024)),
        "fc2_b": 0.01 * jax.random.normal(ks[9], (128,), jnp.float32),
        # 'it' parameter is only used by loss_function, not by forward().
    }


def prepare_params(p):
    """One-time weight prep: NHWC permute, fold NormConv2d scale, +/- stack
    (TwoSidedReLU), zero-pad output lanes where needed, transpose, cast bf16."""

    def conv_prep(w, b, stride, mout_pad=None):
        cout, cin, kh, kw = w.shape
        scale = 1.0 / math.sqrt(math.ceil(kh / stride) * math.ceil(kw / stride))
        wp = jnp.transpose(w, (0, 2, 3, 1))              # (Cout, KH, KW, Cin)
        wf = wp.reshape(cout, kh * kw * cin) * scale     # fold input scale in
        w_stk = jnp.concatenate([wf, -wf], axis=0)       # TwoSidedReLU stacking
        b_stk = jnp.concatenate([b, -b], axis=0)
        m = 2 * cout
        if mout_pad is not None and mout_pad > m:        # lane-dense output
            w_stk = jnp.pad(w_stk, ((0, mout_pad - m), (0, 0)))
            b_stk = jnp.pad(b_stk, ((0, mout_pad - m),))
            m = mout_pad
        return (jnp.transpose(w_stk).astype(jnp.bfloat16),   # (K, M)
                b_stk.reshape(1, m).astype(jnp.float32))

    prep = {}
    # conv1: cin=1, 2*32=64 output channels zero-padded to 128 lanes for a
    # dense store; the pad channels are sliced off before conv2 (free glue).
    prep["conv1_wt"], prep["conv1_b"] = conv_prep(p["conv1_w"], p["conv1_b"],
                                                  stride=2, mout_pad=128)
    # conv2: true cin=64 (no zero-padded contraction), K = 6*6*64 = 2304.
    prep["conv2_wt"], prep["conv2_b"] = conv_prep(p["conv2_w"], p["conv2_b"],
                                                  stride=2)
    # conv3: cin=128, K = 5*5*128 = 3200, M = 256.
    prep["conv3_wt"], prep["conv3_b"] = conv_prep(p["conv3_w"], p["conv3_b"],
                                                  stride=1)

    # fc1: permute columns from NCHW-flatten (c,h,w) order to NHWC (h,w,c)
    # order (so K decomposes into the 16 conv3 output positions), then +/-
    # stack for the TwoSidedReLU after fc1.
    w1 = p["fc1_w"].reshape(512, 256, 4, 4).transpose(0, 2, 3, 1).reshape(512, 4096)
    w1_stk = jnp.concatenate([w1, -w1], axis=0)                    # (1024, 4096)
    b1_stk = jnp.concatenate([p["fc1_b"], -p["fc1_b"]], axis=0)    # (1024,)
    prep["fc1_wt"] = jnp.transpose(w1_stk).astype(jnp.bfloat16)    # (4096, 1024)
    prep["fc1_b"] = b1_stk.reshape(1, 1024).astype(jnp.float32)

    prep["fc2_wt"] = jnp.transpose(p["fc2_w"]).astype(jnp.bfloat16)  # (1024, 128)
    prep["fc2_b"] = p["fc2_b"].reshape(1, 128).astype(jnp.float32)
    return prep


# ----------------------------------------------------------------------------
# Forward pass
# ----------------------------------------------------------------------------
def neighbor_model_forward(x, prep):
    # x: (B, 1, 28, 28) NCHW f32
    B = x.shape[0]
    h = jnp.transpose(x, (0, 2, 3, 1)).astype(jnp.bfloat16)       # NHWC bf16

    # conv1: 28x28x1 -> 14x14x(2*32); output stored lane-dense (128), then
    # sliced back to the real 64 channels before conv2.
    p1, oh, ow = im2col_nhwc(h, 8, 8, 2, 3)
    y1 = pallas_matmul_relu(p1, prep["conv1_wt"], prep["conv1_b"])
    h = y1.reshape(B, oh, ow, 128)[..., :64]

    # conv2: 14x14x64 -> 8x8x128, K=2304.
    p2, oh, ow = im2col_nhwc(h, 6, 6, 2, 3)
    y2 = pallas_matmul_relu(p2, prep["conv2_wt"], prep["conv2_b"])
    h = y2.reshape(B, oh, ow, 128)

    # conv3 + fc1 + fc2 fused: conv3 patches rearranged position-major
    # (16, B, 3200) so the 16 output positions become fc1's K-reduction axis.
    p3, oh3, ow3 = im2col_nhwc(h, 5, 5, 1, 0)
    p3 = p3.reshape(B, oh3 * ow3, -1).transpose(1, 0, 2)
    return pallas_conv3_fc_fused(p3, prep["conv3_wt"], prep["conv3_b"],
                                 prep["fc1_wt"], prep["fc1_b"],
                                 prep["fc2_wt"], prep["fc2_b"])


# ----------------------------------------------------------------------------
# Pure-JAX reference (mirrors the PyTorch module).  compute_dtype=bfloat16
# reproduces the kernel's quantization points (weights/activations bf16,
# f32 accumulation) for a tight comparison; float32 is the exact math.
# ----------------------------------------------------------------------------
def reference_forward(x, p, *, compute_dtype=jnp.float32):
    def q(a):
        return a.astype(compute_dtype)

    def conv_ts(h, w, b, stride, pad):
        kh, kw = int(w.shape[2]), int(w.shape[3])
        scale = 1.0 / math.sqrt(math.ceil(kh / stride) * math.ceil(kw / stride))
        y = jax.lax.conv_general_dilated(
            q(h), q(w * scale), (stride, stride), [(pad, pad), (pad, pad)],
            dimension_numbers=("NCHW", "OIHW", "NCHW"),
            preferred_element_type=jnp.float32)
        y = y + b.reshape(1, -1, 1, 1)
        return jnp.concatenate([jnp.maximum(y, 0.0), jnp.maximum(-y, 0.0)], axis=1)

    h = conv_ts(x, p["conv1_w"], p["conv1_b"], 2, 3)
    h = conv_ts(h, p["conv2_w"], p["conv2_b"], 2, 3)
    h = conv_ts(h, p["conv3_w"], p["conv3_b"], 1, 0)
    h = h.reshape(h.shape[0], -1)
    y = jnp.dot(q(h), q(p["fc1_w"]).T,
                preferred_element_type=jnp.float32) + p["fc1_b"]
    h = jnp.concatenate([jnp.maximum(y, 0.0), jnp.maximum(-y, 0.0)], axis=-1)
    return jnp.dot(q(h), q(p["fc2_w"]).T,
                   preferred_element_type=jnp.float32) + p["fc2_b"]


if __name__ == "__main__":
    key = jax.random.PRNGKey(0)
    kx, kp = jax.random.split(key)
    # 28x28 single-channel input is what the module implies (4096 = 256*4*4).
    x = jax.random.normal(kx, (2, 1, 28, 28), jnp.float32)
    params = init_params(kp)
    prep = prepare_params(params)          # one-time weight prep (not per-forward)

    fwd = jax.jit(neighbor_model_forward)
    out = jax.block_until_ready(fwd(x, prep))
    assert out.shape == (2, 128), out.shape

    ref_f32 = reference_forward(x, params, compute_dtype=jnp.float32)
    ref_bf16 = reference_forward(x, params, compute_dtype=jnp.bfloat16)
    scale = float(jnp.max(jnp.abs(ref_f32))) + 1e-6

    # Tight check vs bf16-mirrored reference (same quantization points).
    err_bf16 = float(jnp.max(jnp.abs(out - ref_bf16)))
    assert err_bf16 <= 2e-2 * scale + 1e-4, (err_bf16, scale)
    # Loose sanity check vs exact f32 math (bf16 weights/activations, f32 accum).
    err_f32 = float(jnp.max(jnp.abs(out - ref_f32)))
    assert err_f32 <= 1e-1 * scale + 1e-3, (err_f32, scale)

    print("KERNEL_OK")
</pallas_src>

<mosaic_0001>
module attributes {stable_mosaic.version = 11 : i64} {
  func.func @_matmul_relu_kernel(%arg0: i32, %arg1: memref<400x64xbf16, #tpu.memory_space<vmem>>, %arg2: memref<64x128xbf16, #tpu.memory_space<vmem>>, %arg3: memref<1x128xf32, #tpu.memory_space<vmem>>, %arg4: memref<400x128xbf16, #tpu.memory_space<vmem>>) attributes {dimension_semantics = [#tpu.dimension_semantics<parallel>], iteration_bounds = array<i64: 1>, scalar_prefetch = 0 : i64, scratch_operands = 0 : i64, tpu.core_type = #tpu.core_type<tc>, window_params = [{transform_indices = @transform_0, window_bounds = array<i64: 400, 64>}, {pipeline_mode = #tpu.pipeline_mode<synchronous>, transform_indices = @transform_1, window_bounds = array<i64: 64, 128>}, {pipeline_mode = #tpu.pipeline_mode<synchronous>, transform_indices = @transform_2, window_bounds = array<i64: 1, 128>}, {transform_indices = @transform_3, window_bounds = array<i64: 400, 128>}]} {
    %c0 = arith.constant 0 : index
    %c0_0 = arith.constant 0 : index
    %0 = vector.load %arg1[%c0, %c0_0] : memref<400x64xbf16, #tpu.memory_space<vmem>>, vector<400x64xbf16>
    %c0_1 = arith.constant 0 : index
    %c0_2 = arith.constant 0 : index
    %1 = vector.load %arg2[%c0_1, %c0_2] : memref<64x128xbf16, #tpu.memory_space<vmem>>, vector<64x128xbf16>
    %cst = arith.constant dense<0.000000e+00> : vector<400x128xf32>
    %2 = tpu.matmul %0, %1, %cst {dimension_numbers = #tpu.dot_dimension_numbers<[1], [0], [0], [1], [0, 0, 1, 1], [], []>} : vector<400x64xbf16>, vector<64x128xbf16>, vector<400x128xf32> -> vector<400x128xf32>
    %c0_3 = arith.constant 0 : index
    %c0_4 = arith.constant 0 : index
    %3 = vector.load %arg3[%c0_3, %c0_4] : memref<1x128xf32, #tpu.memory_space<vmem>>, vector<1x128xf32>
    %4 = vector.broadcast %3 : vector<1x128xf32> to vector<400x128xf32>
    %5 = arith.addf %2, %4 : vector<400x128xf32>
    %cst_5 = arith.constant 0.000000e+00 : f32
    %6 = vector.broadcast %cst_5 : f32 to vector<400x128xf32>
    %7 = arith.maximumf %5, %6 : vector<400x128xf32>
    %8 = arith.truncf %7 : vector<400x128xf32> to vector<400x128xbf16>
    %c0_6 = arith.constant 0 : index
    %c0_7 = arith.constant 0 : index
    %9 = vector.load %arg4[%c0_6, %c0_7] : memref<400x128xbf16, #tpu.memory_space<vmem>>, vector<400x128xbf16>
    tpu.vector_store %arg4[%c0_6, %c0_7], %8 {strides = array<i32>} : memref<400x128xbf16, #tpu.memory_space<vmem>>, vector<400x128xbf16>,
    return
  }
  func.func @transform_0(%arg0: i32) -> (i32, i32) {
    %c0_i32 = arith.constant 0 : i32
    %c0_i32_0 = arith.constant 0 : i32
    return %arg0, %c0_i32 : i32, i32
  }
  func.func @transform_1(%arg0: i32) -> (i32, i32) {
    %c0_i32 = arith.constant 0 : i32
    %c0_i32_0 = arith.constant 0 : i32
    %c0_i32_1 = arith.constant 0 : i32
    return %c0_i32, %c0_i32_0 : i32, i32
  }
  func.func @transform_2(%arg0: i32) -> (i32, i32) {
    %c0_i32 = arith.constant 0 : i32
    %c0_i32_0 = arith.constant 0 : i32
    %c0_i32_1 = arith.constant 0 : i32
    return %c0_i32, %c0_i32_0 : i32, i32
  }
  func.func @transform_3(%arg0: i32) -> (i32, i32) {
    %c0_i32 = arith.constant 0 : i32
    %c0_i32_0 = arith.constant 0 : i32
    return %arg0, %c0_i32 : i32, i32
  }
}

module attributes {stable_mosaic.version = 11 : i64} {
  func.func @_matmul_relu_kernel(%arg0: i32, %arg1: memref<128x2304xbf16, #tpu.memory_space<vmem>>, %arg2: memref<2304x128xbf16, #tpu.memory_space<vmem>>, %arg3: memref<1x128xf32, #tpu.memory_space<vmem>>, %arg4: memref<128x128xbf16, #tpu.memory_space<vmem>>) attributes {dimension_semantics = [#tpu.dimension_semantics<parallel>], iteration_bounds = array<i64: 1>, scalar_prefetch = 0 : i64, scratch_operands = 0 : i64, tpu.core_type = #tpu.core_type<tc>, window_params = [{transform_indices = @transform_0, window_bounds = array<i64: 128, 2304>}, {pipeline_mode = #tpu.pipeline_mode<synchronous>, transform_indices = @transform_1, window_bounds = array<i64: 2304, 128>}, {pipeline_mode = #tpu.pipeline_mode<synchronous>, transform_indices = @transform_2, window_bounds = array<i64: 1, 128>}, {transform_indices = @transform_3, window_bounds = array<i64: 128, 128>}]} {
    %c0 = arith.constant 0 : index
    %c0_0 = arith.constant 0 : index
    %0 = vector.load %arg1[%c0, %c0_0] : memref<128x2304xbf16, #tpu.memory_space<vmem>>, vector<128x2304xbf16>
    %c0_1 = arith.constant 0 : index
    %c0_2 = arith.constant 0 : index
    %1 = vector.load %arg2[%c0_1, %c0_2] : memref<2304x128xbf16, #tpu.memory_space<vmem>>, vector<2304x128xbf16>
    %cst = arith.constant dense<0.000000e+00> : vector<128x128xf32>
    %2 = tpu.matmul %0, %1, %cst {dimension_numbers = #tpu.dot_dimension_numbers<[1], [0], [0], [1], [0, 0, 1, 1], [], []>} : vector<128x2304xbf16>, vector<2304x128xbf16>, vector<128x128xf32> -> vector<128x128xf32>
    %c0_3 = arith.constant 0 : index
    %c0_4 = arith.constant 0 : index
    %3 = vector.load %arg3[%c0_3, %c0_4] : memref<1x128xf32, #tpu.memory_space<vmem>>, vector<1x128xf32>
    %4 = vector.broadcast %3 : vector<1x128xf32> to vector<128x128xf32>
    %5 = arith.addf %2, %4 : vector<128x128xf32>
    %cst_5 = arith.constant 0.000000e+00 : f32
    %6 = vector.broadcast %cst_5 : f32 to vector<128x128xf32>
    %7 = arith.maximumf %5, %6 : vector<128x128xf32>
    %8 = arith.truncf %7 : vector<128x128xf32> to vector<128x128xbf16>
    %c0_6 = arith.constant 0 : index
    %c0_7 = arith.constant 0 : index
    %9 = vector.load %arg4[%c0_6, %c0_7] : memref<128x128xbf16, #tpu.memory_space<vmem>>, vector<128x128xbf16>
    tpu.vector_store %arg4[%c0_6, %c0_7], %8 {strides = array<i32>} : memref<128x128xbf16, #tpu.memory_space<vmem>>, vector<128x128xbf16>,
    return
  }
  func.func @transform_0(%arg0: i32) -> (i32, i32) {
    %c0_i32 = arith.constant 0 : i32
    %c0_i32_0 = arith.constant 0 : i32
    return %arg0, %c0_i32 : i32, i32
  }
  func.func @transform_1(%arg0: i32) -> (i32, i32) {
    %c0_i32 = arith.constant 0 : i32
    %c0_i32_0 = arith.constant 0 : i32
    %c0_i32_1 = arith.constant 0 : i32
    return %c0_i32, %c0_i32_0 : i32, i32
  }
  func.func @transform_2(%arg0: i32) -> (i32, i32) {
    %c0_i32 = arith.constant 0 : i32
    %c0_i32_0 = arith.constant 0 : i32
    %c0_i32_1 = arith.constant 0 : i32
    return %c0_i32, %c0_i32_0 : i32, i32
  }
  func.func @transform_3(%arg0: i32) -> (i32, i32) {
    %c0_i32 = arith.constant 0 : i32
    %c0_i32_0 = arith.constant 0 : i32
    return %arg0, %c0_i32 : i32, i32
  }
}

module attributes {stable_mosaic.version = 11 : i64} {
  func.func @_conv3_fc_kernel(%arg0: i32, %arg1: i32, %arg2: memref<1x16x3200xbf16, #tpu.memory_space<vmem>>, %arg3: memref<3200x256xbf16, #tpu.memory_space<vmem>>, %arg4: memref<1x256xf32, #tpu.memory_space<vmem>>, %arg5: memref<256x1024xbf16, #tpu.memory_space<vmem>>, %arg6: memref<1x1024xf32, #tpu.memory_space<vmem>>, %arg7: memref<1024x128xbf16, #tpu.memory_space<vmem>>, %arg8: memref<1x128xf32, #tpu.memory_space<vmem>>, %arg9: memref<16x128xf32, #tpu.memory_space<vmem>>, %arg10: memref<16x1024xf32, #tpu.memory_space<vmem>>) attributes {dimension_semantics = [#tpu.dimension_semantics<parallel>, #tpu.dimension_semantics<arbitrary>], iteration_bounds = array<i64: 1, 16>, scalar_prefetch = 0 : i64, scratch_operands = 1 : i64, tpu.core_type = #tpu.core_type<tc>, window_params = [{transform_indices = @transform_0, window_bounds = array<i64: 1, 16, 3200>}, {pipeline_mode = #tpu.pipeline_mode<synchronous>, transform_indices = @transform_1, window_bounds = array<i64: 3200, 256>}, {pipeline_mode = #tpu.pipeline_mode<synchronous>, transform_indices = @transform_2, window_bounds = array<i64: 1, 256>}, {transform_indices = @transform_3, window_bounds = array<i64: 256, 1024>}, {pipeline_mode = #tpu.pipeline_mode<synchronous>, transform_indices = @transform_4, window_bounds = array<i64: 1, 1024>}, {pipeline_mode = #tpu.pipeline_mode<synchronous>, transform_indices = @transform_5, window_bounds = array<i64: 1024, 128>}, {pipeline_mode = #tpu.pipeline_mode<synchronous>, transform_indices = @transform_6, window_bounds = array<i64: 1, 128>}, {transform_indices = @transform_7, window_bounds = array<i64: 16, 128>}]} {
    %c0_i32 = arith.constant 0 : i32
    %0 = arith.cmpi eq, %arg1, %c0_i32 : i32
    %1 = arith.extui %0 : i1 to i32
    %c0_i32_0 = arith.constant 0 : i32
    %2 = arith.cmpi ne, %1, %c0_i32_0 : i32
    scf.if %2 {
      %cst_16 = arith.constant 0.000000e+00 : f32
      %21 = vector.broadcast %cst_16 : f32 to vector<16x1024xf32>
      %c0_17 = arith.constant 0 : index
      %c0_18 = arith.constant 0 : index
      %22 = vector.load %arg10[%c0_17, %c0_18] : memref<16x1024xf32, #tpu.memory_space<vmem>>, vector<16x1024xf32>
      tpu.vector_store %arg10[%c0_17, %c0_18], %21 {strides = array<i32>} : memref<16x1024xf32, #tpu.memory_space<vmem>>, vector<16x1024xf32>,
    } else {
    }
    %c0 = arith.constant 0 : index
    %c0_1 = arith.constant 0 : index
    %c0_2 = arith.constant 0 : index
    %3 = vector.load %arg2[%c0, %c0_1, %c0_2] : memref<1x16x3200xbf16, #tpu.memory_space<vmem>>, vector<1x16x3200xbf16>
    %4 = vector.shape_cast %3 : vector<1x16x3200xbf16> to vector<16x3200xbf16>
    %c0_3 = arith.constant 0 : index
    %c0_4 = arith.constant 0 : index
    %5 = vector.load %arg3[%c0_3, %c0_4] : memref<3200x256xbf16, #tpu.memory_space<vmem>>, vector<3200x256xbf16>
    %cst = arith.constant dense<0.000000e+00> : vector<16x256xf32>
    %6 = tpu.matmul %4, %5, %cst {dimension_numbers = #tpu.dot_dimension_numbers<[1], [0], [0], [1], [0, 0, 1, 1], [], []>} : vector<16x3200xbf16>, vector<3200x256xbf16>, vector<16x256xf32> -> vector<16x256xf32>
    %c0_5 = arith.constant 0 : index
    %c0_6 = arith.constant 0 : index
    %7 = vector.load %arg4[%c0_5, %c0_6] : memref<1x256xf32, #tpu.memory_space<vmem>>, vector<1x256xf32>
    %8 = vector.broadcast %7 : vector<1x256xf32> to vector<16x256xf32>
    %9 = arith.addf %6, %8 : vector<16x256xf32>
    %cst_7 = arith.constant 0.000000e+00 : f32
    %10 = vector.broadcast %cst_7 : f32 to vector<16x256xf32>
    %11 = arith.maximumf %9, %10 : vector<16x256xf32>
    %c0_8 = arith.constant 0 : index
    %c0_9 = arith.constant 0 : index
    %12 = vector.load %arg10[%c0_8, %c0_9] : memref<16x1024xf32, #tpu.memory_space<vmem>>, vector<16x1024xf32>
    %13 = arith.truncf %11 : vector<16x256xf32> to vector<16x256xbf16>
    %c0_10 = arith.constant 0 : index
    %c0_11 = arith.constant 0 : index
    %14 = vector.load %arg5[%c0_10, %c0_11] : memref<256x1024xbf16, #tpu.memory_space<vmem>>, vector<256x1024xbf16>
    %cst_12 = arith.constant dense<0.000000e+00> : vector<16x1024xf32>
    %15 = tpu.matmul %13, %14, %cst_12 {dimension_numbers = #tpu.dot_dimension_numbers<[1], [0], [0], [1], [0, 0, 1, 1], [], []>} : vector<16x256xbf16>, vector<256x1024xbf16>, vector<16x1024xf32> -> vector<16x1024xf32>
    %16 = arith.addf %12, %15 : vector<16x1024xf32>
    %c0_13 = arith.constant 0 : index
    %c0_14 = arith.constant 0 : index
    %17 = vector.load %arg10[%c0_13, %c0_14] : memref<16x1024xf32, #tpu.memory_space<vmem>>, vector<16x1024xf32>
    tpu.vector_store %arg10[%c0_13, %c0_14], %16 {strides = array<i32>} : memref<16x1024xf32, #tpu.memory_space<vmem>>, vector<16x1024xf32>,
    %c15_i32 = arith.constant 15 : i32
    %18 = arith.cmpi eq, %arg1, %c15_i32 : i32
    %19 = arith.extui %18 : i1 to i32
    %c0_i32_15 = arith.constant 0 : i32
    %20 = arith.cmpi ne, %19, %c0_i32_15 : i32
    scf.if %20 {
      %c0_16 = arith.constant 0 : index
      %c0_17 = arith.constant 0 : index
      %21 = vector.load %arg10[%c0_16, %c0_17] : memref<16x1024xf32, #tpu.memory_space<vmem>>, vector<16x1024xf32>
      %c0_18 = arith.constant 0 : index
      %c0_19 = arith.constant 0 : index
      %22 = vector.load %arg6[%c0_18, %c0_19] : memref<1x1024xf32, #tpu.memory_space<vmem>>, vector<1x1024xf32>
      %23 = vector.broadcast %22 : vector<1x1024xf32> to vector<16x1024xf32>
      %24 = arith.addf %21, %23 : vector<16x1024xf32>
      %cst_20 = arith.constant 0.000000e+00 : f32
      %25 = vector.broadcast %cst_20 : f32 to vector<16x1024xf32>
      %26 = arith.maximumf %24, %25 : vector<16x1024xf32>
      %27 = arith.truncf %26 : vector<16x1024xf32> to vector<16x1024xbf16>
      %c0_21 = arith.constant 0 : index
      %c0_22 = arith.constant 0 : index
      %28 = vector.load %arg7[%c0_21, %c0_22] : memref<1024x128xbf16, #tpu.memory_space<vmem>>, vector<1024x128xbf16>
      %cst_23 = arith.constant dense<0.000000e+00> : vector<16x128xf32>
      %29 = tpu.matmul %27, %28, %cst_23 {dimension_numbers = #tpu.dot_dimension_numbers<[1], [0], [0], [1], [0, 0, 1, 1], [], []>} : vector<16x1024xbf16>, vector<1024x128xbf16>, vector<16x128xf32> -> vector<16x128xf32>
      %c0_24 = arith.constant 0 : index
      %c0_25 = arith.constant 0 : index
      %30 = vector.load %arg8[%c0_24, %c0_25] : memref<1x128xf32, #tpu.memory_space<vmem>>, vector<1x128xf32>
      %31 = vector.broadcast %30 : vector<1x128xf32> to vector<16x128xf32>
      %32 = arith.addf %29, %31 : vector<16x128xf32>
      %c0_26 = arith.constant 0 : index
      %c0_27 = arith.constant 0 : index
      %33 = vector.load %arg9[%c0_26, %c0_27] : memref<16x128xf32, #tpu.memory_space<vmem>>, vector<16x128xf32>
      tpu.vector_store %arg9[%c0_26, %c0_27], %32 {strides = array<i32>} : memref<16x128xf32, #tpu.memory_space<vmem>>, vector<16x128xf32>,
    } else {
    }
    return
  }
  func.func @transform_0(%arg0: i32, %arg1: i32) -> (i32, i32, i32) {
    %c0_i32 = arith.constant 0 : i32
    %c0_i32_0 = arith.constant 0 : i32
    return %arg1, %arg0, %c0_i32 : i32, i32, i32
  }
  func.func @transform_1(%arg0: i32, %arg1: i32) -> (i32, i32) {
    %c0_i32 = arith.constant 0 : i32
    %c0_i32_0 = arith.constant 0 : i32
    %c0_i32_1 = arith.constant 0 : i32
    return %c0_i32, %c0_i32_0 : i32, i32
  }
  func.func @transform_2(%arg0: i32, %arg1: i32) -> (i32, i32) {
    %c0_i32 = arith.constant 0 : i32
    %c0_i32_0 = arith.constant 0 : i32
    %c0_i32_1 = arith.constant 0 : i32
    return %c0_i32, %c0_i32_0 : i32, i32
  }
  func.func @transform_3(%arg0: i32, %arg1: i32) -> (i32, i32) {
    %c0_i32 = arith.constant 0 : i32
    %c0_i32_0 = arith.constant 0 : i32
    return %arg1, %c0_i32 : i32, i32
  }
  func.func @transform_4(%arg0: i32, %arg1: i32) -> (i32, i32) {
    %c0_i32 = arith.constant 0 : i32
    %c0_i32_0 = arith.constant 0 : i32
    %c0_i32_1 = arith.constant 0 : i32
    return %c0_i32, %c0_i32_0 : i32, i32
  }
  func.func @transform_5(%arg0: i32, %arg1: i32) -> (i32, i32) {
    %c0_i32 = arith.constant 0 : i32
    %c0_i32_0 = arith.constant 0 : i32
    %c0_i32_1 = arith.constant 0 : i32
    return %c0_i32, %c0_i32_0 : i32, i32
  }
  func.func @transform_6(%arg0: i32, %arg1: i32) -> (i32, i32) {
    %c0_i32 = arith.constant 0 : i32
    %c0_i32_0 = arith.constant 0 : i32
    %c0_i32_1 = arith.constant 0 : i32
    return %c0_i32, %c0_i32_0 : i32, i32
  }
  func.func @transform_7(%arg0: i32, %arg1: i32) -> (i32, i32) {
    %c0_i32 = arith.constant 0 : i32
    %c0_i32_0 = arith.constant 0 : i32
    return %arg0, %c0_i32 : i32, i32
  }
}

</mosaic_0001>

<bundles_post_ra>
// kernel: neighbor_model_forward.3
= control target key start
LH: loop header
LB: loop body
LE: loop exit
PB: predicated region body
PF: predicated region fallthrough
CT: control target
= control target key end

     0   :  { %vm226_vm0 = vcmask 523264   ;;  %s1184_s1 = inlined_call_operand.vmem [shape: bf16[64,128], index: 1, kind: input, shape index: {}]   ;;  %s1185_s2 = inlined_call_operand.vmem [shape: f32[1,128], index: 2, kind: input, shape index: {}]   ;;  %s1186_s0 = inlined_call_operand.vmem [shape: bf16[400,64], index: 0, kind: input, shape index: {}]   ;;  %s1187_s3 = inlined_call_operand.vmem [shape: bf16[400,128], index: 3, kind: output, shape index: {}]  }
   0x1   :  { %v759_v0 = vld [vmem:[%s1184_s1 + $0x18] sm:$0xff]  ;;  %v758_v1 = vld [vmem:[%s1184_s1 + $0x10] sm:$0xff]  ;;  %v757_v2 = vld [vmem:[%s1184_s1 + $0x8] sm:$0xff] }
   0x2   :  { %910 = vmatpush.bf16.msra.mxu2 %v759_v0  ;;  %911 = vmatpush.bf16.msra.mxu3 %v759_v0  ;;  %v756_v3 = vld [vmem:[%s1184_s1] sm:$0xff]  ;;  %v750_v5 = vld [vmem:[%s1186_s0 + $0x98] sm:$0xff]  ;;  %v737_v7 = vld [vmem:[%s1186_s0 + $0x30] sm:$0xff] }
   0x3   :  { %306 = vmatpush.bf16.msra.mxu0 %v759_v0  ;;  %909 = vmatpush.bf16.msra.mxu1 %v759_v0  ;;  %v743_v4 = vld [vmem:[%s1186_s0 + $0x60] sm:$0xff]  ;;  %v744_v8 = vld [vmem:[%s1186_s0 + $0x68] sm:$0xff]  ;;  %v738_v11 = vld [vmem:[%s1186_s0 + $0x38] sm:$0xff] }
   0x4   :  { %v731_v6 = vld [vmem:[%s1186_s0] sm:$0xff]  ;;  %v732_v10 = vld [vmem:[%s1186_s0 + $0x8] sm:$0xff]  ;;  %v745_v12 = vld [vmem:[%s1186_s0 + $0x70] sm:$0xff] }
   0x5   :  { %v751_v9 = vld [vmem:[%s1186_s0 + $0xa0] sm:$0xff]  ;;  %v752_v13 = vld [vmem:[%s1186_s0 + $0xa8] sm:$0xff]  ;;  %v733_v14 = vld [vmem:[%s1186_s0 + $0x10] sm:$0xff] }
   0x6   :  { %913 = vmatpush.bf16.msra.mxu2 %v758_v1  ;;  %914 = vmatpush.bf16.msra.mxu3 %v758_v1  ;;  %v739_v15 = vld [vmem:[%s1186_s0 + $0x40] sm:$0xff]  ;;  %v746_v16 = vld [vmem:[%s1186_s0 + $0x78] sm:$0xff]  ;;  %v753_v17 = vld [vmem:[%s1186_s0 + $0xb0] sm:$0xff] }
   0x7   :  { %307 = vmatpush.bf16.msra.mxu0 %v758_v1  ;;  %912 = vmatpush.bf16.msra.mxu1 %v758_v1  ;;  %v734_v18 = vld [vmem:[%s1186_s0 + $0x18] sm:$0xff]  ;;  %v740_v19 = vld [vmem:[%s1186_s0 + $0x48] sm:$0xff]  ;;  %v747_v20 = vld [vmem:[%s1186_s0 + $0x80] sm:$0xff] }
   0x8   :  { %v754_v21 = vld [vmem:[%s1186_s0 + $0xb8] sm:$0xff]  ;;  %v735_v22 = vld [vmem:[%s1186_s0 + $0x20] sm:$0xff]  ;;  %v741_v23 = vld [vmem:[%s1186_s0 + $0x50] sm:$0xff] }
   0x9   :  { %v748_v24 = vld [vmem:[%s1186_s0 + $0x88] sm:$0xff]  ;;  %v755_v25 = vld [vmem:[%s1186_s0 + $0xc0] sm:$0xff]  ;;  %v742_v27 = vld [vmem:[%s1186_s0 + $0x58] sm:$0xff] }
   0xa   :  { %916 = vmatpush.bf16.msra.mxu2 %v757_v2  ;;  %917 = vmatpush.bf16.msra.mxu3 %v757_v2  ;;  %v736_v26 = vld [vmem:[%s1186_s0 + $0x28] sm:$0xff]  ;;  %v749_v28 = vld [vmem:[%s1186_s0 + $0x90] sm:$0xff]  ;;  %v1057_v31 = vld [vmem:[%s1185_s2] ss:$0 sm:$0xff] }
   0xb   :  { %308 = vmatpush.bf16.msra.mxu0 %v757_v2  ;;  %915 = vmatpush.bf16.msra.mxu1 %v757_v2 }
   0xe   :  { %919 = vmatpush.bf16.msra.mxu2 %v756_v3  ;;  %920 = vmatpush.bf16.msra.mxu3 %v756_v3 }
   0xf   :  { %309 = vmatpush.bf16.msra.mxu0 %v756_v3  ;;  %918 = vmatpush.bf16.msra.mxu1 %v756_v3 }
  0x11   :  { %718 = vmatmul.msk.bf16.vlgmr.msra.gmra.mxu2 %vm226_vm0, %v743_v4  ;;  %725 = vmatmul.msk.bf16.vlgmr.msra.gmra.mxu3 %vm226_vm0, %v750_v5 }
  0x12   :  { %706 = vmatmul.msk.bf16.vlgmr.msra.gmra.mxu0 %vm226_vm0, %v731_v6  ;;  %712 = vmatmul.msk.bf16.vlgmr.msra.gmra.mxu1 %vm226_vm0, %v737_v7 }
  0x21   :  { %719 = vmatmul.msk.bf16.gmra.mxu2 %vm226_vm0, %v744_v8  ;;  %726 = vmatmul.msk.bf16.gmra.mxu3 %vm226_vm0, %v751_v9 }
  0x22   :  { %707 = vmatmul.msk.bf16.gmra.mxu0 %vm226_vm0, %v732_v10  ;;  %713 = vmatmul.msk.bf16.gmra.mxu1 %vm226_vm0, %v738_v11 }
  0x31   :  { %720 = vmatmul.msk.bf16.gmra.mxu2 %vm226_vm0, %v745_v12  ;;  %727 = vmatmul.msk.bf16.gmra.mxu3 %vm226_vm0, %v752_v13 }
  0x32   :  { %708 = vmatmul.msk.bf16.gmra.mxu0 %vm226_vm0, %v733_v14  ;;  %714 = vmatmul.msk.bf16.gmra.mxu1 %vm226_vm0, %v739_v15 }
  0x41   :  { %721 = vmatmul.msk.bf16.gmra.mxu2 %vm226_vm0, %v746_v16  ;;  %728 = vmatmul.msk.bf16.gmra.mxu3 %vm226_vm0, %v753_v17 }
  0x42   :  { %709 = vmatmul.msk.bf16.gmra.mxu0 %vm226_vm0, %v734_v18  ;;  %715 = vmatmul.msk.bf16.gmra.mxu1 %vm226_vm0, %v740_v19 }
  0x51   :  { %722 = vmatmul.msk.bf16.gmra.mxu2 %vm226_vm0, %v747_v20  ;;  %729 = vmatmul.msk.bf16.gmra.mxu3 %vm226_vm0, %v754_v21 }
  0x52   :  { %710 = vmatmul.msk.bf16.gmra.mxu0 %vm226_vm0, %v735_v22  ;;  %716 = vmatmul.msk.bf16.gmra.mxu1 %vm226_vm0, %v741_v23 }
  0x61   :  { %723 = vmatmul.msk.bf16.gmra.mxu2 %vm226_vm0, %v748_v24  ;;  %730 = vmatmul.msk.bf16.gmra.mxu3 %vm226_vm0, %v755_v25 }
  0x62   :  { %711 = vmatmul.msk.bf16.gmra.mxu0 %vm226_vm0, %v736_v26  ;;  %717 = vmatmul.msk.bf16.gmra.mxu1 %vm226_vm0, %v742_v27 }
  0x71   :  { %724 = vmatmul.msk.bf16.gmra.mxu2 %vm226_vm0, %v749_v28 }
  0x8f   :  { %v311_v29 = vpop.f32.mrf.mxu0  ;;  %v341_v30 = vpop.f32.mrf.mxu1 }
  0x90   :  { %v312_v33 = vadd.f32 %v1057_v31, %v311_v29  ;;  %v342_v34 = vadd.f32 %v1057_v31, %v341_v30 }
  0x92   :  { %v436_v38 = vmax.f32 %v312_v33, 0.0  ;;  %v448_v39 = vmax.f32 %v342_v34, 0.0 }
  0x94   :  { %v371_v32 = vpop.f32.mrf.mxu2  ;;  %v406_v35 = vpop.f32.mrf.mxu3 }
  0x95   :  { %v407_v42 = vadd.f32 %v1057_v31, %v406_v35  ;;  %v372_v45 = vadd.f32 %v1057_v31, %v371_v32 }
  0x97   :  { %v313_v36 = vpop.f32.mrf.mxu0  ;;  %v343_v37 = vpop.f32.mrf.mxu1  ;;  %v474_v51 = vmax.f32 %v407_v42, 0.0  ;;  %v460_v53 = vmax.f32 %v372_v45, 0.0 }
  0x98   :  { %v314_v40 = vadd.f32 %v1057_v31, %v313_v36  ;;  %v344_v41 = vadd.f32 %v1057_v31, %v343_v37 }
  0x9a   :  { %v437_v43 = vmax.f32 %v314_v40, 0.0  ;;  %v449_v44 = vmax.f32 %v344_v41, 0.0 }
  0x9c   :  { %v373_v46 = vpop.f32.mrf.mxu2  ;;  %v763_v47 = vpack.c.bf16 %v437_v43, %v436_v38  ;;  %v793_v48 = vpack.c.bf16 %v449_v44, %v448_v39  ;;  %v408_v49 = vpop.f32.mrf.mxu3 }
  0x9d   :  { %v374_v50 = vadd.f32 %v1057_v31, %v373_v46  ;;  %v409_v52 = vadd.f32 %v1057_v31, %v408_v49 }
  0x9e   :  { %764 = vst [vmem:[%s1187_s3] sm:$0xff] %v763_v47  }
  0x9f   :  { %v461_v54 = vmax.f32 %v374_v50, 0.0  ;;  %890 = vst [vmem:[%s1187_s3 + $0x30] sm:$0xff] %v793_v48   ;;  %v475_v55 = vmax.f32 %v409_v52, 0.0  ;;  %v316_v56 = vpop.f32.mrf.mxu0  ;;  %v346_v57 = vpop.f32.mrf.mxu1 }
  0xa0   :  { %v317_v61 = vadd.f32 %v1057_v31, %v316_v56  ;;  %v347_v62 = vadd.f32 %v1057_v31, %v346_v57 }
  0xa1   :  { %v823_v58 = vpack.c.bf16 %v461_v54, %v460_v53  ;;  %v858_v59 = vpack.c.bf16 %v475_v55, %v474_v51 }
  0xa2   :  { %v438_v2 = vmax.f32 %v317_v61, 0.0  ;;  %v450_v3 = vmax.f32 %v347_v62, 0.0 }
  0xa3   :  { %896 = vst [vmem:[%s1187_s3 + $0x60] sm:$0xff] %v823_v58  }
  0xa4   :  { %v376_v60 = vpop.f32.mrf.mxu2  ;;  %903 = vst [vmem:[%s1187_s3 + $0x98] sm:$0xff] %v858_v59   ;;  %v411_v63 = vpop.f32.mrf.mxu3 }
  0xa5   :  { %v412_v6 = vadd.f32 %v1057_v31, %v411_v63  ;;  %v377_v9 = vadd.f32 %v1057_v31, %v376_v60 }
  0xa7   :  { %v318_v0 = vpop.f32.mrf.mxu0  ;;  %v348_v1 = vpop.f32.mrf.mxu1  ;;  %v476_v15 = vmax.f32 %v412_v6, 0.0  ;;  %v462_v17 = vmax.f32 %v377_v9, 0.0 }
  0xa8   :  { %v319_v4 = vadd.f32 %v1057_v31, %v318_v0  ;;  %v349_v5 = vadd.f32 %v1057_v31, %v348_v1 }
  0xaa   :  { %v439_v7 = vmax.f32 %v319_v4, 0.0  ;;  %v451_v8 = vmax.f32 %v349_v5, 0.0 }
  0xac   :  { %v378_v10 = vpop.f32.mrf.mxu2  ;;  %v768_v11 = vpack.c.bf16 %v439_v7, %v438_v2  ;;  %v798_v12 = vpack.c.bf16 %v451_v8, %v450_v3  ;;  %v413_v13 = vpop.f32.mrf.mxu3 }
  0xad   :  { %v379_v14 = vadd.f32 %v1057_v31, %v378_v10  ;;  %v414_v16 = vadd.f32 %v1057_v31, %v413_v13 }
  0xae   :  { %885 = vst [vmem:[%s1187_s3 + $0x8] sm:$0xff] %v768_v11  }
  0xaf   :  { %v463_v18 = vmax.f32 %v379_v14, 0.0  ;;  %891 = vst [vmem:[%s1187_s3 + $0x38] sm:$0xff] %v798_v12   ;;  %v477_v19 = vmax.f32 %v414_v16, 0.0  ;;  %v321_v20 = vpop.f32.mrf.mxu0  ;;  %v351_v21 = vpop.f32.mrf.mxu1 }
  0xb0   :  { %v322_v25 = vadd.f32 %v1057_v31, %v321_v20  ;;  %v352_v26 = vadd.f32 %v1057_v31, %v351_v21 }
  0xb1   :  { %v828_v22 = vpack.c.bf16 %v463_v18, %v462_v17  ;;  %v863_v23 = vpack.c.bf16 %v477_v19, %v476_v15 }
  0xb2   :  { %v440_v30 = vmax.f32 %v322_v25, 0.0  ;;  %v452_v32 = vmax.f32 %v352_v26, 0.0 }
  0xb3   :  { %897 = vst [vmem:[%s1187_s3 + $0x68] sm:$0xff] %v828_v22  }
  0xb4   :  { %v381_v24 = vpop.f32.mrf.mxu2  ;;  %904 = vst [vmem:[%s1187_s3 + $0xa0] sm:$0xff] %v863_v23   ;;  %v416_v27 = vpop.f32.mrf.mxu3 }
  0xb5   :  { %v417_v35 = vadd.f32 %v1057_v31, %v416_v27  ;;  %v382_v38 = vadd.f32 %v1057_v31, %v381_v24 }
  0xb7   :  { %v323_v28 = vpop.f32.mrf.mxu0  ;;  %v353_v29 = vpop.f32.mrf.mxu1  ;;  %v478_v44 = vmax.f32 %v417_v35, 0.0  ;;  %v464_v46 = vmax.f32 %v382_v38, 0.0 }
  0xb8   :  { %v324_v33 = vadd.f32 %v1057_v31, %v323_v28  ;;  %v354_v34 = vadd.f32 %v1057_v31, %v353_v29 }
  0xba   :  { %v441_v36 = vmax.f32 %v324_v33, 0.0  ;;  %v453_v37 = vmax.f32 %v354_v34, 0.0 }
  0xbc   :  { %v383_v39 = vpop.f32.mrf.mxu2  ;;  %v773_v40 = vpack.c.bf16 %v441_v36, %v440_v30  ;;  %v803_v41 = vpack.c.bf16 %v453_v37, %v452_v32  ;;  %v418_v42 = vpop.f32.mrf.mxu3 }
  0xbd   :  { %v384_v43 = vadd.f32 %v1057_v31, %v383_v39  ;;  %v419_v45 = vadd.f32 %v1057_v31, %v418_v42 }
  0xbe   :  { %886 = vst [vmem:[%s1187_s3 + $0x10] sm:$0xff] %v773_v40  }
  0xbf   :  { %v465_v47 = vmax.f32 %v384_v43, 0.0  ;;  %892 = vst [vmem:[%s1187_s3 + $0x40] sm:$0xff] %v803_v41   ;;  %v479_v48 = vmax.f32 %v419_v45, 0.0  ;;  %v326_v49 = vpop.f32.mrf.mxu0  ;;  %v356_v50 = vpop.f32.mrf.mxu1 }
  0xc0   :  { %v327_v54 = vadd.f32 %v1057_v31, %v326_v49  ;;  %v357_v55 = vadd.f32 %v1057_v31, %v356_v50 }
  0xc1   :  { %v833_v51 = vpack.c.bf16 %v465_v47, %v464_v46  ;;  %v868_v52 = vpack.c.bf16 %v479_v48, %v478_v44 }
  0xc2   :  { %v442_v59 = vmax.f32 %v327_v54, 0.0  ;;  %v454_v60 = vmax.f32 %v357_v55, 0.0 }
  0xc3   :  { %898 = vst [vmem:[%s1187_s3 + $0x70] sm:$0xff] %v833_v51  }
  0xc4   :  { %v386_v53 = vpop.f32.mrf.mxu2  ;;  %905 = vst [vmem:[%s1187_s3 + $0xa8] sm:$0xff] %v868_v52   ;;  %v421_v56 = vpop.f32.mrf.mxu3 }
  0xc5   :  { %v422_v63 = vadd.f32 %v1057_v31, %v421_v56  ;;  %v387_v2 = vadd.f32 %v1057_v31, %v386_v53 }
  0xc7   :  { %v328_v57 = vpop.f32.mrf.mxu0  ;;  %v358_v58 = vpop.f32.mrf.mxu1  ;;  %v480_v8 = vmax.f32 %v422_v63, 0.0  ;;  %v466_v10 = vmax.f32 %v387_v2, 0.0 }
  0xc8   :  { %v329_v61 = vadd.f32 %v1057_v31, %v328_v57  ;;  %v359_v62 = vadd.f32 %v1057_v31, %v358_v58 }
  0xca   :  { %v443_v0 = vmax.f32 %v329_v61, 0.0  ;;  %v455_v1 = vmax.f32 %v359_v62, 0.0 }
  0xcc   :  { %v388_v3 = vpop.f32.mrf.mxu2  ;;  %v778_v4 = vpack.c.bf16 %v443_v0, %v442_v59  ;;  %v808_v5 = vpack.c.bf16 %v455_v1, %v454_v60  ;;  %v423_v6 = vpop.f32.mrf.mxu3 }
  0xcd   :  { %v389_v7 = vadd.f32 %v1057_v31, %v388_v3  ;;  %v424_v9 = vadd.f32 %v1057_v31, %v423_v6 }
  0xce   :  { %887 = vst [vmem:[%s1187_s3 + $0x18] sm:$0xff] %v778_v4  }
  0xcf   :  { %v467_v11 = vmax.f32 %v389_v7, 0.0  ;;  %893 = vst [vmem:[%s1187_s3 + $0x48] sm:$0xff] %v808_v5   ;;  %v481_v12 = vmax.f32 %v424_v9, 0.0  ;;  %v331_v13 = vpop.f32.mrf.mxu0  ;;  %v361_v14 = vpop.f32.mrf.mxu1 }
  0xd0   :  { %v332_v18 = vadd.f32 %v1057_v31, %v331_v13  ;;  %v362_v19 = vadd.f32 %v1057_v31, %v361_v14 }
  0xd1   :  { %v838_v15 = vpack.c.bf16 %v467_v11, %v466_v10  ;;  %v873_v16 = vpack.c.bf16 %v481_v12, %v480_v8 }
  0xd2   :  { %v444_v23 = vmax.f32 %v332_v18, 0.0  ;;  %v456_v24 = vmax.f32 %v362_v19, 0.0 }
  0xd3   :  { %899 = vst [vmem:[%s1187_s3 + $0x78] sm:$0xff] %v838_v15  }
  0xd4   :  { %v391_v17 = vpop.f32.mrf.mxu2  ;;  %906 = vst [vmem:[%s1187_s3 + $0xb0] sm:$0xff] %v873_v16   ;;  %v426_v20 = vpop.f32.mrf.mxu3 }
  0xd5   :  { %v427_v27 = vadd.f32 %v1057_v31, %v426_v20  ;;  %v392_v30 = vadd.f32 %v1057_v31, %v391_v17 }
  0xd7   :  { %v333_v21 = vpop.f32.mrf.mxu0  ;;  %v363_v22 = vpop.f32.mrf.mxu1  ;;  %v482_v37 = vmax.f32 %v427_v27, 0.0  ;;  %v468_v39 = vmax.f32 %v392_v30, 0.0 }
  0xd8   :  { %v334_v25 = vadd.f32 %v1057_v31, %v333_v21  ;;  %v364_v26 = vadd.f32 %v1057_v31, %v363_v22 }
  0xda   :  { %v445_v28 = vmax.f32 %v334_v25, 0.0  ;;  %v457_v29 = vmax.f32 %v364_v26, 0.0 }
  0xdc   :  { %v393_v32 = vpop.f32.mrf.mxu2  ;;  %v783_v33 = vpack.c.bf16 %v445_v28, %v444_v23  ;;  %v813_v34 = vpack.c.bf16 %v457_v29, %v456_v24  ;;  %v428_v35 = vpop.f32.mrf.mxu3 }
  0xdd   :  { %v394_v36 = vadd.f32 %v1057_v31, %v393_v32  ;;  %v429_v38 = vadd.f32 %v1057_v31, %v428_v35 }
  0xde   :  { %888 = vst [vmem:[%s1187_s3 + $0x20] sm:$0xff] %v783_v33  }
  0xdf   :  { %v469_v40 = vmax.f32 %v394_v36, 0.0  ;;  %894 = vst [vmem:[%s1187_s3 + $0x50] sm:$0xff] %v813_v34   ;;  %v483_v41 = vmax.f32 %v429_v38, 0.0  ;;  %v336_v42 = vpop.f32.mrf.mxu0  ;;  %v366_v43 = vpop.f32.mrf.mxu1 }
  0xe0   :  { %v337_v47 = vadd.f32 %v1057_v31, %v336_v42  ;;  %v367_v48 = vadd.f32 %v1057_v31, %v366_v43 }
  0xe1   :  { %v843_v44 = vpack.c.bf16 %v469_v40, %v468_v39  ;;  %v878_v45 = vpack.c.bf16 %v483_v41, %v482_v37 }
  0xe2   :  { %v446_v52 = vmax.f32 %v337_v47, 0.0  ;;  %v458_v53 = vmax.f32 %v367_v48, 0.0 }
  0xe3   :  { %900 = vst [vmem:[%s1187_s3 + $0x80] sm:$0xff] %v843_v44  }
  0xe4   :  { %v396_v46 = vpop.f32.mrf.mxu2  ;;  %907 = vst [vmem:[%s1187_s3 + $0xb8] sm:$0xff] %v878_v45   ;;  %v431_v49 = vpop.f32.mrf.mxu3 }
  0xe5   :  { %v432_v56 = vadd.f32 %v1057_v31, %v431_v49  ;;  %v397_v59 = vadd.f32 %v1057_v31, %v396_v46 }
  0xe7   :  { %v338_v50 = vpop.f32.mrf.mxu0  ;;  %v368_v51 = vpop.f32.mrf.mxu1  ;;  %v484_v1 = vmax.f32 %v432_v56, 0.0  ;;  %v470_v3 = vmax.f32 %v397_v59, 0.0 }
  0xe8   :  { %v339_v54 = vadd.f32 %v1057_v31, %v338_v50  ;;  %v369_v55 = vadd.f32 %v1057_v31, %v368_v51 }
  0xea   :  { %v447_v57 = vmax.f32 %v339_v54, 0.0  ;;  %v459_v58 = vmax.f32 %v369_v55, 0.0 }
  0xec   :  { %v398_v60 = vpop.f32.mrf.mxu2  ;;  %v788_v61 = vpack.c.bf16 %v447_v57, %v446_v52  ;;  %v818_v62 = vpack.c.bf16 %v459_v58, %v458_v53  ;;  %v433_v63 = vpop.f32.mrf.mxu3 }
  0xed   :  { %v399_v0 = vadd.f32 %v1057_v31, %v398_v60  ;;  %v434_v2 = vadd.f32 %v1057_v31, %v433_v63 }
  0xee   :  { %889 = vst [vmem:[%s1187_s3 + $0x28] sm:$0xff] %v788_v61  }
  0xef   :  { %v471_v4 = vmax.f32 %v399_v0, 0.0  ;;  %895 = vst [vmem:[%s1187_s3 + $0x58] sm:$0xff] %v818_v62   ;;  %v485_v5 = vmax.f32 %v434_v2, 0.0 }
  0xf1   :  { %v848_v6 = vpack.c.bf16 %v471_v4, %v470_v3  ;;  %v883_v7 = vpack.c.bf16 %v485_v5, %v484_v1 }
  0xf3   :  { %901 = vst [vmem:[%s1187_s3 + $0x88] sm:$0xff] %v848_v6  }
  0xf4   :  { %v401_v8 = vpop.f32.mrf.mxu2  ;;  %908 = vst [vmem:[%s1187_s3 + $0xc0] sm:$0xff] %v883_v7  }
  0xf5   :  { %v402_v9 = vadd.f32 %v1057_v31, %v401_v8 }
  0xf7   :  { %v472_v12 = vmax.f32 %v402_v9, 0.0 }
  0xfc   :  { %v403_v10 = vpop.f32.mrf.mxu2 }
  0xfd   :  { %v404_v11 = vadd.f32 %v1057_v31, %v403_v10 }
  0xff   :  { %v473_v13 = vmax.f32 %v404_v11, 0.0 }
 0x101   :  { %v853_v14 = vpack.c.bf16 %v473_v13, %v472_v12 }
 0x103   :  { %902 = vst [vmem:[%s1187_s3 + $0x90] sm:$0xff] %v853_v14  }

// kernel: neighbor_model_forward.4
= control target key start
LH: loop header
LB: loop body
LE: loop exit
PB: predicated region body
PF: predicated region fallthrough
CT: control target
= control target key end

     0   :  { %s6025_s1 = inlined_call_operand.vmem [shape: bf16[2304,128], index: 1, kind: input, shape index: {}]   ;;  %s6026_s2 = inlined_call_operand.vmem [shape: f32[1,128], index: 2, kind: input, shape index: {}]   ;;  %s6027_s0 = inlined_call_operand.vmem [shape: bf16[128,2304], index: 0, kind: input, shape index: {}]   ;;  %s6028_s3 = inlined_call_operand.vmem [shape: bf16[128,128], index: 3, kind: output, shape index: {}]  }
   0x1   :  { %v4271_v0 = vld [vmem:[%s6025_s1 + $0x38] sm:$0xff]  ;;  %v4270_v2 = vld [vmem:[%s6025_s1 + $0x30] sm:$0xff]  ;;  %v4269_v4 = vld [vmem:[%s6025_s1 + $0x28] sm:$0xff] }
   0x2   :  { %v4279_v1 = vld [vmem:[%s6025_s1 + $0x78] sm:$0xff]  ;;  %4455 = vmatpush.bf16.msra.mxu2 %v4271_v0  ;;  %v4278_v3 = vld [vmem:[%s6025_s1 + $0x70] sm:$0xff]  ;;  %2034 = vmatpush.bf16.msra.mxu0 %v4271_v0  ;;  %v4277_v5 = vld [vmem:[%s6025_s1 + $0x68] sm:$0xff] }
   0x3   :  { %4463 = vmatpush.bf16.msra.mxu3 %v4279_v1  ;;  %2083 = vmatpush.bf16.msra.mxu1 %v4279_v1  ;;  %v4268_v6 = vld [vmem:[%s6025_s1 + $0x20] sm:$0xff]  ;;  %v4267_v8 = vld [vmem:[%s6025_s1 + $0x18] sm:$0xff]  ;;  %v4266_v10 = vld [vmem:[%s6025_s1 + $0x10] sm:$0xff] }
   0x4   :  { %v4276_v7 = vld [vmem:[%s6025_s1 + $0x60] sm:$0xff]  ;;  %v4275_v9 = vld [vmem:[%s6025_s1 + $0x58] sm:$0xff]  ;;  %v4274_v11 = vld [vmem:[%s6025_s1 + $0x50] sm:$0xff] }
   0x5   :  { %v4265_v12 = vld [vmem:[%s6025_s1 + $0x8] sm:$0xff]  ;;  %v4264_v14 = vld [vmem:[%s6025_s1] sm:$0xff]  ;;  %v4287_v20 = vld [vmem:[%s6025_s1 + $0xb8] sm:$0xff] }
   0x6   :  { %4456 = vmatpush.bf16.msra.mxu2 %v4270_v2  ;;  %2035 = vmatpush.bf16.msra.mxu0 %v4270_v2  ;;  %v4273_v13 = vld [vmem:[%s6025_s1 + $0x48] sm:$0xff]  ;;  %v4272_v15 = vld [vmem:[%s6025_s1 + $0x40] sm:$0xff]  ;;  %v4295_v23 = vld [vmem:[%s6025_s1 + $0xf8] sm:$0xff] }
   0x7   :  { %4464 = vmatpush.bf16.msra.mxu3 %v4278_v3  ;;  %2084 = vmatpush.bf16.msra.mxu1 %v4278_v3  ;;  %v3258_v16 = vld [vmem:[%s6027_s0 + $0x240] sm:$0xf]  ;;  %v4201_v17 = vld [vmem:[%s6027_s0 + $0x284] sm:$0xf0]  ;;  %v4192_v18 = vld [vmem:[%s6027_s0 + $0x244] sm:$0xf] }
   0x8   :  { %v3260_v19 = vld [vmem:[%s6027_s0 + $0x288] sm:$0xf0]  ;;  %v2970_v21 = vld [vmem:[%s6027_s0] sm:$0xf]  ;;  %v4129_v22 = vld [vmem:[%s6027_s0 + $0x44] sm:$0xf0]  ;;  %v3259_v26 = vor.u32 %v4201_v17, %v3258_v16 }
   0x9   :  { %v4120_v24 = vld [vmem:[%s6027_s0 + $0x4] sm:$0xf]  ;;  %v2972_v25 = vld [vmem:[%s6027_s0 + $0x48] sm:$0xf0]  ;;  %v3263_v27 = vor.u32 %v4192_v18, %v3260_v19  ;;  %v2971_v28 = vor.u32 %v4129_v22, %v2970_v21  ;;  %v4311_v29 = vld [vmem:[%s6025_s1 + $0x178] sm:$0xff] }
   0xa   :  { %4457 = vmatpush.bf16.msra.mxu2 %v4269_v4  ;;  %2036 = vmatpush.bf16.msra.mxu0 %v4269_v4  ;;  %v2975_v30 = vor.u32 %v4120_v24, %v2972_v25  ;;  %v4286_v31 = vld [vmem:[%s6025_s1 + $0xb0] sm:$0xff]  ;;  %v4303_v33 = vld [vmem:[%s6025_s1 + $0x138] sm:$0xff]  ;;  %v4285_v35 = vld [vmem:[%s6025_s1 + $0xa8] sm:$0xff] }
   0xb   :  { %4465 = vmatpush.bf16.msra.mxu3 %v4277_v5  ;;  %2085 = vmatpush.bf16.msra.mxu1 %v4277_v5  ;;  %v4294_v32 = vld [vmem:[%s6025_s1 + $0xf0] sm:$0xff]  ;;  %v4293_v36 = vld [vmem:[%s6025_s1 + $0xe8] sm:$0xff]  ;;  %v4284_v39 = vld [vmem:[%s6025_s1 + $0xa0] sm:$0xff] }
   0xc   :  { %v4310_v34 = vld [vmem:[%s6025_s1 + $0x170] sm:$0xff]  ;;  %v4309_v38 = vld [vmem:[%s6025_s1 + $0x168] sm:$0xff]  ;;  %v4292_v40 = vld [vmem:[%s6025_s1 + $0xe0] sm:$0xff] }
   0xd   :  { %v4302_v37 = vld [vmem:[%s6025_s1 + $0x130] sm:$0xff]  ;;  %v4301_v41 = vld [vmem:[%s6025_s1 + $0x128] sm:$0xff]  ;;  %v4219_v43 = vld [vmem:[%s6027_s0 + $0x314] sm:$0xf0] }
   0xe   :  { %4458 = vmatpush.bf16.msra.mxu2 %v4268_v6  ;;  %2037 = vmatpush.bf16.msra.mxu0 %v4268_v6  ;;  %v3330_v42 = vld [vmem:[%s6027_s0 + $0x2d0] sm:$0xf]  ;;  %v4210_v44 = vld [vmem:[%s6027_s0 + $0x2d4] sm:$0xf]  ;;  %v3332_v45 = vld [vmem:[%s6027_s0 + $0x318] sm:$0xf0] }
   0xf   :  { %4466 = vmatpush.bf16.msra.mxu3 %v4276_v7  ;;  %2086 = vmatpush.bf16.msra.mxu1 %v4276_v7  ;;  %v3042_v46 = vld [vmem:[%s6027_s0 + $0x90] sm:$0xf]  ;;  %v4308_v47 = vld [vmem:[%s6025_s1 + $0x160] sm:$0xff]  ;;  %v4147_v48 = vld [vmem:[%s6027_s0 + $0xd4] sm:$0xf0]  ;;  %v3331_v54 = vor.u32 %v4219_v43, %v3330_v42  ;;  %v3335_v55 = vor.u32 %v4210_v44, %v3332_v45 }
  0x10   :  { %v4138_v49 = vld [vmem:[%s6027_s0 + $0x94] sm:$0xf]  ;;  %v4283_v50 = vld [vmem:[%s6025_s1 + $0x98] sm:$0xff]  ;;  %v4300_v53 = vld [vmem:[%s6025_s1 + $0x120] sm:$0xff]  ;;  %v3043_v56 = vor.u32 %v4147_v48, %v3042_v46 }
  0x11   :  { %v3044_v51 = vld [vmem:[%s6027_s0 + $0xd8] sm:$0xf0]  ;;  %v4282_v59 = vld [vmem:[%s6025_s1 + $0x90] sm:$0xff]  ;;  %v4281_v62 = vld [vmem:[%s6025_s1 + $0x88] sm:$0xff] }
  0x12   :  { %4459 = vmatpush.bf16.msra.mxu2 %v4267_v8  ;;  %2038 = vmatpush.bf16.msra.mxu0 %v4267_v8  ;;  %v4291_v52 = vld [vmem:[%s6025_s1 + $0xd8] sm:$0xff]  ;;  %v3047_v58 = vor.u32 %v4138_v49, %v3044_v51  ;;  %v4290_v60 = vld [vmem:[%s6025_s1 + $0xd0] sm:$0xff]  ;;  %v4289_v0 = vld [vmem:[%s6025_s1 + $0xc8] sm:$0xff] }
  0x13   :  { %4467 = vmatpush.bf16.msra.mxu3 %v4275_v9  ;;  %2087 = vmatpush.bf16.msra.mxu1 %v4275_v9  ;;  %v4307_v57 = vld [vmem:[%s6025_s1 + $0x158] sm:$0xff]  ;;  %v4306_v63 = vld [vmem:[%s6025_s1 + $0x150] sm:$0xff]  ;;  %v4305_v2 = vld [vmem:[%s6025_s1 + $0x148] sm:$0xff] }
  0x14   :  { %v4299_v61 = vld [vmem:[%s6025_s1 + $0x118] sm:$0xff]  ;;  %v4298_v1 = vld [vmem:[%s6025_s1 + $0x110] sm:$0xff]  ;;  %v4280_v3 = vld [vmem:[%s6025_s1 + $0x80] sm:$0xff] }
  0x15   :  { %v4288_v4 = vld [vmem:[%s6025_s1 + $0xc0] sm:$0xff]  ;;  %v4297_v5 = vld [vmem:[%s6025_s1 + $0x108] sm:$0xff]  ;;  %v4327_v21 = vld [vmem:[%s6025_s1 + $0x1f8] sm:$0xff] }
  0x16   :  { %4460 = vmatpush.bf16.msra.mxu2 %v4266_v10  ;;  %2039 = vmatpush.bf16.msra.mxu0 %v4266_v10  ;;  %v3402_v6 = vld [vmem:[%s6027_s0 + $0x360] sm:$0xf]  ;;  %v4237_v7 = vld [vmem:[%s6027_s0 + $0x3a4] sm:$0xf0]  ;;  %v4228_v8 = vld [vmem:[%s6027_s0 + $0x364] sm:$0xf] }
  0x17   :  { %4468 = vmatpush.bf16.msra.mxu3 %v4274_v11  ;;  %2088 = vmatpush.bf16.msra.mxu1 %v4274_v11  ;;  %v3404_v9 = vld [vmem:[%s6027_s0 + $0x3a8] sm:$0xf0]  ;;  %v3114_v10 = vld [vmem:[%s6027_s0 + $0x120] sm:$0xf]  ;;  %v4165_v11 = vld [vmem:[%s6027_s0 + $0x164] sm:$0xf0] }
  0x18   :  { %v3407_v16 = vor.u32 %v4228_v8, %v3404_v9  ;;  %v3115_v17 = vor.u32 %v4165_v11, %v3114_v10  ;;  %v4304_v19 = vld [vmem:[%s6025_s1 + $0x140] sm:$0xff]  ;;  %v4335_v22 = vld [vmem:[%s6025_s1 + $0x238] sm:$0xff]  ;;  %v3474_v24 = vld [vmem:[%s6027_s0 + $0x3f0] sm:$0xf] }
  0x19   :  { %v4255_v25 = vld [vmem:[%s6027_s0 + $0x434] sm:$0xf0]  ;;  %v4121_v42 = vld [vmem:[%s6027_s0 + $0xc] sm:$0xf]  ;;  %v2980_v43 = vld [vmem:[%s6027_s0 + $0x50] sm:$0xf0] }
  0x1a   :  { %4461 = vmatpush.bf16.msra.mxu2 %v4265_v12  ;;  %2040 = vmatpush.bf16.msra.mxu0 %v4265_v12  ;;  %v4156_v12 = vld [vmem:[%s6027_s0 + $0x124] sm:$0xf]  ;;  %v2986_v44 = vld [vmem:[%s6027_s0 + $0x10] sm:$0xf]  ;;  %v4131_v45 = vld [vmem:[%s6027_s0 + $0x54] sm:$0xf0]  ;;  %v2983_v49 = vor.u32 %v4121_v42, %v2980_v43 }
  0x1b   :  { %4469 = vmatpush.bf16.msra.mxu3 %v4273_v13  ;;  %2089 = vmatpush.bf16.msra.mxu1 %v4273_v13  ;;  %v3116_v13 = vld [vmem:[%s6027_s0 + $0x168] sm:$0xf0]  ;;  %v4122_v46 = vld [vmem:[%s6027_s0 + $0x14] sm:$0xf]  ;;  %v3122_v8 = vld [vmem:[%s6027_s0 + $0x128] sm:$0xf] }
  0x1c   :  { %v3119_v18 = vor.u32 %v4156_v12, %v3116_v13  ;;  %v4166_v9 = vld [vmem:[%s6027_s0 + $0x16c] sm:$0xf0]  ;;  %v4157_v10 = vld [vmem:[%s6027_s0 + $0x12c] sm:$0xf]  ;;  %v3124_v11 = vld [vmem:[%s6027_s0 + $0x170] sm:$0xf0] }
  0x1d   :  { %v3130_v12 = vld [vmem:[%s6027_s0 + $0x130] sm:$0xf]  ;;  %v4167_v13 = vld [vmem:[%s6027_s0 + $0x174] sm:$0xf0] }
  0x1e   :  { %4462 = vmatpush.bf16.msra.mxu2 %v4264_v14  ;;  %2041 = vmatpush.bf16.msra.mxu0 %v4264_v14  ;;  %v4296_v14 = vld [vmem:[%s6025_s1 + $0x100] sm:$0xff]  ;;  %v4330_v42 = vld [vmem:[%s6025_s1 + $0x210] sm:$0xff] }
  0x1f   :  { %4470 = vmatpush.bf16.msra.mxu3 %v4272_v15  ;;  %2090 = vmatpush.bf16.msra.mxu1 %v4272_v15  ;;  %v3403_v15 = vor.u32 %v4237_v7, %v3402_v6  ;;  %v4332_v6 = vld [vmem:[%s6025_s1 + $0x220] sm:$0xff]  ;;  %v3274_v43 = vld [vmem:[%s6027_s0 + $0x250] sm:$0xf] }
  0x20   :  { %v4340_v7 = vld [vmem:[%s6025_s1 + $0x260] sm:$0xff] }
  0x21   :  { %2062 = vmatmul.bf16.vlgmr.msra.gmra.mxu2 %v3259_v26  ;;  %2042 = vmatmul.bf16.vlgmr.msra.gmra.mxu0 %v2971_v28  ;;  %v4246_v26 = vld [vmem:[%s6027_s0 + $0x3f4] sm:$0xf]  ;;  %v3186_v28 = vld [vmem:[%s6027_s0 + $0x1b0] sm:$0xf] }
  0x22   :  { %2132 = vmatpush.bf16.msrb.mxu2 %v4287_v20  ;;  %2111 = vmatmul.bf16.vlgmr.msra.gmra.mxu3 %v3263_v27  ;;  %v4319_v20 = vld [vmem:[%s6025_s1 + $0x1b8] sm:$0xff] }
  0x23   :  { %2181 = vmatpush.bf16.msrb.mxu3 %v4295_v23  ;;  %2279 = vmatpush.bf16.msrb.mxu1 %v4311_v29  ;;  %v4343_v23 = vld [vmem:[%s6025_s1 + $0x278] sm:$0xff] }
  0x24   :  { %2091 = vmatmul.bf16.vlgmr.msra.gmra.mxu1 %v2975_v30  ;;  %2230 = vmatpush.bf16.msrb.mxu0 %v4303_v33  ;;  %v3476_v27 = vld [vmem:[%s6027_s0 + $0x438] sm:$0xf0]  ;;  %v4183_v29 = vld [vmem:[%s6027_s0 + $0x1f4] sm:$0xf0]  ;;  %v4174_v30 = vld [vmem:[%s6027_s0 + $0x1b4] sm:$0xf] }
  0x25   :  { %v3479_v33 = vor.u32 %v4246_v26, %v3476_v27  ;;  %v4331_v26 = vld [vmem:[%s6025_s1 + $0x218] sm:$0xff]  ;;  %v3202_v27 = vld [vmem:[%s6027_s0 + $0x1c0] sm:$0xf] }
  0x26   :  { %2133 = vmatpush.bf16.msrb.mxu2 %v4286_v31  ;;  %v3188_v31 = vld [vmem:[%s6027_s0 + $0x1f8] sm:$0xf0] }
  0x27   :  { %2182 = vmatpush.bf16.msrb.mxu3 %v4294_v32  ;;  %2280 = vmatpush.bf16.msrb.mxu1 %v4310_v34  ;;  %v3475_v32 = vor.u32 %v4255_v25, %v3474_v24  ;;  %v3187_v34 = vor.u32 %v4183_v29, %v3186_v28  ;;  %v4175_v24 = vld [vmem:[%s6027_s0 + $0x1bc] sm:$0xf]  ;;  %v3196_v25 = vld [vmem:[%s6027_s0 + $0x200] sm:$0xf0]  ;;  %v4185_v28 = vld [vmem:[%s6027_s0 + $0x204] sm:$0xf0] }
  0x28   :  { %2231 = vmatpush.bf16.msrb.mxu0 %v4302_v37  ;;  %v4326_v37 = vld [vmem:[%s6025_s1 + $0x1f0] sm:$0xff]  ;;  %v4176_v29 = vld [vmem:[%s6027_s0 + $0x1c4] sm:$0xf] }
  0x2a   :  { %2134 = vmatpush.bf16.msrb.mxu2 %v4285_v35  ;;  %v3191_v35 = vor.u32 %v4174_v30, %v3188_v31  ;;  %v3204_v30 = vld [vmem:[%s6027_s0 + $0x208] sm:$0xf0] }
  0x2b   :  { %2183 = vmatpush.bf16.msrb.mxu3 %v4293_v36  ;;  %2281 = vmatpush.bf16.msrb.mxu1 %v4309_v38  ;;  %v4318_v36 = vld [vmem:[%s6025_s1 + $0x1b0] sm:$0xff] }
  0x2c   :  { %2232 = vmatpush.bf16.msrb.mxu0 %v4301_v41  ;;  %v4334_v38 = vld [vmem:[%s6025_s1 + $0x230] sm:$0xff] }
  0x2d   :  { %v4130_v41 = vld [vmem:[%s6027_s0 + $0x4c] sm:$0xf0] }
  0x2e   :  { %2135 = vmatpush.bf16.msrb.mxu2 %v4284_v39  ;;  %v4342_v39 = vld [vmem:[%s6025_s1 + $0x270] sm:$0xff] }
  0x2f   :  { %2184 = vmatpush.bf16.msrb.mxu3 %v4292_v40  ;;  %2282 = vmatpush.bf16.msrb.mxu1 %v4308_v47  ;;  %v2978_v40 = vld [vmem:[%s6027_s0 + $0x8] sm:$0xf]  ;;  %v2988_v47 = vld [vmem:[%s6027_s0 + $0x58] sm:$0xf0] }
  0x30   :  { %2233 = vmatpush.bf16.msrb.mxu0 %v4300_v53  ;;  %v2979_v48 = vor.u32 %v4130_v41, %v2978_v40  ;;  %v2991_v51 = vor.u32 %v4122_v46, %v2988_v47  ;;  %v4325_v53 = vld [vmem:[%s6025_s1 + $0x1e8] sm:$0xff]  ;;  %v3268_v41 = vld [vmem:[%s6027_s0 + $0x290] sm:$0xf0]  ;;  %v3276_v46 = vld [vmem:[%s6027_s0 + $0x298] sm:$0xf0] }
  0x31   :  { %2067 = vmatmul.bf16.gmra.mxu2 %v3331_v54  ;;  %2047 = vmatmul.bf16.gmra.mxu0 %v3043_v56  ;;  %v4333_v54 = vld [vmem:[%s6025_s1 + $0x228] sm:$0xff]  ;;  %v3050_v56 = vld [vmem:[%s6027_s0 + $0x98] sm:$0xf] }
  0x32   :  { %2136 = vmatpush.bf16.msrb.mxu2 %v4283_v50  ;;  %2116 = vmatmul.bf16.gmra.mxu3 %v3335_v55  ;;  %v2987_v50 = vor.u32 %v4131_v45, %v2986_v44  ;;  %v4341_v55 = vld [vmem:[%s6025_s1 + $0x268] sm:$0xff]  ;;  %v4203_v44 = vld [vmem:[%s6027_s0 + $0x294] sm:$0xf0]  ;;  %v4194_v45 = vld [vmem:[%s6027_s0 + $0x254] sm:$0xf] }
  0x33   :  { %2185 = vmatpush.bf16.msrb.mxu3 %v4291_v52  ;;  %2283 = vmatpush.bf16.msrb.mxu1 %v4307_v57  ;;  %v4317_v52 = vld [vmem:[%s6025_s1 + $0x1a8] sm:$0xff]  ;;  %v4148_v57 = vld [vmem:[%s6027_s0 + $0xdc] sm:$0xf0] }
  0x34   :  { %2096 = vmatmul.bf16.gmra.mxu1 %v3047_v58  ;;  %2234 = vmatpush.bf16.msrb.mxu0 %v4299_v61  ;;  %v4139_v58 = vld [vmem:[%s6027_s0 + $0x9c] sm:$0xf]  ;;  %v4149_v61 = vld [vmem:[%s6027_s0 + $0xe4] sm:$0xf0]  ;;  %v4193_v40 = vld [vmem:[%s6027_s0 + $0x24c] sm:$0xf] }
  0x36   :  { %2137 = vmatpush.bf16.msrb.mxu2 %v4282_v59  ;;  %v3052_v59 = vld [vmem:[%s6027_s0 + $0xe0] sm:$0xf0] }
  0x37   :  { %2186 = vmatpush.bf16.msrb.mxu3 %v4290_v60  ;;  %2284 = vmatpush.bf16.msrb.mxu1 %v4306_v63  ;;  %v3058_v60 = vld [vmem:[%s6027_s0 + $0xa0] sm:$0xf]  ;;  %v3060_v63 = vld [vmem:[%s6027_s0 + $0xe8] sm:$0xf0] }
  0x38   :  { %2235 = vmatpush.bf16.msrb.mxu0 %v4298_v1  ;;  %v3055_v1 = vor.u32 %v4139_v58, %v3052_v59  ;;  %v4321_v58 = vld [vmem:[%s6025_s1 + $0x1c8] sm:$0xff] }
  0x3a   :  { %2138 = vmatpush.bf16.msrb.mxu2 %v4281_v62  ;;  %v4140_v62 = vld [vmem:[%s6027_s0 + $0xa4] sm:$0xf] }
  0x3b   :  { %2187 = vmatpush.bf16.msrb.mxu3 %v4289_v0  ;;  %2285 = vmatpush.bf16.msrb.mxu1 %v4305_v2  ;;  %v3051_v0 = vor.u32 %v4148_v57, %v3050_v56  ;;  %v3059_v2 = vor.u32 %v4149_v61, %v3058_v60  ;;  %v4313_v56 = vld [vmem:[%s6025_s1 + $0x188] sm:$0xff] }
  0x3c   :  { %2236 = vmatpush.bf16.msrb.mxu0 %v4297_v5  ;;  %v4324_v5 = vld [vmem:[%s6025_s1 + $0x1e0] sm:$0xff] }
  0x3e   :  { %2139 = vmatpush.bf16.msrb.mxu2 %v4280_v3  ;;  %v3063_v3 = vor.u32 %v4140_v62, %v3060_v63 }
  0x3f   :  { %2188 = vmatpush.bf16.msrb.mxu3 %v4288_v4  ;;  %2286 = vmatpush.bf16.msrb.mxu1 %v4304_v19  ;;  %v4316_v4 = vld [vmem:[%s6025_s1 + $0x1a0] sm:$0xff] }
  0x40   :  { %2237 = vmatpush.bf16.msrb.mxu0 %v4296_v14  ;;  %v4158_v14 = vld [vmem:[%s6027_s0 + $0x134] sm:$0xf] }
  0x41   :  { %2072 = vmatmul.bf16.gmra.mxu2 %v3403_v15  ;;  %2052 = vmatmul.bf16.gmra.mxu0 %v3115_v17  ;;  %v3132_v15 = vld [vmem:[%s6027_s0 + $0x178] sm:$0xf0]  ;;  %v3127_v17 = vor.u32 %v4157_v10, %v3124_v11 }
  0x42   :  { %2121 = vmatmul.bf16.gmra.mxu3 %v3407_v16  ;;  %2328 = vmatpush.bf16.msra.mxu2 %v4319_v20  ;;  %v3123_v16 = vor.u32 %v4166_v9, %v3122_v8  ;;  %v3135_v19 = vor.u32 %v4158_v14, %v3132_v15  ;;  %v4315_v20 = vld [vmem:[%s6025_s1 + $0x198] sm:$0xff]  ;;  %v3346_v8 = vld [vmem:[%s6027_s0 + $0x2e0] sm:$0xf]  ;;  %v4221_v9 = vld [vmem:[%s6027_s0 + $0x324] sm:$0xf0] }
  0x43   :  { %2377 = vmatpush.bf16.msra.mxu3 %v4327_v21  ;;  %2475 = vmatpush.bf16.msra.mxu1 %v4343_v23  ;;  %v4323_v21 = vld [vmem:[%s6025_s1 + $0x1d8] sm:$0xff]  ;;  %v4184_v23 = vld [vmem:[%s6027_s0 + $0x1fc] sm:$0xf0] }
  0x44   :  { %2101 = vmatmul.bf16.gmra.mxu1 %v3119_v18  ;;  %2426 = vmatpush.bf16.msra.mxu0 %v4335_v22  ;;  %v3131_v18 = vor.u32 %v4167_v13, %v3130_v12  ;;  %v3194_v22 = vld [vmem:[%s6027_s0 + $0x1b8] sm:$0xf]  ;;  %v4212_v12 = vld [vmem:[%s6027_s0 + $0x2e4] sm:$0xf]  ;;  %v3348_v13 = vld [vmem:[%s6027_s0 + $0x328] sm:$0xf0] }
  0x45   :  { %v3195_v31 = vor.u32 %v4184_v23, %v3194_v22 }
  0x46   :  { %2329 = vmatpush.bf16.msra.mxu2 %v4318_v36  ;;  %v4314_v36 = vld [vmem:[%s6025_s1 + $0x190] sm:$0xff] }
  0x47   :  { %2378 = vmatpush.bf16.msra.mxu3 %v4326_v37  ;;  %2476 = vmatpush.bf16.msra.mxu1 %v4342_v39  ;;  %v4322_v37 = vld [vmem:[%s6025_s1 + $0x1d0] sm:$0xff] }
  0x48   :  { %2427 = vmatpush.bf16.msra.mxu0 %v4334_v38  ;;  %v3266_v38 = vld [vmem:[%s6027_s0 + $0x248] sm:$0xf]  ;;  %v4202_v39 = vld [vmem:[%s6027_s0 + $0x28c] sm:$0xf0] }
  0x49   :  { %v3267_v47 = vor.u32 %v4202_v39, %v3266_v38  ;;  %v3412_v38 = vld [vmem:[%s6027_s0 + $0x3b0] sm:$0xf0]  ;;  %v4328_v39 = vld [vmem:[%s6025_s1 + $0x200] sm:$0xff] }
  0x4a   :  { %2330 = vmatpush.bf16.msra.mxu2 %v4317_v52  ;;  %v3279_v52 = vor.u32 %v4194_v45, %v3276_v46  ;;  %v3420_v45 = vld [vmem:[%s6027_s0 + $0x3b8] sm:$0xf0] }
  0x4b   :  { %2379 = vmatpush.bf16.msra.mxu3 %v4325_v53  ;;  %2477 = vmatpush.bf16.msra.mxu1 %v4341_v55  ;;  %v4338_v53 = vld [vmem:[%s6025_s1 + $0x250] sm:$0xff] }
  0x4c   :  { %2428 = vmatpush.bf16.msra.mxu0 %v4333_v54 }
  0x4e   :  { %2331 = vmatpush.bf16.msra.mxu2 %v4316_v4 }
  0x4f   :  { %2380 = vmatpush.bf16.msra.mxu3 %v4324_v5  ;;  %2478 = vmatpush.bf16.msra.mxu1 %v4340_v7  ;;  %v4211_v5 = vld [vmem:[%s6027_s0 + $0x2dc] sm:$0xf]  ;;  %v4329_v7 = vld [vmem:[%s6025_s1 + $0x208] sm:$0xff] }
  0x50   :  { %2429 = vmatpush.bf16.msra.mxu0 %v4332_v6  ;;  %v3340_v6 = vld [vmem:[%s6027_s0 + $0x320] sm:$0xf0] }
  0x51   :  { %2077 = vmatmul.bf16.gmra.mxu2 %v3475_v32  ;;  %2057 = vmatmul.bf16.gmra.mxu0 %v3187_v34  ;;  %v3199_v32 = vor.u32 %v4175_v24, %v3196_v25  ;;  %v3207_v34 = vor.u32 %v4176_v29, %v3204_v30  ;;  %v4312_v24 = vld [vmem:[%s6025_s1 + $0x180] sm:$0xff] }
  0x52   :  { %2126 = vmatmul.bf16.gmra.mxu3 %v3479_v33  ;;  %2332 = vmatpush.bf16.msra.mxu2 %v4315_v20  ;;  %v3203_v33 = vor.u32 %v4185_v28, %v3202_v27  ;;  %v3351_v20 = vor.u32 %v4212_v12, %v3348_v13  ;;  %v3490_v12 = vld [vmem:[%s6027_s0 + $0x400] sm:$0xf]  ;;  %v4257_v13 = vld [vmem:[%s6027_s0 + $0x444] sm:$0xf0] }
  0x53   :  { %2381 = vmatpush.bf16.msra.mxu3 %v4323_v21  ;;  %v4337_v21 = vld [vmem:[%s6025_s1 + $0x248] sm:$0xff] }
  0x54   :  { %2106 = vmatmul.bf16.gmra.mxu1 %v3191_v35  ;;  %2430 = vmatpush.bf16.msra.mxu0 %v4331_v26  ;;  %v4339_v35 = vld [vmem:[%s6025_s1 + $0x258] sm:$0xff]  ;;  %v4320_v26 = vld [vmem:[%s6025_s1 + $0x1c0] sm:$0xff] }
  0x55   :  { %2479 = vmatpush.bf16.msra.mxu1 %v4339_v35  ;;  %v4238_v35 = vld [vmem:[%s6027_s0 + $0x3ac] sm:$0xf0] }
  0x56   :  { %2333 = vmatpush.bf16.msra.mxu2 %v4314_v36 }
  0x57   :  { %2382 = vmatpush.bf16.msra.mxu3 %v4322_v37  ;;  %v4229_v37 = vld [vmem:[%s6027_s0 + $0x36c] sm:$0xf] }
  0x58   :  { %2431 = vmatpush.bf16.msra.mxu0 %v4330_v42 }
  0x59   :  { %2480 = vmatpush.bf16.msra.mxu1 %v4338_v53 }
  0x5a   :  { %2334 = vmatpush.bf16.msra.mxu2 %v4313_v56 }
  0x5b   :  { %2383 = vmatpush.bf16.msra.mxu3 %v4321_v58  ;;  %v4351_v58 = vld [vmem:[%s6025_s1 + $0x2b8] sm:$0xff] }
  0x5c   :  { %2432 = vmatpush.bf16.msra.mxu0 %v4329_v7  ;;  %v4367_v7 = vld [vmem:[%s6025_s1 + $0x338] sm:$0xff] }
  0x5d   :  { %2481 = vmatpush.bf16.msra.mxu1 %v4337_v21 }
  0x5e   :  { %2335 = vmatpush.bf16.msra.mxu2 %v4312_v24 }
  0x5f   :  { %2384 = vmatpush.bf16.msra.mxu3 %v4320_v26 }
  0x60   :  { %2433 = vmatpush.bf16.msra.mxu0 %v4328_v39 }
  0x61   :  { %2140 = vmatmul.bf16.vlgmr.msrb.gmra.mxu2 %v2979_v48  ;;  %2238 = vmatmul.bf16.vlgmr.msrb.gmra.mxu0 %v2987_v50  ;;  %v3271_v48 = vor.u32 %v4193_v40, %v3268_v41  ;;  %v3275_v50 = vor.u32 %v4203_v44, %v3274_v43  ;;  %v3418_v40 = vld [vmem:[%s6027_s0 + $0x370] sm:$0xf]  ;;  %v4239_v41 = vld [vmem:[%s6027_s0 + $0x3b4] sm:$0xf0]  ;;  %v4230_v44 = vld [vmem:[%s6027_s0 + $0x374] sm:$0xf] }
  0x62   :  { %2189 = vmatmul.bf16.vlgmr.msrb.gmra.mxu3 %v2983_v49  ;;  %v4924_v49 = vld [vmem:[%s6026_s2] ss:$0 sm:$0xff]  ;;  %v3423_v53 = vor.u32 %v4230_v44, %v3420_v45  ;;  %2524 = vmatpush.bf16.msrb.mxu2 %v4351_v58 }
  0x63   :  { %v4132_v45 = vld [vmem:[%s6027_s0 + $0x5c] sm:$0xf0] }
  0x64   :  { %2287 = vmatmul.bf16.vlgmr.msrb.gmra.mxu1 %v2991_v51  ;;  %2622 = vmatpush.bf16.msrb.mxu0 %v4367_v7 }
  0x71   :  { %2145 = vmatmul.bf16.gmra.mxu2 %v3051_v0  ;;  %2243 = vmatmul.bf16.gmra.mxu0 %v3059_v2  ;;  %v3338_v2 = vld [vmem:[%s6027_s0 + $0x2d8] sm:$0xf] }
  0x72   :  { %2194 = vmatmul.bf16.gmra.mxu3 %v3055_v1 }
  0x74   :  { %2292 = vmatmul.bf16.gmra.mxu1 %v3063_v3  ;;  %v4220_v3 = vld [vmem:[%s6027_s0 + $0x31c] sm:$0xf0] }
  0x75   :  { %v3339_v15 = vor.u32 %v4220_v3, %v3338_v2 }
  0x81   :  { %2150 = vmatmul.bf16.gmra.mxu2 %v3123_v16  ;;  %2248 = vmatmul.bf16.gmra.mxu0 %v3131_v18  ;;  %v3343_v16 = vor.u32 %v4211_v5, %v3340_v6  ;;  %v3482_v6 = vld [vmem:[%s6027_s0 + $0x3f8] sm:$0xf] }
  0x82   :  { %2199 = vmatmul.bf16.gmra.mxu3 %v3127_v17  ;;  %v3347_v17 = vor.u32 %v4221_v9, %v3346_v8  ;;  %v4256_v9 = vld [vmem:[%s6027_s0 + $0x43c] sm:$0xf0] }
  0x84   :  { %2297 = vmatmul.bf16.gmra.mxu1 %v3135_v19 }
  0x91   :  { %2155 = vmatmul.bf16.gmra.mxu2 %v3195_v31  ;;  %2253 = vmatmul.bf16.gmra.mxu0 %v3203_v33 }
  0x92   :  { %2204 = vmatmul.bf16.gmra.mxu3 %v3199_v32 }
  0x94   :  { %2302 = vmatmul.bf16.gmra.mxu1 %v3207_v34  ;;  %v3410_v34 = vld [vmem:[%s6027_s0 + $0x368] sm:$0xf] }
  0x9e   :  { %v2043_v51 = vpop.f32.mrf.mxu0 }
  0x9f   :  { %v2044_v54 = vadd.f32 %v4924_v49, %v2043_v51 }
  0xa1   :  { %v2092_v55 = vpop.f32.mrf.mxu1  ;;  %2160 = vmatmul.bf16.gmra.mxu2 %v3267_v47  ;;  %2258 = vmatmul.bf16.gmra.mxu0 %v3275_v50  ;;  %v3411_v47 = vor.u32 %v4238_v35, %v3410_v34  ;;  %v3419_v50 = vor.u32 %v4239_v41, %v3418_v40 }
  0xa2   :  { %2209 = vmatmul.bf16.gmra.mxu3 %v3271_v48  ;;  %v4933_v57 = vadd.f32 %v2092_v55, %v2044_v54  ;;  %v3415_v48 = vor.u32 %v4229_v37, %v3412_v38  ;;  %v4336_v54 = vld [vmem:[%s6025_s1 + $0x240] sm:$0xff] }
  0xa3   :  { %2482 = vmatpush.bf16.msra.mxu1 %v4336_v54  ;;  %v4124_v54 = vld [vmem:[%s6027_s0 + $0x24] sm:$0xf] }
  0xa4   :  { %2307 = vmatmul.bf16.gmra.mxu1 %v3279_v52  ;;  %v2063_v59 = vpop.f32.mrf.mxu2 }
  0xa5   :  { %v2112_v60 = vpop.f32.mrf.mxu3  ;;  %v2064_v61 = vadd.f32 %v4924_v49, %v2063_v59 }
  0xa6   :  { %v2045_v63 = vpop.f32.mrf.mxu0 }
  0xa7   :  { %v4939_v62 = vadd.f32 %v2112_v60, %v2064_v61  ;;  %v2046_v0 = vadd.f32 %v4924_v49, %v2045_v63  ;;  %v4359_v60 = vld [vmem:[%s6025_s1 + $0x2f8] sm:$0xff] }
  0xa8   :  { %2573 = vmatpush.bf16.msrb.mxu3 %v4359_v60 }
  0xa9   :  { %v2094_v1 = vpop.f32.mrf.mxu1 }
  0xaa   :  { %v4948_v4 = vadd.f32 %v2094_v1, %v2046_v0 }
  0xac   :  { %v2065_v10 = vpop.f32.mrf.mxu2 }
  0xad   :  { %v2114_v11 = vpop.f32.mrf.mxu3  ;;  %v2066_v14 = vadd.f32 %v4924_v49, %v2065_v10  ;;  %v4247_v10 = vld [vmem:[%s6027_s0 + $0x3fc] sm:$0xf] }
  0xae   :  { %v2048_v19 = vpop.f32.mrf.mxu0 }
  0xaf   :  { %v4972_v18 = vadd.f32 %v2114_v11, %v2066_v14  ;;  %v2049_v22 = vadd.f32 %v4924_v49, %v2048_v19  ;;  %v3484_v11 = vld [vmem:[%s6027_s0 + $0x440] sm:$0xf0] }
  0xb0   :  { %v3487_v21 = vor.u32 %v4247_v10, %v3484_v11 }
  0xb1   :  { %v2097_v23 = vpop.f32.mrf.mxu1  ;;  %2165 = vmatmul.bf16.gmra.mxu2 %v3339_v15  ;;  %2263 = vmatmul.bf16.gmra.mxu0 %v3347_v17  ;;  %v3492_v17 = vld [vmem:[%s6027_s0 + $0x448] sm:$0xf0] }
  0xb2   :  { %2214 = vmatmul.bf16.gmra.mxu3 %v3343_v16  ;;  %v4981_v25 = vadd.f32 %v2097_v23, %v2049_v22  ;;  %v4248_v16 = vld [vmem:[%s6027_s0 + $0x404] sm:$0xf]  ;;  %v3491_v22 = vor.u32 %v4257_v13, %v3490_v12 }
  0xb3   :  { %v3495_v26 = vor.u32 %v4248_v16, %v3492_v17  ;;  %v4365_v16 = vld [vmem:[%s6025_s1 + $0x328] sm:$0xff]  ;;  %v4150_v17 = vld [vmem:[%s6027_s0 + $0xec] sm:$0xf0] }
  0xb4   :  { %2312 = vmatmul.bf16.gmra.mxu1 %v3351_v20  ;;  %v2068_v27 = vpop.f32.mrf.mxu2  ;;  %v3483_v20 = vor.u32 %v4256_v9, %v3482_v6  ;;  %v4349_v6 = vld [vmem:[%s6025_s1 + $0x2a8] sm:$0xff] }
  0xb5   :  { %v2117_v28 = vpop.f32.mrf.mxu3  ;;  %v2069_v29 = vadd.f32 %v4924_v49, %v2068_v27 }
  0xb6   :  { %v2050_v31 = vpop.f32.mrf.mxu0 }
  0xb7   :  { %v4987_v30 = vadd.f32 %v2117_v28, %v2069_v29  ;;  %v2051_v32 = vadd.f32 %v4924_v49, %v2050_v31  ;;  %v4375_v29 = vld [vmem:[%s6025_s1 + $0x378] sm:$0xff]  ;;  %v4350_v31 = vld [vmem:[%s6025_s1 + $0x2b0] sm:$0xff] }
  0xb8   :  { %2525 = vmatpush.bf16.msrb.mxu2 %v4350_v31  ;;  %2671 = vmatpush.bf16.msrb.mxu1 %v4375_v29 }
  0xb9   :  { %v2099_v33 = vpop.f32.mrf.mxu1 }
  0xba   :  { %v4996_v36 = vadd.f32 %v2099_v33, %v2051_v32  ;;  %v4358_v33 = vld [vmem:[%s6025_s1 + $0x2f0] sm:$0xff] }
  0xbb   :  { %2574 = vmatpush.bf16.msrb.mxu3 %v4358_v33 }
  0xbc   :  { %v2070_v42 = vpop.f32.mrf.mxu2  ;;  %2526 = vmatpush.bf16.msrb.mxu2 %v4349_v6  ;;  %v4160_v6 = vld [vmem:[%s6027_s0 + $0x144] sm:$0xf] }
  0xbd   :  { %v2119_v43 = vpop.f32.mrf.mxu3  ;;  %v2071_v46 = vadd.f32 %v4924_v49, %v2070_v42  ;;  %v2994_v42 = vld [vmem:[%s6027_s0 + $0x18] sm:$0xf] }
  0xbe   :  { %v2053_v52 = vpop.f32.mrf.mxu0  ;;  %v2995_v58 = vor.u32 %v4132_v45, %v2994_v42  ;;  %v4373_v42 = vld [vmem:[%s6025_s1 + $0x368] sm:$0xff] }
  0xbf   :  { %v5020_v51 = vadd.f32 %v2119_v43, %v2071_v46  ;;  %v2054_v55 = vadd.f32 %v4924_v49, %v2053_v52  ;;  %v4366_v43 = vld [vmem:[%s6025_s1 + $0x330] sm:$0xff]  ;;  %v4123_v46 = vld [vmem:[%s6027_s0 + $0x1c] sm:$0xf] }
  0xc0   :  { %2623 = vmatpush.bf16.msrb.mxu0 %v4366_v43  ;;  %v4348_v43 = vld [vmem:[%s6025_s1 + $0x2a0] sm:$0xff] }
  0xc1   :  { %v2102_v56 = vpop.f32.mrf.mxu1  ;;  %2170 = vmatmul.bf16.gmra.mxu2 %v3411_v47  ;;  %2268 = vmatmul.bf16.gmra.mxu0 %v3419_v50  ;;  %v2996_v47 = vld [vmem:[%s6027_s0 + $0x60] sm:$0xf0]  ;;  %v4133_v50 = vld [vmem:[%s6027_s0 + $0x64] sm:$0xf0] }
  0xc2   :  { %2219 = vmatmul.bf16.gmra.mxu3 %v3415_v48  ;;  %v5029_v59 = vadd.f32 %v2102_v56, %v2054_v55  ;;  %v3002_v48 = vld [vmem:[%s6027_s0 + $0x20] sm:$0xf]  ;;  %v3004_v55 = vld [vmem:[%s6027_s0 + $0x68] sm:$0xf0]  ;;  %v2999_v60 = vor.u32 %v4123_v46, %v2996_v47  ;;  %2527 = vmatpush.bf16.msrb.mxu2 %v4348_v43  ;;  %v4178_v43 = vld [vmem:[%s6027_s0 + $0x1d4] sm:$0xf] }
  0xc4   :  { %2317 = vmatmul.bf16.gmra.mxu1 %v3423_v53  ;;  %v2073_v61 = vpop.f32.mrf.mxu2  ;;  %2624 = vmatpush.bf16.msrb.mxu0 %v4365_v16 }
  0xc5   :  { %v2122_v63 = vpop.f32.mrf.mxu3  ;;  %v2074_v0 = vadd.f32 %v4924_v49, %v2073_v61  ;;  %v3003_v61 = vor.u32 %v4133_v50, %v3002_v48 }
  0xc6   :  { %v2055_v2 = vpop.f32.mrf.mxu0 }
  0xc7   :  { %v5035_v1 = vadd.f32 %v2122_v63, %v2074_v0  ;;  %v2056_v3 = vadd.f32 %v4924_v49, %v2055_v2  ;;  %v3007_v2 = vor.u32 %v4124_v54, %v3004_v55  ;;  %v3138_v55 = vld [vmem:[%s6027_s0 + $0x138] sm:$0xf] }
  0xc9   :  { %v2104_v5 = vpop.f32.mrf.mxu1 }
  0xca   :  { %v5044_v8 = vadd.f32 %v2104_v5, %v2056_v3  ;;  %v4374_v5 = vld [vmem:[%s6025_s1 + $0x370] sm:$0xff] }
  0xcb   :  { %2672 = vmatpush.bf16.msrb.mxu1 %v4374_v5 }
  0xcc   :  { %v2075_v14 = vpop.f32.mrf.mxu2 }
  0xcd   :  { %v2124_v15 = vpop.f32.mrf.mxu3  ;;  %v2076_v19 = vadd.f32 %v4924_v49, %v2075_v14 }
  0xce   :  { %v2058_v24 = vpop.f32.mrf.mxu0 }
  0xcf   :  { %v5068_v23 = vadd.f32 %v2124_v15, %v2076_v19  ;;  %v2059_v27 = vadd.f32 %v4924_v49, %v2058_v24  ;;  %v3066_v15 = vld [vmem:[%s6027_s0 + $0xa8] sm:$0xf]  ;;  %v3068_v19 = vld [vmem:[%s6027_s0 + $0xf0] sm:$0xf0]  ;;  %2673 = vmatpush.bf16.msrb.mxu1 %v4373_v42 }
  0xd0   :  { %v3067_v31 = vor.u32 %v4150_v17, %v3066_v15  ;;  %v4372_v17 = vld [vmem:[%s6025_s1 + $0x360] sm:$0xff] }
  0xd1   :  { %v2107_v28 = vpop.f32.mrf.mxu1  ;;  %2175 = vmatmul.bf16.gmra.mxu2 %v3483_v20  ;;  %2273 = vmatmul.bf16.gmra.mxu0 %v3491_v22  ;;  %v3074_v20 = vld [vmem:[%s6027_s0 + $0xb0] sm:$0xf] }
  0xd2   :  { %2224 = vmatmul.bf16.gmra.mxu3 %v3487_v21  ;;  %v5077_v32 = vadd.f32 %v2107_v28, %v2059_v27  ;;  %v4151_v21 = vld [vmem:[%s6027_s0 + $0xf4] sm:$0xf0]  ;;  %v4142_v27 = vld [vmem:[%s6027_s0 + $0xb4] sm:$0xf]  ;;  %v3076_v28 = vld [vmem:[%s6027_s0 + $0xf8] sm:$0xf0] }
  0xd3   :  { %2674 = vmatpush.bf16.msrb.mxu1 %v4372_v17 }
  0xd4   :  { %2322 = vmatmul.bf16.gmra.mxu1 %v3495_v26  ;;  %v2078_v34 = vpop.f32.mrf.mxu2 }
  0xd5   :  { %v2127_v35 = vpop.f32.mrf.mxu3  ;;  %v2079_v37 = vadd.f32 %v4924_v49, %v2078_v34  ;;  %v3075_v34 = vor.u32 %v4151_v21, %v3074_v20 }
  0xd6   :  { %v2060_v39 = vpop.f32.mrf.mxu0 }
  0xd7   :  { %v5083_v38 = vadd.f32 %v2127_v35, %v2079_v37  ;;  %v2061_v40 = vadd.f32 %v4924_v49, %v2060_v39  ;;  %v3079_v39 = vor.u32 %v4142_v27, %v3076_v28 }
  0xd9   :  { %v2109_v41 = vpop.f32.mrf.mxu1 }
  0xda   :  { %v5092_v44 = vadd.f32 %v2109_v41, %v2061_v40 }
  0xdc   :  { %v2080_v52 = vpop.f32.mrf.mxu2 }
  0xdd   :  { %v2129_v53 = vpop.f32.mrf.mxu3  ;;  %v2081_v56 = vadd.f32 %v4924_v49, %v2080_v52  ;;  %v4357_v49 = vld [vmem:[%s6025_s1 + $0x2e8] sm:$0xff] }
  0xde   :  { %v2239_v0 = vpop.f32.mrf.mxu0  ;;  %2575 = vmatpush.bf16.msrb.mxu3 %v4357_v49  ;;  %v3148_v49 = vld [vmem:[%s6027_s0 + $0x188] sm:$0xf0] }
  0xdf   :  { %v5116_v63 = vadd.f32 %v2129_v53, %v2081_v56  ;;  %v4364_v56 = vld [vmem:[%s6025_s1 + $0x320] sm:$0xff] }
  0xe0   :  { %2625 = vmatpush.bf16.msrb.mxu0 %v4364_v56 }
  0xe1   :  { %v2288_v3 = vpop.f32.mrf.mxu1  ;;  %2336 = vmatmul.bf16.vlgmr.msra.gmra.mxu2 %v2995_v58  ;;  %2434 = vmatmul.bf16.vlgmr.msra.gmra.mxu0 %v3003_v61  ;;  %v4168_v58 = vld [vmem:[%s6027_s0 + $0x17c] sm:$0xf0] }
  0xe2   :  { %2385 = vmatmul.bf16.vlgmr.msra.gmra.mxu3 %v2999_v60  ;;  %v3140_v60 = vld [vmem:[%s6027_s0 + $0x180] sm:$0xf0]  ;;  %v3146_v61 = vld [vmem:[%s6027_s0 + $0x140] sm:$0xf] }
  0xe4   :  { %2483 = vmatmul.bf16.vlgmr.msra.gmra.mxu1 %v3007_v2  ;;  %v2141_v7 = vpop.f32.mrf.mxu2 }
  0xe5   :  { %v2190_v9 = vpop.f32.mrf.mxu3  ;;  %v2142_v10 = vadd.f32 %v2141_v7, %v4933_v57  ;;  %v4141_v57 = vld [vmem:[%s6027_s0 + $0xac] sm:$0xf] }
  0xe6   :  { %v2241_v12 = vpop.f32.mrf.mxu0  ;;  %v3071_v33 = vor.u32 %v4141_v57, %v3068_v19  ;;  %v4347_v57 = vld [vmem:[%s6025_s1 + $0x298] sm:$0xff] }
  0xe7   :  { %v2191_v11 = vadd.f32 %v2190_v9, %v2142_v10  ;;  %v3139_v9 = vor.u32 %v4168_v58, %v3138_v55  ;;  %2528 = vmatpush.bf16.msrb.mxu2 %v4347_v57  ;;  %v4371_v58 = vld [vmem:[%s6025_s1 + $0x358] sm:$0xff]  ;;  %v4196_v57 = vld [vmem:[%s6027_s0 + $0x264] sm:$0xf] }
  0xe8   :  { %2675 = vmatpush.bf16.msrb.mxu1 %v4371_v58 }
  0xe9   :  { %v2290_v13 = vpop.f32.mrf.mxu1  ;;  %v2240_v14 = vadd.f32 %v2239_v0, %v2191_v11  ;;  %v4169_v0 = vld [vmem:[%s6027_s0 + $0x184] sm:$0xf0] }
  0xea   :  { %v3147_v11 = vor.u32 %v4169_v0, %v3146_v61 }
  0xeb   :  { %v5149_v22 = vadd.f32 %v2288_v3, %v2240_v14  ;;  %v3151_v14 = vor.u32 %v4160_v6, %v3148_v49 }
  0xec   :  { %v2143_v24 = vpop.f32.mrf.mxu2 }
  0xed   :  { %v2192_v26 = vpop.f32.mrf.mxu3  ;;  %v2144_v29 = vadd.f32 %v2143_v24, %v4948_v4  ;;  %v4356_v4 = vld [vmem:[%s6025_s1 + $0x2e0] sm:$0xff] }
  0xee   :  { %v2244_v37 = vpop.f32.mrf.mxu0  ;;  %2576 = vmatpush.bf16.msrb.mxu3 %v4356_v4  ;;  %v3220_v4 = vld [vmem:[%s6027_s0 + $0x218] sm:$0xf0] }
  0xef   :  { %v2193_v35 = vadd.f32 %v2192_v26, %v2144_v29 }
  0xf1   :  { %v2293_v40 = vpop.f32.mrf.mxu1  ;;  %v2242_v41 = vadd.f32 %v2241_v12, %v2193_v35  ;;  %2341 = vmatmul.bf16.gmra.mxu2 %v3067_v31  ;;  %2439 = vmatmul.bf16.gmra.mxu0 %v3075_v34  ;;  %v3210_v31 = vld [vmem:[%s6027_s0 + $0x1c8] sm:$0xf]  ;;  %v4186_v34 = vld [vmem:[%s6027_s0 + $0x20c] sm:$0xf0]  ;;  %v3212_v35 = vld [vmem:[%s6027_s0 + $0x210] sm:$0xf0] }
  0xf2   :  { %2390 = vmatmul.bf16.gmra.mxu3 %v3071_v33  ;;  %v4363_v33 = vld [vmem:[%s6025_s1 + $0x318] sm:$0xff] }
  0xf3   :  { %v5167_v45 = vadd.f32 %v2290_v13, %v2242_v41  ;;  %2626 = vmatpush.bf16.msrb.mxu0 %v4363_v33 }
  0xf4   :  { %2488 = vmatmul.bf16.gmra.mxu1 %v3079_v39  ;;  %v2146_v46 = vpop.f32.mrf.mxu2  ;;  %v4187_v39 = vld [vmem:[%s6027_s0 + $0x214] sm:$0xf0] }
  0xf5   :  { %v2195_v47 = vpop.f32.mrf.mxu3  ;;  %v2147_v48 = vadd.f32 %v2146_v46, %v4981_v25  ;;  %v4159_v25 = vld [vmem:[%s6027_s0 + $0x13c] sm:$0xf] }
  0xf6   :  { %v2246_v52 = vpop.f32.mrf.mxu0  ;;  %v3143_v10 = vor.u32 %v4159_v25, %v3140_v60  ;;  %v4346_v25 = vld [vmem:[%s6025_s1 + $0x290] sm:$0xff] }
  0xf7   :  { %v2196_v50 = vadd.f32 %v2195_v47, %v2147_v48  ;;  %v3211_v47 = vor.u32 %v4186_v34, %v3210_v31  ;;  %2529 = vmatpush.bf16.msrb.mxu2 %v4346_v25  ;;  %v4370_v34 = vld [vmem:[%s6025_s1 + $0x350] sm:$0xff] }
  0xf8   :  { %2676 = vmatpush.bf16.msrb.mxu1 %v4370_v34  ;;  %v4214_v25 = vld [vmem:[%s6027_s0 + $0x2f4] sm:$0xf] }
  0xf9   :  { %v2295_v53 = vpop.f32.mrf.mxu1  ;;  %v2245_v54 = vadd.f32 %v2244_v37, %v2196_v50  ;;  %v3218_v37 = vld [vmem:[%s6027_s0 + $0x1d0] sm:$0xf] }
  0xfa   :  { %v3219_v50 = vor.u32 %v4187_v39, %v3218_v37 }
  0xfb   :  { %v5191_v2 = vadd.f32 %v2293_v40, %v2245_v54  ;;  %v3223_v54 = vor.u32 %v4178_v43, %v3220_v4 }
  0xfc   :  { %v2148_v3 = vpop.f32.mrf.mxu2 }
  0xfd   :  { %v2197_v5 = vpop.f32.mrf.mxu3  ;;  %v2149_v7 = vadd.f32 %v2148_v3, %v4996_v36  ;;  %v4355_v36 = vld [vmem:[%s6025_s1 + $0x2d8] sm:$0xff] }
  0xfe   :  { %v2249_v13 = vpop.f32.mrf.mxu0  ;;  %2577 = vmatpush.bf16.msrb.mxu3 %v4355_v36  ;;  %v3292_v36 = vld [vmem:[%s6027_s0 + $0x2a8] sm:$0xf0] }
  0xff   :  { %v2198_v12 = vadd.f32 %v2197_v5, %v2149_v7 }
 0x101   :  { %v2298_v15 = vpop.f32.mrf.mxu1  ;;  %v2247_v16 = vadd.f32 %v2246_v52, %v2198_v12  ;;  %2346 = vmatmul.bf16.gmra.mxu2 %v3139_v9  ;;  %2444 = vmatmul.bf16.gmra.mxu0 %v3147_v11  ;;  %v3282_v9 = vld [vmem:[%s6027_s0 + $0x258] sm:$0xf]  ;;  %v4204_v11 = vld [vmem:[%s6027_s0 + $0x29c] sm:$0xf0]  ;;  %v3284_v12 = vld [vmem:[%s6027_s0 + $0x2a0] sm:$0xf0] }
 0x102   :  { %2395 = vmatmul.bf16.gmra.mxu3 %v3143_v10  ;;  %v4362_v10 = vld [vmem:[%s6025_s1 + $0x310] sm:$0xff] }
 0x103   :  { %v5209_v19 = vadd.f32 %v2295_v53, %v2247_v16  ;;  %2627 = vmatpush.bf16.msrb.mxu0 %v4362_v10 }
 0x104   :  { %2493 = vmatmul.bf16.gmra.mxu1 %v3151_v14  ;;  %v2151_v20 = vpop.f32.mrf.mxu2  ;;  %v4205_v14 = vld [vmem:[%s6027_s0 + $0x2a4] sm:$0xf0] }
 0x105   :  { %v2200_v21 = vpop.f32.mrf.mxu3  ;;  %v2152_v24 = vadd.f32 %v2151_v20, %v5029_v59  ;;  %v4177_v59 = vld [vmem:[%s6027_s0 + $0x1cc] sm:$0xf] }
 0x106   :  { %v2251_v27 = vpop.f32.mrf.mxu0  ;;  %v3215_v48 = vor.u32 %v4177_v59, %v3212_v35  ;;  %v4345_v59 = vld [vmem:[%s6025_s1 + $0x288] sm:$0xff] }
 0x107   :  { %v2201_v26 = vadd.f32 %v2200_v21, %v2152_v24  ;;  %v3283_v21 = vor.u32 %v4204_v11, %v3282_v9  ;;  %2530 = vmatpush.bf16.msrb.mxu2 %v4345_v59  ;;  %v4369_v11 = vld [vmem:[%s6025_s1 + $0x348] sm:$0xff]  ;;  %v4232_v59 = vld [vmem:[%s6027_s0 + $0x384] sm:$0xf] }
 0x108   :  { %2677 = vmatpush.bf16.msrb.mxu1 %v4369_v11 }
 0x109   :  { %v2300_v28 = vpop.f32.mrf.mxu1  ;;  %v2250_v29 = vadd.f32 %v2249_v13, %v2201_v26  ;;  %v3290_v13 = vld [vmem:[%s6027_s0 + $0x260] sm:$0xf] }
 0x10a   :  { %v3291_v26 = vor.u32 %v4205_v14, %v3290_v13 }
 0x10b   :  { %v5233_v40 = vadd.f32 %v2298_v15, %v2250_v29  ;;  %v3295_v29 = vor.u32 %v4196_v57, %v3292_v36 }
 0x10c   :  { %v2153_v41 = vpop.f32.mrf.mxu2 }
 0x10d   :  { %v2202_v42 = vpop.f32.mrf.mxu3  ;;  %v2154_v46 = vadd.f32 %v2153_v41, %v5044_v8  ;;  %v4354_v8 = vld [vmem:[%s6025_s1 + $0x2d0] sm:$0xff] }
 0x10e   :  { %v2254_v53 = vpop.f32.mrf.mxu0  ;;  %2578 = vmatpush.bf16.msrb.mxu3 %v4354_v8  ;;  %v3364_v8 = vld [vmem:[%s6027_s0 + $0x338] sm:$0xf0] }
 0x10f   :  { %v2203_v52 = vadd.f32 %v2202_v42, %v2154_v46 }
 0x111   :  { %v2303_v55 = vpop.f32.mrf.mxu1  ;;  %v2252_v56 = vadd.f32 %v2251_v27, %v2203_v52  ;;  %2351 = vmatmul.bf16.gmra.mxu2 %v3211_v47  ;;  %2449 = vmatmul.bf16.gmra.mxu0 %v3219_v50  ;;  %v3354_v47 = vld [vmem:[%s6027_s0 + $0x2e8] sm:$0xf]  ;;  %v4222_v50 = vld [vmem:[%s6027_s0 + $0x32c] sm:$0xf0]  ;;  %v3356_v52 = vld [vmem:[%s6027_s0 + $0x330] sm:$0xf0] }
 0x112   :  { %2400 = vmatmul.bf16.gmra.mxu3 %v3215_v48  ;;  %v4361_v48 = vld [vmem:[%s6025_s1 + $0x308] sm:$0xff] }
 0x113   :  { %v5251_v60 = vadd.f32 %v2300_v28, %v2252_v56  ;;  %2628 = vmatpush.bf16.msrb.mxu0 %v4361_v48  ;;  %v4368_v48 = vld [vmem:[%s6025_s1 + $0x340] sm:$0xff] }
 0x114   :  { %2498 = vmatmul.bf16.gmra.mxu1 %v3223_v54  ;;  %v2156_v61 = vpop.f32.mrf.mxu2  ;;  %v4223_v54 = vld [vmem:[%s6027_s0 + $0x334] sm:$0xf0] }
 0x115   :  { %v2205_v0 = vpop.f32.mrf.mxu3  ;;  %v2157_v3 = vadd.f32 %v2156_v61, %v5077_v32  ;;  %v4195_v32 = vld [vmem:[%s6027_s0 + $0x25c] sm:$0xf]  ;;  %2678 = vmatpush.bf16.msrb.mxu1 %v4368_v48 }
 0x116   :  { %v2256_v6 = vpop.f32.mrf.mxu0  ;;  %v3287_v24 = vor.u32 %v4195_v32, %v3284_v12  ;;  %v4344_v32 = vld [vmem:[%s6025_s1 + $0x280] sm:$0xff] }
 0x117   :  { %v2206_v5 = vadd.f32 %v2205_v0, %v2157_v3  ;;  %v3355_v0 = vor.u32 %v4222_v50, %v3354_v47  ;;  %2531 = vmatpush.bf16.msrb.mxu2 %v4344_v32  ;;  %v4250_v32 = vld [vmem:[%s6027_s0 + $0x414] sm:$0xf] }
 0x119   :  { %v2305_v49 = vpop.f32.mrf.mxu1  ;;  %v2255_v7 = vadd.f32 %v2254_v53, %v2206_v5  ;;  %v3362_v53 = vld [vmem:[%s6027_s0 + $0x2f0] sm:$0xf] }
 0x11a   :  { %v3363_v5 = vor.u32 %v4223_v54, %v3362_v53 }
 0x11b   :  { %v5275_v15 = vadd.f32 %v2303_v55, %v2255_v7  ;;  %v3367_v7 = vor.u32 %v4214_v25, %v3364_v8 }
 0x11c   :  { %v2158_v16 = vpop.f32.mrf.mxu2 }
 0x11d   :  { %v2207_v17 = vpop.f32.mrf.mxu3  ;;  %v2159_v20 = vadd.f32 %v2158_v16, %v5092_v44  ;;  %v4353_v44 = vld [vmem:[%s6025_s1 + $0x2c8] sm:$0xff] }
 0x11e   :  { %v2259_v28 = vpop.f32.mrf.mxu0  ;;  %2579 = vmatpush.bf16.msrb.mxu3 %v4353_v44  ;;  %v3436_v44 = vld [vmem:[%s6027_s0 + $0x3c8] sm:$0xf0] }
 0x11f   :  { %v2208_v27 = vadd.f32 %v2207_v17, %v2159_v20 }
 0x121   :  { %v2308_v31 = vpop.f32.mrf.mxu1  ;;  %v2257_v33 = vadd.f32 %v2256_v6, %v2208_v27  ;;  %2356 = vmatmul.bf16.gmra.mxu2 %v3283_v21  ;;  %2454 = vmatmul.bf16.gmra.mxu0 %v3291_v26  ;;  %v3426_v21 = vld [vmem:[%s6027_s0 + $0x378] sm:$0xf]  ;;  %v4240_v26 = vld [vmem:[%s6027_s0 + $0x3bc] sm:$0xf0]  ;;  %v3428_v27 = vld [vmem:[%s6027_s0 + $0x3c0] sm:$0xf0] }
 0x122   :  { %2405 = vmatmul.bf16.gmra.mxu3 %v3287_v24  ;;  %v4360_v24 = vld [vmem:[%s6025_s1 + $0x300] sm:$0xff] }
 0x123   :  { %v5293_v35 = vadd.f32 %v2305_v49, %v2257_v33  ;;  %2629 = vmatpush.bf16.msrb.mxu0 %v4360_v24 }
 0x124   :  { %2503 = vmatmul.bf16.gmra.mxu1 %v3295_v29  ;;  %v2161_v37 = vpop.f32.mrf.mxu2  ;;  %v4241_v29 = vld [vmem:[%s6027_s0 + $0x3c4] sm:$0xf0] }
 0x125   :  { %v2210_v39 = vpop.f32.mrf.mxu3  ;;  %v2162_v41 = vadd.f32 %v2161_v37, %v4939_v62  ;;  %v4213_v62 = vld [vmem:[%s6027_s0 + $0x2ec] sm:$0xf] }
 0x126   :  { %v2261_v43 = vpop.f32.mrf.mxu0  ;;  %v3359_v3 = vor.u32 %v4213_v62, %v3356_v52  ;;  %v4383_v62 = vld [vmem:[%s6025_s1 + $0x3b8] sm:$0xff] }
 0x127   :  { %v2211_v42 = vadd.f32 %v2210_v39, %v2162_v41  ;;  %v3427_v39 = vor.u32 %v4240_v26, %v3426_v21  ;;  %2720 = vmatpush.bf16.msra.mxu2 %v4383_v62  ;;  %v4407_v26 = vld [vmem:[%s6025_s1 + $0x478] sm:$0xff]  ;;  %v4126_v62 = vld [vmem:[%s6027_s0 + $0x34] sm:$0xf] }
 0x128   :  { %2867 = vmatpush.bf16.msra.mxu1 %v4407_v26 }
 0x129   :  { %v2310_v4 = vpop.f32.mrf.mxu1  ;;  %v2260_v46 = vadd.f32 %v2259_v28, %v2211_v42  ;;  %v3434_v28 = vld [vmem:[%s6027_s0 + $0x380] sm:$0xf] }
 0x12a   :  { %v3435_v42 = vor.u32 %v4241_v29, %v3434_v28 }
 0x12b   :  { %v5317_v55 = vadd.f32 %v2308_v31, %v2260_v46  ;;  %v3439_v46 = vor.u32 %v4232_v59, %v3436_v44 }
 0x12c   :  { %v2163_v56 = vpop.f32.mrf.mxu2 }
 0x12d   :  { %v2212_v58 = vpop.f32.mrf.mxu3  ;;  %v2164_v61 = vadd.f32 %v2163_v56, %v4972_v18  ;;  %v4352_v18 = vld [vmem:[%s6025_s1 + $0x2c0] sm:$0xff] }
 0x12e   :  { %v2264_v49 = vpop.f32.mrf.mxu0  ;;  %2580 = vmatpush.bf16.msrb.mxu3 %v4352_v18  ;;  %v3508_v18 = vld [vmem:[%s6027_s0 + $0x458] sm:$0xf0] }
 0x12f   :  { %v2213_v6 = vadd.f32 %v2212_v58, %v2164_v61 }
 0x131   :  { %v2313_v9 = vpop.f32.mrf.mxu1  ;;  %v2262_v10 = vadd.f32 %v2261_v43, %v2213_v6  ;;  %2361 = vmatmul.bf16.gmra.mxu2 %v3355_v0  ;;  %2459 = vmatmul.bf16.gmra.mxu0 %v3363_v5  ;;  %v3498_v0 = vld [vmem:[%s6027_s0 + $0x408] sm:$0xf]  ;;  %v4258_v5 = vld [vmem:[%s6027_s0 + $0x44c] sm:$0xf0]  ;;  %v3500_v6 = vld [vmem:[%s6027_s0 + $0x450] sm:$0xf0] }
 0x132   :  { %2410 = vmatmul.bf16.gmra.mxu3 %v3359_v3  ;;  %v4399_v3 = vld [vmem:[%s6025_s1 + $0x438] sm:$0xff] }
 0x133   :  { %v5335_v12 = vadd.f32 %v2310_v4, %v2262_v10  ;;  %2818 = vmatpush.bf16.msra.mxu0 %v4399_v3 }
 0x134   :  { %2508 = vmatmul.bf16.gmra.mxu1 %v3367_v7  ;;  %v2166_v13 = vpop.f32.mrf.mxu2  ;;  %v4259_v7 = vld [vmem:[%s6027_s0 + $0x454] sm:$0xf0] }
 0x135   :  { %v2215_v14 = vpop.f32.mrf.mxu3  ;;  %v2167_v16 = vadd.f32 %v2166_v13, %v4987_v30  ;;  %v4231_v30 = vld [vmem:[%s6027_s0 + $0x37c] sm:$0xf] }
 0x136   :  { %v2266_v57 = vpop.f32.mrf.mxu0  ;;  %v3431_v41 = vor.u32 %v4231_v30, %v3428_v27  ;;  %v4382_v30 = vld [vmem:[%s6025_s1 + $0x3b0] sm:$0xff] }
 0x137   :  { %v2216_v17 = vadd.f32 %v2215_v14, %v2167_v16  ;;  %v3499_v14 = vor.u32 %v4258_v5, %v3498_v0  ;;  %2721 = vmatpush.bf16.msra.mxu2 %v4382_v30  ;;  %v4406_v5 = vld [vmem:[%s6025_s1 + $0x470] sm:$0xff]  ;;  %v4144_v30 = vld [vmem:[%s6027_s0 + $0xc4] sm:$0xf] }
 0x138   :  { %2868 = vmatpush.bf16.msra.mxu1 %v4406_v5 }
 0x139   :  { %v2315_v36 = vpop.f32.mrf.mxu1  ;;  %v2265_v20 = vadd.f32 %v2264_v49, %v2216_v17  ;;  %v3506_v49 = vld [vmem:[%s6027_s0 + $0x410] sm:$0xf] }
 0x13a   :  { %v3507_v17 = vor.u32 %v4259_v7, %v3506_v49 }
 0x13b   :  { %v5359_v31 = vadd.f32 %v2313_v9, %v2265_v20  ;;  %v3511_v20 = vor.u32 %v4250_v32, %v3508_v18 }
 0x13c   :  { %v2168_v33 = vpop.f32.mrf.mxu2 }
 0x13d   :  { %v2217_v34 = vpop.f32.mrf.mxu3  ;;  %v2169_v37 = vadd.f32 %v2168_v33, %v5020_v51  ;;  %v4391_v51 = vld [vmem:[%s6025_s1 + $0x3f8] sm:$0xff] }
 0x13e   :  { %v2269_v4 = vpop.f32.mrf.mxu0  ;;  %2769 = vmatpush.bf16.msra.mxu3 %v4391_v51  ;;  %v3020_v51 = vld [vmem:[%s6027_s0 + $0x78] sm:$0xf0] }
 0x13f   :  { %v2218_v43 = vadd.f32 %v2217_v34, %v2169_v37 }
 0x141   :  { %v2318_v47 = vpop.f32.mrf.mxu1  ;;  %v2267_v50 = vadd.f32 %v2266_v57, %v2218_v43  ;;  %2366 = vmatmul.bf16.gmra.mxu2 %v3427_v39  ;;  %2464 = vmatmul.bf16.gmra.mxu0 %v3435_v42  ;;  %v3010_v39 = vld [vmem:[%s6027_s0 + $0x28] sm:$0xf]  ;;  %v4134_v42 = vld [vmem:[%s6027_s0 + $0x6c] sm:$0xf0]  ;;  %v3012_v43 = vld [vmem:[%s6027_s0 + $0x70] sm:$0xf0] }
 0x142   :  { %2415 = vmatmul.bf16.gmra.mxu3 %v3431_v41  ;;  %v4398_v41 = vld [vmem:[%s6025_s1 + $0x430] sm:$0xff] }
 0x143   :  { %v5377_v52 = vadd.f32 %v2315_v36, %v2267_v50  ;;  %2819 = vmatpush.bf16.msra.mxu0 %v4398_v41 }
 0x144   :  { %2513 = vmatmul.bf16.gmra.mxu1 %v3439_v46  ;;  %v2171_v53 = vpop.f32.mrf.mxu2  ;;  %v4135_v46 = vld [vmem:[%s6027_s0 + $0x74] sm:$0xf0] }
 0x145   :  { %v2220_v54 = vpop.f32.mrf.mxu3  ;;  %v2172_v56 = vadd.f32 %v2171_v53, %v5035_v1  ;;  %v4249_v1 = vld [vmem:[%s6027_s0 + $0x40c] sm:$0xf] }
 0x146   :  { %v2271_v25 = vpop.f32.mrf.mxu0  ;;  %v3503_v16 = vor.u32 %v4249_v1, %v3500_v6  ;;  %v4381_v1 = vld [vmem:[%s6025_s1 + $0x3a8] sm:$0xff] }
 0x147   :  { %v2221_v58 = vadd.f32 %v2220_v54, %v2172_v56  ;;  %v3011_v54 = vor.u32 %v4134_v42, %v3010_v39  ;;  %2722 = vmatpush.bf16.msra.mxu2 %v4381_v1  ;;  %v4405_v42 = vld [vmem:[%s6025_s1 + $0x468] sm:$0xff]  ;;  %v4162_v1 = vld [vmem:[%s6027_s0 + $0x154] sm:$0xf] }
 0x148   :  { %2869 = vmatpush.bf16.msra.mxu1 %v4405_v42 }
 0x149   :  { %v2320_v8 = vpop.f32.mrf.mxu1  ;;  %v2270_v61 = vadd.f32 %v2269_v4, %v2221_v58  ;;  %v3018_v4 = vld [vmem:[%s6027_s0 + $0x30] sm:$0xf] }
 0x14a   :  { %v3019_v58 = vor.u32 %v4135_v46, %v3018_v4 }
 0x14b   :  { %v5401_v9 = vadd.f32 %v2318_v47, %v2270_v61  ;;  %v3023_v61 = vor.u32 %v4126_v62, %v3020_v51 }
 0x14c   :  { %v2173_v10 = vpop.f32.mrf.mxu2 }
 0x14d   :  { %v2222_v11 = vpop.f32.mrf.mxu3  ;;  %v2174_v13 = vadd.f32 %v2173_v10, %v5068_v23  ;;  %v4390_v23 = vld [vmem:[%s6025_s1 + $0x3f0] sm:$0xff] }
 0x14e   :  { %v2274_v36 = vpop.f32.mrf.mxu0  ;;  %2770 = vmatpush.bf16.msra.mxu3 %v4390_v23  ;;  %v3092_v23 = vld [vmem:[%s6027_s0 + $0x108] sm:$0xf0] }
 0x14f   :  { %v2223_v57 = vadd.f32 %v2222_v11, %v2174_v13 }
 0x151   :  { %v2323_v21 = vpop.f32.mrf.mxu1  ;;  %v2272_v24 = vadd.f32 %v2271_v25, %v2223_v57  ;;  %2371 = vmatmul.bf16.gmra.mxu2 %v3499_v14  ;;  %2469 = vmatmul.bf16.gmra.mxu0 %v3507_v17  ;;  %v3082_v14 = vld [vmem:[%s6027_s0 + $0xb8] sm:$0xf]  ;;  %v4152_v17 = vld [vmem:[%s6027_s0 + $0xfc] sm:$0xf0]  ;;  %v3084_v57 = vld [vmem:[%s6027_s0 + $0x100] sm:$0xf0] }
 0x152   :  { %2420 = vmatmul.bf16.gmra.mxu3 %v3503_v16  ;;  %v4397_v16 = vld [vmem:[%s6025_s1 + $0x428] sm:$0xff] }
 0x153   :  { %v5419_v27 = vadd.f32 %v2320_v8, %v2272_v24  ;;  %2820 = vmatpush.bf16.msra.mxu0 %v4397_v16 }
 0x154   :  { %2518 = vmatmul.bf16.gmra.mxu1 %v3511_v20  ;;  %v2176_v28 = vpop.f32.mrf.mxu2  ;;  %v4153_v20 = vld [vmem:[%s6027_s0 + $0x104] sm:$0xf0] }
 0x155   :  { %v2225_v29 = vpop.f32.mrf.mxu3  ;;  %v2177_v33 = vadd.f32 %v2176_v28, %v5083_v38  ;;  %v4125_v38 = vld [vmem:[%s6027_s0 + $0x2c] sm:$0xf] }
 0x156   :  { %v2276_v59 = vpop.f32.mrf.mxu0  ;;  %v3015_v56 = vor.u32 %v4125_v38, %v3012_v43  ;;  %v4380_v38 = vld [vmem:[%s6025_s1 + $0x3a0] sm:$0xff] }
 0x157   :  { %v2226_v34 = vadd.f32 %v2225_v29, %v2177_v33  ;;  %v3083_v29 = vor.u32 %v4152_v17, %v3082_v14  ;;  %2723 = vmatpush.bf16.msra.mxu2 %v4380_v38  ;;  %v4404_v17 = vld [vmem:[%s6025_s1 + $0x460] sm:$0xff] }
 0x158   :  { %2870 = vmatpush.bf16.msra.mxu1 %v4404_v17  ;;  %v4180_v38 = vld [vmem:[%s6027_s0 + $0x1e4] sm:$0xf] }
 0x159   :  { %v2325_v44 = vpop.f32.mrf.mxu1  ;;  %v2275_v37 = vadd.f32 %v2274_v36, %v2226_v34  ;;  %v3090_v36 = vld [vmem:[%s6027_s0 + $0xc0] sm:$0xf] }
 0x15a   :  { %v3091_v34 = vor.u32 %v4153_v20, %v3090_v36 }
 0x15b   :  { %v5443_v47 = vadd.f32 %v2323_v21, %v2275_v37  ;;  %v3095_v37 = vor.u32 %v4144_v30, %v3092_v23 }
 0x15c   :  { %v2178_v48 = vpop.f32.mrf.mxu2 }
 0x15d   :  { %v2227_v50 = vpop.f32.mrf.mxu3  ;;  %v2179_v53 = vadd.f32 %v2178_v48, %v5116_v63  ;;  %v4389_v63 = vld [vmem:[%s6025_s1 + $0x3e8] sm:$0xff] }
 0x15e   :  { %v2435_v8 = vpop.f32.mrf.mxu0  ;;  %2771 = vmatpush.bf16.msra.mxu3 %v4389_v63  ;;  %v3164_v63 = vld [vmem:[%s6027_s0 + $0x198] sm:$0xf0] }
 0x15f   :  { %v2228_v25 = vadd.f32 %v2227_v50, %v2179_v53 }
 0x161   :  { %v2484_v0 = vpop.f32.mrf.mxu1  ;;  %v2277_v3 = vadd.f32 %v2276_v59, %v2228_v25  ;;  %2532 = vmatmul.bf16.vlgmr.msrb.gmra.mxu2 %v3011_v54  ;;  %2630 = vmatmul.bf16.vlgmr.msrb.gmra.mxu0 %v3019_v58  ;;  %v3154_v54 = vld [vmem:[%s6027_s0 + $0x148] sm:$0xf]  ;;  %v4170_v58 = vld [vmem:[%s6027_s0 + $0x18c] sm:$0xf0]  ;;  %v3156_v25 = vld [vmem:[%s6027_s0 + $0x190] sm:$0xf0] }
 0x162   :  { %2581 = vmatmul.bf16.vlgmr.msrb.gmra.mxu3 %v3015_v56  ;;  %v4396_v56 = vld [vmem:[%s6025_s1 + $0x420] sm:$0xff] }
 0x163   :  { %v5461_v6 = vadd.f32 %v2325_v44, %v2277_v3  ;;  %2821 = vmatpush.bf16.msra.mxu0 %v4396_v56 }
 0x164   :  { %2679 = vmatmul.bf16.vlgmr.msrb.gmra.mxu1 %v3023_v61  ;;  %v2337_v49 = vpop.f32.mrf.mxu2  ;;  %v4171_v61 = vld [vmem:[%s6027_s0 + $0x194] sm:$0xf0] }
 0x165   :  { %v2386_v7 = vpop.f32.mrf.mxu3  ;;  %v2338_v10 = vadd.f32 %v2337_v49, %v5149_v22  ;;  %v4143_v22 = vld [vmem:[%s6027_s0 + $0xbc] sm:$0xf] }
 0x166   :  { %v2437_v32 = vpop.f32.mrf.mxu0  ;;  %v3087_v33 = vor.u32 %v4143_v22, %v3084_v57  ;;  %v4379_v22 = vld [vmem:[%s6025_s1 + $0x398] sm:$0xff] }
 0x167   :  { %v2387_v11 = vadd.f32 %v2386_v7, %v2338_v10  ;;  %v3155_v7 = vor.u32 %v4170_v58, %v3154_v54  ;;  %2724 = vmatpush.bf16.msra.mxu2 %v4379_v22  ;;  %v4403_v58 = vld [vmem:[%s6025_s1 + $0x458] sm:$0xff]  ;;  %v4198_v22 = vld [vmem:[%s6027_s0 + $0x274] sm:$0xf] }
 0x168   :  { %2871 = vmatpush.bf16.msra.mxu1 %v4403_v58 }
 0x169   :  { %v2486_v18 = vpop.f32.mrf.mxu1  ;;  %v2436_v13 = vadd.f32 %v2435_v8, %v2387_v11  ;;  %v3162_v8 = vld [vmem:[%s6027_s0 + $0x150] sm:$0xf] }
 0x16a   :  { %v3163_v11 = vor.u32 %v4171_v61, %v3162_v8 }
 0x16b   :  { %v5485_v21 = vadd.f32 %v2484_v0, %v2436_v13  ;;  %v3167_v13 = vor.u32 %v4162_v1, %v3164_v63 }
 0x16c   :  { %v2339_v24 = vpop.f32.mrf.mxu2 }
 0x16d   :  { %v2388_v26 = vpop.f32.mrf.mxu3  ;;  %v2340_v28 = vadd.f32 %v2339_v24, %v5167_v45  ;;  %v4388_v45 = vld [vmem:[%s6025_s1 + $0x3e0] sm:$0xff] }
 0x16e   :  { %v2440_v44 = vpop.f32.mrf.mxu0  ;;  %2772 = vmatpush.bf16.msra.mxu3 %v4388_v45  ;;  %v3236_v45 = vld [vmem:[%s6027_s0 + $0x228] sm:$0xf0] }
 0x16f   :  { %v2389_v59 = vadd.f32 %v2388_v26, %v2340_v28 }
 0x171   :  { %v2489_v39 = vpop.f32.mrf.mxu1  ;;  %v2438_v41 = vadd.f32 %v2437_v32, %v2389_v59  ;;  %2537 = vmatmul.bf16.gmra.mxu2 %v3083_v29  ;;  %2635 = vmatmul.bf16.gmra.mxu0 %v3091_v34  ;;  %v3226_v29 = vld [vmem:[%s6027_s0 + $0x1d8] sm:$0xf]  ;;  %v4188_v34 = vld [vmem:[%s6027_s0 + $0x21c] sm:$0xf0]  ;;  %v3228_v59 = vld [vmem:[%s6027_s0 + $0x220] sm:$0xf0] }
 0x172   :  { %2586 = vmatmul.bf16.gmra.mxu3 %v3087_v33  ;;  %v4395_v33 = vld [vmem:[%s6025_s1 + $0x418] sm:$0xff] }
 0x173   :  { %v5503_v43 = vadd.f32 %v2486_v18, %v2438_v41  ;;  %2822 = vmatpush.bf16.msra.mxu0 %v4395_v33 }
 0x174   :  { %2684 = vmatmul.bf16.gmra.mxu1 %v3095_v37  ;;  %v2342_v4 = vpop.f32.mrf.mxu2  ;;  %v4189_v37 = vld [vmem:[%s6027_s0 + $0x224] sm:$0xf0] }
 0x175   :  { %v2391_v46 = vpop.f32.mrf.mxu3  ;;  %v2343_v48 = vadd.f32 %v2342_v4, %v5191_v2  ;;  %v4161_v2 = vld [vmem:[%s6027_s0 + $0x14c] sm:$0xf] }
 0x176   :  { %v2442_v62 = vpop.f32.mrf.mxu0  ;;  %v3159_v10 = vor.u32 %v4161_v2, %v3156_v25  ;;  %v4378_v2 = vld [vmem:[%s6025_s1 + $0x390] sm:$0xff] }
 0x177   :  { %v2392_v50 = vadd.f32 %v2391_v46, %v2343_v48  ;;  %v3227_v46 = vor.u32 %v4188_v34, %v3226_v29  ;;  %2725 = vmatpush.bf16.msra.mxu2 %v4378_v2  ;;  %v4402_v34 = vld [vmem:[%s6025_s1 + $0x450] sm:$0xff]  ;;  %v4216_v2 = vld [vmem:[%s6027_s0 + $0x304] sm:$0xf] }
 0x178   :  { %2872 = vmatpush.bf16.msra.mxu1 %v4402_v34 }
 0x179   :  { %v2491_v51 = vpop.f32.mrf.mxu1  ;;  %v2441_v53 = vadd.f32 %v2440_v44, %v2392_v50  ;;  %v3234_v44 = vld [vmem:[%s6027_s0 + $0x1e0] sm:$0xf] }
 0x17a   :  { %v3235_v50 = vor.u32 %v4189_v37, %v3234_v44 }
 0x17b   :  { %v5527_v0 = vadd.f32 %v2489_v39, %v2441_v53  ;;  %v3239_v53 = vor.u32 %v4180_v38, %v3236_v45 }
 0x17c   :  { %v2344_v3 = vpop.f32.mrf.mxu2 }
 0x17d   :  { %v2393_v5 = vpop.f32.mrf.mxu3  ;;  %v2345_v49 = vadd.f32 %v2344_v3, %v5209_v19  ;;  %v4387_v19 = vld [vmem:[%s6025_s1 + $0x3d8] sm:$0xff] }
 0x17e   :  { %v2445_v18 = vpop.f32.mrf.mxu0  ;;  %2773 = vmatpush.bf16.msra.mxu3 %v4387_v19  ;;  %v3308_v19 = vld [vmem:[%s6027_s0 + $0x2b8] sm:$0xf0] }
 0x17f   :  { %v2394_v32 = vadd.f32 %v2393_v5, %v2345_v49 }
 0x181   :  { %v2494_v14 = vpop.f32.mrf.mxu1  ;;  %v2443_v16 = vadd.f32 %v2442_v62, %v2394_v32  ;;  %2542 = vmatmul.bf16.gmra.mxu2 %v3155_v7  ;;  %2640 = vmatmul.bf16.gmra.mxu0 %v3163_v11  ;;  %v3298_v7 = vld [vmem:[%s6027_s0 + $0x268] sm:$0xf]  ;;  %v4206_v11 = vld [vmem:[%s6027_s0 + $0x2ac] sm:$0xf0]  ;;  %v3300_v32 = vld [vmem:[%s6027_s0 + $0x2b0] sm:$0xf0] }
 0x182   :  { %2591 = vmatmul.bf16.gmra.mxu3 %v3159_v10  ;;  %v4394_v10 = vld [vmem:[%s6025_s1 + $0x410] sm:$0xff] }
 0x183   :  { %v5545_v57 = vadd.f32 %v2491_v51, %v2443_v16  ;;  %2823 = vmatpush.bf16.msra.mxu0 %v4394_v10 }
 0x184   :  { %2689 = vmatmul.bf16.gmra.mxu1 %v3167_v13  ;;  %v2347_v36 = vpop.f32.mrf.mxu2  ;;  %v4207_v13 = vld [vmem:[%s6027_s0 + $0x2b4] sm:$0xf0] }
 0x185   :  { %v2396_v20 = vpop.f32.mrf.mxu3  ;;  %v2348_v24 = vadd.f32 %v2347_v36, %v5233_v40  ;;  %v4179_v40 = vld [vmem:[%s6027_s0 + $0x1dc] sm:$0xf] }
 0x186   :  { %v2447_v30 = vpop.f32.mrf.mxu0  ;;  %v3231_v48 = vor.u32 %v4179_v40, %v3228_v59  ;;  %v4377_v40 = vld [vmem:[%s6025_s1 + $0x388] sm:$0xff] }
 0x187   :  { %v2397_v26 = vadd.f32 %v2396_v20, %v2348_v24  ;;  %v3299_v20 = vor.u32 %v4206_v11, %v3298_v7  ;;  %2726 = vmatpush.bf16.msra.mxu2 %v4377_v40  ;;  %v4401_v11 = vld [vmem:[%s6025_s1 + $0x448] sm:$0xff]  ;;  %v4234_v40 = vld [vmem:[%s6027_s0 + $0x394] sm:$0xf] }
 0x188   :  { %2873 = vmatpush.bf16.msra.mxu1 %v4401_v11 }
 0x189   :  { %v2496_v23 = vpop.f32.mrf.mxu1  ;;  %v2446_v28 = vadd.f32 %v2445_v18, %v2397_v26  ;;  %v3306_v18 = vld [vmem:[%s6027_s0 + $0x270] sm:$0xf] }
 0x18a   :  { %v3307_v26 = vor.u32 %v4207_v13, %v3306_v18 }
 0x18b   :  { %v5569_v39 = vadd.f32 %v2494_v14, %v2446_v28  ;;  %v3311_v28 = vor.u32 %v4198_v22, %v3308_v19 }
 0x18c   :  { %v2349_v41 = vpop.f32.mrf.mxu2 }
 0x18d   :  { %v2398_v42 = vpop.f32.mrf.mxu3  ;;  %v2350_v4 = vadd.f32 %v2349_v41, %v5251_v60  ;;  %v4386_v60 = vld [vmem:[%s6025_s1 + $0x3d0] sm:$0xff] }
 0x18e   :  { %v2450_v51 = vpop.f32.mrf.mxu0  ;;  %2774 = vmatpush.bf16.msra.mxu3 %v4386_v60  ;;  %v3380_v60 = vld [vmem:[%s6027_s0 + $0x348] sm:$0xf0] }
 0x18f   :  { %v2399_v62 = vadd.f32 %v2398_v42, %v2350_v4 }
 0x191   :  { %v2499_v54 = vpop.f32.mrf.mxu1  ;;  %v2448_v56 = vadd.f32 %v2447_v30, %v2399_v62  ;;  %2547 = vmatmul.bf16.gmra.mxu2 %v3227_v46  ;;  %2645 = vmatmul.bf16.gmra.mxu0 %v3235_v50  ;;  %v3370_v46 = vld [vmem:[%s6027_s0 + $0x2f8] sm:$0xf]  ;;  %v4224_v50 = vld [vmem:[%s6027_s0 + $0x33c] sm:$0xf0]  ;;  %v3372_v62 = vld [vmem:[%s6027_s0 + $0x340] sm:$0xf0] }
 0x192   :  { %2596 = vmatmul.bf16.gmra.mxu3 %v3231_v48  ;;  %v4393_v48 = vld [vmem:[%s6025_s1 + $0x408] sm:$0xff] }
 0x193   :  { %v5587_v25 = vadd.f32 %v2496_v23, %v2448_v56  ;;  %2824 = vmatpush.bf16.msra.mxu0 %v4393_v48  ;;  %v4400_v48 = vld [vmem:[%s6025_s1 + $0x440] sm:$0xff] }
 0x194   :  { %2694 = vmatmul.bf16.gmra.mxu1 %v3239_v53  ;;  %v2352_v8 = vpop.f32.mrf.mxu2  ;;  %v4225_v53 = vld [vmem:[%s6027_s0 + $0x344] sm:$0xf0] }
 0x195   :  { %v2401_v61 = vpop.f32.mrf.mxu3  ;;  %v2353_v3 = vadd.f32 %v2352_v8, %v5275_v15  ;;  %v4197_v15 = vld [vmem:[%s6027_s0 + $0x26c] sm:$0xf]  ;;  %2874 = vmatpush.bf16.msra.mxu1 %v4400_v48 }
 0x196   :  { %v2452_v1 = vpop.f32.mrf.mxu0  ;;  %v3303_v24 = vor.u32 %v4197_v15, %v3300_v32  ;;  %v4376_v15 = vld [vmem:[%s6025_s1 + $0x380] sm:$0xff] }
 0x197   :  { %v2402_v5 = vadd.f32 %v2401_v61, %v2353_v3  ;;  %v3371_v61 = vor.u32 %v4224_v50, %v3370_v46  ;;  %2727 = vmatpush.bf16.msra.mxu2 %v4376_v15 }
 0x199   :  { %v2501_v63 = vpop.f32.mrf.mxu1  ;;  %v2451_v49 = vadd.f32 %v2450_v51, %v2402_v5  ;;  %v3378_v51 = vld [vmem:[%s6027_s0 + $0x300] sm:$0xf] }
 0x19a   :  { %v3379_v5 = vor.u32 %v4225_v53, %v3378_v51 }
 0x19b   :  { %v5611_v14 = vadd.f32 %v2499_v54, %v2451_v49  ;;  %v3383_v49 = vor.u32 %v4216_v2, %v3380_v60  ;;  %v3514_v60 = vld [vmem:[%s6027_s0 + $0x418] sm:$0xf] }
 0x19c   :  { %v2354_v16 = vpop.f32.mrf.mxu2 }
 0x19d   :  { %v2403_v17 = vpop.f32.mrf.mxu3  ;;  %v2355_v36 = vadd.f32 %v2354_v16, %v5293_v35  ;;  %v4385_v35 = vld [vmem:[%s6025_s1 + $0x3c8] sm:$0xff] }
 0x19e   :  { %v2455_v23 = vpop.f32.mrf.mxu0  ;;  %2775 = vmatpush.bf16.msra.mxu3 %v4385_v35  ;;  %v3452_v35 = vld [vmem:[%s6027_s0 + $0x3d8] sm:$0xf0] }
 0x19f   :  { %v2404_v30 = vadd.f32 %v2403_v17, %v2355_v36 }
 0x1a1   :  { %v2504_v29 = vpop.f32.mrf.mxu1  ;;  %v2453_v33 = vadd.f32 %v2452_v1, %v2404_v30  ;;  %2552 = vmatmul.bf16.gmra.mxu2 %v3299_v20  ;;  %2650 = vmatmul.bf16.gmra.mxu0 %v3307_v26  ;;  %v3442_v20 = vld [vmem:[%s6027_s0 + $0x388] sm:$0xf]  ;;  %v4242_v26 = vld [vmem:[%s6027_s0 + $0x3cc] sm:$0xf0]  ;;  %v3444_v30 = vld [vmem:[%s6027_s0 + $0x3d0] sm:$0xf0] }
 0x1a2   :  { %2601 = vmatmul.bf16.gmra.mxu3 %v3303_v24  ;;  %v4392_v24 = vld [vmem:[%s6025_s1 + $0x400] sm:$0xff] }
 0x1a3   :  { %v5629_v59 = vadd.f32 %v2501_v63, %v2453_v33  ;;  %2825 = vmatpush.bf16.msra.mxu0 %v4392_v24 }
 0x1a4   :  { %2699 = vmatmul.bf16.gmra.mxu1 %v3311_v28  ;;  %v2357_v44 = vpop.f32.mrf.mxu2  ;;  %v4243_v28 = vld [vmem:[%s6027_s0 + $0x3d4] sm:$0xf0] }
 0x1a5   :  { %v2406_v37 = vpop.f32.mrf.mxu3  ;;  %v2358_v41 = vadd.f32 %v2357_v44, %v5317_v55  ;;  %v4215_v55 = vld [vmem:[%s6027_s0 + $0x2fc] sm:$0xf] }
 0x1a6   :  { %v2457_v38 = vpop.f32.mrf.mxu0  ;;  %v3375_v3 = vor.u32 %v4215_v55, %v3372_v62 }
 0x1a7   :  { %v2407_v42 = vadd.f32 %v2406_v37, %v2358_v41  ;;  %v3443_v37 = vor.u32 %v4242_v26, %v3442_v20 }
 0x1a9   :  { %v2506_v45 = vpop.f32.mrf.mxu1  ;;  %v2456_v4 = vadd.f32 %v2455_v23, %v2407_v42  ;;  %v3450_v23 = vld [vmem:[%s6027_s0 + $0x390] sm:$0xf] }
 0x1aa   :  { %v3451_v42 = vor.u32 %v4243_v28, %v3450_v23  ;;  %v3026_v28 = vld [vmem:[%s6027_s0 + $0x38] sm:$0xf] }
 0x1ab   :  { %v5653_v54 = vadd.f32 %v2504_v29, %v2456_v4  ;;  %v3455_v4 = vor.u32 %v4234_v40, %v3452_v35  ;;  %v3034_v40 = vld [vmem:[%s6027_s0 + $0x40] sm:$0xf]  ;;  %v4137_v35 = vld [vmem:[%s6027_s0 + $0x84] sm:$0xf0] }
 0x1ac   :  { %v2359_v56 = vpop.f32.mrf.mxu2  ;;  %v3035_v48 = vor.u32 %v4137_v35, %v3034_v40  ;;  %v3170_v40 = vld [vmem:[%s6027_s0 + $0x158] sm:$0xf]  ;;  %v4172_v35 = vld [vmem:[%s6027_s0 + $0x19c] sm:$0xf0] }
 0x1ad   :  { %v2408_v58 = vpop.f32.mrf.mxu3  ;;  %v2360_v8 = vadd.f32 %v2359_v56, %v5335_v12  ;;  %v4384_v12 = vld [vmem:[%s6025_s1 + $0x3c0] sm:$0xff] }
 0x1ae   :  { %v2460_v63 = vpop.f32.mrf.mxu0  ;;  %2776 = vmatpush.bf16.msra.mxu3 %v4384_v12 }
 0x1af   :  { %v2409_v1 = vadd.f32 %v2408_v58, %v2360_v8  ;;  %v4260_v8 = vld [vmem:[%s6027_s0 + $0x45c] sm:$0xf0] }
 0x1b0   :  { %v3515_v15 = vor.u32 %v4260_v8, %v3514_v60 }
 0x1b1   :  { %v2509_v7 = vpop.f32.mrf.mxu1  ;;  %v2458_v10 = vadd.f32 %v2457_v38, %v2409_v1  ;;  %2557 = vmatmul.bf16.gmra.mxu2 %v3371_v61  ;;  %2655 = vmatmul.bf16.gmra.mxu0 %v3379_v5  ;;  %v4251_v61 = vld [vmem:[%s6027_s0 + $0x41c] sm:$0xf]  ;;  %v4261_v5 = vld [vmem:[%s6027_s0 + $0x464] sm:$0xf0] }
 0x1b2   :  { %2606 = vmatmul.bf16.gmra.mxu3 %v3375_v3  ;;  %v3522_v3 = vld [vmem:[%s6027_s0 + $0x420] sm:$0xf] }
 0x1b3   :  { %v5671_v32 = vadd.f32 %v2506_v45, %v2458_v10  ;;  %v3524_v10 = vld [vmem:[%s6027_s0 + $0x468] sm:$0xf0] }
 0x1b4   :  { %2704 = vmatmul.bf16.gmra.mxu1 %v3383_v49  ;;  %v2362_v18 = vpop.f32.mrf.mxu2 }
 0x1b5   :  { %v2411_v13 = vpop.f32.mrf.mxu3  ;;  %v2363_v16 = vadd.f32 %v2362_v18, %v5359_v31  ;;  %v4233_v31 = vld [vmem:[%s6027_s0 + $0x38c] sm:$0xf]  ;;  %v3523_v18 = vor.u32 %v4261_v5, %v3522_v3  ;;  %v3098_v3 = vld [vmem:[%s6027_s0 + $0xc8] sm:$0xf]  ;;  %v4154_v5 = vld [vmem:[%s6027_s0 + $0x10c] sm:$0xf0] }
 0x1b6   :  { %v2462_v22 = vpop.f32.mrf.mxu0  ;;  %v3447_v41 = vor.u32 %v4233_v31, %v3444_v30 }
 0x1b7   :  { %v2412_v17 = vadd.f32 %v2411_v13, %v2363_v16 }
 0x1b9   :  { %v2511_v19 = vpop.f32.mrf.mxu1  ;;  %v2461_v36 = vadd.f32 %v2460_v63, %v2412_v17 }
 0x1bb   :  { %v5695_v29 = vadd.f32 %v2509_v7, %v2461_v36  ;;  %v4252_v7 = vld [vmem:[%s6027_s0 + $0x424] sm:$0xf] }
 0x1bc   :  { %v2364_v33 = vpop.f32.mrf.mxu2  ;;  %v3527_v17 = vor.u32 %v4252_v7, %v3524_v10  ;;  %v4155_v7 = vld [vmem:[%s6027_s0 + $0x114] sm:$0xf0] }
 0x1bd   :  { %v2413_v34 = vpop.f32.mrf.mxu3  ;;  %v2365_v44 = vadd.f32 %v2364_v33, %v5377_v52  ;;  %v4136_v33 = vld [vmem:[%s6027_s0 + $0x7c] sm:$0xf0] }
 0x1be   :  { %v2465_v45 = vpop.f32.mrf.mxu0 }
 0x1bf   :  { %v2414_v38 = vadd.f32 %v2413_v34, %v2365_v44  ;;  %v4127_v34 = vld [vmem:[%s6027_s0 + $0x3c] sm:$0xf] }
 0x1c1   :  { %v2514_v46 = vpop.f32.mrf.mxu1  ;;  %v2463_v50 = vadd.f32 %v2462_v22, %v2414_v38  ;;  %2562 = vmatmul.bf16.gmra.mxu2 %v3443_v37  ;;  %2660 = vmatmul.bf16.gmra.mxu0 %v3451_v42  ;;  %v4128_v42 = vld [vmem:[%s6027_s0 + $0x44] sm:$0xf]  ;;  %v3036_v38 = vld [vmem:[%s6027_s0 + $0x88] sm:$0xf0] }
 0x1c2   :  { %2611 = vmatmul.bf16.gmra.mxu3 %v3447_v41 }
 0x1c3   :  { %v5707_v55 = vadd.f32 %v2511_v19, %v2463_v50 }
 0x1c4   :  { %2709 = vmatmul.bf16.gmra.mxu1 %v3455_v4  ;;  %v2367_v52 = vpop.f32.mrf.mxu2  ;;  %v3027_v4 = vor.u32 %v4136_v33, %v3026_v28 }
 0x1c5   :  { %v2416_v62 = vpop.f32.mrf.mxu3  ;;  %v2368_v51 = vadd.f32 %v2367_v52, %v5401_v9  ;;  %v3516_v9 = vld [vmem:[%s6027_s0 + $0x460] sm:$0xf0] }
 0x1c6   :  { %v2467_v56 = vpop.f32.mrf.mxu0  ;;  %v3519_v12 = vor.u32 %v4251_v61, %v3516_v9 }
 0x1c7   :  { %v2417_v53 = vadd.f32 %v2416_v62, %v2368_v51  ;;  %v3039_v62 = vor.u32 %v4128_v42, %v3036_v38  ;;  %v4173_v42 = vld [vmem:[%s6027_s0 + $0x1a4] sm:$0xf0] }
 0x1c9   :  { %v2516_v58 = vpop.f32.mrf.mxu1  ;;  %v2466_v2 = vadd.f32 %v2465_v45, %v2417_v53 }
 0x1cb   :  { %v5728_v1 = vadd.f32 %v2514_v46, %v2466_v2 }
 0x1cc   :  { %v2369_v63 = vpop.f32.mrf.mxu2 }
 0x1cd   :  { %v2418_v49 = vpop.f32.mrf.mxu3  ;;  %v2370_v11 = vadd.f32 %v2369_v63, %v5419_v27  ;;  %v4145_v63 = vld [vmem:[%s6027_s0 + $0xcc] sm:$0xf] }
 0x1ce   :  { %v2470_v16 = vpop.f32.mrf.mxu0 }
 0x1cf   :  { %v2419_v13 = vadd.f32 %v2418_v49, %v2370_v11  ;;  %v3106_v49 = vld [vmem:[%s6027_s0 + $0xd0] sm:$0xf] }
 0x1d1   :  { %v2519_v22 = vpop.f32.mrf.mxu1  ;;  %v2468_v19 = vadd.f32 %v2467_v56, %v2419_v13  ;;  %2567 = vmatmul.bf16.gmra.mxu2 %v3515_v15  ;;  %2665 = vmatmul.bf16.gmra.mxu0 %v3523_v18  ;;  %v3108_v18 = vld [vmem:[%s6027_s0 + $0x118] sm:$0xf0] }
 0x1d2   :  { %2616 = vmatmul.bf16.gmra.mxu3 %v3519_v12  ;;  %v4146_v12 = vld [vmem:[%s6027_s0 + $0xd4] sm:$0xf] }
 0x1d3   :  { %v5737_v36 = vadd.f32 %v2516_v58, %v2468_v19 }
 0x1d4   :  { %2714 = vmatmul.bf16.gmra.mxu1 %v3527_v17  ;;  %v2372_v20 = vpop.f32.mrf.mxu2 }
 0x1d5   :  { %v2421_v24 = vpop.f32.mrf.mxu3  ;;  %v2373_v26 = vadd.f32 %v2372_v20, %v5443_v47  ;;  %v3028_v47 = vld [vmem:[%s6027_s0 + $0x80] sm:$0xf0] }
 0x1d6   :  { %v2472_v27 = vpop.f32.mrf.mxu0  ;;  %v3031_v46 = vor.u32 %v4127_v34, %v3028_v47 }
 0x1d7   :  { %v2422_v31 = vadd.f32 %v2421_v24, %v2373_v26  ;;  %v3111_v24 = vor.u32 %v4146_v12, %v3108_v18  ;;  %v4191_v12 = vld [vmem:[%s6027_s0 + $0x234] sm:$0xf0] }
 0x1d9   :  { %v2521_v30 = vpop.f32.mrf.mxu1  ;;  %v2471_v23 = vadd.f32 %v2470_v16, %v2422_v31  ;;  %v3099_v16 = vor.u32 %v4154_v5, %v3098_v3 }
 0x1db   :  { %v5758_v44 = vadd.f32 %v2519_v22, %v2471_v23  ;;  %v3107_v22 = vor.u32 %v4155_v7, %v3106_v49  ;;  %v3242_v49 = vld [vmem:[%s6027_s0 + $0x1e8] sm:$0xf]  ;;  %v4190_v7 = vld [vmem:[%s6027_s0 + $0x22c] sm:$0xf0] }
 0x1dc   :  { %v2374_v37 = vpop.f32.mrf.mxu2 }
 0x1dd   :  { %v2423_v41 = vpop.f32.mrf.mxu3  ;;  %v2375_v45 = vadd.f32 %v2374_v37, %v5461_v6  ;;  %v4163_v37 = vld [vmem:[%s6027_s0 + $0x15c] sm:$0xf] }
 0x1de   :  { %v2631_v52 = vpop.f32.mrf.mxu0 }
 0x1df   :  { %v2424_v50 = vadd.f32 %v2423_v41, %v2375_v45  ;;  %v3178_v41 = vld [vmem:[%s6027_s0 + $0x160] sm:$0xf] }
 0x1e1   :  { %v2680_v51 = vpop.f32.mrf.mxu1  ;;  %v2473_v53 = vadd.f32 %v2472_v27, %v2424_v50  ;;  %2728 = vmatmul.bf16.vlgmr.msra.gmra.mxu2 %v3027_v4  ;;  %2826 = vmatmul.bf16.vlgmr.msra.gmra.mxu0 %v3035_v48  ;;  %v3180_v48 = vld [vmem:[%s6027_s0 + $0x1a8] sm:$0xf0] }
 0x1e2   :  { %2777 = vmatmul.bf16.vlgmr.msra.gmra.mxu3 %v3031_v46  ;;  %v4164_v46 = vld [vmem:[%s6027_s0 + $0x164] sm:$0xf] }
 0x1e3   :  { %v5767_v56 = vadd.f32 %v2521_v30, %v2473_v53 }
 0x1e4   :  { %2875 = vmatmul.bf16.vlgmr.msra.gmra.mxu1 %v3039_v62  ;;  %v2533_v58 = vpop.f32.mrf.mxu2 }
 0x1e5   :  { %v2582_v2 = vpop.f32.mrf.mxu3  ;;  %v2534_v60 = vadd.f32 %v2533_v58, %v5485_v21  ;;  %v3100_v21 = vld [vmem:[%s6027_s0 + $0x110] sm:$0xf0] }
 0x1e6   :  { %v2633_v6 = vpop.f32.mrf.mxu0  ;;  %v3103_v17 = vor.u32 %v4145_v63, %v3100_v21 }
 0x1e7   :  { %v2583_v8 = vadd.f32 %v2582_v2, %v2534_v60  ;;  %v3183_v2 = vor.u32 %v4164_v46, %v3180_v48  ;;  %v4209_v46 = vld [vmem:[%s6027_s0 + $0x2c4] sm:$0xf0] }
 0x1e9   :  { %v2682_v61 = vpop.f32.mrf.mxu1  ;;  %v2632_v9 = vadd.f32 %v2631_v52, %v2583_v8  ;;  %v3171_v52 = vor.u32 %v4172_v35, %v3170_v40 }
 0x1eb   :  { %v5788_v10 = vadd.f32 %v2680_v51, %v2632_v9  ;;  %v3179_v51 = vor.u32 %v4173_v42, %v3178_v41  ;;  %v3314_v41 = vld [vmem:[%s6027_s0 + $0x278] sm:$0xf]  ;;  %v4208_v42 = vld [vmem:[%s6027_s0 + $0x2bc] sm:$0xf0] }
 0x1ec   :  { %v2535_v11 = vpop.f32.mrf.mxu2 }
 0x1ed   :  { %v2584_v15 = vpop.f32.mrf.mxu3  ;;  %v2536_v13 = vadd.f32 %v2535_v11, %v5503_v43  ;;  %v4181_v11 = vld [vmem:[%s6027_s0 + $0x1ec] sm:$0xf] }
 0x1ee   :  { %v2636_v20 = vpop.f32.mrf.mxu0 }
 0x1ef   :  { %v2585_v19 = vadd.f32 %v2584_v15, %v2536_v13  ;;  %v3250_v15 = vld [vmem:[%s6027_s0 + $0x1f0] sm:$0xf] }
 0x1f1   :  { %v2685_v26 = vpop.f32.mrf.mxu1  ;;  %v2634_v31 = vadd.f32 %v2633_v6, %v2585_v19  ;;  %2733 = vmatmul.bf16.gmra.mxu2 %v3099_v16  ;;  %2831 = vmatmul.bf16.gmra.mxu0 %v3107_v22  ;;  %v3252_v22 = vld [vmem:[%s6027_s0 + $0x238] sm:$0xf0] }
 0x1f2   :  { %2782 = vmatmul.bf16.gmra.mxu3 %v3103_v17  ;;  %v4182_v17 = vld [vmem:[%s6027_s0 + $0x1f4] sm:$0xf] }
 0x1f3   :  { %v5797_v27 = vadd.f32 %v2682_v61, %v2634_v31 }
 0x1f4   :  { %2880 = vmatmul.bf16.gmra.mxu1 %v3111_v24  ;;  %v2538_v30 = vpop.f32.mrf.mxu2 }
 0x1f5   :  { %v2587_v23 = vpop.f32.mrf.mxu3  ;;  %v2539_v28 = vadd.f32 %v2538_v30, %v5527_v0  ;;  %v3172_v0 = vld [vmem:[%s6027_s0 + $0x1a0] sm:$0xf0] }
 0x1f6   :  { %v2638_v43 = vpop.f32.mrf.mxu0  ;;  %v3175_v62 = vor.u32 %v4163_v37, %v3172_v0 }
 0x1f7   :  { %v2588_v33 = vadd.f32 %v2587_v23, %v2539_v28  ;;  %v3255_v23 = vor.u32 %v4182_v17, %v3252_v22  ;;  %v4227_v17 = vld [vmem:[%s6027_s0 + $0x354] sm:$0xf0] }
 0x1f9   :  { %v2687_v34 = vpop.f32.mrf.mxu1  ;;  %v2637_v47 = vadd.f32 %v2636_v20, %v2588_v33  ;;  %v3243_v20 = vor.u32 %v4190_v7, %v3242_v49 }
 0x1fb   :  { %v5818_v38 = vadd.f32 %v2685_v26, %v2637_v47  ;;  %v3251_v26 = vor.u32 %v4191_v12, %v3250_v15  ;;  %v3386_v15 = vld [vmem:[%s6027_s0 + $0x308] sm:$0xf]  ;;  %v4226_v12 = vld [vmem:[%s6027_s0 + $0x34c] sm:$0xf0] }
 0x1fc   :  { %v2540_v45 = vpop.f32.mrf.mxu2 }
 0x1fd   :  { %v2589_v4 = vpop.f32.mrf.mxu3  ;;  %v2541_v50 = vadd.f32 %v2540_v45, %v5545_v57  ;;  %v4199_v45 = vld [vmem:[%s6027_s0 + $0x27c] sm:$0xf] }
 0x1fe   :  { %v2641_v58 = vpop.f32.mrf.mxu0 }
 0x1ff   :  { %v2590_v53 = vadd.f32 %v2589_v4, %v2541_v50  ;;  %v3322_v4 = vld [vmem:[%s6027_s0 + $0x280] sm:$0xf] }
 0x201   :  { %v2690_v60 = vpop.f32.mrf.mxu1  ;;  %v2639_v8 = vadd.f32 %v2638_v43, %v2590_v53  ;;  %2738 = vmatmul.bf16.gmra.mxu2 %v3171_v52  ;;  %2836 = vmatmul.bf16.gmra.mxu0 %v3179_v51  ;;  %v3324_v51 = vld [vmem:[%s6027_s0 + $0x2c8] sm:$0xf0] }
 0x202   :  { %2787 = vmatmul.bf16.gmra.mxu3 %v3175_v62  ;;  %v4200_v62 = vld [vmem:[%s6027_s0 + $0x284] sm:$0xf] }
 0x203   :  { %v5827_v6 = vadd.f32 %v2687_v34, %v2639_v8 }
 0x204   :  { %2885 = vmatmul.bf16.gmra.mxu1 %v3183_v2  ;;  %v2543_v61 = vpop.f32.mrf.mxu2 }
 0x205   :  { %v2592_v9 = vpop.f32.mrf.mxu3  ;;  %v2544_v3 = vadd.f32 %v2543_v61, %v5569_v39  ;;  %v3244_v39 = vld [vmem:[%s6027_s0 + $0x230] sm:$0xf0] }
 0x206   :  { %v2643_v57 = vpop.f32.mrf.mxu0  ;;  %v3247_v24 = vor.u32 %v4181_v11, %v3244_v39 }
 0x207   :  { %v2593_v5 = vadd.f32 %v2592_v9, %v2544_v3  ;;  %v3327_v9 = vor.u32 %v4200_v62, %v3324_v51  ;;  %v4245_v62 = vld [vmem:[%s6027_s0 + $0x3e4] sm:$0xf0] }
 0x209   :  { %v2692_v63 = vpop.f32.mrf.mxu1  ;;  %v2642_v21 = vadd.f32 %v2641_v58, %v2593_v5  ;;  %v3315_v58 = vor.u32 %v4208_v42, %v3314_v41 }
 0x20b   :  { %v5848_v18 = vadd.f32 %v2690_v60, %v2642_v21  ;;  %v3323_v60 = vor.u32 %v4209_v46, %v3322_v4  ;;  %v3458_v4 = vld [vmem:[%s6027_s0 + $0x398] sm:$0xf]  ;;  %v4244_v46 = vld [vmem:[%s6027_s0 + $0x3dc] sm:$0xf0] }
 0x20c   :  { %v2545_v13 = vpop.f32.mrf.mxu2 }
 0x20d   :  { %v2594_v16 = vpop.f32.mrf.mxu3  ;;  %v2546_v19 = vadd.f32 %v2545_v13, %v5587_v25  ;;  %v4217_v13 = vld [vmem:[%s6027_s0 + $0x30c] sm:$0xf] }
 0x20e   :  { %v2646_v30 = vpop.f32.mrf.mxu0 }
 0x20f   :  { %v2595_v31 = vadd.f32 %v2594_v16, %v2546_v19  ;;  %v3394_v16 = vld [vmem:[%s6027_s0 + $0x310] sm:$0xf] }
 0x211   :  { %v2695_v28 = vpop.f32.mrf.mxu1  ;;  %v2644_v33 = vadd.f32 %v2643_v57, %v2595_v31  ;;  %2743 = vmatmul.bf16.gmra.mxu2 %v3243_v20  ;;  %2841 = vmatmul.bf16.gmra.mxu0 %v3251_v26  ;;  %v3396_v26 = vld [vmem:[%s6027_s0 + $0x358] sm:$0xf0] }
 0x212   :  { %2792 = vmatmul.bf16.gmra.mxu3 %v3247_v24  ;;  %v4218_v24 = vld [vmem:[%s6027_s0 + $0x314] sm:$0xf] }
 0x213   :  { %v5857_v43 = vadd.f32 %v2692_v63, %v2644_v33 }
 0x214   :  { %2890 = vmatmul.bf16.gmra.mxu1 %v3255_v23  ;;  %v2548_v34 = vpop.f32.mrf.mxu2 }
 0x215   :  { %v2597_v47 = vpop.f32.mrf.mxu3  ;;  %v2549_v40 = vadd.f32 %v2548_v34, %v5611_v14  ;;  %v3316_v14 = vld [vmem:[%s6027_s0 + $0x2c0] sm:$0xf0] }
 0x216   :  { %v2648_v25 = vpop.f32.mrf.mxu0  ;;  %v3319_v2 = vor.u32 %v4199_v45, %v3316_v14 }
 0x217   :  { %v2598_v35 = vadd.f32 %v2597_v47, %v2549_v40  ;;  %v3399_v47 = vor.u32 %v4218_v24, %v3396_v26  ;;  %v4263_v24 = vld [vmem:[%s6027_s0 + $0x474] sm:$0xf0] }
 0x219   :  { %v2697_v37 = vpop.f32.mrf.mxu1  ;;  %v2647_v0 = vadd.f32 %v2646_v30, %v2598_v35  ;;  %v3387_v30 = vor.u32 %v4226_v12, %v3386_v15 }
 0x21b   :  { %v5878_v48 = vadd.f32 %v2695_v28, %v2647_v0  ;;  %v3395_v28 = vor.u32 %v4227_v17, %v3394_v16  ;;  %v3530_v16 = vld [vmem:[%s6027_s0 + $0x428] sm:$0xf]  ;;  %v4262_v17 = vld [vmem:[%s6027_s0 + $0x46c] sm:$0xf0] }
 0x21c   :  { %v2550_v50 = vpop.f32.mrf.mxu2 }
 0x21d   :  { %v2599_v52 = vpop.f32.mrf.mxu3  ;;  %v2551_v53 = vadd.f32 %v2550_v50, %v5629_v59  ;;  %v4235_v50 = vld [vmem:[%s6027_s0 + $0x39c] sm:$0xf] }
 0x21e   :  { %v2651_v61 = vpop.f32.mrf.mxu0 }
 0x21f   :  { %v2600_v8 = vadd.f32 %v2599_v52, %v2551_v53  ;;  %v3466_v52 = vld [vmem:[%s6027_s0 + $0x3a0] sm:$0xf] }
 0x221   :  { %v2700_v3 = vpop.f32.mrf.mxu1  ;;  %v2649_v5 = vadd.f32 %v2648_v25, %v2600_v8  ;;  %2748 = vmatmul.bf16.gmra.mxu2 %v3315_v58  ;;  %2846 = vmatmul.bf16.gmra.mxu0 %v3323_v60  ;;  %v3468_v60 = vld [vmem:[%s6027_s0 + $0x3e8] sm:$0xf0] }
 0x222   :  { %2797 = vmatmul.bf16.gmra.mxu3 %v3319_v2  ;;  %v4236_v2 = vld [vmem:[%s6027_s0 + $0x3a4] sm:$0xf] }
 0x223   :  { %v5887_v57 = vadd.f32 %v2697_v37, %v2649_v5 }
 0x224   :  { %2895 = vmatmul.bf16.gmra.mxu1 %v3327_v9  ;;  %v2553_v63 = vpop.f32.mrf.mxu2 }
 0x225   :  { %v2602_v21 = vpop.f32.mrf.mxu3  ;;  %v2554_v49 = vadd.f32 %v2553_v63, %v5653_v54  ;;  %v3388_v54 = vld [vmem:[%s6027_s0 + $0x350] sm:$0xf0] }
 0x226   :  { %v2653_v59 = vpop.f32.mrf.mxu0  ;;  %v3391_v23 = vor.u32 %v4217_v13, %v3388_v54 }
 0x227   :  { %v2603_v7 = vadd.f32 %v2602_v21, %v2554_v49  ;;  %v3471_v21 = vor.u32 %v4236_v2, %v3468_v60 }
 0x229   :  { %v2702_v11 = vpop.f32.mrf.mxu1  ;;  %v2652_v39 = vadd.f32 %v2651_v61, %v2603_v7  ;;  %v3459_v61 = vor.u32 %v4244_v46, %v3458_v4 }
 0x22b   :  { %v5908_v22 = vadd.f32 %v2700_v3, %v2652_v39  ;;  %v3467_v3 = vor.u32 %v4245_v62, %v3466_v52 }
 0x22c   :  { %v2555_v19 = vpop.f32.mrf.mxu2 }
 0x22d   :  { %v2604_v20 = vpop.f32.mrf.mxu3  ;;  %v2556_v31 = vadd.f32 %v2555_v19, %v5671_v32  ;;  %v4253_v19 = vld [vmem:[%s6027_s0 + $0x42c] sm:$0xf] }
 0x22e   :  { %v2656_v34 = vpop.f32.mrf.mxu0 }
 0x22f   :  { %v2605_v33 = vadd.f32 %v2604_v20, %v2556_v31  ;;  %v3538_v20 = vld [vmem:[%s6027_s0 + $0x430] sm:$0xf] }
 0x231   :  { %v2705_v40 = vpop.f32.mrf.mxu1  ;;  %v2654_v35 = vadd.f32 %v2653_v59, %v2605_v33  ;;  %2753 = vmatmul.bf16.gmra.mxu2 %v3387_v30  ;;  %2851 = vmatmul.bf16.gmra.mxu0 %v3395_v28  ;;  %v3540_v28 = vld [vmem:[%s6027_s0 + $0x478] sm:$0xf0] }
 0x232   :  { %2802 = vmatmul.bf16.gmra.mxu3 %v3391_v23  ;;  %v4254_v23 = vld [vmem:[%s6027_s0 + $0x434] sm:$0xf] }
 0x233   :  { %v5917_v25 = vadd.f32 %v2702_v11, %v2654_v35 }
 0x234   :  { %2900 = vmatmul.bf16.gmra.mxu1 %v3399_v47  ;;  %v2558_v37 = vpop.f32.mrf.mxu2 }
 0x235   :  { %v2607_v0 = vpop.f32.mrf.mxu3  ;;  %v2559_v41 = vadd.f32 %v2558_v37, %v5695_v29  ;;  %v3460_v29 = vld [vmem:[%s6027_s0 + $0x3e0] sm:$0xf0] }
 0x236   :  { %v2658_v32 = vpop.f32.mrf.mxu0  ;;  %v3463_v9 = vor.u32 %v4235_v50, %v3460_v29 }
 0x237   :  { %v2608_v42 = vadd.f32 %v2607_v0, %v2559_v41  ;;  %v3543_v0 = vor.u32 %v4254_v23, %v3540_v28 }
 0x239   :  { %v2707_v45 = vpop.f32.mrf.mxu1  ;;  %v2657_v14 = vadd.f32 %v2656_v34, %v2608_v42  ;;  %v3531_v34 = vor.u32 %v4262_v17, %v3530_v16 }
 0x23b   :  { %v5938_v51 = vadd.f32 %v2705_v40, %v2657_v14  ;;  %v3539_v40 = vor.u32 %v4263_v24, %v3538_v20 }
 0x23c   :  { %v2560_v53 = vpop.f32.mrf.mxu2 }
 0x23d   :  { %v2609_v58 = vpop.f32.mrf.mxu3  ;;  %v2561_v8 = vadd.f32 %v2560_v53, %v5707_v55 }
 0x23e   :  { %v2661_v63 = vpop.f32.mrf.mxu0 }
 0x23f   :  { %v2610_v5 = vadd.f32 %v2609_v58, %v2561_v8 }
 0x241   :  { %v2710_v49 = vpop.f32.mrf.mxu1  ;;  %v2659_v7 = vadd.f32 %v2658_v32, %v2610_v5  ;;  %2758 = vmatmul.bf16.gmra.mxu2 %v3459_v61  ;;  %2856 = vmatmul.bf16.gmra.mxu0 %v3467_v3 }
 0x242   :  { %2807 = vmatmul.bf16.gmra.mxu3 %v3463_v9 }
 0x243   :  { %v5947_v59 = vadd.f32 %v2707_v45, %v2659_v7 }
 0x244   :  { %2905 = vmatmul.bf16.gmra.mxu1 %v3471_v21  ;;  %v2563_v11 = vpop.f32.mrf.mxu2 }
 0x245   :  { %v2612_v39 = vpop.f32.mrf.mxu3  ;;  %v2564_v15 = vadd.f32 %v2563_v11, %v5728_v1  ;;  %v3532_v1 = vld [vmem:[%s6027_s0 + $0x470] sm:$0xf0] }
 0x246   :  { %v2663_v55 = vpop.f32.mrf.mxu0  ;;  %v3535_v47 = vor.u32 %v4253_v19, %v3532_v1 }
 0x247   :  { %v2613_v12 = vadd.f32 %v2612_v39, %v2564_v15 }
 0x249   :  { %v2712_v13 = vpop.f32.mrf.mxu1  ;;  %v2662_v54 = vadd.f32 %v2661_v63, %v2613_v12 }
 0x24b   :  { %v5968_v26 = vadd.f32 %v2710_v49, %v2662_v54 }
 0x24c   :  { %v2565_v31 = vpop.f32.mrf.mxu2 }
 0x24d   :  { %v2614_v30 = vpop.f32.mrf.mxu3  ;;  %v2566_v33 = vadd.f32 %v2565_v31, %v5737_v36 }
 0x24e   :  { %v2666_v37 = vpop.f32.mrf.mxu0 }
 0x24f   :  { %v2615_v35 = vadd.f32 %v2614_v30, %v2566_v33 }
 0x251   :  { %v2715_v41 = vpop.f32.mrf.mxu1  ;;  %v2664_v42 = vadd.f32 %v2663_v55, %v2615_v35  ;;  %2763 = vmatmul.bf16.gmra.mxu2 %v3531_v34  ;;  %2861 = vmatmul.bf16.gmra.mxu0 %v3539_v40 }
 0x252   :  { %2812 = vmatmul.bf16.gmra.mxu3 %v3535_v47 }
 0x253   :  { %v5977_v32 = vadd.f32 %v2712_v13, %v2664_v42 }
 0x254   :  { %2910 = vmatmul.bf16.gmra.mxu1 %v3543_v0  ;;  %v2568_v45 = vpop.f32.mrf.mxu2 }
 0x255   :  { %v2617_v14 = vpop.f32.mrf.mxu3  ;;  %v2569_v4 = vadd.f32 %v2568_v45, %v5758_v44 }
 0x256   :  { %v2668_v36 = vpop.f32.mrf.mxu0 }
 0x257   :  { %v2618_v46 = vadd.f32 %v2617_v14, %v2569_v4 }
 0x259   :  { %v2717_v50 = vpop.f32.mrf.mxu1  ;;  %v2667_v29 = vadd.f32 %v2666_v37, %v2618_v46 }
 0x25b   :  { %v5980_v52 = vadd.f32 %v2715_v41, %v2667_v29 }
 0x25c   :  { %v2570_v62 = vpop.f32.mrf.mxu2 }
 0x25d   :  { %v2619_v53 = vpop.f32.mrf.mxu3  ;;  %v2571_v58 = vadd.f32 %v2570_v62, %v5767_v56 }
 0x25e   :  { %v2827_v60 = vpop.f32.mrf.mxu0 }
 0x25f   :  { %v2620_v2 = vadd.f32 %v2619_v53, %v2571_v58 }
 0x261   :  { %v2876_v8 = vpop.f32.mrf.mxu1  ;;  %v2669_v61 = vadd.f32 %v2668_v36, %v2620_v2 }
 0x263   :  { %v5983_v9 = vadd.f32 %v2717_v50, %v2669_v61 }
 0x264   :  { %v2729_v3 = vpop.f32.mrf.mxu2 }
 0x265   :  { %v2778_v5 = vpop.f32.mrf.mxu3  ;;  %v2730_v44 = vadd.f32 %v2729_v3, %v5788_v10 }
 0x266   :  { %v2829_v63 = vpop.f32.mrf.mxu0 }
 0x267   :  { %v2779_v49 = vadd.f32 %v2778_v5, %v2730_v44 }
 0x269   :  { %v2878_v21 = vpop.f32.mrf.mxu1  ;;  %v2828_v39 = vadd.f32 %v2827_v60, %v2779_v49 }
 0x26b   :  { %v2877_v13 = vadd.f32 %v2876_v8, %v2828_v39 }
 0x26c   :  { %v2731_v7 = vpop.f32.mrf.mxu2 }
 0x26d   :  { %v2780_v11 = vpop.f32.mrf.mxu3  ;;  %v2732_v15 = vadd.f32 %v2731_v7, %v5797_v27  ;;  %v2916_v1 = vmax.f32 %v2877_v13, 0.0 }
 0x26e   :  { %v2832_v56 = vpop.f32.mrf.mxu0 }
 0x26f   :  { %v2781_v12 = vadd.f32 %v2780_v11, %v2732_v15 }
 0x271   :  { %v2881_v55 = vpop.f32.mrf.mxu1  ;;  %v2830_v54 = vadd.f32 %v2829_v63, %v2781_v12 }
 0x273   :  { %v2879_v16 = vadd.f32 %v2878_v21, %v2830_v54 }
 0x274   :  { %v2734_v17 = vpop.f32.mrf.mxu2 }
 0x275   :  { %v2783_v19 = vpop.f32.mrf.mxu3  ;;  %v2917_v20 = vmax.f32 %v2879_v16, 0.0  ;;  %v2735_v10 = vadd.f32 %v2734_v17, %v5818_v38 }
 0x276   :  { %v2834_v31 = vpop.f32.mrf.mxu0 }
 0x277   :  { %v4411_v24 = vpack.c.bf16 %v2917_v20, %v2916_v1  ;;  %v2784_v27 = vadd.f32 %v2783_v19, %v2735_v10 }
 0x279   :  { %v2883_v30 = vpop.f32.mrf.mxu1  ;;  %4412 = vst [vmem:[%s6028_s3] sm:$0xff] %v4411_v24   ;;  %v2833_v33 = vadd.f32 %v2832_v56, %v2784_v27 }
 0x27b   :  { %v2882_v37 = vadd.f32 %v2881_v55, %v2833_v33 }
 0x27c   :  { %v2736_v23 = vpop.f32.mrf.mxu2 }
 0x27d   :  { %v2785_v28 = vpop.f32.mrf.mxu3  ;;  %v2737_v34 = vadd.f32 %v2736_v23, %v5827_v6  ;;  %v2918_v45 = vmax.f32 %v2882_v37, 0.0 }
 0x27e   :  { %v2837_v40 = vpop.f32.mrf.mxu0 }
 0x27f   :  { %v2786_v47 = vadd.f32 %v2785_v28, %v2737_v34 }
 0x281   :  { %v2886_v35 = vpop.f32.mrf.mxu1  ;;  %v2835_v0 = vadd.f32 %v2834_v31, %v2786_v47 }
 0x283   :  { %v2884_v41 = vadd.f32 %v2883_v30, %v2835_v0 }
 0x284   :  { %v2739_v38 = vpop.f32.mrf.mxu2 }
 0x285   :  { %v2788_v42 = vpop.f32.mrf.mxu3  ;;  %v2919_v14 = vmax.f32 %v2884_v41, 0.0  ;;  %v2740_v4 = vadd.f32 %v2739_v38, %v5848_v18 }
 0x286   :  { %v2839_v36 = vpop.f32.mrf.mxu0 }
 0x287   :  { %v4416_v46 = vpack.c.bf16 %v2919_v14, %v2918_v45  ;;  %v2789_v6 = vadd.f32 %v2788_v42, %v2740_v4 }
 0x289   :  { %v2888_v50 = vpop.f32.mrf.mxu1  ;;  %4448 = vst [vmem:[%s6028_s3 + $0x8] sm:$0xff] %v4416_v46   ;;  %v2838_v53 = vadd.f32 %v2837_v40, %v2789_v6 }
 0x28b   :  { %v2887_v61 = vadd.f32 %v2886_v35, %v2838_v53 }
 0x28c   :  { %v2741_v29 = vpop.f32.mrf.mxu2 }
 0x28d   :  { %v2790_v62 = vpop.f32.mrf.mxu3  ;;  %v2742_v58 = vadd.f32 %v2741_v29, %v5857_v43  ;;  %v2920_v63 = vmax.f32 %v2887_v61, 0.0 }
 0x28e   :  { %v2842_v60 = vpop.f32.mrf.mxu0 }
 0x28f   :  { %v2791_v2 = vadd.f32 %v2790_v62, %v2742_v58 }
 0x291   :  { %v2891_v8 = vpop.f32.mrf.mxu1  ;;  %v2840_v3 = vadd.f32 %v2839_v36, %v2791_v2 }
 0x293   :  { %v2889_v5 = vadd.f32 %v2888_v50, %v2840_v3 }
 0x294   :  { %v2744_v18 = vpop.f32.mrf.mxu2 }
 0x295   :  { %v2793_v44 = vpop.f32.mrf.mxu3  ;;  %v2921_v21 = vmax.f32 %v2889_v5, 0.0  ;;  %v2745_v49 = vadd.f32 %v2744_v18, %v5878_v48 }
 0x296   :  { %v2844_v11 = vpop.f32.mrf.mxu0 }
 0x297   :  { %v4421_v7 = vpack.c.bf16 %v2921_v21, %v2920_v63  ;;  %v2794_v43 = vadd.f32 %v2793_v44, %v2745_v49 }
 0x299   :  { %v2893_v39 = vpop.f32.mrf.mxu1  ;;  %4449 = vst [vmem:[%s6028_s3 + $0x10] sm:$0xff] %v4421_v7   ;;  %v2843_v56 = vadd.f32 %v2842_v60, %v2794_v43 }
 0x29b   :  { %v2892_v17 = vadd.f32 %v2891_v8, %v2843_v56 }
 0x29c   :  { %v2746_v15 = vpop.f32.mrf.mxu2 }
 0x29d   :  { %v2795_v12 = vpop.f32.mrf.mxu3  ;;  %v2747_v55 = vadd.f32 %v2746_v15, %v5887_v57  ;;  %v2922_v10 = vmax.f32 %v2892_v17, 0.0 }
 0x29e   :  { %v2847_v54 = vpop.f32.mrf.mxu0 }
 0x29f   :  { %v2796_v13 = vadd.f32 %v2795_v12, %v2747_v55 }
 0x2a1   :  { %v2896_v16 = vpop.f32.mrf.mxu1  ;;  %v2845_v19 = vadd.f32 %v2844_v11, %v2796_v13 }
 0x2a3   :  { %v2894_v1 = vadd.f32 %v2893_v39, %v2845_v19 }
 0x2a4   :  { %v2749_v48 = vpop.f32.mrf.mxu2 }
 0x2a5   :  { %v2798_v20 = vpop.f32.mrf.mxu3  ;;  %v2923_v24 = vmax.f32 %v2894_v1, 0.0  ;;  %v2750_v31 = vadd.f32 %v2749_v48, %v5908_v22 }
 0x2a6   :  { %v2849_v27 = vpop.f32.mrf.mxu0 }
 0x2a7   :  { %v4426_v30 = vpack.c.bf16 %v2923_v24, %v2922_v10  ;;  %v2799_v57 = vadd.f32 %v2798_v20, %v2750_v31 }
 0x2a9   :  { %v2898_v23 = vpop.f32.mrf.mxu1  ;;  %4450 = vst [vmem:[%s6028_s3 + $0x18] sm:$0xff] %v4426_v30   ;;  %v2848_v34 = vadd.f32 %v2847_v54, %v2799_v57 }
 0x2ab   :  { %v2897_v0 = vadd.f32 %v2896_v16, %v2848_v34 }
 0x2ac   :  { %v2751_v28 = vpop.f32.mrf.mxu2 }
 0x2ad   :  { %v2800_v33 = vpop.f32.mrf.mxu3  ;;  %v2752_v47 = vadd.f32 %v2751_v28, %v5917_v25  ;;  %v2924_v45 = vmax.f32 %v2897_v0, 0.0 }
 0x2ae   :  { %v2852_v35 = vpop.f32.mrf.mxu0 }
 0x2af   :  { %v2801_v40 = vadd.f32 %v2800_v33, %v2752_v47 }
 0x2b1   :  { %v2901_v37 = vpop.f32.mrf.mxu1  ;;  %v2850_v41 = vadd.f32 %v2849_v27, %v2801_v40 }
 0x2b3   :  { %v2899_v38 = vadd.f32 %v2898_v23, %v2850_v41 }
 0x2b4   :  { %v2754_v22 = vpop.f32.mrf.mxu2 }
 0x2b5   :  { %v2803_v42 = vpop.f32.mrf.mxu3  ;;  %v2925_v14 = vmax.f32 %v2899_v38, 0.0  ;;  %v2755_v4 = vadd.f32 %v2754_v22, %v5938_v51 }
 0x2b6   :  { %v2854_v36 = vpop.f32.mrf.mxu0 }
 0x2b7   :  { %v4431_v46 = vpack.c.bf16 %v2925_v14, %v2924_v45  ;;  %v2804_v50 = vadd.f32 %v2803_v42, %v2755_v4 }
 0x2b9   :  { %4451 = vst [vmem:[%s6028_s3 + $0x20] sm:$0xff] %v4431_v46   ;;  %v2903_v25 = vpop.f32.mrf.mxu1  ;;  %v2853_v62 = vadd.f32 %v2852_v35, %v2804_v50 }
 0x2bb   :  { %v2902_v2 = vadd.f32 %v2901_v37, %v2853_v62 }
 0x2bc   :  { %v2756_v6 = vpop.f32.mrf.mxu2 }
 0x2bd   :  { %v2805_v29 = vpop.f32.mrf.mxu3  ;;  %v2757_v53 = vadd.f32 %v2756_v6, %v5947_v59  ;;  %v2926_v18 = vmax.f32 %v2902_v2, 0.0 }
 0x2be   :  { %v2857_v8 = vpop.f32.mrf.mxu0 }
 0x2bf   :  { %v2806_v58 = vadd.f32 %v2805_v29, %v2757_v53 }
 0x2c1   :  { %v2855_v60 = vadd.f32 %v2854_v36, %v2806_v58  ;;  %v2906_v3 = vpop.f32.mrf.mxu1 }
 0x2c3   :  { %v2904_v61 = vadd.f32 %v2903_v25, %v2855_v60 }
 0x2c4   :  { %v2759_v51 = vpop.f32.mrf.mxu2 }
 0x2c5   :  { %v2808_v5 = vpop.f32.mrf.mxu3  ;;  %v2927_v44 = vmax.f32 %v2904_v61, 0.0  ;;  %v2760_v63 = vadd.f32 %v2759_v51, %v5968_v26 }
 0x2c6   :  { %v2859_v7 = vpop.f32.mrf.mxu0 }
 0x2c7   :  { %v4436_v21 = vpack.c.bf16 %v2927_v44, %v2926_v18  ;;  %v2809_v49 = vadd.f32 %v2808_v5, %v2760_v63 }
 0x2c9   :  { %4452 = vst [vmem:[%s6028_s3 + $0x28] sm:$0xff] %v4436_v21   ;;  %v2858_v39 = vadd.f32 %v2857_v8, %v2809_v49  ;;  %v2908_v15 = vpop.f32.mrf.mxu1 }
 0x2cb   :  { %v2907_v56 = vadd.f32 %v2906_v3, %v2858_v39 }
 0x2cc   :  { %v2761_v59 = vpop.f32.mrf.mxu2 }
 0x2cd   :  { %v2810_v11 = vpop.f32.mrf.mxu3  ;;  %v2762_v43 = vadd.f32 %v2761_v59, %v5977_v32  ;;  %v2928_v26 = vmax.f32 %v2907_v56, 0.0 }
 0x2ce   :  { %v2862_v1 = vpop.f32.mrf.mxu0 }
 0x2cf   :  { %v2811_v12 = vadd.f32 %v2810_v11, %v2762_v43 }
 0x2d1   :  { %v2860_v55 = vadd.f32 %v2859_v7, %v2811_v12  ;;  %v2911_v20 = vpop.f32.mrf.mxu1 }
 0x2d3   :  { %v2909_v13 = vadd.f32 %v2908_v15, %v2860_v55 }
 0x2d4   :  { %v2764_v54 = vpop.f32.mrf.mxu2 }
 0x2d5   :  { %v2813_v16 = vpop.f32.mrf.mxu3  ;;  %v2929_v17 = vmax.f32 %v2909_v13, 0.0  ;;  %v2765_v19 = vadd.f32 %v2764_v54, %v5980_v52 }
 0x2d6   :  { %v2864_v23 = vpop.f32.mrf.mxu0 }
 0x2d7   :  { %v4441_v48 = vpack.c.bf16 %v2929_v17, %v2928_v26  ;;  %v2814_v10 = vadd.f32 %v2813_v16, %v2765_v19 }
 0x2d9   :  { %4453 = vst [vmem:[%s6028_s3 + $0x30] sm:$0xff] %v4441_v48   ;;  %v2863_v24 = vadd.f32 %v2862_v1, %v2814_v10  ;;  %v2913_v33 = vpop.f32.mrf.mxu1 }
 0x2db   :  { %v2912_v57 = vadd.f32 %v2911_v20, %v2863_v24 }
 0x2dc   :  { %v2766_v32 = vpop.f32.mrf.mxu2 }
 0x2dd   :  { %v2767_v31 = vadd.f32 %v2766_v32, %v5983_v9  ;;  %v2815_v30 = vpop.f32.mrf.mxu3  ;;  %v2930_v52 = vmax.f32 %v2912_v57, 0.0 }
 0x2df   :  { %v2816_v27 = vadd.f32 %v2815_v30, %v2767_v31 }
 0x2e1   :  { %v2865_v28 = vadd.f32 %v2864_v23, %v2816_v27 }
 0x2e3   :  { %v2914_v34 = vadd.f32 %v2913_v33, %v2865_v28 }
 0x2e5   :  { %v2931_v47 = vmax.f32 %v2914_v34, 0.0 }
 0x2e7   :  { %v4446_v40 = vpack.c.bf16 %v2931_v47, %v2930_v52 }
 0x2e9   :  { %4454 = vst [vmem:[%s6028_s3 + $0x38] sm:$0xff] %v4446_v40  }

// kernel: neighbor_model_forward.5
= control target key start
LH: loop header
LB: loop body
LE: loop exit
PB: predicated region body
PF: predicated region fallthrough
CT: control target
= control target key end

     0   :  { %s8644_s24 = smov 0   ;;  %s8646_s25 = smov 0   ;;  %s11960_s0 = inlined_call_operand.vmem [shape: bf16[16,16,3200], index: 0, kind: input, shape index: {}]   ;;  %s11961_s1 = inlined_call_operand.vmem [shape: bf16[3200,256], index: 1, kind: input, shape index: {}]   ;;  %s11962_s2 = inlined_call_operand.vmem [shape: f32[1,256], index: 2, kind: input, shape index: {}]   ;;  %s11963_s3 = inlined_call_operand.vmem [shape: bf16[4096,1024], index: 3, kind: input, shape index: {}]   ;;  %s11964_s4 = inlined_call_operand.vmem [shape: f32[1,1024], index: 4, kind: input, shape index: {}]   ;;  %s11965_s5 = inlined_call_operand.vmem [shape: bf16[1024,128], index: 5, kind: input, shape index: {}]   ;;  %s11966_s6 = inlined_call_operand.vmem [shape: f32[1,128], index: 6, kind: input, shape index: {}]   ;;  %s11967_s7 = inlined_call_operand.vmem [shape: f32[16,128], index: 7, kind: output, shape index: {}]  }
   0x1   :  { %s8648_s26 = smov 0  }
   0x2 LB: > { %s26_s27 = sadd.s32 1, %s8597_s25  ;;  %p5454_p0 = scmp.ge.s32.totalorder %s8601_s26, 1  ;;  %s8601_s26 = sphi %s8648_s26, %s17_s26   ;;  %s8597_s25 = sphi %s8646_s25, %s11969_s25   ;;  %s8593_s24 = sphi %s8644_s24, %s11968_s24  }
   0x3   : > { %p27_p1 = scmp.ge.s32.totalorder %s26_s27, 16  ;;  %p269_p2 = scmp.lt.s32.totalorder %s8601_s26, 17 }
   0x5   : > { %s11971_s27 = smov (%p27_p1, %s26_s27), 0  ;;  %p270_p3 = pnand %p5454_p0, %p269_p2 }
   0x6   : > { %p313_p4 = scmp.lt.s32.totalorder (!%p270_p3), %s8593_s24, 15  ;;  %s5456_s28 = sshll.u32 (!%p270_p3), %s8593_s24, 5 }
   0x7   : > { %273 = sbr.rel (%p270_p3) target bundleno = 1015 (0x3f7), region = 48  ;;  %p324_p5 = scmp.lt.s32.totalorder (!%p270_p3), %s5456_s28, 511 }
   0x8   : > { %p5459_p6 = scmp.ne.s32.totalorder (!%p270_p3), %s8593_s24, 0 }
   0xc   : > { %s314_s29 = scalar_select %p313_p4, %s8593_s24, 15 }
   0xd   : > { %s11973_s28 = smov (!%p324_p5, %s5456_s28), 511  ;;  %339 = sbr.rel (%p5459_p6) target bundleno = 35 (0x23), region = 52 }
   0xe   : > { %s8551_s30 = smul.u32 200, %s314_s29  ;;  %s7933_s8 = sshll.u32 %s11973_s28, 5 }
   0xf   : > { %s8675_s14 = scalar_lea.vmem %s11963_s3, %s7933_s8 }
  0x10   : > { %s8670_s11 = scalar_lea.vmem %s11960_s0, %s8551_s30 }
  0x12   : > { %v8603_v0 = vmov 0.0  }
  0x13   : > { %340 = vst [vmem:[#allocation2 + $0x30] sm:$0xff] %v8603_v0 }
  0x14   : > { %341 = vst [vmem:[#allocation2] sm:$0xff] %v8603_v0 }
  0x15   : > { %342 = vst [vmem:[#allocation2 + $0x58] sm:$0xff] %v8603_v0 }
  0x16   : > { %343 = vst [vmem:[#allocation2 + $0x18] sm:$0xff] %v8603_v0 }
  0x17   : > { %344 = vst [vmem:[#allocation2 + $0x50] sm:$0xff] %v8603_v0 }
  0x18   : > { %345 = vst [vmem:[#allocation2 + $0x68] sm:$0xff] %v8603_v0 }
  0x19   : > { %346 = vst [vmem:[#allocation2 + $0x8] sm:$0xff] %v8603_v0 }
  0x1a   : > { %347 = vst [vmem:[#allocation2 + $0x48] sm:$0xff] %v8603_v0 }
  0x1b   : > { %348 = vst [vmem:[#allocation2 + $0x40] sm:$0xff] %v8603_v0 }
  0x1c   : > { %349 = vst [vmem:[#allocation2 + $0x20] sm:$0xff] %v8603_v0 }
  0x1d   : > { %350 = vst [vmem:[#allocation2 + $0x10] sm:$0xff] %v8603_v0 }
  0x1e   : > { %351 = vst [vmem:[#allocation2 + $0x38] sm:$0xff] %v8603_v0 }
  0x1f   : > { %352 = vst [vmem:[#allocation2 + $0x60] sm:$0xff] %v8603_v0 }
  0x20   : > { %353 = vst [vmem:[#allocation2 + $0x70] sm:$0xff] %v8603_v0 }
  0x21   : > { %354 = vst [vmem:[#allocation2 + $0x78] sm:$0xff] %v8603_v0 }
  0x22   : > { %355 = vst [vmem:[#allocation2 + $0x28] sm:$0xff] %v8603_v0 }
  0x23 PF: > { %v5618_v1 = vld [vmem:[%s11961_s1 + $0x70] sm:$0xf]  ;;  %v7974_v2 = vld [vmem:[%s11961_s1 + $0x74] sm:$0xf0]  ;;  %v5610_v12 = vld [vmem:[%s11961_s1 + $0x60] sm:$0xf] }
  0x24   : > { %v5682_v3 = vld [vmem:[%s11961_s1 + $0xf0] sm:$0xf]  ;;  %v5619_v4 = vor.u32 %v7974_v2, %v5618_v1  ;;  %v7990_v5 = vld [vmem:[%s11961_s1 + $0xf4] sm:$0xf0]  ;;  %v7972_v14 = vld [vmem:[%s11961_s1 + $0x64] sm:$0xf0] }
  0x25   : > { %v5746_v6 = vld [vmem:[%s11961_s1 + $0x170] sm:$0xf]  ;;  %v8006_v7 = vld [vmem:[%s11961_s1 + $0x174] sm:$0xf0]  ;;  %v5683_v8 = vor.u32 %v7990_v5, %v5682_v3  ;;  %v5674_v15 = vld [vmem:[%s11961_s1 + $0xe0] sm:$0xf]  ;;  %v5611_v17 = vor.u32 %v7972_v14, %v5610_v12 }
  0x26   : > { %v5747_v9 = vor.u32 %v8006_v7, %v5746_v6  ;;  %v5810_v10 = vld [vmem:[%s11961_s1 + $0x1f0] sm:$0xf]  ;;  %v8022_v11 = vld [vmem:[%s11961_s1 + $0x1f4] sm:$0xf0]  ;;  %2914 = vmatpush.bf16.msra.mxu0 %v5619_v4  ;;  %v7988_v16 = vld [vmem:[%s11961_s1 + $0xe4] sm:$0xf0] }
  0x27   : > { %v5811_v13 = vor.u32 %v8022_v11, %v5810_v10  ;;  %2928 = vmatpush.bf16.msra.mxu1 %v5683_v8  ;;  %v5675_v18 = vor.u32 %v7988_v16, %v5674_v15  ;;  %v5738_v19 = vld [vmem:[%s11961_s1 + $0x160] sm:$0xf]  ;;  %v8004_v20 = vld [vmem:[%s11961_s1 + $0x164] sm:$0xf0]  ;;  %v5602_v24 = vld [vmem:[%s11961_s1 + $0x50] sm:$0xf] }
  0x28   : > { %2942 = vmatpush.bf16.msra.mxu2 %v5747_v9  ;;  %v5802_v21 = vld [vmem:[%s11961_s1 + $0x1e0] sm:$0xf]  ;;  %v5739_v22 = vor.u32 %v8004_v20, %v5738_v19  ;;  %v8020_v23 = vld [vmem:[%s11961_s1 + $0x1e4] sm:$0xf0]  ;;  %v7970_v25 = vld [vmem:[%s11961_s1 + $0x54] sm:$0xf0] }
  0x29   : > { %2956 = vmatpush.bf16.msra.mxu3 %v5811_v13  ;;  %v5803_v26 = vor.u32 %v8020_v23, %v5802_v21  ;;  %v5666_v27 = vld [vmem:[%s11961_s1 + $0xd0] sm:$0xf]  ;;  %v7986_v28 = vld [vmem:[%s11961_s1 + $0xd4] sm:$0xf0]  ;;  %v5603_v30 = vor.u32 %v7970_v25, %v5602_v24  ;;  %v5594_v36 = vld [vmem:[%s11961_s1 + $0x40] sm:$0xf] }
  0x2a   : > { %v5730_v29 = vld [vmem:[%s11961_s1 + $0x150] sm:$0xf]  ;;  %2915 = vmatpush.bf16.msra.mxu0 %v5611_v17  ;;  %v8002_v31 = vld [vmem:[%s11961_s1 + $0x154] sm:$0xf0]  ;;  %v5667_v34 = vor.u32 %v7986_v28, %v5666_v27  ;;  %v7968_v37 = vld [vmem:[%s11961_s1 + $0x44] sm:$0xf0] }
  0x2b   : > { %v5794_v32 = vld [vmem:[%s11961_s1 + $0x1d0] sm:$0xf]  ;;  %v8018_v33 = vld [vmem:[%s11961_s1 + $0x1d4] sm:$0xf0]  ;;  %2929 = vmatpush.bf16.msra.mxu1 %v5675_v18  ;;  %v5731_v35 = vor.u32 %v8002_v31, %v5730_v29  ;;  %v5658_v38 = vld [vmem:[%s11961_s1 + $0xc0] sm:$0xf]  ;;  %v5595_v45 = vor.u32 %v7968_v37, %v5594_v36 }
  0x2c   : > { %2943 = vmatpush.bf16.msra.mxu2 %v5739_v22  ;;  %v5795_v39 = vor.u32 %v8018_v33, %v5794_v32  ;;  %v7984_v40 = vld [vmem:[%s11961_s1 + $0xc4] sm:$0xf0]  ;;  %v5722_v41 = vld [vmem:[%s11961_s1 + $0x140] sm:$0xf]  ;;  %v5586_v48 = vld [vmem:[%s11961_s1 + $0x30] sm:$0xf] }
  0x2d   : > { %2957 = vmatpush.bf16.msra.mxu3 %v5803_v26  ;;  %v8000_v42 = vld [vmem:[%s11961_s1 + $0x144] sm:$0xf0]  ;;  %v5786_v43 = vld [vmem:[%s11961_s1 + $0x1c0] sm:$0xf]  ;;  %v5659_v46 = vor.u32 %v7984_v40, %v5658_v38  ;;  %v7966_v49 = vld [vmem:[%s11961_s1 + $0x34] sm:$0xf0] }
  0x2e   : > { %v8016_v44 = vld [vmem:[%s11961_s1 + $0x1c4] sm:$0xf0]  ;;  %2916 = vmatpush.bf16.msra.mxu0 %v5603_v30  ;;  %v5723_v47 = vor.u32 %v8000_v42, %v5722_v41  ;;  %v5650_v50 = vld [vmem:[%s11961_s1 + $0xb0] sm:$0xf]  ;;  %v7982_v52 = vld [vmem:[%s11961_s1 + $0xb4] sm:$0xf0]  ;;  %v5587_v57 = vor.u32 %v7966_v49, %v5586_v48 }
  0x2f   : > { %2930 = vmatpush.bf16.msra.mxu1 %v5667_v34  ;;  %v5787_v51 = vor.u32 %v8016_v44, %v5786_v43  ;;  %v5714_v53 = vld [vmem:[%s11961_s1 + $0x130] sm:$0xf]  ;;  %v7998_v54 = vld [vmem:[%s11961_s1 + $0x134] sm:$0xf0]  ;;  %v5651_v58 = vor.u32 %v7982_v52, %v5650_v50  ;;  %v5578_v60 = vld [vmem:[%s11961_s1 + $0x20] sm:$0xf] }
  0x30   : > { %2944 = vmatpush.bf16.msra.mxu2 %v5731_v35  ;;  %v5778_v55 = vld [vmem:[%s11961_s1 + $0x1b0] sm:$0xf]  ;;  %v8014_v56 = vld [vmem:[%s11961_s1 + $0x1b4] sm:$0xf0]  ;;  %v5715_v59 = vor.u32 %v7998_v54, %v5714_v53  ;;  %v7964_v61 = vld [vmem:[%s11961_s1 + $0x24] sm:$0xf0] }
  0x31   : > { %2958 = vmatpush.bf16.msra.mxu3 %v5795_v39  ;;  %v5642_v62 = vld [vmem:[%s11961_s1 + $0xa0] sm:$0xf]  ;;  %v5779_v63 = vor.u32 %v8014_v56, %v5778_v55  ;;  %v7980_v0 = vld [vmem:[%s11961_s1 + $0xa4] sm:$0xf0]  ;;  %v5579_v5 = vor.u32 %v7964_v61, %v5578_v60  ;;  %v5570_v8 = vld [vmem:[%s11961_s1 + $0x10] sm:$0xf] }
  0x32   : > { %2917 = vmatpush.bf16.msra.mxu0 %v5595_v45  ;;  %v5706_v1 = vld [vmem:[%s11961_s1 + $0x120] sm:$0xf]  ;;  %v7996_v2 = vld [vmem:[%s11961_s1 + $0x124] sm:$0xf0]  ;;  %v5643_v6 = vor.u32 %v7980_v0, %v5642_v62  ;;  %v7962_v9 = vld [vmem:[%s11961_s1 + $0x14] sm:$0xf0] }
  0x33   : > { %2931 = vmatpush.bf16.msra.mxu1 %v5659_v46  ;;  %v5770_v3 = vld [vmem:[%s11961_s1 + $0x1a0] sm:$0xf]  ;;  %v8012_v4 = vld [vmem:[%s11961_s1 + $0x1a4] sm:$0xf0]  ;;  %v5707_v7 = vor.u32 %v7996_v2, %v5706_v1  ;;  %v5634_v10 = vld [vmem:[%s11961_s1 + $0x90] sm:$0xf]  ;;  %v5571_v17 = vor.u32 %v7962_v9, %v5570_v8 }
  0x34   : > { %2945 = vmatpush.bf16.msra.mxu2 %v5723_v47  ;;  %v5771_v11 = vor.u32 %v8012_v4, %v5770_v3  ;;  %v7978_v12 = vld [vmem:[%s11961_s1 + $0x94] sm:$0xf0]  ;;  %v5698_v13 = vld [vmem:[%s11961_s1 + $0x110] sm:$0xf]  ;;  %v5562_v18 = vld [vmem:[%s11961_s1] sm:$0xf] }
  0x35   : > { %2959 = vmatpush.bf16.msra.mxu3 %v5787_v51  ;;  %v7994_v14 = vld [vmem:[%s11961_s1 + $0x114] sm:$0xf0]  ;;  %v5762_v15 = vld [vmem:[%s11961_s1 + $0x190] sm:$0xf]  ;;  %v7960_v19 = vld [vmem:[%s11961_s1 + $0x4] sm:$0xf0]  ;;  %v5635_v20 = vor.u32 %v7978_v12, %v5634_v10 }
  0x36   : > { %2918 = vmatpush.bf16.msra.mxu0 %v5587_v57  ;;  %v8010_v16 = vld [vmem:[%s11961_s1 + $0x194] sm:$0xf0]  ;;  %v5699_v21 = vor.u32 %v7994_v14, %v5698_v13  ;;  %v5626_v22 = vld [vmem:[%s11961_s1 + $0x80] sm:$0xf]  ;;  %v7976_v23 = vld [vmem:[%s11961_s1 + $0x84] sm:$0xf0]  ;;  %v5563_v32 = vor.u32 %v7960_v19, %v5562_v18 }
  0x37   : > { %2932 = vmatpush.bf16.msra.mxu1 %v5651_v58  ;;  %v5690_v24 = vld [vmem:[%s11961_s1 + $0x100] sm:$0xf]  ;;  %v5763_v25 = vor.u32 %v8010_v16, %v5762_v15  ;;  %v7992_v26 = vld [vmem:[%s11961_s1 + $0x104] sm:$0xf0]  ;;  %v5874_v27 = vld [vmem:[%s11961_s1 + $0x270] sm:$0xf]  ;;  %v5627_v36 = vor.u32 %v7976_v23, %v5626_v22 }
  0x38   : > { %2946 = vmatpush.bf16.msra.mxu2 %v5715_v59  ;;  %v8038_v28 = vld [vmem:[%s11961_s1 + $0x274] sm:$0xf0]  ;;  %v5938_v29 = vld [vmem:[%s11961_s1 + $0x2f0] sm:$0xf]  ;;  %v5754_v34 = vld [vmem:[%s11961_s1 + $0x180] sm:$0xf]  ;;  %v5691_v37 = vor.u32 %v7992_v26, %v5690_v24 }
  0x39   : > { %2960 = vmatpush.bf16.msra.mxu3 %v5779_v63  ;;  %v8054_v30 = vld [vmem:[%s11961_s1 + $0x2f4] sm:$0xf0]  ;;  %v6002_v31 = vld [vmem:[%s11961_s1 + $0x370] sm:$0xf]  ;;  %v8008_v35 = vld [vmem:[%s11961_s1 + $0x184] sm:$0xf0]  ;;  %v5875_v40 = vor.u32 %v8038_v28, %v5874_v27 }
  0x3a   : > { %2919 = vmatpush.bf16.msra.mxu0 %v5579_v5  ;;  %v8070_v33 = vld [vmem:[%s11961_s1 + $0x374] sm:$0xf0]  ;;  %v6066_v38 = vld [vmem:[%s11961_s1 + $0x3f0] sm:$0xf]  ;;  %v5939_v41 = vor.u32 %v8054_v30, %v5938_v29  ;;  %v5866_v42 = vld [vmem:[%s11961_s1 + $0x260] sm:$0xf]  ;;  %v5755_v45 = vor.u32 %v8008_v35, %v5754_v34 }
  0x3b   : > { %2933 = vmatpush.bf16.msra.mxu1 %v5643_v6  ;;  %v8086_v39 = vld [vmem:[%s11961_s1 + $0x3f4] sm:$0xf0]  ;;  %v8036_v43 = vld [vmem:[%s11961_s1 + $0x264] sm:$0xf0]  ;;  %v6003_v44 = vor.u32 %v8070_v33, %v6002_v31  ;;  %v5930_v46 = vld [vmem:[%s11961_s1 + $0x2e0] sm:$0xf] }
  0x3c   : > { %2947 = vmatpush.bf16.msra.mxu2 %v5707_v7  ;;  %v8052_v47 = vld [vmem:[%s11961_s1 + $0x2e4] sm:$0xf0]  ;;  %v5994_v48 = vld [vmem:[%s11961_s1 + $0x360] sm:$0xf]  ;;  %v6067_v49 = vor.u32 %v8086_v39, %v6066_v38  ;;  %v5858_v53 = vld [vmem:[%s11961_s1 + $0x250] sm:$0xf]  ;;  %v5867_v57 = vor.u32 %v8036_v43, %v5866_v42 }
  0x3d   : > { %2961 = vmatpush.bf16.msra.mxu3 %v5771_v11  ;;  %v8068_v50 = vld [vmem:[%s11961_s1 + $0x364] sm:$0xf0]  ;;  %v6058_v51 = vld [vmem:[%s11961_s1 + $0x3e0] sm:$0xf]  ;;  %v7946_v55 = vld [vmem:[%s8670_s11 + $0x60] sm:$0xf0]  ;;  %v5931_v58 = vor.u32 %v8052_v47, %v5930_v46 }
  0x3e   : > { %2920 = vmatpush.bf16.msra.mxu0 %v5571_v17  ;;  %v8084_v52 = vld [vmem:[%s11961_s1 + $0x3e4] sm:$0xf0]  ;;  %v5462_v54 = vld [vmem:[%s8670_s11] sm:$0xf]  ;;  %v8034_v59 = vld [vmem:[%s11961_s1 + $0x254] sm:$0xf0]  ;;  %v5995_v63 = vor.u32 %v8068_v50, %v5994_v48 }
  0x3f   : > { %2934 = vmatpush.bf16.msra.mxu1 %v5635_v20  ;;  %v5470_v56 = vld [vmem:[%s8670_s11 + $0x8] sm:$0xf]  ;;  %v5922_v60 = vld [vmem:[%s11961_s1 + $0x2d0] sm:$0xf]  ;;  %v8930_v61 = vor.u32 %v7946_v55, %v5462_v54  ;;  %v7947_v62 = vld [vmem:[%s8670_s11 + $0x68] sm:$0xf0]  ;;  %v6059_v4 = vor.u32 %v8084_v52, %v6058_v51  ;;  %v5859_v12 = vor.u32 %v8034_v59, %v5858_v53 }
  0x40   : > { %2948 = vmatpush.bf16.msra.mxu2 %v5699_v21  ;;  %v8050_v0 = vld [vmem:[%s11961_s1 + $0x2d4] sm:$0xf0]  ;;  %v5986_v1 = vld [vmem:[%s11961_s1 + $0x350] sm:$0xf]  ;;  %v8942_v3 = vor.u32 %v7947_v62, %v5470_v56  ;;  %v7934_v6 = vld [vmem:[%s8670_s11 + $0x4] sm:$0xf] }
  0x41   : > { %2962 = vmatpush.bf16.msra.mxu3 %v5763_v25  ;;  %v8066_v2 = vld [vmem:[%s11961_s1 + $0x354] sm:$0xf0]  ;;  %v6050_v5 = vld [vmem:[%s11961_s1 + $0x3d0] sm:$0xf]  ;;  %v5464_v7 = vld [vmem:[%s8670_s11 + $0x64] sm:$0xf0]  ;;  %v5923_v13 = vor.u32 %v8050_v0, %v5922_v60 }
  0x42   : > { %2921 = vmatpush.bf16.msra.mxu0 %v5563_v32  ;;  %v8082_v8 = vld [vmem:[%s11961_s1 + $0x3d4] sm:$0xf0]  ;;  %v8954_v9 = vor.u32 %v7934_v6, %v5464_v7  ;;  %v7935_v10 = vld [vmem:[%s8670_s11 + $0xc] sm:$0xf]  ;;  %v5472_v11 = vld [vmem:[%s8670_s11 + $0x6c] sm:$0xf0]  ;;  %v5987_v16 = vor.u32 %v8066_v2, %v5986_v1 }
  0x43   : > { %2935 = vmatpush.bf16.msra.mxu1 %v5627_v36  ;;  %v5850_v14 = vld [vmem:[%s11961_s1 + $0x240] sm:$0xf]  ;;  %v8961_v15 = vor.u32 %v7935_v10, %v5472_v11  ;;  %v8032_v17 = vld [vmem:[%s11961_s1 + $0x244] sm:$0xf0]  ;;  %v6051_v20 = vor.u32 %v8082_v8, %v6050_v5  ;;  %v5842_v27 = vld [vmem:[%s11961_s1 + $0x230] sm:$0xf] }
  0x44   : > { %2949 = vmatpush.bf16.msra.mxu2 %v5691_v37  ;;  %v5914_v18 = vld [vmem:[%s11961_s1 + $0x2c0] sm:$0xf]  ;;  %v8048_v19 = vld [vmem:[%s11961_s1 + $0x2c4] sm:$0xf0]  ;;  %v5851_v25 = vor.u32 %v8032_v17, %v5850_v14  ;;  %v8030_v29 = vld [vmem:[%s11961_s1 + $0x234] sm:$0xf0] }
  0x45   : > { %2963 = vmatpush.bf16.msra.mxu3 %v5755_v45  ;;  %2922 = vmatmul.bf16.vlgmr.msra.gmra.mxu0 %v8930_v61  ;;  %v5978_v21 = vld [vmem:[%s11961_s1 + $0x340] sm:$0xf]  ;;  %v8064_v22 = vld [vmem:[%s11961_s1 + $0x344] sm:$0xf0]  ;;  %v5915_v26 = vor.u32 %v8048_v19, %v5914_v18  ;;  %v5906_v30 = vld [vmem:[%s11961_s1 + $0x2b0] sm:$0xf]  ;;  %v5843_v37 = vor.u32 %v8030_v29, %v5842_v27 }
  0x46   : > { %2970 = vmatpush.bf16.msrb.mxu0 %v5875_v40  ;;  %2936 = vmatmul.bf16.vlgmr.msra.gmra.mxu1 %v8954_v9  ;;  %v6042_v23 = vld [vmem:[%s11961_s1 + $0x3c0] sm:$0xf]  ;;  %v8080_v24 = vld [vmem:[%s11961_s1 + $0x3c4] sm:$0xf0]  ;;  %v5979_v28 = vor.u32 %v8064_v22, %v5978_v21  ;;  %v8046_v31 = vld [vmem:[%s11961_s1 + $0x2b4] sm:$0xf0] }
  0x47   : > { %2984 = vmatpush.bf16.msrb.mxu1 %v5939_v41  ;;  %2950 = vmatmul.bf16.vlgmr.msra.gmra.mxu2 %v8942_v3  ;;  %v6043_v32 = vor.u32 %v8080_v24, %v6042_v23  ;;  %v5970_v33 = vld [vmem:[%s11961_s1 + $0x330] sm:$0xf]  ;;  %v8062_v34 = vld [vmem:[%s11961_s1 + $0x334] sm:$0xf0]  ;;  %v5907_v38 = vor.u32 %v8046_v31, %v5906_v30  ;;  %v5834_v39 = vld [vmem:[%s11961_s1 + $0x220] sm:$0xf] }
  0x48   : > { %2998 = vmatpush.bf16.msrb.mxu2 %v6003_v44  ;;  %2964 = vmatmul.bf16.vlgmr.msra.gmra.mxu3 %v8961_v15  ;;  %v6034_v35 = vld [vmem:[%s11961_s1 + $0x3b0] sm:$0xf]  ;;  %v8078_v36 = vld [vmem:[%s11961_s1 + $0x3b4] sm:$0xf0]  ;;  %v5971_v40 = vor.u32 %v8062_v34, %v5970_v33  ;;  %v8028_v41 = vld [vmem:[%s11961_s1 + $0x224] sm:$0xf0] }
  0x49   : > { %3012 = vmatpush.bf16.msrb.mxu3 %v6067_v49  ;;  %v5898_v42 = vld [vmem:[%s11961_s1 + $0x2a0] sm:$0xf]  ;;  %v8044_v43 = vld [vmem:[%s11961_s1 + $0x2a4] sm:$0xf0]  ;;  %v6035_v44 = vor.u32 %v8078_v36, %v6034_v35  ;;  %v5835_v49 = vor.u32 %v8028_v41, %v5834_v39  ;;  %v5826_v51 = vld [vmem:[%s11961_s1 + $0x210] sm:$0xf] }
  0x4a   : > { %2971 = vmatpush.bf16.msrb.mxu0 %v5867_v57  ;;  %v5962_v45 = vld [vmem:[%s11961_s1 + $0x320] sm:$0xf]  ;;  %v8060_v46 = vld [vmem:[%s11961_s1 + $0x324] sm:$0xf0]  ;;  %v5899_v50 = vor.u32 %v8044_v43, %v5898_v42  ;;  %v8026_v52 = vld [vmem:[%s11961_s1 + $0x214] sm:$0xf0] }
  0x4b   : > { %2985 = vmatpush.bf16.msrb.mxu1 %v5931_v58  ;;  %v6026_v47 = vld [vmem:[%s11961_s1 + $0x3a0] sm:$0xf]  ;;  %v8076_v48 = vld [vmem:[%s11961_s1 + $0x3a4] sm:$0xf0]  ;;  %v5963_v53 = vor.u32 %v8060_v46, %v5962_v45  ;;  %v5890_v54 = vld [vmem:[%s11961_s1 + $0x290] sm:$0xf]  ;;  %v5827_v2 = vor.u32 %v8026_v52, %v5826_v51 }
  0x4c   : > { %2999 = vmatpush.bf16.msrb.mxu2 %v5995_v63  ;;  %v8042_v55 = vld [vmem:[%s11961_s1 + $0x294] sm:$0xf0]  ;;  %v5954_v56 = vld [vmem:[%s11961_s1 + $0x310] sm:$0xf]  ;;  %v6027_v57 = vor.u32 %v8076_v48, %v6026_v47  ;;  %v5818_v62 = vld [vmem:[%s11961_s1 + $0x200] sm:$0xf] }
  0x4d   : > { %3013 = vmatpush.bf16.msrb.mxu3 %v6059_v4  ;;  %v8058_v58 = vld [vmem:[%s11961_s1 + $0x314] sm:$0xf0]  ;;  %v6018_v59 = vld [vmem:[%s11961_s1 + $0x390] sm:$0xf]  ;;  %v8024_v63 = vld [vmem:[%s11961_s1 + $0x204] sm:$0xf0]  ;;  %v5891_v4 = vor.u32 %v8042_v55, %v5890_v54 }
  0x4e   : > { %2972 = vmatpush.bf16.msrb.mxu0 %v5859_v12  ;;  %v8074_v60 = vld [vmem:[%s11961_s1 + $0x394] sm:$0xf0]  ;;  %v5882_v0 = vld [vmem:[%s11961_s1 + $0x280] sm:$0xf]  ;;  %v8040_v1 = vld [vmem:[%s11961_s1 + $0x284] sm:$0xf0]  ;;  %v5955_v8 = vor.u32 %v8058_v58, %v5954_v56  ;;  %v5819_v21 = vor.u32 %v8024_v63, %v5818_v62 }
  0x4f   : > { %2986 = vmatpush.bf16.msrb.mxu1 %v5923_v13  ;;  %v5946_v5 = vld [vmem:[%s11961_s1 + $0x300] sm:$0xf]  ;;  %v8056_v6 = vld [vmem:[%s11961_s1 + $0x304] sm:$0xf0]  ;;  %v6130_v7 = vld [vmem:[%s11961_s1 + $0x470] sm:$0xf]  ;;  %v6019_v13 = vor.u32 %v8074_v60, %v6018_v59  ;;  %v5883_v22 = vor.u32 %v8040_v1, %v5882_v0 }
  0x50   : > { %3000 = vmatpush.bf16.msrb.mxu2 %v5987_v16  ;;  %v8102_v10 = vld [vmem:[%s11961_s1 + $0x474] sm:$0xf0]  ;;  %v6194_v11 = vld [vmem:[%s11961_s1 + $0x4f0] sm:$0xf]  ;;  %v6010_v17 = vld [vmem:[%s11961_s1 + $0x380] sm:$0xf] }
  0x51   : > { %3014 = vmatpush.bf16.msrb.mxu3 %v6051_v20  ;;  %v8118_v12 = vld [vmem:[%s11961_s1 + $0x4f4] sm:$0xf0]  ;;  %v6258_v14 = vld [vmem:[%s11961_s1 + $0x570] sm:$0xf]  ;;  %v8072_v18 = vld [vmem:[%s11961_s1 + $0x384] sm:$0xf0]  ;;  %v6131_v27 = vor.u32 %v8102_v10, %v6130_v7 }
  0x52   : > { %2973 = vmatpush.bf16.msrb.mxu0 %v5851_v25  ;;  %v8134_v16 = vld [vmem:[%s11961_s1 + $0x574] sm:$0xf0]  ;;  %v5478_v19 = vld [vmem:[%s8670_s11 + $0x10] sm:$0xf]  ;;  %v7948_v20 = vld [vmem:[%s8670_s11 + $0x70] sm:$0xf0]  ;;  %v6195_v31 = vor.u32 %v8118_v12, %v6194_v11  ;;  %v6011_v36 = vor.u32 %v8072_v18, %v6010_v17 }
  0x53   : > { %2987 = vmatpush.bf16.msrb.mxu1 %v5915_v26  ;;  %v5486_v23 = vld [vmem:[%s8670_s11 + $0x18] sm:$0xf]  ;;  %v7949_v24 = vld [vmem:[%s8670_s11 + $0x78] sm:$0xf0]  ;;  %v6322_v25 = vld [vmem:[%s11961_s1 + $0x5f0] sm:$0xf]  ;;  %v5947_v26 = vor.u32 %v8056_v6, %v5946_v5 }
  0x54   : > { %3001 = vmatpush.bf16.msrb.mxu2 %v5979_v28  ;;  %v8150_v28 = vld [vmem:[%s11961_s1 + $0x5f4] sm:$0xf0]  ;;  %v7936_v29 = vld [vmem:[%s8670_s11 + $0x14] sm:$0xf]  ;;  %v7937_v33 = vld [vmem:[%s8670_s11 + $0x1c] sm:$0xf]  ;;  %v9128_v41 = vor.u32 %v7949_v24, %v5486_v23 }
  0x55   : > { %3015 = vmatpush.bf16.msrb.mxu3 %v6043_v32  ;;  %v5480_v30 = vld [vmem:[%s8670_s11 + $0x74] sm:$0xf0]  ;;  %v6259_v32 = vor.u32 %v8134_v16, %v6258_v14  ;;  %v6122_v34 = vld [vmem:[%s11961_s1 + $0x460] sm:$0xf]  ;;  %v8100_v35 = vld [vmem:[%s11961_s1 + $0x464] sm:$0xf0]  ;;  %v6323_v42 = vor.u32 %v8150_v28, %v6322_v25 }
  0x56   : > { %2974 = vmatpush.bf16.msrb.mxu0 %v5843_v37  ;;  %v9119_v37 = vor.u32 %v7948_v20, %v5478_v19  ;;  %v6186_v39 = vld [vmem:[%s11961_s1 + $0x4e0] sm:$0xf]  ;;  %v9136_v45 = vor.u32 %v7936_v29, %v5480_v30  ;;  %v6123_v46 = vor.u32 %v8100_v35, %v6122_v34  ;;  %v8148_v48 = vld [vmem:[%s11961_s1 + $0x5e4] sm:$0xf0]  ;;  %v6114_v51 = vld [vmem:[%s11961_s1 + $0x450] sm:$0xf] }
  0x57   : > { %2988 = vmatpush.bf16.msrb.mxu1 %v5907_v38  ;;  %v5488_v38 = vld [vmem:[%s8670_s11 + $0x7c] sm:$0xf0]  ;;  %v8098_v52 = vld [vmem:[%s11961_s1 + $0x454] sm:$0xf0]  ;;  %v6178_v54 = vld [vmem:[%s11961_s1 + $0x4d0] sm:$0xf] }
  0x58   : > { %3002 = vmatpush.bf16.msrb.mxu2 %v5971_v40  ;;  %v8116_v40 = vld [vmem:[%s11961_s1 + $0x4e4] sm:$0xf0]  ;;  %v6250_v43 = vld [vmem:[%s11961_s1 + $0x560] sm:$0xf]  ;;  %v8114_v55 = vld [vmem:[%s11961_s1 + $0x4d4] sm:$0xf0]  ;;  %v6115_v59 = vor.u32 %v8098_v52, %v6114_v51 }
  0x59   : > { %3016 = vmatpush.bf16.msrb.mxu3 %v6035_v44  ;;  %v8132_v44 = vld [vmem:[%s11961_s1 + $0x564] sm:$0xf0]  ;;  %v6314_v47 = vld [vmem:[%s11961_s1 + $0x5e0] sm:$0xf]  ;;  %v8130_v58 = vld [vmem:[%s11961_s1 + $0x554] sm:$0xf0]  ;;  %v6179_v63 = vor.u32 %v8114_v55, %v6178_v54 }
  0x5a   : > { %2975 = vmatpush.bf16.msrb.mxu0 %v5835_v49  ;;  %v9144_v49 = vor.u32 %v7937_v33, %v5488_v38  ;;  %v6315_v56 = vor.u32 %v8148_v48, %v6314_v47  ;;  %v6306_v60 = vld [vmem:[%s11961_s1 + $0x5d0] sm:$0xf]  ;;  %v8146_v62 = vld [vmem:[%s11961_s1 + $0x5d4] sm:$0xf0]  ;;  %v6106_v0 = vld [vmem:[%s11961_s1 + $0x440] sm:$0xf] }
  0x5b   : > { %2989 = vmatpush.bf16.msrb.mxu1 %v5899_v50  ;;  %v6187_v50 = vor.u32 %v8116_v40, %v6186_v39  ;;  %v8096_v1 = vld [vmem:[%s11961_s1 + $0x444] sm:$0xf0]  ;;  %v6307_v6 = vor.u32 %v8146_v62, %v6306_v60  ;;  %v6234_v7 = vld [vmem:[%s11961_s1 + $0x540] sm:$0xf]  ;;  %v6098_v14 = vld [vmem:[%s11961_s1 + $0x430] sm:$0xf] }
  0x5c   : > { %3003 = vmatpush.bf16.msrb.mxu2 %v5963_v53  ;;  %v6251_v53 = vor.u32 %v8132_v44, %v6250_v43  ;;  %v8112_v5 = vld [vmem:[%s11961_s1 + $0x4c4] sm:$0xf0]  ;;  %v6107_v10 = vor.u32 %v8096_v1, %v6106_v0  ;;  %v6298_v11 = vld [vmem:[%s11961_s1 + $0x5c0] sm:$0xf]  ;;  %v8094_v16 = vld [vmem:[%s11961_s1 + $0x434] sm:$0xf0] }
  0x5d   : > { %3017 = vmatpush.bf16.msrb.mxu3 %v6027_v57  ;;  %v6242_v57 = vld [vmem:[%s11961_s1 + $0x550] sm:$0xf]  ;;  %v8144_v12 = vld [vmem:[%s11961_s1 + $0x5c4] sm:$0xf0]  ;;  %v8110_v19 = vld [vmem:[%s11961_s1 + $0x4b4] sm:$0xf0]  ;;  %v6099_v23 = vor.u32 %v8094_v16, %v6098_v14 }
  0x5e   : > { %2976 = vmatpush.bf16.msrb.mxu0 %v5827_v2  ;;  %v6243_v2 = vor.u32 %v8130_v58, %v6242_v57  ;;  %v6162_v18 = vld [vmem:[%s11961_s1 + $0x4b0] sm:$0xf]  ;;  %v6299_v20 = vor.u32 %v8144_v12, %v6298_v11  ;;  %v8142_v25 = vld [vmem:[%s11961_s1 + $0x5b4] sm:$0xf0]  ;;  %v8092_v28 = vld [vmem:[%s11961_s1 + $0x424] sm:$0xf0] }
  0x5f   : > { %2990 = vmatpush.bf16.msrb.mxu1 %v5891_v4  ;;  %v6170_v4 = vld [vmem:[%s11961_s1 + $0x4c0] sm:$0xf]  ;;  %v6290_v24 = vld [vmem:[%s11961_s1 + $0x5b0] sm:$0xf]  ;;  %v8124_v34 = vld [vmem:[%s11961_s1 + $0x524] sm:$0xf0] }
  0x60   : > { %3004 = vmatpush.bf16.msrb.mxu2 %v5955_v8  ;;  %v8128_v8 = vld [vmem:[%s11961_s1 + $0x544] sm:$0xf0]  ;;  %v6154_v30 = vld [vmem:[%s11961_s1 + $0x4a0] sm:$0xf]  ;;  %v6082_v40 = vld [vmem:[%s11961_s1 + $0x410] sm:$0xf] }
  0x61   : > { %3018 = vmatpush.bf16.msrb.mxu3 %v6019_v13  ;;  %v6171_v13 = vor.u32 %v8112_v5, %v6170_v4  ;;  %v6235_v17 = vor.u32 %v8128_v8, %v6234_v7  ;;  %v6218_v33 = vld [vmem:[%s11961_s1 + $0x520] sm:$0xf]  ;;  %v8140_v38 = vld [vmem:[%s11961_s1 + $0x5a4] sm:$0xf0]  ;;  %v6146_v43 = vld [vmem:[%s11961_s1 + $0x490] sm:$0xf] }
  0x62   : > { %2977 = vmatpush.bf16.msrb.mxu0 %v5819_v21  ;;  %v6226_v21 = vld [vmem:[%s11961_s1 + $0x530] sm:$0xf]  ;;  %v6219_v44 = vor.u32 %v8124_v34, %v6218_v33  ;;  %v8122_v48 = vld [vmem:[%s11961_s1 + $0x514] sm:$0xf0]  ;;  %v8088_v55 = vld [vmem:[%s11961_s1 + $0x404] sm:$0xf0] }
  0x63   : > { %2991 = vmatpush.bf16.msrb.mxu1 %v5883_v22  ;;  %v8126_v22 = vld [vmem:[%s11961_s1 + $0x534] sm:$0xf0]  ;;  %v6210_v47 = vld [vmem:[%s11961_s1 + $0x510] sm:$0xf]  ;;  %v8104_v57 = vld [vmem:[%s11961_s1 + $0x484] sm:$0xf0] }
  0x64   : > { %3005 = vmatpush.bf16.msrb.mxu2 %v5947_v26  ;;  %v6163_v26 = vor.u32 %v8110_v19, %v6162_v18  ;;  %v6227_v29 = vor.u32 %v8126_v22, %v6226_v21  ;;  %v6274_v51 = vld [vmem:[%s11961_s1 + $0x590] sm:$0xf]  ;;  %v8138_v52 = vld [vmem:[%s11961_s1 + $0x594] sm:$0xf0]  ;;  %v8120_v60 = vld [vmem:[%s11961_s1 + $0x504] sm:$0xf0]  ;;  %v6211_v1 = vor.u32 %v8122_v48, %v6210_v47 }
  0x65   : > { %3019 = vmatpush.bf16.msrb.mxu3 %v6011_v36  ;;  %2978 = vmatmul.bf16.vlgmr.msrb.gmra.mxu0 %v9119_v37  ;;  %v6282_v36 = vld [vmem:[%s11961_s1 + $0x5a0] sm:$0xf]  ;;  %v6386_v62 = vld [vmem:[%s11961_s1 + $0x670] sm:$0xf]  ;;  %v8198_v5 = vld [vmem:[%s11961_s1 + $0x774] sm:$0xf0] }
  0x66   : > { %3026 = vmatpush.bf16.msra.mxu0 %v6131_v27  ;;  %2992 = vmatmul.bf16.vlgmr.msrb.gmra.mxu1 %v9136_v45  ;;  %v6090_v27 = vld [vmem:[%s11961_s1 + $0x420] sm:$0xf]  ;;  %v6450_v0 = vld [vmem:[%s11961_s1 + $0x6f0] sm:$0xf]  ;;  %v8136_v8 = vld [vmem:[%s11961_s1 + $0x584] sm:$0xf0] }
  0x67   : > { %3040 = vmatpush.bf16.msra.mxu1 %v6195_v31  ;;  %3006 = vmatmul.bf16.vlgmr.msrb.gmra.mxu2 %v9128_v41  ;;  %v8108_v31 = vld [vmem:[%s11961_s1 + $0x4a4] sm:$0xf0]  ;;  %v6091_v35 = vor.u32 %v8092_v28, %v6090_v27  ;;  %v6514_v4 = vld [vmem:[%s11961_s1 + $0x770] sm:$0xf]  ;;  %v6266_v7 = vld [vmem:[%s11961_s1 + $0x580] sm:$0xf] }
  0x68   : > { %3054 = vmatpush.bf16.msra.mxu2 %v6259_v32  ;;  %3020 = vmatmul.bf16.vlgmr.msrb.gmra.mxu3 %v9144_v49  ;;  %v6291_v32 = vor.u32 %v8142_v25, %v6290_v24  ;;  %v6155_v39 = vor.u32 %v8108_v31, %v6154_v30  ;;  %v7950_v12 = vld [vmem:[%s8670_s11 + $0x80] sm:$0xf0]  ;;  %v7951_v14 = vld [vmem:[%s8670_s11 + $0x88] sm:$0xf0]  ;;  %v6578_v18 = vld [vmem:[%s11961_s1 + $0x7f0] sm:$0xf]  ;;  %v6267_v27 = vor.u32 %v8136_v8, %v6266_v7 }
  0x69   : > { %3068 = vmatpush.bf16.msra.mxu3 %v6323_v42  ;;  %v8090_v42 = vld [vmem:[%s11961_s1 + $0x414] sm:$0xf0]  ;;  %v7939_v24 = vld [vmem:[%s8670_s11 + $0x2c] sm:$0xf]  ;;  %v5504_v25 = vld [vmem:[%s8670_s11 + $0x8c] sm:$0xf0] }
  0x6a   : > { %3027 = vmatpush.bf16.msra.mxu0 %v6123_v46  ;;  %v8106_v46 = vld [vmem:[%s11961_s1 + $0x494] sm:$0xf0]  ;;  %v6083_v54 = vor.u32 %v8090_v42, %v6082_v40  ;;  %v6378_v28 = vld [vmem:[%s11961_s1 + $0x660] sm:$0xf]  ;;  %v8180_v33 = vld [vmem:[%s11961_s1 + $0x6e4] sm:$0xf0]  ;;  %v9356_v42 = vor.u32 %v7939_v24, %v5504_v25 }
  0x6b   : > { %3041 = vmatpush.bf16.msra.mxu1 %v6187_v50  ;;  %v6283_v50 = vor.u32 %v8140_v38, %v6282_v36  ;;  %v6147_v58 = vor.u32 %v8106_v46, %v6146_v43  ;;  %v8214_v19 = vld [vmem:[%s11961_s1 + $0x7f4] sm:$0xf0]  ;;  %v6442_v30 = vld [vmem:[%s11961_s1 + $0x6e0] sm:$0xf]  ;;  %v8212_v40 = vld [vmem:[%s11961_s1 + $0x7e4] sm:$0xf0] }
  0x6c   : > { %3055 = vmatpush.bf16.msra.mxu2 %v6251_v53  ;;  %v6074_v53 = vld [vmem:[%s11961_s1 + $0x400] sm:$0xf]  ;;  %v6370_v47 = vld [vmem:[%s11961_s1 + $0x650] sm:$0xf]  ;;  %v8162_v48 = vld [vmem:[%s11961_s1 + $0x654] sm:$0xf0] }
  0x6d   : > { %3069 = vmatpush.bf16.msra.mxu3 %v6315_v56  ;;  %v6138_v56 = vld [vmem:[%s11961_s1 + $0x480] sm:$0xf]  ;;  %v6075_v11 = vor.u32 %v8088_v55, %v6074_v53  ;;  %v6498_v53 = vld [vmem:[%s11961_s1 + $0x750] sm:$0xf]  ;;  %v8156_v25 = vld [vmem:[%s11961_s1 + $0x624] sm:$0xf0] }
  0x6e   : > { %3028 = vmatpush.bf16.msra.mxu0 %v6115_v59  ;;  %v6202_v59 = vld [vmem:[%s11961_s1 + $0x500] sm:$0xf]  ;;  %v6139_v16 = vor.u32 %v8104_v57, %v6138_v56  ;;  %v6562_v55 = vld [vmem:[%s11961_s1 + $0x7d0] sm:$0xf]  ;;  %v8210_v56 = vld [vmem:[%s11961_s1 + $0x7d4] sm:$0xf0]  ;;  %v6371_v57 = vor.u32 %v8162_v48, %v6370_v47 }
  0x6f   : > { %3042 = vmatpush.bf16.msra.mxu1 %v6179_v63  ;;  %v8166_v63 = vld [vmem:[%s11961_s1 + $0x674] sm:$0xf0]  ;;  %v6203_v21 = vor.u32 %v8120_v60, %v6202_v59  ;;  %v6506_v34 = vld [vmem:[%s11961_s1 + $0x760] sm:$0xf]  ;;  %v6466_v48 = vld [vmem:[%s11961_s1 + $0x710] sm:$0xf] }
  0x70   : > { %3056 = vmatpush.bf16.msra.mxu2 %v6243_v2  ;;  %v8182_v2 = vld [vmem:[%s11961_s1 + $0x6f4] sm:$0xf0]  ;;  %v6362_v60 = vld [vmem:[%s11961_s1 + $0x640] sm:$0xf]  ;;  %p7672_p7 = scmp.ne.s32.totalorder %s8593_s24, 15 }
  0x71   : > { %3070 = vmatpush.bf16.msra.mxu3 %v6307_v6  ;;  %v6275_v6 = vor.u32 %v8138_v52, %v6274_v51  ;;  %v6451_v22 = vor.u32 %v8182_v2, %v6450_v0  ;;  %v8178_v52 = vld [vmem:[%s11961_s1 + $0x6d4] sm:$0xf0]  ;;  %v6563_v0 = vor.u32 %v8210_v56, %v6562_v55  ;;  %v6490_v2 = vld [vmem:[%s11961_s1 + $0x740] sm:$0xf] }
  0x72   : > { %3029 = vmatpush.bf16.msra.mxu0 %v6107_v10  ;;  %v5494_v10 = vld [vmem:[%s8670_s11 + $0x20] sm:$0xf] }
  0x73   : > { %3043 = vmatpush.bf16.msra.mxu1 %v6171_v13  ;;  %v5502_v13 = vld [vmem:[%s8670_s11 + $0x28] sm:$0xf]  ;;  %v9335_v31 = vor.u32 %v7950_v12, %v5494_v10  ;;  %v8158_v12 = vld [vmem:[%s11961_s1 + $0x634] sm:$0xf0]  ;;  %v6346_v24 = vld [vmem:[%s11961_s1 + $0x620] sm:$0xf] }
  0x74   : > { %3057 = vmatpush.bf16.msra.mxu2 %v6235_v17  ;;  %v6387_v17 = vor.u32 %v8166_v63, %v6386_v62  ;;  %v9346_v36 = vor.u32 %v7951_v14, %v5502_v13  ;;  %v8160_v62 = vld [vmem:[%s11961_s1 + $0x644] sm:$0xf0]  ;;  %v6426_v63 = vld [vmem:[%s11961_s1 + $0x6c0] sm:$0xf]  ;;  %v6418_v13 = vld [vmem:[%s11961_s1 + $0x6b0] sm:$0xf] }
  0x75   : > { %3071 = vmatpush.bf16.msra.mxu3 %v6299_v20  ;;  %v7938_v20 = vld [vmem:[%s8670_s11 + $0x24] sm:$0xf]  ;;  %v6363_v7 = vor.u32 %v8160_v62, %v6362_v60  ;;  %v6394_v56 = vld [vmem:[%s11961_s1 + $0x680] sm:$0xf] }
  0x76   : > { %3030 = vmatpush.bf16.msra.mxu0 %v6099_v23  ;;  %v5496_v23 = vld [vmem:[%s8670_s11 + $0x84] sm:$0xf0] }
  0x77   : > { %3044 = vmatpush.bf16.msra.mxu1 %v6163_v26  ;;  %v6515_v26 = vor.u32 %v8198_v5, %v6514_v4  ;;  %v9348_v38 = vor.u32 %v7938_v20, %v5496_v23  ;;  %v8192_v4 = vld [vmem:[%s11961_s1 + $0x744] sm:$0xf0]  ;;  %v6554_v5 = vld [vmem:[%s11961_s1 + $0x7c0] sm:$0xf]  ;;  %v8206_v20 = vld [vmem:[%s11961_s1 + $0x7b4] sm:$0xf0] }
  0x78   : > { %3058 = vmatpush.bf16.msra.mxu2 %v6227_v29  ;;  %v8164_v29 = vld [vmem:[%s11961_s1 + $0x664] sm:$0xf0]  ;;  %v6491_v10 = vor.u32 %v8192_v4, %v6490_v2  ;;  %v8246_v4 = vld [vmem:[%s11961_s1 + $0x8f4] sm:$0xf0] }
  0x79   : > { %3072 = vmatpush.bf16.msra.mxu3 %v6291_v32  ;;  %v6579_v32 = vor.u32 %v8214_v19, %v6578_v18  ;;  %v6379_v43 = vor.u32 %v8164_v29, %v6378_v28  ;;  %v8190_v18 = vld [vmem:[%s11961_s1 + $0x734] sm:$0xf0]  ;;  %v6546_v19 = vld [vmem:[%s11961_s1 + $0x7b0] sm:$0xf]  ;;  %v8172_v28 = vld [vmem:[%s11961_s1 + $0x6a4] sm:$0xf0] }
  0x7a   : > { %3031 = vmatpush.bf16.msra.mxu0 %v6091_v35  ;;  %v8196_v35 = vld [vmem:[%s11961_s1 + $0x764] sm:$0xf0]  ;;  %v6474_v29 = vld [vmem:[%s11961_s1 + $0x720] sm:$0xf] }
  0x7b   : > { %3045 = vmatpush.bf16.msra.mxu1 %v6155_v39  ;;  %v6570_v39 = vld [vmem:[%s11961_s1 + $0x7e0] sm:$0xf]  ;;  %v6507_v46 = vor.u32 %v8196_v35, %v6506_v34  ;;  %v6347_v34 = vor.u32 %v8156_v25, %v6346_v24  ;;  %v6338_v35 = vld [vmem:[%s11961_s1 + $0x610] sm:$0xf]  ;;  %v7941_v24 = vld [vmem:[%s8670_s11 + $0x3c] sm:$0xf] }
  0x7c   : > { %3059 = vmatpush.bf16.msra.mxu2 %v6219_v44  ;;  %v6443_v44 = vor.u32 %v8180_v33, %v6442_v30  ;;  %v6571_v51 = vor.u32 %v8212_v40, %v6570_v39  ;;  %v8188_v30 = vld [vmem:[%s11961_s1 + $0x724] sm:$0xf0]  ;;  %v5520_v25 = vld [vmem:[%s8670_s11 + $0x9c] sm:$0xf0] }
  0x7d   : > { %3073 = vmatpush.bf16.msra.mxu3 %v6283_v50  ;;  %v6434_v50 = vld [vmem:[%s11961_s1 + $0x6d0] sm:$0xf]  ;;  %v8204_v33 = vld [vmem:[%s11961_s1 + $0x7a4] sm:$0xf0]  ;;  %v6475_v40 = vor.u32 %v8188_v30, %v6474_v29  ;;  %v6698_v30 = vld [vmem:[%s11961_s1 + $0x8e0] sm:$0xf] }
  0x7e   : > { %3032 = vmatpush.bf16.msra.mxu0 %v6083_v54  ;;  %v8194_v54 = vld [vmem:[%s11961_s1 + $0x754] sm:$0xf0]  ;;  %v8228_v29 = vld [vmem:[%s11961_s1 + $0x864] sm:$0xf0] }
  0x7f   : > { %3046 = vmatpush.bf16.msra.mxu1 %v6147_v58  ;;  %v6435_v58 = vor.u32 %v8178_v52, %v6434_v50  ;;  %v6499_v59 = vor.u32 %v8194_v54, %v6498_v53  ;;  %v8186_v50 = vld [vmem:[%s11961_s1 + $0x714] sm:$0xf0]  ;;  %v6330_v53 = vld [vmem:[%s11961_s1 + $0x600] sm:$0xf]  ;;  %v8152_v54 = vld [vmem:[%s11961_s1 + $0x604] sm:$0xf0] }
  0x80   : > { %3060 = vmatpush.bf16.msra.mxu2 %v6211_v1  ;;  %v8176_v1 = vld [vmem:[%s11961_s1 + $0x6c4] sm:$0xf0]  ;;  %v8202_v52 = vld [vmem:[%s11961_s1 + $0x794] sm:$0xf0]  ;;  %v6467_v62 = vor.u32 %v8186_v50, %v6466_v48 }
  0x81   : > { %3074 = vmatpush.bf16.msra.mxu3 %v6275_v6  ;;  %v8208_v6 = vld [vmem:[%s11961_s1 + $0x7c4] sm:$0xf0]  ;;  %v6427_v8 = vor.u32 %v8176_v1, %v6426_v63  ;;  %v6642_v63 = vld [vmem:[%s11961_s1 + $0x870] sm:$0xf] }
  0x82   : > { %3033 = vmatpush.bf16.msra.mxu0 %v6075_v11  ;;  %v6354_v11 = vld [vmem:[%s11961_s1 + $0x630] sm:$0xf]  ;;  %v6555_v14 = vor.u32 %v8208_v6, %v6554_v5  ;;  %v8262_v6 = vld [vmem:[%s11961_s1 + $0x974] sm:$0xf0]  ;;  %v8276_v48 = vld [vmem:[%s11961_s1 + $0x9e4] sm:$0xf0] }
  0x83   : > { %3047 = vmatpush.bf16.msra.mxu1 %v6139_v16  ;;  %v8174_v16 = vld [vmem:[%s11961_s1 + $0x6b4] sm:$0xf0]  ;;  %v6706_v1 = vld [vmem:[%s11961_s1 + $0x8f0] sm:$0xf] }
  0x84   : > { %3061 = vmatpush.bf16.msra.mxu2 %v6203_v21  ;;  %v6355_v21 = vor.u32 %v8158_v12, %v6354_v11  ;;  %v6770_v5 = vld [vmem:[%s11961_s1 + $0x970] sm:$0xf]  ;;  %v6331_v11 = vor.u32 %v8152_v54, %v6330_v53  ;;  %v7952_v12 = vld [vmem:[%s8670_s11 + $0x90] sm:$0xf0]  ;;  %v8226_v53 = vld [vmem:[%s11961_s1 + $0x854] sm:$0xf0] }
  0x85   : > { %3075 = vmatpush.bf16.msra.mxu3 %v6267_v27  ;;  %3034 = vmatmul.bf16.vlgmr.msra.gmra.mxu0 %v9335_v31  ;;  %v6547_v27 = vor.u32 %v8206_v20, %v6546_v19  ;;  %v8278_v19 = vld [vmem:[%s11961_s1 + $0x9f4] sm:$0xf0]  ;;  %v7940_v20 = vld [vmem:[%s8670_s11 + $0x34] sm:$0xf]  ;;  %v6690_v54 = vld [vmem:[%s11961_s1 + $0x8d0] sm:$0xf] }
  0x86   : > { %3082 = vmatpush.bf16.msrb.mxu0 %v6387_v17  ;;  %3048 = vmatmul.bf16.vlgmr.msra.gmra.mxu1 %v9348_v38  ;;  %v6482_v17 = vld [vmem:[%s11961_s1 + $0x730] sm:$0xf] }
  0x87   : > { %3096 = vmatpush.bf16.msrb.mxu1 %v6451_v22  ;;  %3062 = vmatmul.bf16.vlgmr.msra.gmra.mxu2 %v9346_v36  ;;  %v6419_v22 = vor.u32 %v8174_v16, %v6418_v13  ;;  %v6483_v23 = vor.u32 %v8190_v18, %v6482_v17  ;;  %v5518_v13 = vld [vmem:[%s8670_s11 + $0x38] sm:$0xf]  ;;  %v6834_v18 = vld [vmem:[%s11961_s1 + $0x9f0] sm:$0xf] }
  0x88   : > { %3110 = vmatpush.bf16.msrb.mxu2 %v6515_v26  ;;  %3076 = vmatmul.bf16.vlgmr.msra.gmra.mxu3 %v9356_v42  ;;  %v6410_v26 = vld [vmem:[%s11961_s1 + $0x6a0] sm:$0xf] }
  0x89   : > { %3124 = vmatpush.bf16.msrb.mxu3 %v6579_v32  ;;  %v6538_v32 = vld [vmem:[%s11961_s1 + $0x7a0] sm:$0xf]  ;;  %v6411_v39 = vor.u32 %v8172_v28, %v6410_v26  ;;  %v6771_v26 = vor.u32 %v8262_v6, %v6770_v5  ;;  %v8240_v5 = vld [vmem:[%s11961_s1 + $0x8c4] sm:$0xf0] }
  0x8a   : > { %3083 = vmatpush.bf16.msrb.mxu0 %v6379_v43  ;;  %v8154_v43 = vld [vmem:[%s11961_s1 + $0x614] sm:$0xf0]  ;;  %v6539_v47 = vor.u32 %v8204_v33, %v6538_v32  ;;  %v6634_v28 = vld [vmem:[%s11961_s1 + $0x860] sm:$0xf] }
  0x8b   : > { %3097 = vmatpush.bf16.msrb.mxu1 %v6443_v44  ;;  %v6402_v44 = vld [vmem:[%s11961_s1 + $0x690] sm:$0xf]  ;;  %v6339_v55 = vor.u32 %v8154_v43, %v6338_v35  ;;  %v6762_v35 = vld [vmem:[%s11961_s1 + $0x960] sm:$0xf] }
  0x8c   : > { %3111 = vmatpush.bf16.msrb.mxu2 %v6507_v46  ;;  %v8170_v46 = vld [vmem:[%s11961_s1 + $0x694] sm:$0xf0]  ;;  %v6746_v6 = vld [vmem:[%s11961_s1 + $0x940] sm:$0xf] }
  0x8d   : > { %3125 = vmatpush.bf16.msrb.mxu3 %v6571_v51  ;;  %v6530_v51 = vld [vmem:[%s11961_s1 + $0x790] sm:$0xf]  ;;  %v6403_v60 = vor.u32 %v8170_v46, %v6402_v44  ;;  %v9562_v44 = vor.u32 %v7941_v24, %v5520_v25  ;;  %v6635_v46 = vor.u32 %v8228_v29, %v6634_v28  ;;  %v8270_v25 = vld [vmem:[%s11961_s1 + $0x9b4] sm:$0xf0]  ;;  %v6602_v28 = vld [vmem:[%s11961_s1 + $0x820] sm:$0xf] }
  0x8e   : > { %3084 = vmatpush.bf16.msrb.mxu0 %v6371_v57  ;;  %v8168_v57 = vld [vmem:[%s11961_s1 + $0x684] sm:$0xf0]  ;;  %v6531_v2 = vor.u32 %v8202_v52, %v6530_v51  ;;  %v6626_v52 = vld [vmem:[%s11961_s1 + $0x850] sm:$0xf] }
  0x8f   : > { %3098 = vmatpush.bf16.msrb.mxu1 %v6435_v58  ;;  %v6458_v58 = vld [vmem:[%s11961_s1 + $0x700] sm:$0xf]  ;;  %v6395_v16 = vor.u32 %v8168_v57, %v6394_v56  ;;  %v6754_v56 = vld [vmem:[%s11961_s1 + $0x950] sm:$0xf]  ;;  %v8258_v57 = vld [vmem:[%s11961_s1 + $0x954] sm:$0xf0] }
  0x90   : > { %3112 = vmatpush.bf16.msrb.mxu2 %v6499_v59  ;;  %v8184_v59 = vld [vmem:[%s11961_s1 + $0x704] sm:$0xf0]  ;;  %v6802_v24 = vld [vmem:[%s11961_s1 + $0x9b0] sm:$0xf] }
  0x91   : > { %3126 = vmatpush.bf16.msrb.mxu3 %v6563_v0  ;;  %v8230_v0 = vld [vmem:[%s11961_s1 + $0x874] sm:$0xf0]  ;;  %v6459_v17 = vor.u32 %v8184_v59, %v6458_v58  ;;  %v6627_v59 = vor.u32 %v8226_v53, %v6626_v52  ;;  %v8220_v29 = vld [vmem:[%s11961_s1 + $0x824] sm:$0xf0] }
  0x92   : > { %3085 = vmatpush.bf16.msrb.mxu0 %v6363_v7  ;;  %v6522_v7 = vld [vmem:[%s11961_s1 + $0x780] sm:$0xf]  ;;  %v8218_v53 = vld [vmem:[%s11961_s1 + $0x814] sm:$0xf0] }
  0x93   : > { %3099 = vmatpush.bf16.msrb.mxu1 %v6427_v8  ;;  %v8200_v8 = vld [vmem:[%s11961_s1 + $0x784] sm:$0xf0] }
  0x94   : > { %3113 = vmatpush.bf16.msrb.mxu2 %v6491_v10  ;;  %v5510_v10 = vld [vmem:[%s8670_s11 + $0x30] sm:$0xf] }
  0x95   : > { %3127 = vmatpush.bf16.msrb.mxu3 %v6555_v14  ;;  %v7953_v14 = vld [vmem:[%s8670_s11 + $0x98] sm:$0xf0]  ;;  %v9547_v32 = vor.u32 %v7952_v12, %v5510_v10  ;;  %v8272_v12 = vld [vmem:[%s11961_s1 + $0x9c4] sm:$0xf0] }
  0x96   : > { %3086 = vmatpush.bf16.msrb.mxu0 %v6355_v21  ;;  %v6643_v21 = vor.u32 %v8230_v0, %v6642_v63  ;;  %v9549_v33 = vor.u32 %v7953_v14, %v5518_v13  ;;  %v6755_v0 = vor.u32 %v8258_v57, %v6754_v56  ;;  %v6722_v56 = vld [vmem:[%s11961_s1 + $0x910] sm:$0xf]  ;;  %v8250_v57 = vld [vmem:[%s11961_s1 + $0x914] sm:$0xf0] }
  0x97   : > { %3100 = vmatpush.bf16.msrb.mxu1 %v6419_v22  ;;  %v6707_v22 = vor.u32 %v8246_v4, %v6706_v1  ;;  %v6618_v1 = vld [vmem:[%s11961_s1 + $0x840] sm:$0xf] }
  0x98   : > { %3114 = vmatpush.bf16.msrb.mxu2 %v6483_v23  ;;  %v5512_v23 = vld [vmem:[%s8670_s11 + $0x94] sm:$0xf0]  ;;  %v6682_v4 = vld [vmem:[%s11961_s1 + $0x8c0] sm:$0xf] }
  0x99   : > { %3128 = vmatpush.bf16.msrb.mxu3 %v6547_v27  ;;  %v6523_v27 = vor.u32 %v8200_v8, %v6522_v7  ;;  %v9560_v43 = vor.u32 %v7940_v20, %v5512_v23  ;;  %v8256_v7 = vld [vmem:[%s11961_s1 + $0x944] sm:$0xf0]  ;;  %v6683_v13 = vor.u32 %v8240_v5, %v6682_v4  ;;  %v6738_v20 = vld [vmem:[%s11961_s1 + $0x930] sm:$0xf]  ;;  %v6714_v4 = vld [vmem:[%s11961_s1 + $0x900] sm:$0xf] }
  0x9a   : > { %3087 = vmatpush.bf16.msrb.mxu0 %v6347_v34  ;;  %v8244_v34 = vld [vmem:[%s11961_s1 + $0x8e4] sm:$0xf0]  ;;  %v6747_v14 = vor.u32 %v8256_v7, %v6746_v6  ;;  %v6723_v7 = vor.u32 %v8250_v57, %v6722_v56 }
  0x9b   : > { %3101 = vmatpush.bf16.msrb.mxu1 %v6411_v39  ;;  %v8260_v39 = vld [vmem:[%s11961_s1 + $0x964] sm:$0xf0]  ;;  %v6699_v50 = vor.u32 %v8244_v34, %v6698_v30  ;;  %v6666_v30 = vld [vmem:[%s11961_s1 + $0x8a0] sm:$0xf] }
  0x9c   : > { %3115 = vmatpush.bf16.msrb.mxu2 %v6475_v40  ;;  %v6835_v40 = vor.u32 %v8278_v19, %v6834_v18  ;;  %v6763_v51 = vor.u32 %v8260_v39, %v6762_v35  ;;  %v6674_v18 = vld [vmem:[%s11961_s1 + $0x8b0] sm:$0xf]  ;;  %v8238_v19 = vld [vmem:[%s11961_s1 + $0x8b4] sm:$0xf0]  ;;  %v8236_v34 = vld [vmem:[%s11961_s1 + $0x8a4] sm:$0xf0] }
  0x9d   : > { %3129 = vmatpush.bf16.msrb.mxu3 %v6539_v47  ;;  %v6826_v47 = vld [vmem:[%s11961_s1 + $0x9e0] sm:$0xf]  ;;  %v8252_v39 = vld [vmem:[%s11961_s1 + $0x924] sm:$0xf0] }
  0x9e   : > { %3088 = vmatpush.bf16.msrb.mxu0 %v6339_v55  ;;  %v8242_v55 = vld [vmem:[%s11961_s1 + $0x8d4] sm:$0xf0]  ;;  %v6827_v58 = vor.u32 %v8276_v48, %v6826_v47  ;;  %v6730_v35 = vld [vmem:[%s11961_s1 + $0x920] sm:$0xf]  ;;  %v8268_v48 = vld [vmem:[%s11961_s1 + $0x9a4] sm:$0xf0] }
  0x9f   : > { %3102 = vmatpush.bf16.msrb.mxu1 %v6403_v60  ;;  %v6818_v60 = vld [vmem:[%s11961_s1 + $0x9d0] sm:$0xf]  ;;  %v6691_v63 = vor.u32 %v8242_v55, %v6690_v54  ;;  %v6794_v47 = vld [vmem:[%s11961_s1 + $0x9a0] sm:$0xf]  ;;  %v6731_v52 = vor.u32 %v8252_v39, %v6730_v35  ;;  %v8234_v55 = vld [vmem:[%s11961_s1 + $0x894] sm:$0xf0] }
  0xa0   : > { %3116 = vmatpush.bf16.msrb.mxu2 %v6467_v62  ;;  %v8274_v62 = vld [vmem:[%s11961_s1 + $0x9d4] sm:$0xf0]  ;;  %v6658_v54 = vld [vmem:[%s11961_s1 + $0x890] sm:$0xf]  ;;  %v8248_v5 = vld [vmem:[%s11961_s1 + $0x904] sm:$0xf0] }
  0xa1   : > { %3130 = vmatpush.bf16.msrb.mxu3 %v6531_v2  ;;  %v8224_v2 = vld [vmem:[%s11961_s1 + $0x844] sm:$0xf0]  ;;  %v6819_v8 = vor.u32 %v8274_v62, %v6818_v60  ;;  %v8266_v60 = vld [vmem:[%s11961_s1 + $0x994] sm:$0xf0]  ;;  %v6586_v62 = vld [vmem:[%s11961_s1 + $0x800] sm:$0xf]  ;;  %v6659_v6 = vor.u32 %v8234_v55, %v6658_v54 }
  0xa2   : > { %3089 = vmatpush.bf16.msrb.mxu0 %v6331_v11  ;;  %v6619_v10 = vor.u32 %v8224_v2, %v6618_v1  ;;  %v6810_v11 = vld [vmem:[%s11961_s1 + $0x9c0] sm:$0xf]  ;;  %v8232_v2 = vld [vmem:[%s11961_s1 + $0x884] sm:$0xf0]  ;;  %v7943_v35 = vld [vmem:[%s8670_s11 + $0x4c] sm:$0xf] }
  0xa3   : > { %3103 = vmatpush.bf16.msrb.mxu1 %v6395_v16  ;;  %v6610_v16 = vld [vmem:[%s11961_s1 + $0x830] sm:$0xf]  ;;  %v6650_v1 = vld [vmem:[%s11961_s1 + $0x880] sm:$0xf]  ;;  %v8324_v55 = vld [vmem:[%s11961_s1 + $0xb64] sm:$0xf0] }
  0xa4   : > { %3117 = vmatpush.bf16.msrb.mxu2 %v6459_v17  ;;  %v8222_v17 = vld [vmem:[%s11961_s1 + $0x834] sm:$0xf0]  ;;  %v5536_v39 = vld [vmem:[%s8670_s11 + $0xac] sm:$0xf0]  ;;  %v7018_v54 = vld [vmem:[%s11961_s1 + $0xb60] sm:$0xf] }
  0xa5   : > { %3131 = vmatpush.bf16.msrb.mxu3 %v6523_v27  ;;  %3090 = vmatmul.bf16.vlgmr.msrb.gmra.mxu0 %v9547_v32  ;;  %v6611_v23 = vor.u32 %v8222_v17, %v6610_v16  ;;  %v6778_v17 = vld [vmem:[%s11961_s1 + $0x980] sm:$0xf] }
  0xa6   : > { %3138 = vmatpush.bf16.msra.mxu0 %v6643_v21  ;;  %3104 = vmatmul.bf16.vlgmr.msrb.gmra.mxu1 %v9560_v43  ;;  %v8254_v21 = vld [vmem:[%s11961_s1 + $0x934] sm:$0xf0] }
  0xa7   : > { %3152 = vmatpush.bf16.msra.mxu1 %v6707_v22  ;;  %3118 = vmatmul.bf16.vlgmr.msrb.gmra.mxu2 %v9549_v33  ;;  %v6811_v22 = vor.u32 %v8272_v12, %v6810_v11  ;;  %v6739_v27 = vor.u32 %v8254_v21, %v6738_v20  ;;  %v6962_v11 = vld [vmem:[%s11961_s1 + $0xaf0] sm:$0xf]  ;;  %v8310_v12 = vld [vmem:[%s11961_s1 + $0xaf4] sm:$0xf0]  ;;  %v7954_v21 = vld [vmem:[%s8670_s11 + $0xa0] sm:$0xf0] }
  0xa8   : > { %3166 = vmatpush.bf16.msra.mxu2 %v6771_v26  ;;  %3132 = vmatmul.bf16.vlgmr.msrb.gmra.mxu3 %v9562_v44  ;;  %v6675_v26 = vor.u32 %v8238_v19, %v6674_v18  ;;  %v8264_v18 = vld [vmem:[%s11961_s1 + $0x984] sm:$0xf0]  ;;  %v5526_v19 = vld [vmem:[%s8670_s11 + $0x40] sm:$0xf] }
  0xa9   : > { %3180 = vmatpush.bf16.msra.mxu3 %v6835_v40  ;;  %v6803_v40 = vor.u32 %v8270_v25, %v6802_v24  ;;  %v6651_v24 = vor.u32 %v8232_v2, %v6650_v1  ;;  %v6715_v25 = vor.u32 %v8248_v5, %v6714_v4  ;;  %v6882_v1 = vld [vmem:[%s11961_s1 + $0xa50] sm:$0xf]  ;;  %v8290_v2 = vld [vmem:[%s11961_s1 + $0xa54] sm:$0xf0] }
  0xaa   : > { %3139 = vmatpush.bf16.msra.mxu0 %v6635_v46  ;;  %v6603_v46 = vor.u32 %v8220_v29, %v6602_v28  ;;  %v7942_v28 = vld [vmem:[%s8670_s11 + $0x44] sm:$0xf]  ;;  %v6946_v4 = vld [vmem:[%s11961_s1 + $0xad0] sm:$0xf]  ;;  %v8306_v5 = vld [vmem:[%s11961_s1 + $0xad4] sm:$0xf0] }
  0xab   : > { %3153 = vmatpush.bf16.msra.mxu1 %v6699_v50  ;;  %v6594_v50 = vld [vmem:[%s11961_s1 + $0x810] sm:$0xf] }
  0xac   : > { %3167 = vmatpush.bf16.msra.mxu2 %v6763_v51  ;;  %v6667_v51 = vor.u32 %v8236_v34, %v6666_v30  ;;  %v6963_v30 = vor.u32 %v8310_v12, %v6962_v11  ;;  %v5528_v34 = vld [vmem:[%s8670_s11 + $0xa4] sm:$0xf0]  ;;  %v7074_v11 = vld [vmem:[%s11961_s1 + $0xbd0] sm:$0xf]  ;;  %v8338_v12 = vld [vmem:[%s11961_s1 + $0xbd4] sm:$0xf0] }
  0xad   : > { %3181 = vmatpush.bf16.msra.mxu3 %v6827_v58  ;;  %v6786_v58 = vld [vmem:[%s11961_s1 + $0x990] sm:$0xf]  ;;  %v9772_v57 = vor.u32 %v7942_v28, %v5528_v34  ;;  %v8302_v34 = vld [vmem:[%s11961_s1 + $0xab4] sm:$0xf0] }
  0xae   : > { %3140 = vmatpush.bf16.msra.mxu0 %v6627_v59  ;;  %v6795_v59 = vor.u32 %v8268_v48, %v6794_v47  ;;  %v6787_v16 = vor.u32 %v8266_v60, %v6786_v58  ;;  %v6890_v47 = vld [vmem:[%s11961_s1 + $0xa60] sm:$0xf]  ;;  %v8292_v48 = vld [vmem:[%s11961_s1 + $0xa64] sm:$0xf0]  ;;  %v9774_v58 = vor.u32 %v7943_v35, %v5536_v39  ;;  %v6866_v28 = vld [vmem:[%s11961_s1 + $0xa30] sm:$0xf] }
  0xaf   : > { %3154 = vmatpush.bf16.msra.mxu1 %v6691_v63  ;;  %v8216_v63 = vld [vmem:[%s11961_s1 + $0x804] sm:$0xf0]  ;;  %v7082_v60 = vld [vmem:[%s11961_s1 + $0xbe0] sm:$0xf]  ;;  %v6994_v35 = vld [vmem:[%s11961_s1 + $0xb30] sm:$0xf] }
  0xb0   : > { %3168 = vmatpush.bf16.msra.mxu2 %v6755_v0  ;;  %v6595_v0 = vor.u32 %v8218_v53, %v6594_v50  ;;  %v6587_v20 = vor.u32 %v8216_v63, %v6586_v62  ;;  %v6954_v50 = vld [vmem:[%s11961_s1 + $0xae0] sm:$0xf]  ;;  %v8308_v53 = vld [vmem:[%s11961_s1 + $0xae4] sm:$0xf0]  ;;  %v8318_v39 = vld [vmem:[%s11961_s1 + $0xb34] sm:$0xf0] }
  0xb1   : > { %3182 = vmatpush.bf16.msra.mxu3 %v6819_v8  ;;  %v6898_v8 = vld [vmem:[%s11961_s1 + $0xa70] sm:$0xf]  ;;  %v8340_v62 = vld [vmem:[%s11961_s1 + $0xbe4] sm:$0xf0]  ;;  %v6955_v63 = vor.u32 %v8308_v53, %v6954_v50  ;;  %v6995_v53 = vor.u32 %v8318_v39, %v6994_v35  ;;  %v7034_v39 = vld [vmem:[%s11961_s1 + $0xb80] sm:$0xf] }
  0xb2   : > { %3141 = vmatpush.bf16.msra.mxu0 %v6619_v10  ;;  %v8294_v10 = vld [vmem:[%s11961_s1 + $0xa74] sm:$0xf0] }
  0xb3   : > { %3155 = vmatpush.bf16.msra.mxu1 %v6683_v13  ;;  %v7026_v13 = vld [vmem:[%s11961_s1 + $0xb70] sm:$0xf]  ;;  %v6899_v29 = vor.u32 %v8294_v10, %v6898_v8  ;;  %v7083_v8 = vor.u32 %v8340_v62, %v7082_v60  ;;  %v6883_v10 = vor.u32 %v8290_v2, %v6882_v1  ;;  %v6986_v60 = vld [vmem:[%s11961_s1 + $0xb20] sm:$0xf]  ;;  %v8316_v62 = vld [vmem:[%s11961_s1 + $0xb24] sm:$0xf0] }
  0xb4   : > { %3169 = vmatpush.bf16.msra.mxu2 %v6747_v14  ;;  %v8326_v14 = vld [vmem:[%s11961_s1 + $0xb74] sm:$0xf0]  ;;  %v7050_v1 = vld [vmem:[%s11961_s1 + $0xba0] sm:$0xf]  ;;  %v8332_v2 = vld [vmem:[%s11961_s1 + $0xba4] sm:$0xf0] }
  0xb5   : > { %3183 = vmatpush.bf16.msra.mxu3 %v6811_v22  ;;  %v5534_v22 = vld [vmem:[%s8670_s11 + $0x48] sm:$0xf] }
  0xb6   : > { %3142 = vmatpush.bf16.msra.mxu0 %v6611_v23  ;;  %v7955_v23 = vld [vmem:[%s8670_s11 + $0xa8] sm:$0xf0] }
  0xb7   : > { %3156 = vmatpush.bf16.msra.mxu1 %v6675_v26  ;;  %v7090_v26 = vld [vmem:[%s11961_s1 + $0xbf0] sm:$0xf] }
  0xb8   : > { %3170 = vmatpush.bf16.msra.mxu2 %v6739_v27  ;;  %v8342_v27 = vld [vmem:[%s11961_s1 + $0xbf4] sm:$0xf0] }
  0xb9   : > { %3184 = vmatpush.bf16.msra.mxu3 %v6803_v40  ;;  %v7027_v40 = vor.u32 %v8326_v14, %v7026_v13  ;;  %v7091_v56 = vor.u32 %v8342_v27, %v7090_v26  ;;  %v6947_v13 = vor.u32 %v8306_v5, %v6946_v4  ;;  %v6850_v4 = vld [vmem:[%s11961_s1 + $0xa10] sm:$0xf] }
  0xba   : > { %3143 = vmatpush.bf16.msra.mxu0 %v6603_v46  ;;  %v6779_v46 = vor.u32 %v8264_v18, %v6778_v17  ;;  %v8288_v17 = vld [vmem:[%s11961_s1 + $0xa44] sm:$0xf0]  ;;  %v6938_v18 = vld [vmem:[%s11961_s1 + $0xac0] sm:$0xf] }
  0xbb   : > { %3157 = vmatpush.bf16.msra.mxu1 %v6667_v51  ;;  %v9759_v51 = vor.u32 %v7954_v21, %v5526_v19  ;;  %v8304_v19 = vld [vmem:[%s11961_s1 + $0xac4] sm:$0xf0] }
  0xbc   : > { %3171 = vmatpush.bf16.msra.mxu2 %v6731_v52  ;;  %v9761_v52 = vor.u32 %v7955_v23, %v5534_v22  ;;  %v8320_v21 = vld [vmem:[%s11961_s1 + $0xb44] sm:$0xf0]  ;;  %v7075_v22 = vor.u32 %v8338_v12, %v7074_v11  ;;  %v6939_v26 = vor.u32 %v8304_v19, %v6938_v18  ;;  %v6978_v11 = vld [vmem:[%s11961_s1 + $0xb10] sm:$0xf]  ;;  %v8314_v12 = vld [vmem:[%s11961_s1 + $0xb14] sm:$0xf0] }
  0xbd   : > { %3185 = vmatpush.bf16.msra.mxu3 %v6795_v59  ;;  %v6891_v59 = vor.u32 %v8292_v48, %v6890_v47  ;;  %v7058_v47 = vld [vmem:[%s11961_s1 + $0xbb0] sm:$0xf]  ;;  %v8334_v48 = vld [vmem:[%s11961_s1 + $0xbb4] sm:$0xf0]  ;;  %v8280_v18 = vld [vmem:[%s11961_s1 + $0xa04] sm:$0xf0] }
  0xbe   : > { %3144 = vmatpush.bf16.msra.mxu0 %v6595_v0  ;;  %v7019_v0 = vor.u32 %v8324_v55, %v7018_v54  ;;  %v6858_v54 = vld [vmem:[%s11961_s1 + $0xa20] sm:$0xf]  ;;  %v8284_v55 = vld [vmem:[%s11961_s1 + $0xa24] sm:$0xf0] }
  0xbf   : > { %3158 = vmatpush.bf16.msra.mxu1 %v6659_v6  ;;  %v7010_v6 = vld [vmem:[%s11961_s1 + $0xb50] sm:$0xf] }
  0xc0   : > { %3172 = vmatpush.bf16.msra.mxu2 %v6723_v7  ;;  %v8322_v7 = vld [vmem:[%s11961_s1 + $0xb54] sm:$0xf0] }
  0xc1   : > { %3186 = vmatpush.bf16.msra.mxu3 %v6787_v16  ;;  %v7011_v14 = vor.u32 %v8322_v7, %v7010_v6  ;;  %v6874_v16 = vld [vmem:[%s11961_s1 + $0xa40] sm:$0xf]  ;;  %v6987_v6 = vor.u32 %v8316_v62, %v6986_v60  ;;  %v8282_v7 = vld [vmem:[%s11961_s1 + $0xa14] sm:$0xf0]  ;;  %v7944_v60 = vld [vmem:[%s8670_s11 + $0x54] sm:$0xf] }
  0xc2   : > { %3145 = vmatpush.bf16.msra.mxu0 %v6587_v20  ;;  %v7002_v20 = vld [vmem:[%s11961_s1 + $0xb40] sm:$0xf]  ;;  %v6875_v23 = vor.u32 %v8288_v17, %v6874_v16  ;;  %v8330_v16 = vld [vmem:[%s11961_s1 + $0xb94] sm:$0xf0]  ;;  %v6851_v19 = vor.u32 %v8282_v7, %v6850_v4  ;;  %v8356_v7 = vld [vmem:[%s11961_s1 + $0xc64] sm:$0xf0] }
  0xc3   : > { %3159 = vmatpush.bf16.msra.mxu1 %v6651_v24  ;;  %v7066_v24 = vld [vmem:[%s11961_s1 + $0xbc0] sm:$0xf]  ;;  %v7003_v27 = vor.u32 %v8320_v21, %v7002_v20  ;;  %v8296_v21 = vld [vmem:[%s11961_s1 + $0xa84] sm:$0xf0] }
  0xc4   : > { %3173 = vmatpush.bf16.msra.mxu2 %v6715_v25  ;;  %v8336_v25 = vld [vmem:[%s11961_s1 + $0xbc4] sm:$0xf0]  ;;  %v6842_v17 = vld [vmem:[%s11961_s1 + $0xa00] sm:$0xf] }
  0xc5   : > { %3187 = vmatpush.bf16.msra.mxu3 %v6779_v46  ;;  %3146 = vmatmul.bf16.vlgmr.msra.gmra.mxu0 %v9759_v51  ;;  %v6906_v20 = vld [vmem:[%s11961_s1 + $0xa80] sm:$0xf] }
  0xc6   : > { %3194 = vmatpush.bf16.msrb.mxu0 %v6899_v29  ;;  %3160 = vmatmul.bf16.vlgmr.msra.gmra.mxu1 %v9772_v57  ;;  %v8286_v29 = vld [vmem:[%s11961_s1 + $0xa34] sm:$0xf0] }
  0xc7   : > { %3208 = vmatpush.bf16.msrb.mxu1 %v6963_v30  ;;  %3174 = vmatmul.bf16.vlgmr.msra.gmra.mxu2 %v9761_v52  ;;  %v6930_v30 = vld [vmem:[%s11961_s1 + $0xab0] sm:$0xf]  ;;  %v6867_v46 = vor.u32 %v8286_v29, %v6866_v28  ;;  %v7973_v28 = vld [vmem:[%s11961_s1 + $0x74] sm:$0xf]  ;;  %v5620_v29 = vld [vmem:[%s11961_s1 + $0x78] sm:$0xf0] }
  0xc8   : > { %3222 = vmatpush.bf16.msrb.mxu2 %v7027_v40  ;;  %3188 = vmatmul.bf16.vlgmr.msra.gmra.mxu3 %v9774_v58  ;;  %v7067_v40 = vor.u32 %v8336_v25, %v7066_v24  ;;  %v6931_v50 = vor.u32 %v8302_v34, %v6930_v30  ;;  %v6979_v25 = vor.u32 %v8314_v12, %v6978_v11  ;;  %v7989_v30 = vld [vmem:[%s11961_s1 + $0xf4] sm:$0xf]  ;;  %v5684_v34 = vld [vmem:[%s11961_s1 + $0xf8] sm:$0xf0]  ;;  %v5612_v12 = vld [vmem:[%s11961_s1 + $0x68] sm:$0xf0] }
  0xc9   : > { %3236 = vmatpush.bf16.msrb.mxu3 %v7091_v56  ;;  %v6922_v56 = vld [vmem:[%s11961_s1 + $0xaa0] sm:$0xf]  ;;  %v5687_v4 = vor.u32 %v7989_v30, %v5684_v34 }
  0xca   : > { %3195 = vmatpush.bf16.msrb.mxu0 %v6891_v59  ;;  %v8300_v59 = vld [vmem:[%s11961_s1 + $0xaa4] sm:$0xf0] }
  0xcb   : > { %3209 = vmatpush.bf16.msrb.mxu1 %v6955_v63  ;;  %v7059_v63 = vor.u32 %v8334_v48, %v7058_v47  ;;  %v6923_v5 = vor.u32 %v8300_v59, %v6922_v56  ;;  %v6843_v47 = vor.u32 %v8280_v18, %v6842_v17  ;;  %v7956_v48 = vld [vmem:[%s8670_s11 + $0xb0] sm:$0xf0]  ;;  %v5748_v59 = vld [vmem:[%s11961_s1 + $0x178] sm:$0xf0] }
  0xcc   : > { %3223 = vmatpush.bf16.msrb.mxu2 %v7019_v0  ;;  %v6859_v0 = vor.u32 %v8284_v55, %v6858_v54  ;;  %v6907_v54 = vor.u32 %v8296_v21, %v6906_v20  ;;  %v8005_v56 = vld [vmem:[%s11961_s1 + $0x174] sm:$0xf]  ;;  %v8003_v20 = vld [vmem:[%s11961_s1 + $0x164] sm:$0xf]  ;;  %v5740_v21 = vld [vmem:[%s11961_s1 + $0x168] sm:$0xf0] }
  0xcd   : > { %3237 = vmatpush.bf16.msrb.mxu3 %v7083_v8  ;;  %v6914_v8 = vld [vmem:[%s11961_s1 + $0xa90] sm:$0xf]  ;;  %v5743_v30 = vor.u32 %v8003_v20, %v5740_v21  ;;  %v7114_v20 = vld [vmem:[%s11961_s1 + $0xc20] sm:$0xf]  ;;  %v8348_v21 = vld [vmem:[%s11961_s1 + $0xc24] sm:$0xf0] }
  0xce   : > { %3196 = vmatpush.bf16.msrb.mxu0 %v6883_v10  ;;  %v8298_v10 = vld [vmem:[%s11961_s1 + $0xa94] sm:$0xf0] }
  0xcf   : > { %3210 = vmatpush.bf16.msrb.mxu1 %v6947_v13  ;;  %v7042_v13 = vld [vmem:[%s11961_s1 + $0xb90] sm:$0xf]  ;;  %v6915_v24 = vor.u32 %v8298_v10, %v6914_v8  ;;  %v7971_v8 = vld [vmem:[%s11961_s1 + $0x64] sm:$0xf] }
  0xd0   : > { %3224 = vmatpush.bf16.msrb.mxu2 %v7011_v14  ;;  %v7051_v14 = vor.u32 %v8332_v2, %v7050_v1  ;;  %v7043_v35 = vor.u32 %v8330_v16, %v7042_v13  ;;  %v7945_v1 = vld [vmem:[%s8670_s11 + $0x5c] sm:$0xf]  ;;  %v5552_v2 = vld [vmem:[%s8670_s11 + $0xbc] sm:$0xf0]  ;;  %v7987_v13 = vld [vmem:[%s11961_s1 + $0xe4] sm:$0xf]  ;;  %v5751_v16 = vor.u32 %v8005_v56, %v5748_v59 }
  0xd1   : > { %3238 = vmatpush.bf16.msrb.mxu3 %v7075_v22  ;;  %v6970_v22 = vld [vmem:[%s11961_s1 + $0xb00] sm:$0xf]  ;;  %v9986_v18 = vor.u32 %v7945_v1, %v5552_v2  ;;  %v7122_v1 = vld [vmem:[%s11961_s1 + $0xc30] sm:$0xf]  ;;  %v8350_v2 = vld [vmem:[%s11961_s1 + $0xc34] sm:$0xf0] }
  0xd2   : > { %3197 = vmatpush.bf16.msrb.mxu0 %v6875_v23  ;;  %v8312_v23 = vld [vmem:[%s11961_s1 + $0xb04] sm:$0xf0] }
  0xd3   : > { %3211 = vmatpush.bf16.msrb.mxu1 %v6939_v26  ;;  %v7154_v26 = vld [vmem:[%s11961_s1 + $0xc70] sm:$0xf]  ;;  %v6971_v55 = vor.u32 %v8312_v23, %v6970_v22  ;;  %v5615_v22 = vor.u32 %v7971_v8, %v5612_v12  ;;  %v7123_v12 = vor.u32 %v8350_v2, %v7122_v1  ;;  %v7975_v1 = vld [vmem:[%s11961_s1 + $0x84] sm:$0xf]  ;;  %v5628_v2 = vld [vmem:[%s11961_s1 + $0x88] sm:$0xf0] }
  0xd4   : > { %3225 = vmatpush.bf16.msrb.mxu2 %v7003_v27  ;;  %v8358_v27 = vld [vmem:[%s11961_s1 + $0xc74] sm:$0xf0] }
  0xd5   : > { %3239 = vmatpush.bf16.msrb.mxu3 %v7067_v40  ;;  %v8328_v40 = vld [vmem:[%s11961_s1 + $0xb84] sm:$0xf0]  ;;  %v7155_v62 = vor.u32 %v8358_v27, %v7154_v26  ;;  %v7969_v26 = vld [vmem:[%s11961_s1 + $0x54] sm:$0xf]  ;;  %v5604_v27 = vld [vmem:[%s11961_s1 + $0x58] sm:$0xf0] }
  0xd6   : > { %3198 = vmatpush.bf16.msrb.mxu0 %v6867_v46  ;;  %v5542_v46 = vld [vmem:[%s8670_s11 + $0x50] sm:$0xf] }
  0xd7   : > { %3212 = vmatpush.bf16.msrb.mxu1 %v6931_v50  ;;  %v5550_v50 = vld [vmem:[%s8670_s11 + $0x58] sm:$0xf]  ;;  %v9971_v10 = vor.u32 %v7956_v48, %v5542_v46  ;;  %v8352_v48 = vld [vmem:[%s11961_s1 + $0xc44] sm:$0xf0] }
  0xd8   : > { %3226 = vmatpush.bf16.msrb.mxu2 %v6995_v53  ;;  %v7957_v53 = vld [vmem:[%s8670_s11 + $0xb8] sm:$0xf0] }
  0xd9   : > { %3240 = vmatpush.bf16.msrb.mxu3 %v7059_v63  ;;  %v5623_v63 = vor.u32 %v7973_v28, %v5620_v29  ;;  %v9973_v11 = vor.u32 %v7957_v53, %v5550_v50  ;;  %v7985_v28 = vld [vmem:[%s11961_s1 + $0xd4] sm:$0xf]  ;;  %v5668_v29 = vld [vmem:[%s11961_s1 + $0xd8] sm:$0xf0]  ;;  %v7967_v50 = vld [vmem:[%s11961_s1 + $0x44] sm:$0xf] }
  0xda   : > { %3199 = vmatpush.bf16.msrb.mxu0 %v6859_v0  ;;  %v5544_v0 = vld [vmem:[%s8670_s11 + $0xb4] sm:$0xf0]  ;;  %v5671_v46 = vor.u32 %v7985_v28, %v5668_v29  ;;  %v5596_v53 = vld [vmem:[%s11961_s1 + $0x48] sm:$0xf0]  ;;  %v7995_v28 = vld [vmem:[%s11961_s1 + $0x124] sm:$0xf] }
  0xdb   : > { %3213 = vmatpush.bf16.msrb.mxu1 %v6923_v5  ;;  %v7035_v5 = vor.u32 %v8328_v40, %v7034_v39  ;;  %v9984_v17 = vor.u32 %v7944_v60, %v5544_v0  ;;  %v5732_v39 = vld [vmem:[%s11961_s1 + $0x158] sm:$0xf0]  ;;  %v5607_v40 = vor.u32 %v7969_v26, %v5604_v27  ;;  %v7999_v60 = vld [vmem:[%s11961_s1 + $0x144] sm:$0xf]  ;;  %v7115_v27 = vor.u32 %v8348_v21, %v7114_v20  ;;  %v5708_v29 = vld [vmem:[%s11961_s1 + $0x128] sm:$0xf0] }
  0xdc   : > { %3227 = vmatpush.bf16.msrb.mxu2 %v6987_v6  ;;  %v7146_v6 = vld [vmem:[%s11961_s1 + $0xc60] sm:$0xf] }
  0xdd   : > { %3241 = vmatpush.bf16.msrb.mxu3 %v7051_v14  ;;  %v5676_v14 = vld [vmem:[%s11961_s1 + $0xe8] sm:$0xf0]  ;;  %v5558_v20 = vld [vmem:[%s8670_s11 + $0x60] sm:$0xf] }
  0xde   : > { %3200 = vmatpush.bf16.msrb.mxu0 %v6851_v19  ;;  %v7147_v19 = vor.u32 %v8356_v7, %v7146_v6  ;;  %v5679_v23 = vor.u32 %v7987_v13, %v5676_v14  ;;  %v7981_v6 = vld [vmem:[%s11961_s1 + $0xb4] sm:$0xf]  ;;  %v5652_v7 = vld [vmem:[%s11961_s1 + $0xb8] sm:$0xf0] }
  0xdf   : > { %3214 = vmatpush.bf16.msrb.mxu1 %v6915_v24  ;;  %v7138_v24 = vld [vmem:[%s11961_s1 + $0xc50] sm:$0xf]  ;;  %v7997_v13 = vld [vmem:[%s11961_s1 + $0x134] sm:$0xf]  ;;  %v5716_v14 = vld [vmem:[%s11961_s1 + $0x138] sm:$0xf0] }
  0xe0   : > { %3228 = vmatpush.bf16.msrb.mxu2 %v6979_v25  ;;  %v8354_v25 = vld [vmem:[%s11961_s1 + $0xc54] sm:$0xf0]  ;;  %v5719_v26 = vor.u32 %v7997_v13, %v5716_v14  ;;  %v5940_v13 = vld [vmem:[%s11961_s1 + $0x2f8] sm:$0xf0] }
  0xe1   : > { %3242 = vmatpush.bf16.msrb.mxu3 %v7043_v35  ;;  %v7139_v34 = vor.u32 %v8354_v25, %v7138_v24  ;;  %v8001_v35 = vld [vmem:[%s11961_s1 + $0x154] sm:$0xf]  ;;  %v7979_v24 = vld [vmem:[%s11961_s1 + $0xa4] sm:$0xf]  ;;  %v5644_v25 = vld [vmem:[%s11961_s1 + $0xa8] sm:$0xf0] }
  0xe2   : > { %3201 = vmatpush.bf16.msrb.mxu0 %v6843_v47  ;;  %v7130_v47 = vld [vmem:[%s11961_s1 + $0xc40] sm:$0xf]  ;;  %v5735_v56 = vor.u32 %v8001_v35, %v5732_v39  ;;  %v7106_v35 = vld [vmem:[%s11961_s1 + $0xc10] sm:$0xf]  ;;  %v8346_v39 = vld [vmem:[%s11961_s1 + $0xc14] sm:$0xf0] }
  0xe3   : > { %3215 = vmatpush.bf16.msrb.mxu1 %v6907_v54  ;;  %v7983_v54 = vld [vmem:[%s11961_s1 + $0xc4] sm:$0xf]  ;;  %v7131_v59 = vor.u32 %v8352_v48, %v7130_v47  ;;  %v7977_v47 = vld [vmem:[%s11961_s1 + $0x94] sm:$0xf]  ;;  %v5636_v48 = vld [vmem:[%s11961_s1 + $0x98] sm:$0xf0] }
  0xe4   : > { %3229 = vmatpush.bf16.msrb.mxu2 %v6971_v55  ;;  %v5660_v55 = vld [vmem:[%s11961_s1 + $0xc8] sm:$0xf0] }
  0xe5   : > { %3243 = vmatpush.bf16.msrb.mxu3 %v7035_v5  ;;  %3202 = vmatmul.bf16.vlgmr.msrb.gmra.mxu0 %v9971_v10  ;;  %v5663_v0 = vor.u32 %v7983_v54, %v5660_v55  ;;  %v5588_v5 = vld [vmem:[%s11961_s1 + $0x38] sm:$0xf0]  ;;  %v7107_v55 = vor.u32 %v8346_v39, %v7106_v35  ;;  %v8035_v35 = vld [vmem:[%s11961_s1 + $0x264] sm:$0xf]  ;;  %v5868_v39 = vld [vmem:[%s11961_s1 + $0x268] sm:$0xf0] }
  0xe6   : > { %3250 = vmatpush.bf16.msra.mxu0 %v7155_v62  ;;  %3216 = vmatmul.bf16.vlgmr.msrb.gmra.mxu1 %v9984_v17  ;;  %v5724_v62 = vld [vmem:[%s11961_s1 + $0x148] sm:$0xf0]  ;;  %v5700_v54 = vld [vmem:[%s11961_s1 + $0x118] sm:$0xf0] }
  0xe7   : > { %3264 = vmatpush.bf16.msra.mxu1 %v5623_v63  ;;  %3230 = vmatmul.bf16.vlgmr.msrb.gmra.mxu2 %v9973_v11  ;;  %v5599_v63 = vor.u32 %v7967_v50, %v5596_v53  ;;  %v5727_v8 = vor.u32 %v7999_v60, %v5724_v62  ;;  %v5711_v50 = vor.u32 %v7995_v28, %v5708_v29  ;;  %v7993_v53 = vld [vmem:[%s11961_s1 + $0x114] sm:$0xf]  ;;  %v7959_v60 = vld [vmem:[%s11961_s1 + $0x4] sm:$0xf] }
  0xe8   : > { %3278 = vmatpush.bf16.msra.mxu2 %v5687_v4  ;;  %3244 = vmatmul.bf16.vlgmr.msrb.gmra.mxu3 %v9986_v18  ;;  %v7965_v4 = vld [vmem:[%s11961_s1 + $0x34] sm:$0xf]  ;;  %v8019_v28 = vld [vmem:[%s11961_s1 + $0x1e4] sm:$0xf] }
  0xe9   : > { %3292 = vmatpush.bf16.msra.mxu3 %v5751_v16  ;;  %v5591_v16 = vor.u32 %v7965_v4, %v5588_v5  ;;  %v8021_v4 = vld [vmem:[%s11961_s1 + $0x1f4] sm:$0xf]  ;;  %v5812_v5 = vld [vmem:[%s11961_s1 + $0x1f8] sm:$0xf0] }
  0xea   : > { %3251 = vmatpush.bf16.msra.mxu0 %v7147_v19  ;;  %v5655_v19 = vor.u32 %v7981_v6, %v5652_v7  ;;  %v8037_v6 = vld [vmem:[%s11961_s1 + $0x274] sm:$0xf]  ;;  %v5703_v7 = vor.u32 %v7993_v53, %v5700_v54  ;;  %v5996_v53 = vld [vmem:[%s11961_s1 + $0x368] sm:$0xf0] }
  0xeb   : > { %3265 = vmatpush.bf16.msra.mxu1 %v5615_v22  ;;  %v7963_v22 = vld [vmem:[%s11961_s1 + $0x24] sm:$0xf] }
  0xec   : > { %3279 = vmatpush.bf16.msra.mxu2 %v5679_v23  ;;  %v5580_v23 = vld [vmem:[%s11961_s1 + $0x28] sm:$0xf0] }
  0xed   : > { %3293 = vmatpush.bf16.msra.mxu3 %v5743_v30  ;;  %v5583_v30 = vor.u32 %v7963_v22, %v5580_v23  ;;  %v5631_v22 = vor.u32 %v7975_v1, %v5628_v2  ;;  %v7958_v23 = vld [vmem:[%s8670_s11 + $0xc0] sm:$0xf0]  ;;  %v8049_v1 = vld [vmem:[%s11961_s1 + $0x2d4] sm:$0xf]  ;;  %v5924_v2 = vld [vmem:[%s11961_s1 + $0x2d8] sm:$0xf0] }
  0xee   : > { %3252 = vmatpush.bf16.msra.mxu0 %v7139_v34  ;;  %v5647_v34 = vor.u32 %v7979_v24, %v5644_v25  ;;  %v8069_v24 = vld [vmem:[%s11961_s1 + $0x374] sm:$0xf]  ;;  %v6004_v25 = vld [vmem:[%s11961_s1 + $0x378] sm:$0xf0] }
  0xef   : > { %3266 = vmatpush.bf16.msra.mxu1 %v5607_v40  ;;  %v7961_v40 = vld [vmem:[%s11961_s1 + $0x14] sm:$0xf] }
  0xf0   : > { %3280 = vmatpush.bf16.msra.mxu2 %v5671_v46  ;;  %v5572_v46 = vld [vmem:[%s11961_s1 + $0x18] sm:$0xf0] }
  0xf1   : > { %3294 = vmatpush.bf16.msra.mxu3 %v5735_v56  ;;  %v7098_v56 = vld [vmem:[%s11961_s1 + $0xc00] sm:$0xf]  ;;  %v5575_v62 = vor.u32 %v7961_v40, %v5572_v46  ;;  %v10180_v40 = vor.u32 %v7958_v23, %v5558_v20  ;;  %v6007_v46 = vor.u32 %v8069_v24, %v6004_v25  ;;  %v8063_v20 = vld [vmem:[%s11961_s1 + $0x344] sm:$0xf]  ;;  %v8013_v23 = vld [vmem:[%s11961_s1 + $0x1b4] sm:$0xf] }
  0xf2   : > { %3253 = vmatpush.bf16.msra.mxu0 %v7131_v59  ;;  %v8344_v59 = vld [vmem:[%s11961_s1 + $0xc04] sm:$0xf0]  ;;  %v5780_v25 = vld [vmem:[%s11961_s1 + $0x1b8] sm:$0xf0] }
  0xf3   : > { %3267 = vmatpush.bf16.msra.mxu1 %v5599_v63  ;;  %v5639_v63 = vor.u32 %v7977_v47, %v5636_v48  ;;  %v7099_v14 = vor.u32 %v8344_v59, %v7098_v56  ;;  %v8051_v47 = vld [vmem:[%s11961_s1 + $0x2e4] sm:$0xf]  ;;  %v5932_v48 = vld [vmem:[%s11961_s1 + $0x2e8] sm:$0xf0]  ;;  %v8017_v56 = vld [vmem:[%s11961_s1 + $0x1d4] sm:$0xf] }
  0xf4   : > { %3281 = vmatpush.bf16.msra.mxu2 %v5663_v0  ;;  %v5564_v0 = vld [vmem:[%s11961_s1 + $0x8] sm:$0xf0]  ;;  %v5935_v59 = vor.u32 %v8051_v47, %v5932_v48  ;;  %v8011_v47 = vld [vmem:[%s11961_s1 + $0x1a4] sm:$0xf] }
  0xf5   : > { %3295 = vmatpush.bf16.msra.mxu3 %v5727_v8  ;;  %v5876_v8 = vld [vmem:[%s11961_s1 + $0x278] sm:$0xf0]  ;;  %v5567_v21 = vor.u32 %v7959_v60, %v5564_v0 }
  0xf6   : > { %3254 = vmatpush.bf16.msra.mxu0 %v7123_v12  ;;  %v8053_v12 = vld [vmem:[%s11961_s1 + $0x2f4] sm:$0xf]  ;;  %v5796_v60 = vld [vmem:[%s11961_s1 + $0x1d8] sm:$0xf0] }
  0xf7   : > { %3268 = vmatpush.bf16.msra.mxu1 %v5591_v16  ;;  %v7991_v16 = vld [vmem:[%s11961_s1 + $0x104] sm:$0xf]  ;;  %v5943_v29 = vor.u32 %v8053_v12, %v5940_v13  ;;  %v5927_v12 = vor.u32 %v8049_v1, %v5924_v2  ;;  %v5788_v13 = vld [vmem:[%s11961_s1 + $0x1c8] sm:$0xf0]  ;;  %v8009_v1 = vld [vmem:[%s11961_s1 + $0x194] sm:$0xf] }
  0xf8   : > { %3282 = vmatpush.bf16.msra.mxu2 %v5655_v19  ;;  %v5692_v19 = vld [vmem:[%s11961_s1 + $0x108] sm:$0xf0] }
  0xf9   : > { %3296 = vmatpush.bf16.msra.mxu3 %v5719_v26  ;;  %v5815_v26 = vor.u32 %v8021_v4, %v5812_v5  ;;  %v8065_v4 = vld [vmem:[%s11961_s1 + $0x354] sm:$0xf]  ;;  %v5988_v5 = vld [vmem:[%s11961_s1 + $0x358] sm:$0xf0] }
  0xfa   : > { %3255 = vmatpush.bf16.msra.mxu0 %v7115_v27  ;;  %v5879_v27 = vor.u32 %v8037_v6, %v5876_v8  ;;  %v5799_v6 = vor.u32 %v8017_v56, %v5796_v60  ;;  %v8015_v8 = vld [vmem:[%s11961_s1 + $0x1c4] sm:$0xf] }
  0xfb   : > { %3269 = vmatpush.bf16.msra.mxu1 %v5583_v30  ;;  %v5695_v30 = vor.u32 %v7991_v16, %v5692_v19  ;;  %v8047_v16 = vld [vmem:[%s11961_s1 + $0x2c4] sm:$0xf]  ;;  %v5916_v19 = vld [vmem:[%s11961_s1 + $0x2c8] sm:$0xf0] }
  0xfc   : > { %3283 = vmatpush.bf16.msra.mxu2 %v5647_v34  ;;  %v5804_v34 = vld [vmem:[%s11961_s1 + $0x1e8] sm:$0xf0]  ;;  %v5919_v24 = vor.u32 %v8047_v16, %v5916_v19  ;;  %v8043_v56 = vld [vmem:[%s11961_s1 + $0x2a4] sm:$0xf] }
  0xfd   : > { %3297 = vmatpush.bf16.msra.mxu3 %v5711_v50  ;;  %v8067_v50 = vld [vmem:[%s11961_s1 + $0x364] sm:$0xf]  ;;  %v5807_v54 = vor.u32 %v8019_v28, %v5804_v34  ;;  %v8061_v34 = vld [vmem:[%s11961_s1 + $0x334] sm:$0xf]  ;;  %v5756_v19 = vld [vmem:[%s11961_s1 + $0x188] sm:$0xf0] }
  0xfe   : > { %3256 = vmatpush.bf16.msra.mxu0 %v7107_v55  ;;  %v5871_v55 = vor.u32 %v8035_v35, %v5868_v39  ;;  %v5999_v0 = vor.u32 %v8067_v50, %v5996_v53  ;;  %v5972_v35 = vld [vmem:[%s11961_s1 + $0x338] sm:$0xf0]  ;;  %v5783_v39 = vor.u32 %v8013_v23, %v5780_v25  ;;  %v5772_v50 = vld [vmem:[%s11961_s1 + $0x1a8] sm:$0xf0]  ;;  %v8027_v53 = vld [vmem:[%s11961_s1 + $0x224] sm:$0xf] }
  0xff   : > { %3270 = vmatpush.bf16.msra.mxu1 %v5575_v62  ;;  %v8033_v62 = vld [vmem:[%s11961_s1 + $0x254] sm:$0xf]  ;;  %v8059_v60 = vld [vmem:[%s11961_s1 + $0x324] sm:$0xf]  ;;  %v5884_v23 = vld [vmem:[%s11961_s1 + $0x288] sm:$0xf0] }
 0x100   : > { %3284 = vmatpush.bf16.msra.mxu2 %v5639_v63  ;;  %v5860_v63 = vld [vmem:[%s11961_s1 + $0x258] sm:$0xf0]  ;;  %v8007_v16 = vld [vmem:[%s11961_s1 + $0x184] sm:$0xf]  ;;  %v8085_v25 = vld [vmem:[%s11961_s1 + $0x3f4] sm:$0xf] }
 0x101   : > { %3298 = vmatpush.bf16.msra.mxu3 %v5703_v7  ;;  %v5863_v7 = vor.u32 %v8033_v62, %v5860_v63  ;;  %v5964_v62 = vld [vmem:[%s11961_s1 + $0x328] sm:$0xf0]  ;;  %v5775_v63 = vor.u32 %v8011_v47, %v5772_v50  ;;  %v8133_v50 = vld [vmem:[%s11961_s1 + $0x574] sm:$0xf] }
 0x102   : > { %3257 = vmatpush.bf16.msra.mxu0 %v7099_v14  ;;  %v5991_v14 = vor.u32 %v8065_v4, %v5988_v5  ;;  %v5764_v4 = vld [vmem:[%s11961_s1 + $0x198] sm:$0xf0]  ;;  %v8025_v5 = vld [vmem:[%s11961_s1 + $0x214] sm:$0xf] }
 0x103   : > { %3271 = vmatpush.bf16.msra.mxu1 %v5567_v21  ;;  %v5980_v21 = vld [vmem:[%s11961_s1 + $0x348] sm:$0xf0] }
 0x104   : > { %3285 = vmatpush.bf16.msra.mxu2 %v5631_v22  ;;  %v5983_v28 = vor.u32 %v8063_v20, %v5980_v21  ;;  %v8023_v20 = vld [vmem:[%s11961_s1 + $0x204] sm:$0xf] }
 0x105   : > { %3299 = vmatpush.bf16.msra.mxu3 %v5695_v30  ;;  %3258 = vmatmul.bf16.vlgmr.msra.gmra.mxu0 %v10180_v40  ;;  %v5908_v30 = vld [vmem:[%s11961_s1 + $0x2b8] sm:$0xf0] }
 0x106   : > { %3306 = vmatpush.bf16.msrb.mxu0 %v5815_v26  ;;  %3272 = vmatmul.bf16.vlgmr.msra.gmra.mxu1 %v8930_v61  ;;  %v5852_v61 = vld [vmem:[%s11961_s1 + $0x248] sm:$0xf0]  ;;  %v8029_v26 = vld [vmem:[%s11961_s1 + $0x234] sm:$0xf] }
 0x107   : > { %3320 = vmatpush.bf16.msrb.mxu1 %v5879_v27  ;;  %3286 = vmatmul.bf16.vlgmr.msra.gmra.mxu2 %v8954_v9  ;;  %v8031_v9 = vld [vmem:[%s11961_s1 + $0x244] sm:$0xf]  ;;  %v5844_v27 = vld [vmem:[%s11961_s1 + $0x238] sm:$0xf0] }
 0x108   : > { %3334 = vmatpush.bf16.msrb.mxu2 %v5943_v29  ;;  %3300 = vmatmul.bf16.vlgmr.msra.gmra.mxu3 %v8942_v3  ;;  %v5791_v3 = vor.u32 %v8015_v8, %v5788_v13  ;;  %v5855_v22 = vor.u32 %v8031_v9, %v5852_v61  ;;  %v8045_v29 = vld [vmem:[%s11961_s1 + $0x2b4] sm:$0xf]  ;;  %v5956_v9 = vld [vmem:[%s11961_s1 + $0x318] sm:$0xf0]  ;;  %v5767_v61 = vor.u32 %v8009_v1, %v5764_v4  ;;  %v8115_v1 = vld [vmem:[%s11961_s1 + $0x4e4] sm:$0xf] }
 0x109   : > { %3348 = vmatpush.bf16.msrb.mxu3 %v6007_v46  ;;  %v5847_v46 = vor.u32 %v8029_v26, %v5844_v27  ;;  %v5911_v48 = vor.u32 %v8045_v29, %v5908_v30  ;;  %v8041_v8 = vld [vmem:[%s11961_s1 + $0x294] sm:$0xf]  ;;  %v6068_v26 = vld [vmem:[%s11961_s1 + $0x3f8] sm:$0xf0] }
 0x10a   : > { %3307 = vmatpush.bf16.msrb.mxu0 %v5807_v54  ;;  %v5836_v54 = vld [vmem:[%s11961_s1 + $0x228] sm:$0xf0]  ;;  %v8057_v13 = vld [vmem:[%s11961_s1 + $0x314] sm:$0xf]  ;;  %v6196_v30 = vld [vmem:[%s11961_s1 + $0x4f8] sm:$0xf0] }
 0x10b   : > { %3321 = vmatpush.bf16.msrb.mxu1 %v5871_v55  ;;  %v5975_v55 = vor.u32 %v8061_v34, %v5972_v35  ;;  %v8101_v27 = vld [vmem:[%s11961_s1 + $0x474] sm:$0xf]  ;;  %v5759_v34 = vor.u32 %v8007_v16, %v5756_v19 }
 0x10c   : > { %3335 = vmatpush.bf16.msrb.mxu2 %v5935_v59  ;;  %v5900_v59 = vld [vmem:[%s11961_s1 + $0x2a8] sm:$0xf0]  ;;  %v8117_v29 = vld [vmem:[%s11961_s1 + $0x4f4] sm:$0xf] }
 0x10d   : > { %3349 = vmatpush.bf16.msrb.mxu3 %v5999_v0  ;;  %v5839_v0 = vor.u32 %v8027_v53, %v5836_v54  ;;  %v5903_v2 = vor.u32 %v8043_v56, %v5900_v59  ;;  %v6260_v53 = vld [vmem:[%s11961_s1 + $0x578] sm:$0xf0]  ;;  %v8083_v56 = vld [vmem:[%s11961_s1 + $0x3e4] sm:$0xf]  ;;  %v6060_v59 = vld [vmem:[%s11961_s1 + $0x3e8] sm:$0xf0] }
 0x10e   : > { %3308 = vmatpush.bf16.msrb.mxu0 %v5799_v6  ;;  %v5828_v6 = vld [vmem:[%s11961_s1 + $0x218] sm:$0xf0]  ;;  %v6063_v4 = vor.u32 %v8083_v56, %v6060_v59  ;;  %v8113_v16 = vld [vmem:[%s11961_s1 + $0x4d4] sm:$0xf] }
 0x10f   : > { %3322 = vmatpush.bf16.msrb.mxu1 %v5863_v7  ;;  %v5967_v7 = vor.u32 %v8059_v60, %v5964_v62  ;;  %v8099_v62 = vld [vmem:[%s11961_s1 + $0x464] sm:$0xf]  ;;  %v6228_v56 = vld [vmem:[%s11961_s1 + $0x538] sm:$0xf0] }
 0x110   : > { %3336 = vmatpush.bf16.msrb.mxu2 %v5927_v12  ;;  %v5892_v12 = vld [vmem:[%s11961_s1 + $0x298] sm:$0xf0] }
 0x111   : > { %3350 = vmatpush.bf16.msrb.mxu3 %v5991_v14  ;;  %v5831_v14 = vor.u32 %v8025_v5, %v5828_v6  ;;  %v5895_v21 = vor.u32 %v8041_v8, %v5892_v12  ;;  %v8131_v5 = vld [vmem:[%s11961_s1 + $0x564] sm:$0xf]  ;;  %v6252_v6 = vld [vmem:[%s11961_s1 + $0x568] sm:$0xf0]  ;;  %v8081_v8 = vld [vmem:[%s11961_s1 + $0x3d4] sm:$0xf] }
 0x112   : > { %3309 = vmatpush.bf16.msrb.mxu0 %v5791_v3  ;;  %v5820_v3 = vld [vmem:[%s11961_s1 + $0x208] sm:$0xf0]  ;;  %v6052_v12 = vld [vmem:[%s11961_s1 + $0x3d8] sm:$0xf0] }
 0x113   : > { %3323 = vmatpush.bf16.msrb.mxu1 %v5855_v22  ;;  %v8039_v22 = vld [vmem:[%s11961_s1 + $0x284] sm:$0xf]  ;;  %v5823_v35 = vor.u32 %v8023_v20, %v5820_v3  ;;  %v6055_v19 = vor.u32 %v8081_v8, %v6052_v12  ;;  %v8129_v20 = vld [vmem:[%s11961_s1 + $0x554] sm:$0xf]  ;;  %v6220_v8 = vld [vmem:[%s11961_s1 + $0x528] sm:$0xf0] }
 0x114   : > { %3337 = vmatpush.bf16.msrb.mxu2 %v5919_v24  ;;  %v5959_v24 = vor.u32 %v8057_v13, %v5956_v9  ;;  %v5887_v47 = vor.u32 %v8039_v22, %v5884_v23  ;;  %v8097_v9 = vld [vmem:[%s11961_s1 + $0x454] sm:$0xf]  ;;  %v8079_v3 = vld [vmem:[%s11961_s1 + $0x3c4] sm:$0xf] }
 0x115   : > { %3351 = vmatpush.bf16.msrb.mxu3 %v5983_v28  ;;  %v6132_v28 = vld [vmem:[%s11961_s1 + $0x478] sm:$0xf0]  ;;  %v8095_v23 = vld [vmem:[%s11961_s1 + $0x444] sm:$0xf] }
 0x116   : > { %3310 = vmatpush.bf16.msrb.mxu0 %v5783_v39  ;;  %v8055_v39 = vld [vmem:[%s11961_s1 + $0x304] sm:$0xf]  ;;  %v6135_v54 = vor.u32 %v8101_v27, %v6132_v28 }
 0x117   : > { %3324 = vmatpush.bf16.msrb.mxu1 %v5847_v46  ;;  %v5948_v46 = vld [vmem:[%s11961_s1 + $0x308] sm:$0xf0]  ;;  %v8127_v28 = vld [vmem:[%s11961_s1 + $0x544] sm:$0xf] }
 0x118   : > { %3338 = vmatpush.bf16.msrb.mxu2 %v5911_v48  ;;  %v6071_v48 = vor.u32 %v8085_v25, %v6068_v26  ;;  %v5951_v60 = vor.u32 %v8055_v39, %v5948_v46  ;;  %v8111_v25 = vld [vmem:[%s11961_s1 + $0x4c4] sm:$0xf]  ;;  %v6172_v26 = vld [vmem:[%s11961_s1 + $0x4c8] sm:$0xf0]  ;;  %v8093_v46 = vld [vmem:[%s11961_s1 + $0x434] sm:$0xf] }
 0x119   : > { %3352 = vmatpush.bf16.msrb.mxu3 %v5975_v55  ;;  %v6199_v55 = vor.u32 %v8117_v29, %v6196_v30  ;;  %v6236_v29 = vld [vmem:[%s11961_s1 + $0x548] sm:$0xf0]  ;;  %v6175_v39 = vor.u32 %v8111_v25, %v6172_v26  ;;  %v8103_v26 = vld [vmem:[%s11961_s1 + $0x484] sm:$0xf] }
 0x11a   : > { %3311 = vmatpush.bf16.msrb.mxu0 %v5775_v63  ;;  %v6124_v63 = vld [vmem:[%s11961_s1 + $0x468] sm:$0xf0] }
 0x11b   : > { %3325 = vmatpush.bf16.msrb.mxu1 %v5839_v0  ;;  %v6263_v0 = vor.u32 %v8133_v50, %v6260_v53  ;;  %v8109_v50 = vld [vmem:[%s11961_s1 + $0x4b4] sm:$0xf]  ;;  %v6164_v53 = vld [vmem:[%s11961_s1 + $0x4b8] sm:$0xf0]  ;;  %v6076_v25 = vld [vmem:[%s11961_s1 + $0x408] sm:$0xf0] }
 0x11c   : > { %3339 = vmatpush.bf16.msrb.mxu2 %v5903_v2  ;;  %v6188_v2 = vld [vmem:[%s11961_s1 + $0x4e8] sm:$0xf0] }
 0x11d   : > { %3353 = vmatpush.bf16.msrb.mxu3 %v5967_v7  ;;  %v6127_v7 = vor.u32 %v8099_v62, %v6124_v63  ;;  %v6191_v13 = vor.u32 %v8115_v1, %v6188_v2  ;;  %v6028_v62 = vld [vmem:[%s11961_s1 + $0x3a8] sm:$0xf0]  ;;  %v6167_v63 = vor.u32 %v8109_v50, %v6164_v53  ;;  %v8119_v50 = vld [vmem:[%s11961_s1 + $0x504] sm:$0xf] }
 0x11e   : > { %3312 = vmatpush.bf16.msrb.mxu0 %v5767_v61  ;;  %v6116_v61 = vld [vmem:[%s11961_s1 + $0x458] sm:$0xf0]  ;;  %v6092_v1 = vld [vmem:[%s11961_s1 + $0x428] sm:$0xf0] }
 0x11f   : > { %3326 = vmatpush.bf16.msrb.mxu1 %v5831_v14  ;;  %v6255_v14 = vor.u32 %v8131_v5, %v6252_v6  ;;  %v6156_v5 = vld [vmem:[%s11961_s1 + $0x4a8] sm:$0xf0] }
 0x120   : > { %3340 = vmatpush.bf16.msrb.mxu2 %v5895_v21  ;;  %v6119_v21 = vor.u32 %v8097_v9, %v6116_v61  ;;  %v6020_v9 = vld [vmem:[%s11961_s1 + $0x398] sm:$0xf0]  ;;  %v6204_v53 = vld [vmem:[%s11961_s1 + $0x508] sm:$0xf0] }
 0x121   : > { %3354 = vmatpush.bf16.msrb.mxu3 %v5959_v24 }
 0x122   : > { %3313 = vmatpush.bf16.msrb.mxu0 %v5759_v34  ;;  %v8077_v34 = vld [vmem:[%s11961_s1 + $0x3b4] sm:$0xf] }
 0x123   : > { %3327 = vmatpush.bf16.msrb.mxu1 %v5823_v35  ;;  %v6036_v35 = vld [vmem:[%s11961_s1 + $0x3b8] sm:$0xf0] }
 0x124   : > { %3341 = vmatpush.bf16.msrb.mxu2 %v5887_v47  ;;  %v6100_v47 = vld [vmem:[%s11961_s1 + $0x438] sm:$0xf0] }
 0x125   : > { %3355 = vmatpush.bf16.msrb.mxu3 %v5951_v60  ;;  %3314 = vmatmul.bf16.vlgmr.msrb.gmra.mxu0 %v8961_v15  ;;  %v6180_v15 = vld [vmem:[%s11961_s1 + $0x4d8] sm:$0xf0]  ;;  %v6103_v59 = vor.u32 %v8093_v46, %v6100_v47  ;;  %v8075_v60 = vld [vmem:[%s11961_s1 + $0x3a4] sm:$0xf]  ;;  %v8181_v46 = vld [vmem:[%s11961_s1 + $0x6f4] sm:$0xf] }
 0x126   : > { %3362 = vmatpush.bf16.msra.mxu0 %v6071_v48  ;;  %3328 = vmatmul.bf16.vlgmr.msrb.gmra.mxu1 %v9119_v37  ;;  %v6044_v37 = vld [vmem:[%s11961_s1 + $0x3c8] sm:$0xf0]  ;;  %v6183_v22 = vor.u32 %v8113_v16, %v6180_v15  ;;  %v6239_v48 = vor.u32 %v8127_v28, %v6236_v29  ;;  %v6031_v6 = vor.u32 %v8075_v60, %v6028_v62  ;;  %v6084_v16 = vld [vmem:[%s11961_s1 + $0x418] sm:$0xf0]  ;;  %v10502_v15 = vpop.f32.mrf.mxu0  ;;  %v8149_v29 = vld [vmem:[%s11961_s1 + $0x5f4] sm:$0xf] }
 0x127   : > { %3376 = vmatpush.bf16.msra.mxu1 %v6135_v54  ;;  %3342 = vmatmul.bf16.vlgmr.msrb.gmra.mxu2 %v9136_v45  ;;  %v6244_v45 = vld [vmem:[%s11961_s1 + $0x558] sm:$0xf0]  ;;  %v6047_v27 = vor.u32 %v8079_v3, %v6044_v37  ;;  %v6039_v54 = vor.u32 %v8077_v34, %v6036_v35  ;;  %v6140_v28 = vld [vmem:[%s11961_s1 + $0x488] sm:$0xf0]  ;;  %v8165_v35 = vld [vmem:[%s11961_s1 + $0x674] sm:$0xf] }
 0x128   : > { %3390 = vmatpush.bf16.msra.mxu2 %v6199_v55  ;;  %3356 = vmatmul.bf16.vlgmr.msrb.gmra.mxu3 %v9128_v41  ;;  %v6108_v41 = vld [vmem:[%s11961_s1 + $0x448] sm:$0xf0]  ;;  %v6247_v24 = vor.u32 %v8129_v20, %v6244_v45  ;;  %v8125_v55 = vld [vmem:[%s11961_s1 + $0x534] sm:$0xf]  ;;  %v6148_v45 = vld [vmem:[%s11961_s1 + $0x498] sm:$0xf0]  ;;  %v6143_v60 = vor.u32 %v8103_v26, %v6140_v28  ;;  %v10622_v26 = vpop.f32.mrf.mxu3 }
 0x129   : > { %3404 = vmatpush.bf16.msra.mxu3 %v6263_v0  ;;  %v6111_v30 = vor.u32 %v8095_v23, %v6108_v41  ;;  %v8091_v0 = vld [vmem:[%s11961_s1 + $0x424] sm:$0xf]  ;;  %v6231_v2 = vor.u32 %v8125_v55, %v6228_v56  ;;  %v8105_v20 = vld [vmem:[%s11961_s1 + $0x494] sm:$0xf]  ;;  %v6212_v37 = vld [vmem:[%s11961_s1 + $0x518] sm:$0xf0] }
 0x12a   : > { %3363 = vmatpush.bf16.msra.mxu0 %v6063_v4  ;;  %v8107_v4 = vld [vmem:[%s11961_s1 + $0x4a4] sm:$0xf]  ;;  %v6095_v12 = vor.u32 %v8091_v0, %v6092_v1  ;;  %v6012_v23 = vld [vmem:[%s11961_s1 + $0x388] sm:$0xf0]  ;;  %v8197_v56 = vld [vmem:[%s11961_s1 + $0x774] sm:$0xf]  ;;  %v6207_v0 = vor.u32 %v8119_v50, %v6204_v53 }
 0x12b   : > { %3377 = vmatpush.bf16.msra.mxu1 %v6127_v7  ;;  %v8123_v7 = vld [vmem:[%s11961_s1 + $0x524] sm:$0xf]  ;;  %v6159_v61 = vor.u32 %v8107_v4, %v6156_v5  ;;  %v6300_v28 = vld [vmem:[%s11961_s1 + $0x5c8] sm:$0xf0] }
 0x12c   : > { %3391 = vmatpush.bf16.msra.mxu2 %v6191_v13  ;;  %v8073_v13 = vld [vmem:[%s11961_s1 + $0x394] sm:$0xf]  ;;  %v8147_v1 = vld [vmem:[%s11961_s1 + $0x5e4] sm:$0xf] }
 0x12d   : > { %3405 = vmatpush.bf16.msra.mxu3 %v6255_v14  ;;  %v8089_v14 = vld [vmem:[%s11961_s1 + $0x414] sm:$0xf]  ;;  %v6023_v3 = vor.u32 %v8073_v13, %v6020_v9  ;;  %v8163_v4 = vld [vmem:[%s11961_s1 + $0x664] sm:$0xf] }
 0x12e   : > { %3364 = vmatpush.bf16.msra.mxu0 %v6055_v19  ;;  %v6223_v19 = vor.u32 %v8123_v7, %v6220_v8  ;;  %v6087_v41 = vor.u32 %v8089_v14, %v6084_v16  ;;  %v8179_v7 = vld [vmem:[%s11961_s1 + $0x6e4] sm:$0xf]  ;;  %v6444_v8 = vld [vmem:[%s11961_s1 + $0x6e8] sm:$0xf0]  ;;  %v10584_v13 = vpop.f32.mrf.mxu0  ;;  %v10592_v16 = vpop.f32.mrf.mxu2 }
 0x12f   : > { %3378 = vmatpush.bf16.msra.mxu1 %v6119_v21  ;;  %v8121_v21 = vld [vmem:[%s11961_s1 + $0x514] sm:$0xf]  ;;  %v8195_v9 = vld [vmem:[%s11961_s1 + $0x764] sm:$0xf] }
 0x130   : > { %3392 = vmatpush.bf16.msra.mxu2 %v6183_v22  ;;  %v8071_v22 = vld [vmem:[%s11961_s1 + $0x384] sm:$0xf]  ;;  %v6215_v34 = vor.u32 %v8121_v21, %v6212_v37  ;;  %v6308_v21 = vld [vmem:[%s11961_s1 + $0x5d8] sm:$0xf0] }
 0x131   : > { %3406 = vmatpush.bf16.msra.mxu3 %v6247_v24  ;;  %v8087_v24 = vld [vmem:[%s11961_s1 + $0x404] sm:$0xf]  ;;  %v6015_v47 = vor.u32 %v8071_v22, %v6012_v23  ;;  %v6372_v22 = vld [vmem:[%s11961_s1 + $0x658] sm:$0xf0]  ;;  %v8177_v23 = vld [vmem:[%s11961_s1 + $0x6d4] sm:$0xf] }
 0x132   : > { %3365 = vmatpush.bf16.msra.mxu0 %v6047_v27  ;;  %v6151_v27 = vor.u32 %v8105_v20, %v6148_v45  ;;  %v6447_v20 = vor.u32 %v8179_v7, %v6444_v8  ;;  %v8145_v45 = vld [vmem:[%s11961_s1 + $0x5d4] sm:$0xf]  ;;  %v8139_v8 = vld [vmem:[%s11961_s1 + $0x5a4] sm:$0xf] }
 0x133   : > { %3379 = vmatpush.bf16.msra.mxu1 %v6111_v30  ;;  %v6324_v30 = vld [vmem:[%s11961_s1 + $0x5f8] sm:$0xf0] }
 0x134   : > { %3393 = vmatpush.bf16.msra.mxu2 %v6175_v39  ;;  %v6388_v39 = vld [vmem:[%s11961_s1 + $0x678] sm:$0xf0]  ;;  %v6327_v55 = vor.u32 %v8149_v29, %v6324_v30  ;;  %v6364_v30 = vld [vmem:[%s11961_s1 + $0x648] sm:$0xf0] }
 0x135   : > { %3407 = vmatpush.bf16.msra.mxu3 %v6239_v48  ;;  %v6452_v48 = vld [vmem:[%s11961_s1 + $0x6f8] sm:$0xf0]  ;;  %v6391_v62 = vor.u32 %v8165_v35, %v6388_v39  ;;  %v6428_v35 = vld [vmem:[%s11961_s1 + $0x6c8] sm:$0xf0]  ;;  %v8191_v39 = vld [vmem:[%s11961_s1 + $0x744] sm:$0xf] }
 0x136   : > { %3366 = vmatpush.bf16.msra.mxu0 %v6039_v54  ;;  %v6079_v54 = vor.u32 %v8087_v24, %v6076_v25  ;;  %v6500_v24 = vld [vmem:[%s11961_s1 + $0x758] sm:$0xf0]  ;;  %v6311_v25 = vor.u32 %v8145_v45, %v6308_v21  ;;  %v10650_v50 = vpop.f32.mrf.mxu0  ;;  %v6412_v45 = vld [vmem:[%s11961_s1 + $0x6a8] sm:$0xf0]  ;;  %v10696_v21 = vpop.f32.mrf.mxu3 }
 0x137   : > { %3380 = vmatpush.bf16.msra.mxu1 %v6103_v59  ;;  %v6516_v59 = vld [vmem:[%s11961_s1 + $0x778] sm:$0xf0] }
 0x138   : > { %3394 = vmatpush.bf16.msra.mxu2 %v6167_v63  ;;  %v6455_v63 = vor.u32 %v8181_v46, %v6452_v48  ;;  %v6519_v5 = vor.u32 %v8197_v56, %v6516_v59  ;;  %v6492_v46 = vld [vmem:[%s11961_s1 + $0x748] sm:$0xf0]  ;;  %v6292_v56 = vld [vmem:[%s11961_s1 + $0x5b8] sm:$0xf0]  ;;  %v8157_v59 = vld [vmem:[%s11961_s1 + $0x634] sm:$0xf] }
 0x139   : > { %3408 = vmatpush.bf16.msra.mxu3 %v6231_v2  ;;  %v6316_v2 = vld [vmem:[%s11961_s1 + $0x5e8] sm:$0xf0] }
 0x13a   : > { %3367 = vmatpush.bf16.msra.mxu0 %v6031_v6  ;;  %v6380_v6 = vld [vmem:[%s11961_s1 + $0x668] sm:$0xf0]  ;;  %v6319_v14 = vor.u32 %v8147_v1, %v6316_v2  ;;  %v10670_v1 = vpop.f32.mrf.mxu2  ;;  %v8189_v2 = vld [vmem:[%s11961_s1 + $0x734] sm:$0xf] }
 0x13b   : > { %3381 = vmatpush.bf16.msra.mxu1 %v6095_v12  ;;  %v10582_v12 = vpop.f32.mrf.mxu1 }
 0x13c   : > { %3395 = vmatpush.bf16.msra.mxu2 %v6159_v61  ;;  %v6508_v61 = vld [vmem:[%s11961_s1 + $0x768] sm:$0xf0] }
 0x13d   : > { %3409 = vmatpush.bf16.msra.mxu3 %v6223_v19  ;;  %v6383_v19 = vor.u32 %v8163_v4, %v6380_v6  ;;  %v6511_v37 = vor.u32 %v8195_v9, %v6508_v61  ;;  %v6484_v4 = vld [vmem:[%s11961_s1 + $0x738] sm:$0xf0]  ;;  %v6284_v9 = vld [vmem:[%s11961_s1 + $0x5a8] sm:$0xf0]  ;;  %v8155_v61 = vld [vmem:[%s11961_s1 + $0x624] sm:$0xf] }
 0x13e   : > { %3368 = vmatpush.bf16.msra.mxu0 %v6023_v3  ;;  %v8161_v3 = vld [vmem:[%s11961_s1 + $0x654] sm:$0xf] }
 0x13f   : > { %3382 = vmatpush.bf16.msra.mxu1 %v6087_v41  ;;  %v6436_v41 = vld [vmem:[%s11961_s1 + $0x6d8] sm:$0xf0] }
 0x140   : > { %3396 = vmatpush.bf16.msra.mxu2 %v6151_v27  ;;  %v6375_v27 = vor.u32 %v8161_v3, %v6372_v22  ;;  %v8187_v3 = vld [vmem:[%s11961_s1 + $0x724] sm:$0xf]  ;;  %v6287_v22 = vor.u32 %v8139_v8, %v6284_v9  ;;  %v6460_v9 = vld [vmem:[%s11961_s1 + $0x708] sm:$0xf0] }
 0x141   : > { %3410 = vmatpush.bf16.msra.mxu3 %v6215_v34  ;;  %v8175_v34 = vld [vmem:[%s11961_s1 + $0x6c4] sm:$0xf] }
 0x142   : > { %3369 = vmatpush.bf16.msra.mxu0 %v6015_v47  ;;  %v8183_v8 = vld [vmem:[%s11961_s1 + $0x704] sm:$0xf] }
 0x143   : > { %3383 = vmatpush.bf16.msra.mxu1 %v6079_v54  ;;  %v10648_v48 = vpop.f32.mrf.mxu1  ;;  %v6431_v54 = vor.u32 %v8175_v34, %v6428_v35  ;;  %v6468_v34 = vld [vmem:[%s11961_s1 + $0x718] sm:$0xf0] }
 0x144   : > { %3397 = vmatpush.bf16.msra.mxu2 %v6143_v60  ;;  %v6495_v60 = vor.u32 %v8191_v39, %v6492_v46  ;;  %v8135_v39 = vld [vmem:[%s11961_s1 + $0x584] sm:$0xf]  ;;  %v6268_v46 = vld [vmem:[%s11961_s1 + $0x588] sm:$0xf0] }
 0x145   : > { %3411 = vmatpush.bf16.msra.mxu3 %v6207_v0  ;;  %3370 = vmatmul.bf16.vlgmr.msra.gmra.mxu0 %v9144_v49  ;;  %v8193_v49 = vld [vmem:[%s11961_s1 + $0x754] sm:$0xf]  ;;  %v6420_v0 = vld [vmem:[%s11961_s1 + $0x6b8] sm:$0xf0] }
 0x146   : > { %3418 = vmatpush.bf16.msrb.mxu0 %v6327_v55  ;;  %3384 = vmatmul.bf16.vlgmr.msra.gmra.mxu1 %v9335_v31  ;;  %v8143_v31 = vld [vmem:[%s11961_s1 + $0x5c4] sm:$0xf]  ;;  %v6503_v29 = vor.u32 %v8193_v49, %v6500_v24  ;;  %v8141_v55 = vld [vmem:[%s11961_s1 + $0x5b4] sm:$0xf]  ;;  %v6276_v24 = vld [vmem:[%s11961_s1 + $0x598] sm:$0xf0] }
 0x147   : > { %3432 = vmatpush.bf16.msrb.mxu1 %v6391_v62  ;;  %3398 = vmatmul.bf16.vlgmr.msra.gmra.mxu2 %v9348_v38  ;;  %v6439_v38 = vor.u32 %v8177_v23, %v6436_v41  ;;  %v6303_v47 = vor.u32 %v8143_v31, %v6300_v28  ;;  %v6356_v62 = vld [vmem:[%s11961_s1 + $0x638] sm:$0xf0]  ;;  %v8137_v49 = vld [vmem:[%s11961_s1 + $0x594] sm:$0xf] }
 0x148   : > { %3446 = vmatpush.bf16.msrb.mxu2 %v6455_v63  ;;  %3412 = vmatmul.bf16.vlgmr.msra.gmra.mxu3 %v9346_v36  ;;  %v8159_v36 = vld [vmem:[%s11961_s1 + $0x644] sm:$0xf]  ;;  %v8173_v63 = vld [vmem:[%s11961_s1 + $0x6b4] sm:$0xf]  ;;  %v6359_v6 = vor.u32 %v8157_v59, %v6356_v62  ;;  %v6404_v28 = vld [vmem:[%s11961_s1 + $0x698] sm:$0xf0]  ;;  %v6279_v35 = vor.u32 %v8137_v49, %v6276_v24  ;;  %v6463_v49 = vor.u32 %v8183_v8, %v6460_v9 }
 0x149   : > { %3460 = vmatpush.bf16.msrb.mxu3 %v6519_v5  ;;  %v6367_v53 = vor.u32 %v8159_v36, %v6364_v30  ;;  %v6295_v5 = vor.u32 %v8141_v55, %v6292_v56  ;;  %v6423_v7 = vor.u32 %v8173_v63, %v6420_v0  ;;  %v8169_v31 = vld [vmem:[%s11961_s1 + $0x694] sm:$0xf]  ;;  %v8151_v55 = vld [vmem:[%s11961_s1 + $0x604] sm:$0xf]  ;;  %v6332_v56 = vld [vmem:[%s11961_s1 + $0x608] sm:$0xf0] }
 0x14a   : > { %3419 = vmatpush.bf16.msrb.mxu0 %v6319_v14  ;;  %v6487_v14 = vor.u32 %v8189_v2, %v6484_v4  ;;  %v8185_v30 = vld [vmem:[%s11961_s1 + $0x714] sm:$0xf]  ;;  %v8167_v59 = vld [vmem:[%s11961_s1 + $0x684] sm:$0xf]  ;;  %v6396_v62 = vld [vmem:[%s11961_s1 + $0x688] sm:$0xf0] }
 0x14b   : > { %3433 = vmatpush.bf16.msrb.mxu1 %v6383_v19  ;;  %v6348_v19 = vld [vmem:[%s11961_s1 + $0x628] sm:$0xf0]  ;;  %v10722_v36 = vpop.f32.mrf.mxu1  ;;  %v8213_v63 = vld [vmem:[%s11961_s1 + $0x7f4] sm:$0xf]  ;;  %v6580_v0 = vld [vmem:[%s11961_s1 + $0x7f8] sm:$0xf0] }
 0x14c   : > { %3447 = vmatpush.bf16.msrb.mxu2 %v6447_v20  ;;  %v8171_v20 = vld [vmem:[%s11961_s1 + $0x6a4] sm:$0xf]  ;;  %v6351_v23 = vor.u32 %v8155_v61, %v6348_v19  ;;  %v8229_v2 = vld [vmem:[%s11961_s1 + $0x874] sm:$0xf]  ;;  %v6644_v4 = vld [vmem:[%s11961_s1 + $0x878] sm:$0xf0]  ;;  %v10776_v61 = vpop.f32.mrf.mxu3  ;;  %v6399_v19 = vor.u32 %v8167_v59, %v6396_v62 }
 0x14d   : > { %3461 = vmatpush.bf16.msrb.mxu3 %v6511_v37  ;;  %v6476_v37 = vld [vmem:[%s11961_s1 + $0x728] sm:$0xf0]  ;;  %v6415_v41 = vor.u32 %v8171_v20, %v6412_v45  ;;  %v10781_v20 = vld [vmem:[%s11962_s2] sm:$0x3]  ;;  %v6583_v45 = vor.u32 %v8213_v63, %v6580_v0  ;;  %v8211_v24 = vld [vmem:[%s11961_s1 + $0x7e4] sm:$0xf] }
 0x14e   : > { %3420 = vmatpush.bf16.msrb.mxu0 %v6311_v25  ;;  %v8153_v25 = vld [vmem:[%s11961_s1 + $0x614] sm:$0xf]  ;;  %v6628_v63 = vld [vmem:[%s11961_s1 + $0x858] sm:$0xf0]  ;;  %v8223_v9 = vld [vmem:[%s11961_s1 + $0x844] sm:$0xf] }
 0x14f   : > { %3434 = vmatpush.bf16.msrb.mxu1 %v6375_v27  ;;  %v6479_v27 = vor.u32 %v8187_v3, %v6476_v37  ;;  %v6647_v3 = vor.u32 %v8229_v2, %v6644_v4  ;;  %v8261_v37 = vld [vmem:[%s11961_s1 + $0x974] sm:$0xf]  ;;  %v6692_v2 = vld [vmem:[%s11961_s1 + $0x8d8] sm:$0xf0] }
 0x150   : > { %3448 = vmatpush.bf16.msrb.mxu2 %v6439_v38  ;;  %v6340_v38 = vld [vmem:[%s11961_s1 + $0x618] sm:$0xf0]  ;;  %v8209_v59 = vld [vmem:[%s11961_s1 + $0x7d4] sm:$0xf] }
 0x151   : > { %3462 = vmatpush.bf16.msrb.mxu3 %v6503_v29  ;;  %v10724_v29 = vpop.f32.mrf.mxu0  ;;  %v8225_v62 = vld [vmem:[%s11961_s1 + $0x854] sm:$0xf] }
 0x152   : > { %3421 = vmatpush.bf16.msrb.mxu0 %v6303_v47  ;;  %v10738_v47 = vpop.f32.mrf.mxu2  ;;  %v8241_v0 = vld [vmem:[%s11961_s1 + $0x8d4] sm:$0xf] }
 0x153   : > { %3435 = vmatpush.bf16.msrb.mxu1 %v6367_v53  ;;  %v6343_v53 = vor.u32 %v8153_v25, %v6340_v38  ;;  %v6572_v25 = vld [vmem:[%s11961_s1 + $0x7e8] sm:$0xf0]  ;;  %v6695_v8 = vor.u32 %v8241_v0, %v6692_v2  ;;  %v8219_v2 = vld [vmem:[%s11961_s1 + $0x824] sm:$0xf] }
 0x154   : > { %3449 = vmatpush.bf16.msrb.mxu2 %v6431_v54  ;;  %v6407_v54 = vor.u32 %v8169_v31, %v6404_v28  ;;  %v6636_v38 = vld [vmem:[%s11961_s1 + $0x868] sm:$0xf0]  ;;  %v8243_v31 = vld [vmem:[%s11961_s1 + $0x8e4] sm:$0xf] }
 0x155   : > { %3463 = vmatpush.bf16.msrb.mxu3 %v6495_v60  ;;  %v6471_v60 = vor.u32 %v8185_v30, %v6468_v34  ;;  %v6700_v28 = vld [vmem:[%s11961_s1 + $0x8e8] sm:$0xf0]  ;;  %v10809_v30 = vpop.f32.mrf.mxu1 }
 0x156   : > { %3422 = vmatpush.bf16.msrb.mxu0 %v6295_v5  ;;  %v8245_v5 = vld [vmem:[%s11961_s1 + $0x8f4] sm:$0xf]  ;;  %v6540_v0 = vld [vmem:[%s11961_s1 + $0x7a8] sm:$0xf0] }
 0x157   : > { %3436 = vmatpush.bf16.msrb.mxu1 %v6359_v6  ;;  %v6271_v6 = vor.u32 %v8135_v39, %v6268_v46  ;;  %v6575_v39 = vor.u32 %v8211_v24, %v6572_v25  ;;  %v8259_v46 = vld [vmem:[%s11961_s1 + $0x964] sm:$0xf]  ;;  %v6748_v24 = vld [vmem:[%s11961_s1 + $0x948] sm:$0xf0] }
 0x158   : > { %3450 = vmatpush.bf16.msrb.mxu2 %v6423_v7  ;;  %v6708_v7 = vld [vmem:[%s11961_s1 + $0x8f8] sm:$0xf0] }
 0x159   : > { %3464 = vmatpush.bf16.msrb.mxu3 %v6487_v14  ;;  %v6335_v14 = vor.u32 %v8151_v55, %v6332_v56  ;;  %v6703_v56 = vor.u32 %v8243_v31, %v6700_v28  ;;  %v6548_v31 = vld [vmem:[%s11961_s1 + $0x7b8] sm:$0xf0]  ;;  %v8221_v28 = vld [vmem:[%s11961_s1 + $0x834] sm:$0xf] }
 0x15a   : > { %3423 = vmatpush.bf16.msrb.mxu0 %v6287_v22  ;;  %v6772_v22 = vld [vmem:[%s11961_s1 + $0x978] sm:$0xf0] }
 0x15b   : > { %3437 = vmatpush.bf16.msrb.mxu1 %v6351_v23  ;;  %v10789_v23 = vpop.f32.mrf.mxu0  ;;  %v6775_v34 = vor.u32 %v8261_v37, %v6772_v22 }
 0x15c   : > { %3451 = vmatpush.bf16.msrb.mxu2 %v6415_v41  ;;  %v6711_v41 = vor.u32 %v8245_v5, %v6708_v7  ;;  %v6756_v5 = vld [vmem:[%s11961_s1 + $0x958] sm:$0xf0]  ;;  %v6631_v7 = vor.u32 %v8225_v62, %v6628_v63 }
 0x15d   : > { %3465 = vmatpush.bf16.msrb.mxu3 %v6479_v27  ;;  %v8227_v27 = vld [vmem:[%s11961_s1 + $0x864] sm:$0xf] }
 0x15e   : > { %3424 = vmatpush.bf16.msrb.mxu0 %v6279_v35  ;;  %v784_v35 = vperm.slane %v10781_v20, 0  ;;  %v6639_v55 = vor.u32 %v8227_v27, %v6636_v38  ;;  %v8239_v20 = vld [vmem:[%s11961_s1 + $0x8c4] sm:$0xf] }
 0x15f   : > { %3438 = vmatpush.bf16.msrb.mxu1 %v6343_v53  ;;  %v6764_v53 = vld [vmem:[%s11961_s1 + $0x968] sm:$0xf0] }
 0x160   : > { %3452 = vmatpush.bf16.msrb.mxu2 %v6407_v54  ;;  %v10818_v54 = vpop.f32.mrf.mxu2  ;;  %v6767_v4 = vor.u32 %v8259_v46, %v6764_v53  ;;  %v6676_v46 = vld [vmem:[%s11961_s1 + $0x8b8] sm:$0xf0] }
 0x161   : > { %3466 = vmatpush.bf16.msrb.mxu3 %v6471_v60  ;;  %v6564_v60 = vld [vmem:[%s11961_s1 + $0x7d8] sm:$0xf0] }
 0x162   : > { %3425 = vmatpush.bf16.msrb.mxu0 %v6271_v6  ;;  %v10848_v6 = vpop.f32.mrf.mxu3 }
 0x163   : > { %3439 = vmatpush.bf16.msrb.mxu1 %v6335_v14  ;;  %v2924_v14 = vadd.f32 %v10502_v15, %v784_v35  ;;  %v10871_v37 = vpop.f32.mrf.mxu0  ;;  %v2926_v15 = vadd.f32 %v10584_v13, %v784_v35  ;;  %v8205_v13 = vld [vmem:[%s11961_s1 + $0x7b4] sm:$0xf]  ;;  %v6612_v35 = vld [vmem:[%s11961_s1 + $0x838] sm:$0xf0] }
 0x164   : > { %3453 = vmatpush.bf16.msrb.mxu2 %v6399_v19  ;;  %v6620_v19 = vld [vmem:[%s11961_s1 + $0x848] sm:$0xf0]  ;;  %v6615_v62 = vor.u32 %v8221_v28, %v6612_v35  ;;  %v6724_v28 = vld [vmem:[%s11961_s1 + $0x918] sm:$0xf0] }
 0x165   : > { %3467 = vmatpush.bf16.msrb.mxu3 %v6463_v49  ;;  %3426 = vmatmul.bf16.vlgmr.msrb.gmra.mxu0 %v9356_v42  ;;  %v6567_v42 = vor.u32 %v8209_v59, %v6564_v60  ;;  %v8255_v49 = vld [vmem:[%s11961_s1 + $0x944] sm:$0xf]  ;;  %v6623_v27 = vor.u32 %v8223_v9, %v6620_v19  ;;  %v6740_v59 = vld [vmem:[%s11961_s1 + $0x938] sm:$0xf0]  ;;  %v6732_v9 = vld [vmem:[%s11961_s1 + $0x928] sm:$0xf0] }
 0x166   : > { %3474 = vmatpush.bf16.msra.mxu0 %v6583_v45  ;;  %3440 = vmatmul.bf16.vlgmr.msrb.gmra.mxu1 %v9547_v32  ;;  %v8207_v32 = vld [vmem:[%s11961_s1 + $0x7c4] sm:$0xf]  ;;  %v6684_v45 = vld [vmem:[%s11961_s1 + $0x8c8] sm:$0xf0]  ;;  %v6751_v53 = vor.u32 %v8255_v49, %v6748_v24  ;;  %v8233_v49 = vld [vmem:[%s11961_s1 + $0x894] sm:$0xf] }
 0x167   : > { %3488 = vmatpush.bf16.msra.mxu1 %v6647_v3  ;;  %3454 = vmatmul.bf16.vlgmr.msrb.gmra.mxu2 %v9560_v43  ;;  %v8257_v43 = vld [vmem:[%s11961_s1 + $0x954] sm:$0xf]  ;;  %v10869_v3 = vpop.f32.mrf.mxu1  ;;  %v6687_v38 = vor.u32 %v8239_v20, %v6684_v45  ;;  %v6532_v45 = vld [vmem:[%s11961_s1 + $0x798] sm:$0xf0]  ;;  %v6524_v35 = vld [vmem:[%s11961_s1 + $0x788] sm:$0xf0] }
 0x168   : > { %3502 = vmatpush.bf16.msra.mxu2 %v6711_v41  ;;  %3468 = vmatmul.bf16.vlgmr.msrb.gmra.mxu3 %v9549_v33  ;;  %v6556_v33 = vld [vmem:[%s11961_s1 + $0x7c8] sm:$0xf0]  ;;  %v6759_v22 = vor.u32 %v8257_v43, %v6756_v5  ;;  %v10880_v25 = vpop.f32.mrf.mxu2  ;;  %v8235_v43 = vld [vmem:[%s11961_s1 + $0x8a4] sm:$0xf]  ;;  %v6660_v24 = vld [vmem:[%s11961_s1 + $0x898] sm:$0xf0] }
 0x169   : > { %3516 = vmatpush.bf16.msra.mxu3 %v6775_v34  ;;  %v6559_v41 = vor.u32 %v8207_v32, %v6556_v33  ;;  %v2938_v34 = vadd.f32 %v10582_v12, %v2924_v14  ;;  %v8253_v12 = vld [vmem:[%s11961_s1 + $0x934] sm:$0xf]  ;;  %v6668_v5 = vld [vmem:[%s11961_s1 + $0x8a8] sm:$0xf0]  ;;  %v8251_v33 = vld [vmem:[%s11961_s1 + $0x924] sm:$0xf] }
 0x16a   : > { %3475 = vmatpush.bf16.msra.mxu0 %v6575_v39  ;;  %v8237_v39 = vld [vmem:[%s11961_s1 + $0x8b4] sm:$0xf]  ;;  %v10908_v60 = vpop.f32.mrf.mxu3  ;;  %v6671_v20 = vor.u32 %v8235_v43, %v6668_v5  ;;  %v8247_v43 = vld [vmem:[%s11961_s1 + $0x904] sm:$0xf]  ;;  %v6716_v5 = vld [vmem:[%s11961_s1 + $0x908] sm:$0xf0] }
 0x16b   : > { %3489 = vmatpush.bf16.msra.mxu1 %v6639_v55  ;;  %v2940_v55 = vadd.f32 %v10648_v48, %v2926_v15  ;;  %v6679_v63 = vor.u32 %v8237_v39, %v6676_v46  ;;  %v8203_v48 = vld [vmem:[%s11961_s1 + $0x7a4] sm:$0xf]  ;;  %v6663_v46 = vor.u32 %v8233_v49, %v6660_v24  ;;  %v6719_v49 = vor.u32 %v8247_v43, %v6716_v5  ;;  %v6876_v5 = vld [vmem:[%s11961_s1 + $0xa48] sm:$0xf0] }
 0x16c   : > { %3503 = vmatpush.bf16.msra.mxu2 %v6703_v56  ;;  %v6551_v56 = vor.u32 %v8205_v13, %v6548_v31  ;;  %v8291_v24 = vld [vmem:[%s11961_s1 + $0xa64] sm:$0xf] }
 0x16d   : > { %3517 = vmatpush.bf16.msra.mxu3 %v6767_v4  ;;  %v2952_v4 = vadd.f32 %v10592_v16, %v2938_v34  ;;  %v2954_v32 = vadd.f32 %v10670_v1, %v2940_v55  ;;  %v6543_v16 = vor.u32 %v8203_v48, %v6540_v0  ;;  %v8201_v1 = vld [vmem:[%s11961_s1 + $0x794] sm:$0xf]  ;;  %v8199_v34 = vld [vmem:[%s11961_s1 + $0x784] sm:$0xf] }
 0x16e   : > { %3476 = vmatpush.bf16.msra.mxu0 %v6567_v42  ;;  %v6604_v42 = vld [vmem:[%s11961_s1 + $0x828] sm:$0xf0]  ;;  %v6535_v31 = vor.u32 %v8201_v1, %v6532_v45  ;;  %v8231_v55 = vld [vmem:[%s11961_s1 + $0x884] sm:$0xf]  ;;  %v8325_v45 = vld [vmem:[%s11961_s1 + $0xb74] sm:$0xf] }
 0x16f   : > { %3490 = vmatpush.bf16.msra.mxu1 %v6631_v7  ;;  %v10929_v7 = vpop.f32.mrf.mxu0  ;;  %v10938_v14 = vpop.f32.mrf.mxu1  ;;  %v6607_v19 = vor.u32 %v8219_v2, %v6604_v42  ;;  %v2966_v15 = vadd.f32 %v10622_v26, %v2952_v4  ;;  %v8249_v26 = vld [vmem:[%s11961_s1 + $0x914] sm:$0xf]  ;;  %v2968_v13 = vadd.f32 %v10696_v21, %v2954_v32  ;;  %v8215_v21 = vld [vmem:[%s11961_s1 + $0x804] sm:$0xf]  ;;  %v6527_v4 = vor.u32 %v8199_v34, %v6524_v35  ;;  %v6964_v42 = vld [vmem:[%s11961_s1 + $0xaf8] sm:$0xf0] }
 0x170   : > { %3504 = vmatpush.bf16.msra.mxu2 %v6695_v8  ;;  %v6743_v8 = vor.u32 %v8253_v12, %v6740_v59  ;;  %v6652_v59 = vld [vmem:[%s11961_s1 + $0x888] sm:$0xf0]  ;;  %v6727_v0 = vor.u32 %v8249_v26, %v6724_v28  ;;  %v8309_v2 = vld [vmem:[%s11961_s1 + $0xaf4] sm:$0xf]  ;;  %v8323_v35 = vld [vmem:[%s11961_s1 + $0xb64] sm:$0xf] }
 0x171   : > { %3518 = vmatpush.bf16.msra.mxu3 %v6759_v22  ;;  %v8217_v22 = vld [vmem:[%s11961_s1 + $0x814] sm:$0xf]  ;;  %v2982_v12 = vadd.f32 %v10724_v29, %v2968_v13  ;;  %v6900_v29 = vld [vmem:[%s11961_s1 + $0xa78] sm:$0xf0]  ;;  %v6892_v26 = vld [vmem:[%s11961_s1 + $0xa68] sm:$0xf0] }
 0x172   : > { %3477 = vmatpush.bf16.msra.mxu0 %v6559_v41  ;;  %v6596_v41 = vld [vmem:[%s11961_s1 + $0x818] sm:$0xf0]  ;;  %v10994_v48 = vpop.f32.mrf.mxu3  ;;  %v8307_v13 = vld [vmem:[%s11961_s1 + $0xae4] sm:$0xf] }
 0x173   : > { %3491 = vmatpush.bf16.msra.mxu1 %v6623_v27  ;;  %v10959_v27 = vpop.f32.mrf.mxu2  ;;  %v6599_v39 = vor.u32 %v8217_v22, %v6596_v41  ;;  %v7028_v22 = vld [vmem:[%s11961_s1 + $0xb78] sm:$0xf0]  ;;  %v6967_v41 = vor.u32 %v8309_v2, %v6964_v42  ;;  %v8287_v42 = vld [vmem:[%s11961_s1 + $0xa44] sm:$0xf] }
 0x174   : > { %3505 = vmatpush.bf16.msra.mxu2 %v6687_v38  ;;  %v6735_v38 = vor.u32 %v8251_v33, %v6732_v9  ;;  %v6655_v33 = vor.u32 %v8231_v55, %v6652_v59  ;;  %v7031_v28 = vor.u32 %v8325_v45, %v7028_v22  ;;  %v6820_v55 = vld [vmem:[%s11961_s1 + $0x9d8] sm:$0xf0]  ;;  %v7004_v45 = vld [vmem:[%s11961_s1 + $0xb48] sm:$0xf0]  ;;  %v6879_v22 = vor.u32 %v8287_v42, %v6876_v5  ;;  %v8297_v42 = vld [vmem:[%s11961_s1 + $0xa94] sm:$0xf] }
 0x175   : > { %3519 = vmatpush.bf16.msra.mxu3 %v6751_v53  ;;  %v6588_v53 = vld [vmem:[%s11961_s1 + $0x808] sm:$0xf0]  ;;  %v6884_v59 = vld [vmem:[%s11961_s1 + $0xa58] sm:$0xf0] }
 0x176   : > { %3478 = vmatpush.bf16.msra.mxu0 %v6551_v56  ;;  %v2980_v56 = vadd.f32 %v10650_v50, %v2966_v15  ;;  %v8293_v50 = vld [vmem:[%s11961_s1 + $0xa74] sm:$0xf]  ;;  %v7012_v2 = vld [vmem:[%s11961_s1 + $0xb58] sm:$0xf0] }
 0x177   : > { %3492 = vmatpush.bf16.msra.mxu1 %v6615_v62  ;;  %v8277_v62 = vld [vmem:[%s11961_s1 + $0x9f4] sm:$0xf]  ;;  %v11016_v32 = vpop.f32.mrf.mxu0  ;;  %v6903_v1 = vor.u32 %v8293_v50, %v6900_v29 }
 0x178   : > { %3506 = vmatpush.bf16.msra.mxu2 %v6679_v63  ;;  %v6836_v63 = vld [vmem:[%s11961_s1 + $0x9f8] sm:$0xf0]  ;;  %v2994_v9 = vadd.f32 %v10722_v36, %v2980_v56  ;;  %v8275_v36 = vld [vmem:[%s11961_s1 + $0x9e4] sm:$0xf]  ;;  %v8289_v56 = vld [vmem:[%s11961_s1 + $0xa54] sm:$0xf] }
 0x179   : > { %3520 = vmatpush.bf16.msra.mxu3 %v6743_v8  ;;  %v11014_v8 = vpop.f32.mrf.mxu1  ;;  %v8321_v29 = vld [vmem:[%s11961_s1 + $0xb54] sm:$0xf] }
 0x17a   : > { %3479 = vmatpush.bf16.msra.mxu0 %v6543_v16  ;;  %v6591_v16 = vor.u32 %v8215_v21, %v6588_v53  ;;  %v3008_v34 = vadd.f32 %v10738_v47, %v2994_v9  ;;  %v6895_v21 = vor.u32 %v8291_v24, %v6892_v26  ;;  %v8273_v47 = vld [vmem:[%s11961_s1 + $0x9d4] sm:$0xf] }
 0x17b   : > { %3493 = vmatpush.bf16.msra.mxu1 %v6607_v19  ;;  %v2996_v19 = vadd.f32 %v10809_v30, %v2982_v12  ;;  %v11026_v15 = vpop.f32.mrf.mxu2  ;;  %v6828_v30 = vld [vmem:[%s11961_s1 + $0x9e8] sm:$0xf0]  ;;  %v6823_v50 = vor.u32 %v8273_v47, %v6820_v55  ;;  %v8301_v26 = vld [vmem:[%s11961_s1 + $0xab4] sm:$0xf]  ;;  %v8283_v55 = vld [vmem:[%s11961_s1 + $0xa24] sm:$0xf] }
 0x17c   : > { %3507 = vmatpush.bf16.msra.mxu2 %v6671_v20  ;;  %v6839_v20 = vor.u32 %v8277_v62, %v6836_v63  ;;  %v8305_v62 = vld [vmem:[%s11961_s1 + $0xad4] sm:$0xf]  ;;  %v6948_v63 = vld [vmem:[%s11961_s1 + $0xad8] sm:$0xf0]  ;;  %v6796_v47 = vld [vmem:[%s11961_s1 + $0x9a8] sm:$0xf0] }
 0x17d   : > { %3521 = vmatpush.bf16.msra.mxu3 %v6735_v38  ;;  %v3010_v38 = vadd.f32 %v10818_v54, %v2996_v19  ;;  %v6831_v54 = vor.u32 %v8275_v36, %v6828_v30  ;;  %v7015_v19 = vor.u32 %v8321_v29, %v7012_v2  ;;  %v8285_v36 = vld [vmem:[%s11961_s1 + $0xa34] sm:$0xf]  ;;  %v6988_v29 = vld [vmem:[%s11961_s1 + $0xb28] sm:$0xf0] }
 0x17e   : > { %3480 = vmatpush.bf16.msra.mxu0 %v6535_v31  ;;  %v6956_v31 = vld [vmem:[%s11961_s1 + $0xae8] sm:$0xf0] }
 0x17f   : > { %3494 = vmatpush.bf16.msra.mxu1 %v6599_v39  ;;  %v7020_v39 = vld [vmem:[%s11961_s1 + $0xb68] sm:$0xf0]  ;;  %v6959_v53 = vor.u32 %v8307_v13, %v6956_v31  ;;  %v3024_v12 = vadd.f32 %v10848_v6, %v3010_v38  ;;  %v6868_v38 = vld [vmem:[%s11961_s1 + $0xa38] sm:$0xf0] }
 0x180   : > { %3508 = vmatpush.bf16.msra.mxu2 %v6663_v46  ;;  %v11054_v46 = vpop.f32.mrf.mxu3  ;;  %v6932_v13 = vld [vmem:[%s11961_s1 + $0xab8] sm:$0xf0] }
 0x181   : > { %3522 = vmatpush.bf16.msra.mxu3 %v6727_v0  ;;  %v11077_v0 = vpop.f32.mrf.mxu0  ;;  %v3038_v6 = vadd.f32 %v10871_v37, %v3024_v12  ;;  %v6812_v37 = vld [vmem:[%s11961_s1 + $0x9c8] sm:$0xf0] }
 0x182   : > { %3481 = vmatpush.bf16.msra.mxu0 %v6527_v4  ;;  %v11089_v4 = vpop.f32.mrf.mxu1  ;;  %v6860_v12 = vld [vmem:[%s11961_s1 + $0xa28] sm:$0xf0] }
 0x183   : > { %3495 = vmatpush.bf16.msra.mxu1 %v6591_v16  ;;  %v8303_v16 = vld [vmem:[%s11961_s1 + $0xac4] sm:$0xf]  ;;  %v11110_v9 = vpop.f32.mrf.mxu2  ;;  %v6863_v2 = vor.u32 %v8283_v55, %v6860_v12 }
 0x184   : > { %3509 = vmatpush.bf16.msra.mxu2 %v6655_v33  ;;  %v6940_v33 = vld [vmem:[%s11961_s1 + $0xac8] sm:$0xf0] }
 0x185   : > { %3523 = vmatpush.bf16.msra.mxu3 %v6719_v49  ;;  %3482 = vmatmul.bf16.vlgmr.msra.gmra.mxu0 %v9562_v44  ;;  %v7023_v44 = vor.u32 %v8323_v35, %v7020_v39  ;;  %v8269_v49 = vld [vmem:[%s11961_s1 + $0x9b4] sm:$0xf] }
 0x186   : > { %3530 = vmatpush.bf16.msrb.mxu0 %v6839_v20  ;;  %3496 = vmatmul.bf16.vlgmr.msra.gmra.mxu1 %v9759_v51  ;;  %v6887_v51 = vor.u32 %v8289_v56, %v6884_v59  ;;  %v3052_v20 = vadd.f32 %v10938_v14, %v3038_v6  ;;  %v6804_v14 = vld [vmem:[%s11961_s1 + $0x9b8] sm:$0xf0]  ;;  %v8299_v59 = vld [vmem:[%s11961_s1 + $0xaa4] sm:$0xf] }
 0x187   : > { %3544 = vmatpush.bf16.msrb.mxu1 %v6903_v1  ;;  %3510 = vmatmul.bf16.vlgmr.msra.gmra.mxu2 %v9772_v57  ;;  %v3022_v57 = vadd.f32 %v10776_v61, %v3008_v34  ;;  %v6951_v61 = vor.u32 %v8305_v62, %v6948_v63  ;;  %v8319_v1 = vld [vmem:[%s11961_s1 + $0xb44] sm:$0xf]  ;;  %v8317_v34 = vld [vmem:[%s11961_s1 + $0xb34] sm:$0xf]  ;;  %v6924_v62 = vld [vmem:[%s11961_s1 + $0xaa8] sm:$0xf0] }
 0x188   : > { %3558 = vmatpush.bf16.msrb.mxu2 %v6967_v41  ;;  %3524 = vmatmul.bf16.vlgmr.msra.gmra.mxu3 %v9761_v52  ;;  %v8271_v52 = vld [vmem:[%s11961_s1 + $0x9c4] sm:$0xf]  ;;  %v6943_v41 = vor.u32 %v8303_v16, %v6940_v33  ;;  %v3066_v24 = vadd.f32 %v10959_v27, %v3052_v20  ;;  %v11139_v31 = vpop.f32.mrf.mxu3  ;;  %v6807_v27 = vor.u32 %v8269_v49, %v6804_v14  ;;  %v6980_v20 = vld [vmem:[%s11961_s1 + $0xb18] sm:$0xf0]  ;;  %v6844_v49 = vld [vmem:[%s11961_s1 + $0xa08] sm:$0xf0] }
 0x189   : > { %3572 = vmatpush.bf16.msrb.mxu3 %v7031_v28  ;;  %v3036_v43 = vadd.f32 %v10789_v23, %v3022_v57  ;;  %v6815_v23 = vor.u32 %v8271_v52, %v6812_v37  ;;  %v7007_v28 = vor.u32 %v8319_v1, %v7004_v45  ;;  %v11150_v39 = vpop.f32.mrf.mxu0  ;;  %v6852_v37 = vld [vmem:[%s11961_s1 + $0xa18] sm:$0xf0]  ;;  %v6780_v1 = vld [vmem:[%s11961_s1 + $0x988] sm:$0xf0]  ;;  %v8295_v14 = vld [vmem:[%s11961_s1 + $0xa84] sm:$0xf] }
 0x18a   : > { %3531 = vmatpush.bf16.msrb.mxu0 %v6831_v54  ;;  %v6996_v54 = vld [vmem:[%s11961_s1 + $0xb38] sm:$0xf0]  ;;  %v11148_v35 = vpop.f32.mrf.mxu1  ;;  %v3080_v56 = vadd.f32 %v10994_v48, %v3066_v24  ;;  %v6908_v24 = vld [vmem:[%s11961_s1 + $0xa88] sm:$0xf0] }
 0x18b   : > { %3545 = vmatpush.bf16.msrb.mxu1 %v6895_v21  ;;  %v3050_v30 = vadd.f32 %v10869_v3, %v3036_v43  ;;  %v6871_v21 = vor.u32 %v8285_v36, %v6868_v38  ;;  %v11171_v63 = vpop.f32.mrf.mxu2  ;;  %v6916_v43 = vld [vmem:[%s11961_s1 + $0xa98] sm:$0xf0]  ;;  %v8341_v38 = vld [vmem:[%s11961_s1 + $0xbf4] sm:$0xf]  ;;  %v6911_v55 = vor.u32 %v8295_v14, %v6908_v24 }
 0x18c   : > { %3559 = vmatpush.bf16.msrb.mxu2 %v6959_v53  ;;  %v6935_v53 = vor.u32 %v8301_v26, %v6932_v13  ;;  %v3094_v48 = vadd.f32 %v11016_v32, %v3080_v56  ;;  %v6788_v32 = vld [vmem:[%s11961_s1 + $0x998] sm:$0xf0] }
 0x18d   : > { %3573 = vmatpush.bf16.msrb.mxu3 %v7023_v44  ;;  %v3064_v3 = vadd.f32 %v10880_v25, %v3050_v30  ;;  %v8267_v25 = vld [vmem:[%s11961_s1 + $0x9a4] sm:$0xf]  ;;  %v6999_v44 = vor.u32 %v8317_v34, %v6996_v54  ;;  %v7092_v26 = vld [vmem:[%s11961_s1 + $0xbf8] sm:$0xf0]  ;;  %v8419_v54 = vld [vmem:[%s8675_s14 + $0x1dc] sm:$0xf0] }
 0x18e   : > { %3532 = vmatpush.bf16.msrb.mxu0 %v6823_v50  ;;  %v6799_v6 = vor.u32 %v8267_v25, %v6796_v47  ;;  %v8315_v50 = vld [vmem:[%s11961_s1 + $0xb24] sm:$0xf]  ;;  %v3108_v33 = vadd.f32 %v11089_v4, %v3094_v48  ;;  %v7095_v56 = vor.u32 %v8341_v38, %v7092_v26 }
 0x18f   : > { %3546 = vmatpush.bf16.msrb.mxu1 %v6887_v51  ;;  %v3078_v57 = vadd.f32 %v10908_v60, %v3064_v3  ;;  %v6927_v51 = vor.u32 %v8299_v59, %v6924_v62  ;;  %v8265_v60 = vld [vmem:[%s11961_s1 + $0x994] sm:$0xf]  ;;  %v6991_v16 = vor.u32 %v8315_v50, %v6988_v29  ;;  %v7386_v3 = vld [vmem:[%s8675_s14 + $0x1c0] sm:$0xf]  ;;  %v8355_v48 = vld [vmem:[%s11961_s1 + $0xc64] sm:$0xf] }
 0x190   : > { %3560 = vmatpush.bf16.msrb.mxu2 %v6951_v61  ;;  %v8281_v61 = vld [vmem:[%s11961_s1 + $0xa14] sm:$0xf]  ;;  %v11200_v5 = vpop.f32.mrf.mxu3  ;;  %v3122_v30 = vadd.f32 %v11110_v9, %v3108_v33  ;;  %v7156_v9 = vld [vmem:[%s11961_s1 + $0xc78] sm:$0xf0]  ;;  %v7387_v59 = vor.u32 %v8419_v54, %v7386_v3  ;;  %v7148_v50 = vld [vmem:[%s11961_s1 + $0xc68] sm:$0xf0] }
 0x191   : > { %3574 = vmatpush.bf16.msrb.mxu3 %v7015_v19  ;;  %v3092_v52 = vadd.f32 %v10929_v7, %v3078_v57  ;;  %v8313_v7 = vld [vmem:[%s11961_s1 + $0xb14] sm:$0xf]  ;;  %v6791_v19 = vor.u32 %v8265_v60, %v6788_v32  ;;  %v11215_v45 = vpop.f32.mrf.mxu0  ;;  %v6855_v4 = vor.u32 %v8281_v61, %v6852_v37  ;;  %v7084_v57 = vld [vmem:[%s11961_s1 + $0xbe8] sm:$0xf0]  ;;  %v7354_v29 = vld [vmem:[%s8675_s14 + $0x180] sm:$0xf]  ;;  %v7151_v61 = vor.u32 %v8355_v48, %v7148_v50 }
 0x192   : > { %3533 = vmatpush.bf16.msrb.mxu0 %v6815_v23  ;;  %v8263_v23 = vld [vmem:[%s11961_s1 + $0x984] sm:$0xf]  ;;  %v3163_v13 = vpop.f32.mrf.mxu1  ;;  %v8337_v37 = vld [vmem:[%s11961_s1 + $0xbd4] sm:$0xf]  ;;  %v8403_v33 = vld [vmem:[%s8675_s14 + $0x15c] sm:$0xf0] }
 0x193   : > { %3547 = vmatpush.bf16.msrb.mxu1 %v6879_v22  ;;  %v6919_v22 = vor.u32 %v8297_v42, %v6916_v43  ;;  %v3106_v36 = vadd.f32 %v11014_v8, %v3092_v52  ;;  %v8357_v8 = vld [vmem:[%s11961_s1 + $0xc74] sm:$0xf]  ;;  %v6783_v34 = vor.u32 %v8263_v23, %v6780_v1  ;;  %v3177_v25 = vpop.f32.mrf.mxu2  ;;  %v7124_v3 = vld [vmem:[%s11961_s1 + $0xc38] sm:$0xf0] }
 0x194   : > { %3561 = vmatpush.bf16.msrb.mxu2 %v6943_v41  ;;  %v8279_v41 = vld [vmem:[%s11961_s1 + $0xa04] sm:$0xf]  ;;  %v7159_v12 = vor.u32 %v8357_v8, %v7156_v9  ;;  %v8353_v42 = vld [vmem:[%s11961_s1 + $0xc54] sm:$0xf] }
 0x195   : > { %3575 = vmatpush.bf16.msrb.mxu3 %v7007_v28  ;;  %v6983_v28 = vor.u32 %v8313_v7, %v6980_v20  ;;  %v6847_v47 = vor.u32 %v8279_v41, %v6844_v49  ;;  %v7322_v7 = vld [vmem:[%s8675_s14 + $0x140] sm:$0xf] }
 0x196   : > { %3534 = vmatpush.bf16.msrb.mxu0 %v6807_v27  ;;  %v3120_v27 = vadd.f32 %v11026_v15, %v3106_v36  ;;  %v3136_v15 = vadd.f32 %v11139_v31, %v3122_v30  ;;  %v7323_v1 = vor.u32 %v8403_v33, %v7322_v7  ;;  %v7290_v41 = vld [vmem:[%s8675_s14 + $0x100] sm:$0xf]  ;;  %v8343_v7 = vld [vmem:[%s11961_s1 + $0xc04] sm:$0xf]  ;;  %v7100_v33 = vld [vmem:[%s11961_s1 + $0xc08] sm:$0xf0] }
 0x197   : > { %3548 = vmatpush.bf16.msrb.mxu1 %v6871_v21  ;;  %v8311_v21 = vld [vmem:[%s11961_s1 + $0xb04] sm:$0xf]  ;;  %v8395_v49 = vld [vmem:[%s8675_s14 + $0x11c] sm:$0xf0] }
 0x198   : > { %3562 = vmatpush.bf16.msrb.mxu2 %v6935_v53  ;;  %v6972_v53 = vld [vmem:[%s11961_s1 + $0xb08] sm:$0xf0]  ;;  %v3150_v31 = vadd.f32 %v11150_v39, %v3136_v15  ;;  %v7291_v26 = vor.u32 %v8395_v49, %v7290_v41 }
 0x199   : > { %3576 = vmatpush.bf16.msrb.mxu3 %v6999_v44  ;;  %v6975_v62 = vor.u32 %v8311_v21, %v6972_v53  ;;  %v8339_v44 = vld [vmem:[%s11961_s1 + $0xbe4] sm:$0xf]  ;;  %v3205_v39 = vpop.f32.mrf.mxu0  ;;  %v7052_v15 = vld [vmem:[%s11961_s1 + $0xba8] sm:$0xf0] }
 0x19a   : > { %3535 = vmatpush.bf16.msrb.mxu0 %v6799_v6  ;;  %v3134_v6 = vadd.f32 %v11054_v46, %v3120_v27  ;;  %v7087_v32 = vor.u32 %v8339_v44, %v7084_v57  ;;  %v11270_v46 = vpop.f32.mrf.mxu1  ;;  %v3164_v43 = vadd.f32 %v3163_v13, %v3150_v31  ;;  %v7060_v13 = vld [vmem:[%s11961_s1 + $0xbb8] sm:$0xf0]  ;;  %v7258_v27 = vld [vmem:[%s8675_s14 + $0xc0] sm:$0xf] }
 0x19b   : > { %3549 = vmatpush.bf16.msrb.mxu1 %v6863_v2  ;;  %v8411_v2 = vld [vmem:[%s8675_s14 + $0x19c] sm:$0xf0] }
 0x19c   : > { %3563 = vmatpush.bf16.msrb.mxu2 %v6927_v51  ;;  %v3191_v51 = vpop.f32.mrf.mxu3  ;;  %v3148_v60 = vadd.f32 %v11077_v0, %v3134_v6  ;;  %v7355_v52 = vor.u32 %v8411_v2, %v7354_v29  ;;  %v7076_v0 = vld [vmem:[%s11961_s1 + $0xbd8] sm:$0xf0]  ;;  %v3178_v23 = vadd.f32 %v3177_v25, %v3164_v43  ;;  %v8329_v29 = vld [vmem:[%s11961_s1 + $0xb94] sm:$0xf] }
 0x19d   : > { %3577 = vmatpush.bf16.msrb.mxu3 %v6991_v16  ;;  %v7140_v16 = vld [vmem:[%s11961_s1 + $0xc58] sm:$0xf0] }
 0x19e   : > { %3536 = vmatpush.bf16.msrb.mxu0 %v6791_v19  ;;  %v11288_v19 = vpop.f32.mrf.mxu2  ;;  %v3162_v20 = vadd.f32 %v11148_v35, %v3148_v60  ;;  %v8351_v35 = vld [vmem:[%s11961_s1 + $0xc44] sm:$0xf]  ;;  %v3192_v36 = vadd.f32 %v3191_v51, %v3178_v23  ;;  %v7044_v2 = vld [vmem:[%s11961_s1 + $0xb98] sm:$0xf0]  ;;  %v8345_v51 = vld [vmem:[%s11961_s1 + $0xc14] sm:$0xf] }
 0x19f   : > { %3550 = vmatpush.bf16.msrb.mxu1 %v6855_v4  ;;  %v8335_v4 = vld [vmem:[%s11961_s1 + $0xbc4] sm:$0xf]  ;;  %v7162_v23 = vld [vmem:[%s8675_s14] sm:$0xf] }
 0x1a0   : > { %3564 = vmatpush.bf16.msrb.mxu2 %v6919_v22  ;;  %v7132_v22 = vld [vmem:[%s11961_s1 + $0xc48] sm:$0xf0]  ;;  %v3206_v9 = vadd.f32 %v3205_v39, %v3192_v36  ;;  %v8371_v39 = vld [vmem:[%s8675_s14 + $0x5c] sm:$0xf0] }
 0x1a1   : > { %3578 = vmatpush.bf16.msrb.mxu3 %v6983_v28  ;;  %v11308_v24 = vpop.f32.mrf.mxu0  ;;  %v7135_v38 = vor.u32 %v8351_v35, %v7132_v22  ;;  %v8349_v28 = vld [vmem:[%s11961_s1 + $0xc34] sm:$0xf]  ;;  %v7103_v22 = vor.u32 %v8343_v7, %v7100_v33 }
 0x1a2   : > { %3537 = vmatpush.bf16.msrb.mxu0 %v6783_v34  ;;  %v8387_v34 = vld [vmem:[%s8675_s14 + $0xdc] sm:$0xf0]  ;;  %v3219_v54 = vpop.f32.mrf.mxu1 }
 0x1a3   : > { %3551 = vmatpush.bf16.msrb.mxu1 %v6847_v47  ;;  %v7127_v47 = vor.u32 %v8349_v28, %v7124_v3  ;;  %v7324_v3 = vld [vmem:[%s8675_s14 + $0x160] sm:$0xf0] }
 0x1a4   : > { %3565 = vmatpush.bf16.msrb.mxu2 %v6911_v55  ;;  %v3245_v14 = vpop.f32.mrf.mxu3  ;;  %v7259_v55 = vor.u32 %v8387_v34, %v7258_v27  ;;  %v7330_v27 = vld [vmem:[%s8675_s14 + $0x148] sm:$0xf] }
 0x1a5   : > { %3579 = vmatpush.bf16.msrb.mxu3 %v6975_v62  ;;  %3538 = vmatmul.bf16.vlgmr.msrb.gmra.mxu0 %v9774_v58  ;;  %v7079_v58 = vor.u32 %v8337_v37, %v7076_v0  ;;  %v8379_v62 = vld [vmem:[%s8675_s14 + $0x9c] sm:$0xf0]  ;;  %v7047_v37 = vor.u32 %v8329_v29, %v7044_v2  ;;  %v8327_v0 = vld [vmem:[%s11961_s1 + $0xb84] sm:$0xf]  ;;  %v8404_v34 = vld [vmem:[%s8675_s14 + $0x164] sm:$0xf0] }
 0x1a6   : > { %3586 = vmatpush.bf16.msra.mxu0 %v7095_v56  ;;  %3552 = vmatmul.bf16.vlgmr.msrb.gmra.mxu1 %v9971_v10  ;;  %v7068_v10 = vld [vmem:[%s11961_s1 + $0xbc8] sm:$0xf0]  ;;  %v3233_v25 = vpop.f32.mrf.mxu2  ;;  %v8347_v56 = vld [vmem:[%s11961_s1 + $0xc24] sm:$0xf] }
 0x1a7   : > { %3600 = vmatpush.bf16.msra.mxu1 %v7159_v12  ;;  %3566 = vmatmul.bf16.vlgmr.msrb.gmra.mxu2 %v9984_v17  ;;  %v7143_v17 = vor.u32 %v8353_v42, %v7140_v16  ;;  %v7071_v30 = vor.u32 %v8335_v4, %v7068_v10  ;;  %v7116_v12 = vld [vmem:[%s11961_s1 + $0xc28] sm:$0xf0]  ;;  %v7394_v4 = vld [vmem:[%s8675_s14 + $0x1c8] sm:$0xf]  ;;  %v7196_v2 = vld [vmem:[%s8675_s14 + $0x60] sm:$0xf0] }
 0x1a8   : > { %4404 = vmatpush.bf16.msra.mxu2 %v7387_v59  ;;  %3580 = vmatmul.bf16.vlgmr.msrb.gmra.mxu3 %v9973_v11  ;;  %v3176_v11 = vadd.f32 %v11171_v63, %v3162_v20  ;;  %v8333_v63 = vld [vmem:[%s11961_s1 + $0xbb4] sm:$0xf]  ;;  %v7226_v59 = vld [vmem:[%s8675_s14 + $0x80] sm:$0xf]  ;;  %v7119_v31 = vor.u32 %v8347_v56, %v7116_v12  ;;  %v7036_v16 = vld [vmem:[%s11961_s1 + $0xb88] sm:$0xf0] }
 0x1a9   : > { %v7063_v53 = vor.u32 %v8333_v63, %v7060_v13  ;;  %v7227_v50 = vor.u32 %v8379_v62, %v7226_v59  ;;  %v8420_v10 = vld [vmem:[%s8675_s14 + $0x1e4] sm:$0xf0]  ;;  %v8375_v62 = vld [vmem:[%s8675_s14 + $0x84] sm:$0xf] }
 0x1aa   : > { %3587 = vmatpush.bf16.msra.mxu0 %v7087_v32  ;;  %v3190_v8 = vadd.f32 %v11200_v5, %v3176_v11  ;;  %v8331_v5 = vld [vmem:[%s11961_s1 + $0xba4] sm:$0xf]  ;;  %v7108_v32 = vld [vmem:[%s11961_s1 + $0xc18] sm:$0xf0]  ;;  %v7039_v11 = vor.u32 %v8327_v0, %v7036_v16  ;;  %v7395_v36 = vor.u32 %v8420_v10, %v7394_v4  ;;  %v8412_v63 = vld [vmem:[%s8675_s14 + $0x1a4] sm:$0xf0]  ;;  %v11401_v29 = vpop.f32.mrf.mxu1 }
 0x1ab   : > { %3601 = vmatpush.bf16.msra.mxu1 %v7151_v61  ;;  %v7055_v48 = vor.u32 %v8331_v5, %v7052_v15  ;;  %v3261_v61 = vpop.f32.mrf.mxu0  ;;  %v7111_v42 = vor.u32 %v8345_v51, %v7108_v32  ;;  %v8383_v5 = vld [vmem:[%s8675_s14 + $0xc4] sm:$0xf]  ;;  %v7266_v56 = vld [vmem:[%s8675_s14 + $0xc8] sm:$0xf]  ;;  %v8416_v0 = vld [vmem:[%s8675_s14 + $0x1cc] sm:$0xf] }
 0x1ac   : > { %4405 = vmatpush.bf16.msra.mxu2 %v7355_v52  ;;  %v3204_v21 = vadd.f32 %v11215_v45, %v3190_v8  ;;  %v3220_v45 = vadd.f32 %v3219_v54, %v3206_v9  ;;  %v3247_v6 = vpop.f32.mrf.mxu3  ;;  %v8399_v9 = vld [vmem:[%s8675_s14 + $0x144] sm:$0xf]  ;;  %v7202_v51 = vld [vmem:[%s8675_s14 + $0x48] sm:$0xf]  ;;  %v8421_v16 = vld [vmem:[%s8675_s14 + $0x1ec] sm:$0xf0] }
 0x1ad   : > { %v7327_v54 = vor.u32 %v8399_v9, %v7324_v3  ;;  %v7260_v15 = vld [vmem:[%s8675_s14 + $0xe0] sm:$0xf0]  ;;  %v8413_v4 = vld [vmem:[%s8675_s14 + $0x1ac] sm:$0xf0] }
 0x1ae   : > { %3588 = vmatpush.bf16.msra.mxu0 %v7079_v58  ;;  %v3218_v44 = vadd.f32 %v11270_v46, %v3204_v21  ;;  %v3234_v57 = vadd.f32 %v3233_v25, %v3220_v45  ;;  %v7194_v46 = vld [vmem:[%s8675_s14 + $0x40] sm:$0xf]  ;;  %v7331_v21 = vor.u32 %v8404_v34, %v7330_v27  ;;  %v7292_v25 = vld [vmem:[%s8675_s14 + $0x120] sm:$0xf0]  ;;  %v8388_v45 = vld [vmem:[%s8675_s14 + $0xe4] sm:$0xf0]  ;;  %v7263_v12 = vor.u32 %v8383_v5, %v7260_v15  ;;  %v11414_v7 = vpop.f32.mrf.mxu2 }
 0x1af   : > { %3602 = vmatpush.bf16.msra.mxu1 %v7143_v17  ;;  %v7195_v43 = vor.u32 %v8371_v39, %v7194_v46  ;;  %v8363_v58 = vld [vmem:[%s8675_s14 + $0x1c] sm:$0xf0]  ;;  %v8415_v17 = vld [vmem:[%s8675_s14 + $0x1c4] sm:$0xf]  ;;  %v7267_v59 = vor.u32 %v8388_v45, %v7266_v56  ;;  %v7236_v5 = vld [vmem:[%s8675_s14 + $0xa8] sm:$0xf0] }
 0x1b0   : > { %4406 = vmatpush.bf16.msra.mxu2 %v7323_v1  ;;  %v3232_v60 = vadd.f32 %v11288_v19, %v3218_v44  ;;  %v3248_v52 = vadd.f32 %v3247_v6, %v3234_v57  ;;  %v7388_v1 = vld [vmem:[%s8675_s14 + $0x1e0] sm:$0xf0]  ;;  %v7163_v41 = vor.u32 %v8363_v58, %v7162_v23  ;;  %v7234_v57 = vld [vmem:[%s8675_s14 + $0x88] sm:$0xf]  ;;  %v8408_v58 = vld [vmem:[%s8675_s14 + $0x18c] sm:$0xf] }
 0x1b1   : > { %v7228_v44 = vld [vmem:[%s8675_s14 + $0xa0] sm:$0xf0]  ;;  %v7242_v15 = vld [vmem:[%s8675_s14 + $0x90] sm:$0xf] }
 0x1b2   : > { %3589 = vmatpush.bf16.msra.mxu0 %v7071_v30  ;;  %v3246_v19 = vadd.f32 %v3245_v14, %v3232_v60  ;;  %v3262_v20 = vadd.f32 %v3261_v61, %v3248_v52  ;;  %v7391_v14 = vor.u32 %v8415_v17, %v7388_v1  ;;  %v8407_v30 = vld [vmem:[%s8675_s14 + $0x184] sm:$0xf]  ;;  %v7231_v6 = vor.u32 %v8375_v62, %v7228_v44  ;;  %v8372_v60 = vld [vmem:[%s8675_s14 + $0x64] sm:$0xf0]  ;;  %v7364_v17 = vld [vmem:[%s8675_s14 + $0x1a8] sm:$0xf0]  ;;  %v11420_v10 = vpop.f32.mrf.mxu1 }
 0x1b3   : > { %3603 = vmatpush.bf16.msra.mxu1 %v7135_v38  ;;  %v7356_v38 = vld [vmem:[%s8675_s14 + $0x1a0] sm:$0xf0]  ;;  %v7203_v46 = vor.u32 %v8372_v60, %v7202_v51  ;;  %v7170_v52 = vld [vmem:[%s8675_s14 + $0x8] sm:$0xf]  ;;  %v7370_v1 = vld [vmem:[%s8675_s14 + $0x190] sm:$0xf]  ;;  %v11436_v9 = vpop.f32.mrf.mxu0 }
 0x1b4   : > { %4407 = vmatpush.bf16.msra.mxu2 %v7291_v26  ;;  %v3260_v35 = vadd.f32 %v11308_v24, %v3246_v19  ;;  %v3616_v49 = vmax.f32 %v3262_v20, 0.0  ;;  %v7362_v26 = vld [vmem:[%s8675_s14 + $0x188] sm:$0xf]  ;;  %v7359_v28 = vor.u32 %v8407_v30, %v7356_v38  ;;  %v8359_v39 = vld [vmem:[%s8675_s14 + $0x4] sm:$0xf] }
 0x1b5   : > { %v7363_v8 = vor.u32 %v8412_v63, %v7362_v26  ;;  %v7164_v61 = vld [vmem:[%s8675_s14 + $0x20] sm:$0xf0]  ;;  %v8392_v26 = vld [vmem:[%s8675_s14 + $0x10c] sm:$0xf]  ;;  %v8381_v56 = vld [vmem:[%s8675_s14 + $0xac] sm:$0xf0] }
 0x1b6   : > { %3590 = vmatpush.bf16.msra.mxu0 %v7063_v53  ;;  %v3614_v13 = vmax.f32 %v3260_v35, 0.0  ;;  %v8391_v53 = vld [vmem:[%s8675_s14 + $0x104] sm:$0xf]  ;;  %v7167_v33 = vor.u32 %v8359_v39, %v7164_v61  ;;  %v11422_v35 = vpop.f32.mrf.mxu3  ;;  %v11431_v63 = vpop.f32.mrf.mxu2  ;;  %v8368_v62 = vld [vmem:[%s8675_s14 + $0x4c] sm:$0xf] }
 0x1b7   : > { %3604 = vmatpush.bf16.msra.mxu1 %v7127_v47  ;;  %v8396_v47 = vld [vmem:[%s8675_s14 + $0x124] sm:$0xf0]  ;;  %v7172_v51 = vld [vmem:[%s8675_s14 + $0x28] sm:$0xf0]  ;;  %v8365_v39 = vld [vmem:[%s8675_s14 + $0x2c] sm:$0xf0] }
 0x1b8   : > { %4408 = vmatpush.bf16.msra.mxu2 %v7259_v55  ;;  %v11379_v24 = vpack.c.bf16 %v3616_v49, %v3614_v13  ;;  %v7295_v55 = vor.u32 %v8391_v53, %v7292_v25  ;;  %v7332_v49 = vld [vmem:[%s8675_s14 + $0x168] sm:$0xf0]  ;;  %v7274_v25 = vld [vmem:[%s8675_s14 + $0xd0] sm:$0xf]  ;;  %v8417_v61 = vld [vmem:[%s8675_s14 + $0x1d4] sm:$0xf] }
 0x1b9   : > { %v7300_v13 = vld [vmem:[%s8675_s14 + $0x128] sm:$0xf0] }
 0x1ba   : > { %3591 = vmatpush.bf16.msra.mxu0 %v7055_v48  ;;  %v8380_v48 = vld [vmem:[%s8675_s14 + $0xa4] sm:$0xf0]  ;;  %v11438_v3 = vpop.f32.mrf.mxu1  ;;  %v7303_v27 = vor.u32 %v8392_v26, %v7300_v13  ;;  %v7268_v53 = vld [vmem:[%s8675_s14 + $0xe8] sm:$0xf0]  ;;  %v7610_v26 = vld [vmem:[%s8675_s14 + $0x380] sm:$0xf] }
 0x1bb   : > { %3605 = vmatpush.bf16.msra.mxu1 %v7119_v31  ;;  %v7235_v31 = vor.u32 %v8380_v48, %v7234_v57  ;;  %v11453_v44 = vpop.f32.mrf.mxu0  ;;  %v7204_v57 = vld [vmem:[%s8675_s14 + $0x68] sm:$0xf0]  ;;  %v7210_v48 = vld [vmem:[%s8675_s14 + $0x50] sm:$0xf]  ;;  %v8475_v13 = vld [vmem:[%s8675_s14 + $0x39c] sm:$0xf0] }
 0x1bc   : > { %4409 = vmatpush.bf16.msra.mxu2 %v7227_v50  ;;  %v8367_v50 = vld [vmem:[%s8675_s14 + $0x44] sm:$0xf]  ;;  %v7207_v60 = vor.u32 %v8368_v62, %v7204_v57  ;;  %v8393_v57 = vld [vmem:[%s8675_s14 + $0x114] sm:$0xf] }
 0x1bd   : > { %v7199_v32 = vor.u32 %v8367_v50, %v7196_v2  ;;  %v8360_v2 = vld [vmem:[%s8675_s14 + $0xc] sm:$0xf] }
 0x1be   : > { %3592 = vmatpush.bf16.msra.mxu0 %v7047_v37  ;;  %v8364_v37 = vld [vmem:[%s8675_s14 + $0x24] sm:$0xf0]  ;;  %v11450_v45 = vpop.f32.mrf.mxu2 }
 0x1bf   : > { %3606 = vmatpush.bf16.msra.mxu1 %v7111_v42  ;;  %v7396_v42 = vld [vmem:[%s8675_s14 + $0x1e8] sm:$0xf0]  ;;  %v7171_v19 = vor.u32 %v8364_v37, %v7170_v52  ;;  %v7404_v52 = vld [vmem:[%s8675_s14 + $0x1f0] sm:$0xf0]  ;;  %v7410_v37 = vld [vmem:[%s8675_s14 + $0x1d8] sm:$0xf] }
 0x1c0   : > { %4410 = vmatpush.bf16.msra.mxu2 %v7195_v43  ;;  %v7402_v43 = vld [vmem:[%s8675_s14 + $0x1d0] sm:$0xf]  ;;  %v7399_v20 = vor.u32 %v8416_v0, %v7396_v42  ;;  %v8422_v0 = vld [vmem:[%s8675_s14 + $0x1f4] sm:$0xf0]  ;;  %v7642_v42 = vld [vmem:[%s8675_s14 + $0x3c0] sm:$0xf] }
 0x1c1   : > { %v7403_v23 = vor.u32 %v8421_v16, %v7402_v43  ;;  %v8483_v43 = vld [vmem:[%s8675_s14 + $0x3dc] sm:$0xf0]  ;;  %v8479_v16 = vld [vmem:[%s8675_s14 + $0x3c4] sm:$0xf] }
 0x1c2   : > { %3593 = vmatpush.bf16.msra.mxu0 %v7039_v11  ;;  %v7367_v11 = vor.u32 %v8408_v58, %v7364_v17  ;;  %v7175_v58 = vor.u32 %v8360_v2, %v7172_v51 }
 0x1c3   : > { %3607 = vmatpush.bf16.msra.mxu1 %v7103_v22  ;;  %v7371_v22 = vor.u32 %v8413_v4, %v7370_v1  ;;  %v8409_v1 = vld [vmem:[%s8675_s14 + $0x194] sm:$0xf] }
 0x1c4   : > { %4411 = vmatpush.bf16.msra.mxu2 %v7163_v41  ;;  %v8400_v41 = vld [vmem:[%s8675_s14 + $0x14c] sm:$0xf] }
 0x1c5   : > { %3594 = vmatmul.bf16.vlgmr.msra.gmra.mxu0 %v9986_v18  ;;  %v7298_v18 = vld [vmem:[%s8675_s14 + $0x108] sm:$0xf]  ;;  %v7335_v30 = vor.u32 %v8400_v41, %v7332_v49  ;;  %v7407_v41 = vor.u32 %v8417_v61, %v7404_v52  ;;  %v7411_v49 = vor.u32 %v8422_v0, %v7410_v37  ;;  %v8459_v61 = vld [vmem:[%s8675_s14 + $0x31c] sm:$0xf0]  ;;  %v7548_v0 = vld [vmem:[%s8675_s14 + $0x320] sm:$0xf0] }
 0x1c6   : > { %4432 = vmatpush.bf16.msrb.mxu0 %v7391_v14  ;;  %3608 = vmatmul.bf16.vlgmr.msra.gmra.mxu1 %v10180_v40  ;;  %v7299_v40 = vor.u32 %v8396_v47, %v7298_v18  ;;  %v7338_v14 = vld [vmem:[%s8675_s14 + $0x150] sm:$0xf] }
 0x1c7   : > { %4412 = vmatmul.bf16.vlgmr.msra.gmra.mxu2 %v11379_v24  ;;  %v8389_v18 = vld [vmem:[%s8675_s14 + $0xec] sm:$0xf0] }
 0x1c8   : > { %4460 = vmatpush.bf16.msrb.mxu2 %v7395_v36  ;;  %v8405_v36 = vld [vmem:[%s8675_s14 + $0x16c] sm:$0xf0] }
 0x1c9   : > { %v7339_v38 = vor.u32 %v8405_v36, %v7338_v14  ;;  %v7372_v14 = vld [vmem:[%s8675_s14 + $0x1b0] sm:$0xf0]  ;;  %v7378_v36 = vld [vmem:[%s8675_s14 + $0x198] sm:$0xf] }
 0x1ca   : > { %4433 = vmatpush.bf16.msrb.mxu0 %v7359_v28  ;;  %v7306_v28 = vld [vmem:[%s8675_s14 + $0x110] sm:$0xf] }
 0x1cc   : > { %4461 = vmatpush.bf16.msrb.mxu2 %v7363_v8  ;;  %v8397_v8 = vld [vmem:[%s8675_s14 + $0x12c] sm:$0xf0] }
 0x1cd   : > { %v7307_v34 = vor.u32 %v8397_v8, %v7306_v28  ;;  %v8471_v28 = vld [vmem:[%s8675_s14 + $0x384] sm:$0xf]  ;;  %v7611_v8 = vor.u32 %v8475_v13, %v7610_v26  ;;  %v8377_v26 = vld [vmem:[%s8675_s14 + $0x94] sm:$0xf] }
 0x1ce   : > { %4434 = vmatpush.bf16.msrb.mxu0 %v7327_v54  ;;  %v8384_v54 = vld [vmem:[%s8675_s14 + $0xcc] sm:$0xf] }
 0x1cf   : > { %v7271_v47 = vor.u32 %v8384_v54, %v7268_v53  ;;  %v8401_v54 = vld [vmem:[%s8675_s14 + $0x154] sm:$0xf] }
 0x1d0   : > { %4462 = vmatpush.bf16.msrb.mxu2 %v7331_v21  ;;  %v11441_v21 = vpop.f32.mrf.mxu3 }
 0x1d2   : > { %4435 = vmatpush.bf16.msrb.mxu0 %v7295_v55  ;;  %v7275_v55 = vor.u32 %v8389_v18, %v7274_v25  ;;  %v7375_v18 = vor.u32 %v8409_v1, %v7372_v14  ;;  %v7516_v14 = vld [vmem:[%s8675_s14 + $0x2e0] sm:$0xf0] }
 0x1d4   : > { %4463 = vmatpush.bf16.msrb.mxu2 %v7299_v40  ;;  %v8376_v40 = vld [vmem:[%s8675_s14 + $0x8c] sm:$0xf] }
 0x1d6   : > { %4436 = vmatpush.bf16.msrb.mxu0 %v7263_v12  ;;  %v7239_v12 = vor.u32 %v8376_v40, %v7236_v5  ;;  %v7346_v40 = vld [vmem:[%s8675_s14 + $0x158] sm:$0xf] }
 0x1d7   : > { %v8406_v5 = vld [vmem:[%s8675_s14 + $0x174] sm:$0xf0] }
 0x1d8   : > { %4464 = vmatpush.bf16.msrb.mxu2 %v7267_v59  ;;  %v7243_v59 = vor.u32 %v8381_v56, %v7242_v15  ;;  %v11460_v50 = vpop.f32.mrf.mxu3  ;;  %v8467_v15 = vld [vmem:[%s8675_s14 + $0x35c] sm:$0xf0]  ;;  %v8463_v56 = vld [vmem:[%s8675_s14 + $0x344] sm:$0xf]  ;;  %v7347_v51 = vor.u32 %v8406_v5, %v7346_v40 }
 0x1d9   : > { %v7484_v40 = vld [vmem:[%s8675_s14 + $0x2a0] sm:$0xf0] }
 0x1da   : > { %4437 = vmatpush.bf16.msrb.mxu0 %v7231_v6  ;;  %v8373_v6 = vld [vmem:[%s8675_s14 + $0x6c] sm:$0xf0] }
 0x1dc   : > { %4465 = vmatpush.bf16.msrb.mxu2 %v7235_v31  ;;  %v11458_v31 = vpop.f32.mrf.mxu1 }
 0x1de   : > { %4438 = vmatpush.bf16.msrb.mxu0 %v7199_v32  ;;  %v7211_v32 = vor.u32 %v8373_v6, %v7210_v48 }
 0x1e0   : > { %4466 = vmatpush.bf16.msrb.mxu2 %v7203_v46  ;;  %v7178_v46 = vld [vmem:[%s8675_s14 + $0x10] sm:$0xf]  ;;  %v11498_v25 = vpop.f32.mrf.mxu3 }
 0x1e1   : > { %v7179_v17 = vor.u32 %v8365_v39, %v7178_v46  ;;  %v8398_v46 = vld [vmem:[%s8675_s14 + $0x134] sm:$0xf0]  ;;  %v7546_v39 = vld [vmem:[%s8675_s14 + $0x300] sm:$0xf] }
 0x1e2   : > { %4439 = vmatpush.bf16.msrb.mxu0 %v7167_v33  ;;  %v7643_v33 = vor.u32 %v8483_v43, %v7642_v42  ;;  %v7547_v37 = vor.u32 %v8459_v61, %v7546_v39  ;;  %v7452_v39 = vld [vmem:[%s8675_s14 + $0x260] sm:$0xf0] }
 0x1e4   : > { %4467 = vmatpush.bf16.msrb.mxu2 %v7171_v19  ;;  %v7644_v19 = vld [vmem:[%s8675_s14 + $0x3e0] sm:$0xf0]  ;;  %4418 = vmatpush.bf16.msra.mxu3 %v7643_v33  ;;  %v8385_v33 = vld [vmem:[%s8675_s14 + $0xd4] sm:$0xf] }
 0x1e5   : > { %4440 = vmatmul.bf16.vlgmr.msrb.gmra.mxu0 %v11379_v24  ;;  %v7647_v4 = vor.u32 %v8479_v16, %v7644_v19 }
 0x1e6   : > { %4488 = vmatpush.bf16.msra.mxu0 %v7399_v20  ;;  %v11477_v20 = vld [vmem:[%s11962_s2] sm:$0x3] }
 0x1e7   : > { %4468 = vmatmul.bf16.vlgmr.msrb.gmra.mxu2 %v11379_v24  ;;  %4446 = vmatpush.bf16.msrb.mxu1 %v7647_v4  ;;  %v7276_v4 = vld [vmem:[%s8675_s14 + $0xf0] sm:$0xf0] }
 0x1e8   : > { %4516 = vmatpush.bf16.msra.mxu2 %v7403_v23  ;;  %v785_v23 = vperm.slane %v11477_v20, 1  ;;  %4419 = vmatpush.bf16.msra.mxu3 %v7611_v8  ;;  %v8451_v20 = vld [vmem:[%s8675_s14 + $0x2dc] sm:$0xf0] }
 0x1ea   : > { %4489 = vmatpush.bf16.msra.mxu0 %v7367_v11  ;;  %v11481_v11 = vpop.f32.mrf.mxu2  ;;  %v3276_v43 = vadd.f32 %v11420_v10, %v785_v23  ;;  %v7514_v10 = vld [vmem:[%s8675_s14 + $0x2c0] sm:$0xf] }
 0x1ec   : > { %4517 = vmatpush.bf16.msra.mxu2 %v7371_v22  ;;  %v11483_v22 = vpop.f32.mrf.mxu0 }
 0x1ee   : > { %4490 = vmatpush.bf16.msra.mxu0 %v7335_v30  ;;  %v8414_v30 = vld [vmem:[%s8675_s14 + $0x1b4] sm:$0xf0] }
 0x1f0   : > { %4518 = vmatpush.bf16.msra.mxu2 %v7339_v38  ;;  %v11488_v38 = vpop.f32.mrf.mxu1 }
 0x1f2   : > { %4491 = vmatpush.bf16.msra.mxu0 %v7303_v27  ;;  %v7612_v27 = vld [vmem:[%s8675_s14 + $0x3a0] sm:$0xf0]  ;;  %v11511_v6 = vpop.f32.mrf.mxu2 }
 0x1f3   : > { %v7615_v53 = vor.u32 %v8471_v28, %v7612_v27  ;;  %v7279_v28 = vor.u32 %v8385_v33, %v7276_v4  ;;  %v7244_v27 = vld [vmem:[%s8675_s14 + $0xb0] sm:$0xf0]  ;;  %v8366_v33 = vld [vmem:[%s8675_s14 + $0x34] sm:$0xf0]  ;;  %v8427_v4 = vld [vmem:[%s8675_s14 + $0x21c] sm:$0xf0] }
 0x1f4   : > { %4519 = vmatpush.bf16.msra.mxu2 %v7307_v34  ;;  %v3274_v34 = vadd.f32 %v11401_v29, %v785_v23  ;;  %v7578_v29 = vld [vmem:[%s8675_s14 + $0x340] sm:$0xf]  ;;  %v11519_v52 = vpop.f32.mrf.mxu0  ;;  %v8447_v23 = vld [vmem:[%s8675_s14 + $0x2c4] sm:$0xf] }
 0x1f5   : > { %4447 = vmatpush.bf16.msrb.mxu1 %v7615_v53  ;;  %v7519_v13 = vor.u32 %v8447_v23, %v7516_v14  ;;  %v7482_v53 = vld [vmem:[%s8675_s14 + $0x280] sm:$0xf]  ;;  %v7650_v23 = vld [vmem:[%s8675_s14 + $0x3c8] sm:$0xf] }
 0x1f6   : > { %4492 = vmatpush.bf16.msra.mxu0 %v7271_v47  ;;  %v7379_v47 = vor.u32 %v8414_v30, %v7378_v36  ;;  %v3288_v62 = vadd.f32 %v11414_v7, %v3274_v34  ;;  %v8455_v7 = vld [vmem:[%s8675_s14 + $0x304] sm:$0xf]  ;;  %v3290_v36 = vadd.f32 %v11431_v63, %v3276_v43  ;;  %v7250_v34 = vld [vmem:[%s8675_s14 + $0x98] sm:$0xf] }
 0x1f7   : > { %v7551_v19 = vor.u32 %v8455_v7, %v7548_v0  ;;  %v8439_v63 = vld [vmem:[%s8675_s14 + $0x284] sm:$0xf]  ;;  %v8361_v7 = vld [vmem:[%s8675_s14 + $0x14] sm:$0xf] }
 0x1f8   : > { %4520 = vmatpush.bf16.msra.mxu2 %v7275_v55  ;;  %v7340_v55 = vld [vmem:[%s8675_s14 + $0x170] sm:$0xf0]  ;;  %v3302_v42 = vadd.f32 %v11422_v35, %v3288_v62  ;;  %v11526_v16 = vpop.f32.mrf.mxu1  ;;  %v7282_v35 = vld [vmem:[%s8675_s14 + $0xd8] sm:$0xf]  ;;  %v3304_v5 = vadd.f32 %v11441_v21, %v3290_v36 }
 0x1f9   : > { %v7343_v2 = vor.u32 %v8401_v54, %v7340_v55  ;;  %v8382_v54 = vld [vmem:[%s8675_s14 + $0xb4] sm:$0xf0] }
 0x1fa   : > { %4493 = vmatpush.bf16.msra.mxu0 %v7239_v12  ;;  %v7579_v12 = vor.u32 %v8467_v15, %v7578_v29  ;;  %v3316_v30 = vadd.f32 %v11436_v9, %v3302_v42  ;;  %v11547_v9 = vpop.f32.mrf.mxu2  ;;  %v7251_v62 = vor.u32 %v8382_v54, %v7250_v34  ;;  %v3318_v21 = vadd.f32 %v11453_v44, %v3304_v5  ;;  %v7186_v44 = vld [vmem:[%s8675_s14 + $0x18] sm:$0xf]  ;;  %v8472_v5 = vld [vmem:[%s8675_s14 + $0x38c] sm:$0xf] }
 0x1fc   : > { %4521 = vmatpush.bf16.msra.mxu2 %v7243_v59  ;;  %v7580_v59 = vld [vmem:[%s8675_s14 + $0x360] sm:$0xf0]  ;;  %4420 = vmatpush.bf16.msra.mxu3 %v7579_v12  ;;  %v3330_v29 = vadd.f32 %v11438_v3, %v3316_v30  ;;  %v7487_v12 = vor.u32 %v8439_v63, %v7484_v40  ;;  %v7450_v3 = vld [vmem:[%s8675_s14 + $0x240] sm:$0xf]  ;;  %v8476_v40 = vld [vmem:[%s8675_s14 + $0x3a4] sm:$0xf0] }
 0x1fd   : > { %v7583_v48 = vor.u32 %v8463_v56, %v7580_v59  ;;  %v8369_v56 = vld [vmem:[%s8675_s14 + $0x54] sm:$0xf]  ;;  %v7247_v59 = vor.u32 %v8377_v26, %v7244_v27  ;;  %v8480_v26 = vld [vmem:[%s8675_s14 + $0x3cc] sm:$0xf]  ;;  %v7187_v27 = vor.u32 %v8366_v33, %v7186_v44  ;;  %v8394_v44 = vld [vmem:[%s8675_s14 + $0x11c] sm:$0xf] }
 0x1fe   : > { %4494 = vmatpush.bf16.msra.mxu0 %v7207_v60  ;;  %v7308_v60 = vld [vmem:[%s8675_s14 + $0x130] sm:$0xf0]  ;;  %v3344_v61 = vadd.f32 %v11450_v45, %v3330_v29  ;;  %v7418_v45 = vld [vmem:[%s8675_s14 + $0x200] sm:$0xf] }
 0x1ff   : > { %4448 = vmatpush.bf16.msrb.mxu1 %v7583_v48  ;;  %v7218_v48 = vld [vmem:[%s8675_s14 + $0x58] sm:$0xf] }
 0x200   : > { %4522 = vmatpush.bf16.msra.mxu2 %v7211_v32  ;;  %v7314_v32 = vld [vmem:[%s8675_s14 + $0x118] sm:$0xf]  ;;  %4421 = vmatpush.bf16.msra.mxu3 %v7547_v37  ;;  %v11554_v15 = vpop.f32.mrf.mxu1  ;;  %v7180_v37 = vld [vmem:[%s8675_s14 + $0x30] sm:$0xf0]  ;;  %v3358_v14 = vadd.f32 %v11460_v50, %v3344_v61 }
 0x201   : > { %v7315_v1 = vor.u32 %v8398_v46, %v7314_v32 }
 0x202   : > { %4495 = vmatpush.bf16.msra.mxu0 %v7175_v58  ;;  %v11529_v58 = vpop.f32.mrf.mxu3  ;;  %v3372_v50 = vadd.f32 %v11483_v22, %v3358_v14 }
 0x203   : > { %4449 = vmatpush.bf16.msrb.mxu1 %v7551_v19  ;;  %v8418_v19 = vld [vmem:[%s8675_s14 + $0x1dc] sm:$0xf] }
 0x204   : > { %4523 = vmatpush.bf16.msra.mxu2 %v7179_v17  ;;  %v7311_v17 = vor.u32 %v8393_v57, %v7308_v60  ;;  %v7212_v57 = vld [vmem:[%s8675_s14 + $0x70] sm:$0xf0]  ;;  %v8431_v60 = vld [vmem:[%s8675_s14 + $0x244] sm:$0xf] }
 0x205   : > { %4496 = vmatmul.bf16.vlgmr.msra.gmra.mxu0 %v11379_v24  ;;  %v7455_v0 = vor.u32 %v8431_v60, %v7452_v39  ;;  %v7215_v42 = vor.u32 %v8369_v56, %v7212_v57  ;;  %v7620_v56 = vld [vmem:[%s8675_s14 + $0x3a8] sm:$0xf0]  ;;  %v7348_v60 = vld [vmem:[%s8675_s14 + $0x178] sm:$0xf0] }
 0x206   : > { %4544 = vmatpush.bf16.msrb.mxu0 %v7407_v41  ;;  %v8390_v41 = vld [vmem:[%s8675_s14 + $0xf4] sm:$0xf0]  ;;  %v8464_v57 = vld [vmem:[%s8675_s14 + $0x34c] sm:$0xf] }
 0x207   : > { %4524 = vmatmul.bf16.vlgmr.msra.gmra.mxu2 %v11379_v24  ;;  %v7283_v8 = vor.u32 %v8390_v41, %v7282_v35  ;;  %4450 = vmatpush.bf16.msrb.mxu1 %v7519_v13  ;;  %v8423_v35 = vld [vmem:[%s8675_s14 + $0x204] sm:$0xf]  ;;  %v11578_v41 = vpop.f32.mrf.mxu2  ;;  %v7652_v13 = vld [vmem:[%s8675_s14 + $0x3e8] sm:$0xf0] }
 0x208   : > { %4572 = vmatpush.bf16.msrb.mxu2 %v7411_v49  ;;  %v7515_v49 = vor.u32 %v8451_v20, %v7514_v10  ;;  %v7419_v10 = vor.u32 %v8427_v4, %v7418_v45  ;;  %v7420_v20 = vld [vmem:[%s8675_s14 + $0x220] sm:$0xf0]  ;;  %v7655_v34 = vor.u32 %v8480_v26, %v7652_v13  ;;  %v11590_v54 = vpop.f32.mrf.mxu1 }
 0x209   : > { %v7423_v30 = vor.u32 %v8423_v35, %v7420_v20  ;;  %v7284_v20 = vld [vmem:[%s8675_s14 + $0xf8] sm:$0xf0] }
 0x20a   : > { %4545 = vmatpush.bf16.msrb.mxu0 %v7375_v18  ;;  %4422 = vmatpush.bf16.msra.mxu3 %v7515_v49  ;;  %v8443_v18 = vld [vmem:[%s8675_s14 + $0x29c] sm:$0xf0]  ;;  %v11564_v32 = vpop.f32.mrf.mxu3  ;;  %v8484_v49 = vld [vmem:[%s8675_s14 + $0x3e4] sm:$0xf0] }
 0x20b   : > { %v7483_v55 = vor.u32 %v8443_v18, %v7482_v53  ;;  %4451 = vmatpush.bf16.msrb.mxu1 %v7487_v12  ;;  %v8410_v53 = vld [vmem:[%s8675_s14 + $0x19c] sm:$0xf]  ;;  %v7623_v12 = vor.u32 %v8472_v5, %v7620_v56 }
 0x20c   : > { %4573 = vmatpush.bf16.msrb.mxu2 %v7379_v47  ;;  %v11549_v47 = vpop.f32.mrf.mxu0  ;;  %v7380_v18 = vld [vmem:[%s8675_s14 + $0x1b8] sm:$0xf0] }
 0x20d   : > { %v7220_v56 = vld [vmem:[%s8675_s14 + $0x78] sm:$0xf0] }
 0x20e   : > { %4546 = vmatpush.bf16.msrb.mxu0 %v7343_v2  ;;  %v8374_v2 = vld [vmem:[%s8675_s14 + $0x74] sm:$0xf0]  ;;  %4423 = vmatpush.bf16.msra.mxu3 %v7483_v55  ;;  %v7618_v55 = vld [vmem:[%s8675_s14 + $0x388] sm:$0xf] }
 0x20f   : > { %v7219_v43 = vor.u32 %v8374_v2, %v7218_v48  ;;  %4452 = vmatpush.bf16.msrb.mxu1 %v7455_v0  ;;  %v7619_v29 = vor.u32 %v8476_v40, %v7618_v55  ;;  %v3386_v48 = vadd.f32 %v11488_v38, %v3372_v50  ;;  %v11612_v38 = vpop.f32.mrf.mxu2  ;;  %v7316_v0 = vld [vmem:[%s8675_s14 + $0x138] sm:$0xf0]  ;;  %v8444_v50 = vld [vmem:[%s8675_s14 + $0x2a4] sm:$0xf0] }
 0x210   : > { %4574 = vmatpush.bf16.msrb.mxu2 %v7347_v51  ;;  %v8435_v51 = vld [vmem:[%s8675_s14 + $0x25c] sm:$0xf0]  ;;  %v7319_v35 = vor.u32 %v8394_v44, %v7316_v0  ;;  %v7428_v0 = vld [vmem:[%s8675_s14 + $0x228] sm:$0xf0] }
 0x211   : > { %v7451_v46 = vor.u32 %v8435_v51, %v7450_v3  ;;  %v7588_v3 = vld [vmem:[%s8675_s14 + $0x368] sm:$0xf0]  ;;  %v8402_v51 = vld [vmem:[%s8675_s14 + $0x15c] sm:$0xf]  ;;  %v3400_v39 = vadd.f32 %v11511_v6, %v3386_v48  ;;  %v7554_v6 = vld [vmem:[%s8675_s14 + $0x308] sm:$0xf] }
 0x212   : > { %4547 = vmatpush.bf16.msrb.mxu0 %v7311_v17  ;;  %v7412_v17 = vld [vmem:[%s8675_s14 + $0x1f8] sm:$0xf0]  ;;  %v11594_v63 = vpop.f32.mrf.mxu3 }
 0x213   : > { %4424 = vmatpush.bf16.msra.mxu3 %v7451_v46  ;;  %4453 = vmatpush.bf16.msrb.mxu1 %v7423_v30  ;;  %v7591_v46 = vor.u32 %v8464_v57, %v7588_v3  ;;  %v3414_v33 = vadd.f32 %v11529_v58, %v3400_v39  ;;  %v8448_v58 = vld [vmem:[%s8675_s14 + $0x2cc] sm:$0xf]  ;;  %v7426_v39 = vld [vmem:[%s8675_s14 + $0x208] sm:$0xf] }
 0x214   : > { %4575 = vmatpush.bf16.msrb.mxu2 %v7315_v1  ;;  %v3332_v1 = vadd.f32 %v11458_v31, %v3318_v21  ;;  %v7651_v31 = vor.u32 %v8484_v49, %v7650_v23  ;;  %v7383_v21 = vor.u32 %v8410_v53, %v7380_v18  ;;  %v7522_v23 = vld [vmem:[%s8675_s14 + $0x2c8] sm:$0xf] }
 0x215   : > { %v3428_v4 = vadd.f32 %v11549_v47, %v3414_v33  ;;  %v8452_v49 = vld [vmem:[%s8675_s14 + $0x2e4] sm:$0xf0] }
 0x216   : > { %4548 = vmatpush.bf16.msrb.mxu0 %v7279_v28  ;;  %v3346_v36 = vadd.f32 %v11481_v11, %v3332_v1  ;;  %v11587_v28 = vpop.f32.mrf.mxu0  ;;  %v7415_v11 = vor.u32 %v8418_v19, %v7412_v17  ;;  %v7556_v17 = vld [vmem:[%s8675_s14 + $0x328] sm:$0xf0]  ;;  %v7523_v14 = vor.u32 %v8452_v49, %v7522_v23 }
 0x217   : > { %4425 = vmatpush.bf16.msra.mxu3 %v7419_v10  ;;  %4502 = vmatpush.bf16.msra.mxu1 %v7655_v34  ;;  %v8386_v10 = vld [vmem:[%s8675_s14 + $0xdc] sm:$0xf]  ;;  %v3511_v30 = vpop.f32.mrf.mxu2 }
 0x218   : > { %4576 = vmatpush.bf16.msrb.mxu2 %v7283_v8  ;;  %v7183_v8 = vor.u32 %v8361_v7, %v7180_v37  ;;  %v3360_v22 = vadd.f32 %v11498_v25, %v3346_v36  ;;  %v11617_v7 = vpop.f32.mrf.mxu1  ;;  %v7351_v37 = vor.u32 %v8402_v51, %v7348_v60  ;;  %v7524_v36 = vld [vmem:[%s8675_s14 + $0x2e8] sm:$0xf0]  ;;  %v7287_v13 = vor.u32 %v8386_v10, %v7284_v20  ;;  %v8362_v51 = vld [vmem:[%s8675_s14 + $0x1c] sm:$0xf] }
 0x219   : > { %v7527_v47 = vor.u32 %v8448_v58, %v7524_v36  ;;  %v7188_v60 = vld [vmem:[%s8675_s14 + $0x38] sm:$0xf0] }
 0x21a   : > { %4549 = vmatpush.bf16.msrb.mxu0 %v7247_v59  ;;  %v7586_v59 = vld [vmem:[%s8675_s14 + $0x348] sm:$0xf]  ;;  %v3374_v2 = vadd.f32 %v11519_v52, %v3360_v22  ;;  %v3471_v1 = vpop.f32.mrf.mxu3 }
 0x21b   : > { %4474 = vmatpush.bf16.msrb.mxu3 %v7651_v31  ;;  %4503 = vmatpush.bf16.msra.mxu1 %v7623_v12  ;;  %v3442_v31 = vadd.f32 %v11554_v15, %v3428_v4  ;;  %v7458_v12 = vld [vmem:[%s8675_s14 + $0x248] sm:$0xf] }
 0x21c   : > { %4577 = vmatpush.bf16.msrb.mxu2 %v7251_v62  ;;  %v8468_v62 = vld [vmem:[%s8675_s14 + $0x364] sm:$0xf0]  ;;  %v3388_v61 = vadd.f32 %v11526_v16, %v3374_v2 }
 0x21d   : > { %v7587_v25 = vor.u32 %v8468_v62, %v7586_v59  ;;  %v3456_v53 = vadd.f32 %v11578_v41, %v3442_v31  ;;  %v8436_v59 = vld [vmem:[%s8675_s14 + $0x264] sm:$0xf0]  ;;  %v8432_v41 = vld [vmem:[%s8675_s14 + $0x24c] sm:$0xf] }
 0x21e   : > { %4550 = vmatpush.bf16.msrb.mxu0 %v7215_v42  ;;  %v11614_v52 = vpop.f32.mrf.mxu0  ;;  %v8460_v42 = vld [vmem:[%s8675_s14 + $0x324] sm:$0xf0]  ;;  %v3402_v16 = vadd.f32 %v11547_v9, %v3388_v61  ;;  %v7459_v48 = vor.u32 %v8436_v59, %v7458_v12  ;;  %v8473_v12 = vld [vmem:[%s8675_s14 + $0x394] sm:$0xf] }
 0x21f   : > { %4475 = vmatpush.bf16.msrb.mxu3 %v7619_v29  ;;  %4504 = vmatpush.bf16.msra.mxu1 %v7591_v46  ;;  %v7555_v19 = vor.u32 %v8460_v42, %v7554_v6  ;;  %v8370_v29 = vld [vmem:[%s8675_s14 + $0x5c] sm:$0xf]  ;;  %v3470_v62 = vadd.f32 %v11594_v63, %v3456_v53  ;;  %v8428_v61 = vld [vmem:[%s8675_s14 + $0x224] sm:$0xf0]  ;;  %v8424_v63 = vld [vmem:[%s8675_s14 + $0x20c] sm:$0xf] }
 0x220   : > { %4578 = vmatpush.bf16.msrb.mxu2 %v7219_v43  ;;  %v8456_v43 = vld [vmem:[%s8675_s14 + $0x30c] sm:$0xf]  ;;  %v3416_v9 = vadd.f32 %v11564_v32, %v3402_v16  ;;  %v7490_v32 = vld [vmem:[%s8675_s14 + $0x288] sm:$0xf]  ;;  %v3499_v15 = vpop.f32.mrf.mxu1  ;;  %v7223_v3 = vor.u32 %v8370_v29, %v7220_v56  ;;  %v7431_v6 = vor.u32 %v8424_v63, %v7428_v0  ;;  %v8485_v53 = vld [vmem:[%s8675_s14 + $0x3ec] sm:$0xf0] }
 0x221   : > { %v7559_v45 = vor.u32 %v8456_v43, %v7556_v17  ;;  %v7491_v18 = vor.u32 %v8444_v50, %v7490_v32  ;;  %v7658_v50 = vld [vmem:[%s8675_s14 + $0x3d0] sm:$0xf]  ;;  %v7628_v59 = vld [vmem:[%s8675_s14 + $0x3b0] sm:$0xf0] }
 0x222   : > { %4551 = vmatpush.bf16.msrb.mxu0 %v7183_v8  ;;  %v3430_v26 = vadd.f32 %v11587_v28, %v3416_v9  ;;  %v8378_v8 = vld [vmem:[%s8675_s14 + $0x9c] sm:$0xf]  ;;  %v7492_v28 = vld [vmem:[%s8675_s14 + $0x2a8] sm:$0xf0]  ;;  %v3525_v55 = vpop.f32.mrf.mxu3  ;;  %v8477_v56 = vld [vmem:[%s8675_s14 + $0x3ac] sm:$0xf0] }
 0x223   : > { %4476 = vmatpush.bf16.msrb.mxu3 %v7587_v25  ;;  %4505 = vmatpush.bf16.msra.mxu1 %v7559_v45  ;;  %v3513_v25 = vpop.f32.mrf.mxu2  ;;  %v7530_v63 = vld [vmem:[%s8675_s14 + $0x2d0] sm:$0xf] }
 0x224   : > { %4579 = vmatpush.bf16.msrb.mxu2 %v7187_v27  ;;  %v7252_v27 = vld [vmem:[%s8675_s14 + $0xb8] sm:$0xf0]  ;;  %v3444_v5 = vadd.f32 %v11590_v54, %v3430_v26  ;;  %v7460_v54 = vld [vmem:[%s8675_s14 + $0x268] sm:$0xf0] }
 0x225   : > { %4552 = vmatmul.bf16.vlgmr.msrb.gmra.mxu0 %v11379_v24  ;;  %v7255_v22 = vor.u32 %v8378_v8, %v7252_v27  ;;  %v7463_v2 = vor.u32 %v8432_v41, %v7460_v54  ;;  %v8465_v54 = vld [vmem:[%s8675_s14 + $0x354] sm:$0xf] }
 0x226   : > { %4600 = vmatpush.bf16.msra.mxu0 %v7415_v11  ;;  %v3485_v34 = vpop.f32.mrf.mxu0  ;;  %v8440_v11 = vld [vmem:[%s8675_s14 + $0x28c] sm:$0xf]  ;;  %v3458_v57 = vadd.f32 %v11612_v38, %v3444_v5  ;;  %v7427_v38 = vor.u32 %v8428_v61, %v7426_v39 }
 0x227   : > { %4580 = vmatmul.bf16.vlgmr.msrb.gmra.mxu2 %v11379_v24  ;;  %4477 = vmatpush.bf16.msrb.mxu3 %v7555_v19  ;;  %v7495_v40 = vor.u32 %v8440_v11, %v7492_v28 }
 0x228   : > { %4506 = vmatpush.bf16.msra.mxu1 %v7527_v47  ;;  %v3553_v44 = vpop.f32.mrf.mxu1 }
 0x22a   : > { %4601 = vmatpush.bf16.msra.mxu0 %v7383_v21  ;;  %v3484_v21 = vadd.f32 %v11614_v52, %v3470_v62  ;;  %v7191_v52 = vor.u32 %v8362_v51, %v7188_v60  ;;  %v3527_v33 = vpop.f32.mrf.mxu3  ;;  %v7631_v62 = vor.u32 %v8473_v12, %v7628_v59  ;;  %v7562_v51 = vld [vmem:[%s8675_s14 + $0x310] sm:$0xf]  ;;  %v7538_v59 = vld [vmem:[%s8675_s14 + $0x2d8] sm:$0xf] }
 0x22b   : > { %4478 = vmatpush.bf16.msrb.mxu3 %v7523_v14  ;;  %v3567_v17 = vpop.f32.mrf.mxu2  ;;  %v8461_v60 = vld [vmem:[%s8675_s14 + $0x32c] sm:$0xf0] }
 0x22c   : > { %4507 = vmatpush.bf16.msra.mxu1 %v7495_v40  ;;  %v3498_v42 = vadd.f32 %v11617_v7, %v3484_v21  ;;  %v7659_v40 = vor.u32 %v8485_v53, %v7658_v50  ;;  %v7563_v39 = vor.u32 %v8461_v60, %v7562_v51  ;;  %v7602_v50 = vld [vmem:[%s8675_s14 + $0x358] sm:$0xf]  ;;  %v8466_v53 = vld [vmem:[%s8675_s14 + $0x35c] sm:$0xf] }
 0x22d   : > { %v7508_v51 = vld [vmem:[%s8675_s14 + $0x2b8] sm:$0xf0] }
 0x22e   : > { %4602 = vmatpush.bf16.msra.mxu0 %v7351_v37  ;;  %v3539_v46 = vpop.f32.mrf.mxu0  ;;  %v3472_v37 = vadd.f32 %v3471_v1, %v3458_v57  ;;  %v3512_v16 = vadd.f32 %v3511_v30, %v3498_v42  ;;  %v7594_v57 = vld [vmem:[%s8675_s14 + $0x350] sm:$0xf] }
 0x22f   : > { %4479 = vmatpush.bf16.msrb.mxu3 %v7491_v18  ;;  %v7660_v18 = vld [vmem:[%s8675_s14 + $0x3f0] sm:$0xf0]  ;;  %v7498_v42 = vld [vmem:[%s8675_s14 + $0x290] sm:$0xf] }
 0x230   : > { %4508 = vmatpush.bf16.msra.mxu1 %v7463_v2  ;;  %v3486_v43 = vadd.f32 %v3485_v34, %v3472_v37  ;;  %v3526_v45 = vadd.f32 %v3525_v55, %v3512_v16  ;;  %v3555_v10 = vpop.f32.mrf.mxu1  ;;  %v7596_v2 = vld [vmem:[%s8675_s14 + $0x370] sm:$0xf0]  ;;  %v8453_v37 = vld [vmem:[%s8675_s14 + $0x2ec] sm:$0xf0] }
 0x231   : > { %v7531_v0 = vor.u32 %v8453_v37, %v7530_v63  ;;  %v7476_v63 = vld [vmem:[%s8675_s14 + $0x278] sm:$0xf0] }
 0x232   : > { %4603 = vmatpush.bf16.msra.mxu0 %v7319_v35  ;;  %v3500_v19 = vadd.f32 %v3499_v15, %v3486_v43  ;;  %v3540_v1 = vadd.f32 %v3539_v46, %v3526_v45  ;;  %v3581_v20 = vpop.f32.mrf.mxu3  ;;  %v8481_v15 = vld [vmem:[%s8675_s14 + $0x3d4] sm:$0xf]  ;;  %v8445_v43 = vld [vmem:[%s8675_s14 + $0x2ac] sm:$0xf0] }
 0x233   : > { %4480 = vmatpush.bf16.msrb.mxu3 %v7459_v48  ;;  %v3569_v9 = vpop.f32.mrf.mxu2  ;;  %v7663_v5 = vor.u32 %v8481_v15, %v7660_v18  ;;  %v8469_v48 = vld [vmem:[%s8675_s14 + $0x36c] sm:$0xf0]  ;;  %v7564_v46 = vld [vmem:[%s8675_s14 + $0x330] sm:$0xf0]  ;;  %v7499_v16 = vor.u32 %v8445_v43, %v7498_v42  ;;  %v7604_v15 = vld [vmem:[%s8675_s14 + $0x378] sm:$0xf0] }
 0x234   : > { %4509 = vmatpush.bf16.msra.mxu1 %v7431_v6  ;;  %v3514_v4 = vadd.f32 %v3513_v25, %v3500_v19  ;;  %v3554_v7 = vadd.f32 %v3553_v44, %v3540_v1  ;;  %v7595_v21 = vor.u32 %v8469_v48, %v7594_v57  ;;  %v8457_v25 = vld [vmem:[%s8675_s14 + $0x314] sm:$0xf]  ;;  %v8437_v45 = vld [vmem:[%s8675_s14 + $0x26c] sm:$0xf0]  ;;  %v7540_v57 = vld [vmem:[%s8675_s14 + $0x2f8] sm:$0xf0] }
 0x235   : > { %v7567_v61 = vor.u32 %v8457_v25, %v7564_v46  ;;  %v8449_v44 = vld [vmem:[%s8675_s14 + $0x2d4] sm:$0xf]  ;;  %v7474_v46 = vld [vmem:[%s8675_s14 + $0x258] sm:$0xf]  ;;  %v7444_v42 = vld [vmem:[%s8675_s14 + $0x238] sm:$0xf0] }
 0x236   : > { %4604 = vmatpush.bf16.msra.mxu0 %v7287_v13  ;;  %v3541_v35 = vpop.f32.mrf.mxu0  ;;  %v3528_v23 = vadd.f32 %v3527_v33, %v3514_v4  ;;  %v3568_v58 = vadd.f32 %v3567_v17, %v3554_v7  ;;  %v7500_v33 = vld [vmem:[%s8675_s14 + $0x2b0] sm:$0xf0]  ;;  %v7466_v17 = vld [vmem:[%s8675_s14 + $0x250] sm:$0xf] }
 0x237   : > { %4481 = vmatpush.bf16.msrb.mxu3 %v7427_v38  ;;  %v7532_v38 = vld [vmem:[%s8675_s14 + $0x2f0] sm:$0xf0]  ;;  %v7467_v1 = vor.u32 %v8437_v45, %v7466_v17 }
 0x238   : > { %v3542_v49 = vadd.f32 %v3541_v35, %v3528_v23  ;;  %v3582_v47 = vadd.f32 %v3581_v20, %v3568_v58  ;;  %v7535_v6 = vor.u32 %v8449_v44, %v7532_v38  ;;  %v8433_v4 = vld [vmem:[%s8675_s14 + $0x254] sm:$0xf]  ;;  %v7434_v20 = vld [vmem:[%s8675_s14 + $0x210] sm:$0xf]  ;;  %v7666_v58 = vld [vmem:[%s8675_s14 + $0x3d8] sm:$0xf] }
 0x239   : > { %v7468_v35 = vld [vmem:[%s8675_s14 + $0x270] sm:$0xf0]  ;;  %v8429_v23 = vld [vmem:[%s8675_s14 + $0x22c] sm:$0xf0]  ;;  %v7442_v38 = vld [vmem:[%s8675_s14 + $0x218] sm:$0xf] }
 0x23a   : > { %4605 = vmatpush.bf16.msra.mxu0 %v7255_v22  ;;  %v3556_v36 = vadd.f32 %v3555_v10, %v3542_v49  ;;  %v3583_v26 = vpop.f32.mrf.mxu3  ;;  %v7626_v22 = vld [vmem:[%s8675_s14 + $0x390] sm:$0xf]  ;;  %v7471_v10 = vor.u32 %v8433_v4, %v7468_v35  ;;  %v8425_v7 = vld [vmem:[%s8675_s14 + $0x214] sm:$0xf] }
 0x23b   : > { %v7627_v41 = vor.u32 %v8477_v56, %v7626_v22  ;;  %v7436_v49 = vld [vmem:[%s8675_s14 + $0x230] sm:$0xf0]  ;;  %v7572_v22 = vld [vmem:[%s8675_s14 + $0x338] sm:$0xf0] }
 0x23c   : > { %v3570_v31 = vadd.f32 %v3569_v9, %v3556_v36  ;;  %v8486_v9 = vld [vmem:[%s8675_s14 + $0x3f4] sm:$0xf0]  ;;  %v7668_v36 = vld [vmem:[%s8675_s14 + $0x3f8] sm:$0xf0] }
 0x23e   : > { %4606 = vmatpush.bf16.msra.mxu0 %v7223_v3  ;;  %v3584_v13 = vadd.f32 %v3583_v26, %v3570_v31  ;;  %v7599_v3 = vor.u32 %v8465_v54, %v7596_v2  ;;  %v7667_v31 = vor.u32 %v8486_v9, %v7666_v58  ;;  %v7506_v2 = vld [vmem:[%s8675_s14 + $0x298] sm:$0xf] }
 0x242   : > { %4607 = vmatpush.bf16.msra.mxu0 %v7191_v52  ;;  %v3595_v14 = vpop.f32.mrf.mxu0  ;;  %v8441_v52 = vld [vmem:[%s8675_s14 + $0x294] sm:$0xf] }
 0x243   : > { %v3609_v30 = vpop.f32.mrf.mxu1  ;;  %v7503_v19 = vor.u32 %v8441_v52, %v7500_v33 }
 0x245   : > { %4608 = vmatmul.bf16.vlgmr.msra.gmra.mxu0 %v11379_v24  ;;  %v3596_v24 = vadd.f32 %v3595_v14, %v3582_v47  ;;  %v8482_v14 = vld [vmem:[%s8675_s14 + $0x3dc] sm:$0xf]  ;;  %v7439_v47 = vor.u32 %v8425_v7, %v7436_v49 }
 0x246   : > { %v7671_v26 = vor.u32 %v8482_v14, %v7668_v36 }
 0x247   : > { %v3610_v27 = vadd.f32 %v3609_v30, %v3596_v24  ;;  %v7435_v30 = vor.u32 %v8429_v23, %v7434_v20  ;;  %v7634_v24 = vld [vmem:[%s8675_s14 + $0x398] sm:$0xf]  ;;  %v3627_v23 = vld [vmem:[#allocation2 + $0x20] sm:$0xff] }
 0x249   : > { %v3615_v28 = vmax.f32 %v3610_v27, 0.0  ;;  %v7636_v27 = vld [vmem:[%s8675_s14 + $0x3b8] sm:$0xf0] }
 0x24a   : > { %v3597_v8 = vpop.f32.mrf.mxu0 }
 0x24b   : > { %v3598_v34 = vadd.f32 %v3597_v8, %v3584_v13  ;;  %v3611_v32 = vpop.f32.mrf.mxu1  ;;  %v8478_v13 = vld [vmem:[%s8675_s14 + $0x3b4] sm:$0xf0]  ;;  %v8474_v8 = vld [vmem:[%s8675_s14 + $0x39c] sm:$0xf] }
 0x24d   : > { %v3612_v11 = vadd.f32 %v3611_v32, %v3598_v34  ;;  %v7635_v34 = vor.u32 %v8478_v13, %v7634_v24  ;;  %v7639_v32 = vor.u32 %v8474_v8, %v7636_v27 }
 0x24f   : > { %v3617_v55 = vmax.f32 %v3612_v11, 0.0  ;;  %v8470_v11 = vld [vmem:[%s8675_s14 + $0x374] sm:$0xf0] }
 0x250   : > { %v7603_v18 = vor.u32 %v8470_v11, %v7602_v50 }
 0x251   : > { %v11667_v29 = vpack.c.bf16 %v3617_v55, %v3615_v28  ;;  %v7607_v28 = vor.u32 %v8466_v53, %v7604_v15  ;;  %v7570_v55 = vld [vmem:[%s8675_s14 + $0x318] sm:$0xf] }
 0x252   : > { %v3629_v53 = vld [vmem:[#allocation2 + $0x38] sm:$0xff] }
 0x253   : > { %4426 = vmatmul.bf16.vlgmr.msra.gmra.mxu3 %v11667_v29  ;;  %4454 = vmatmul.bf16.vlgmr.msrb.gmra.mxu1 %v11667_v29 }
 0x254   : > { %4530 = vmatpush.bf16.msra.mxu3 %v7659_v40  ;;  %4558 = vmatpush.bf16.msrb.mxu1 %v7663_v5  ;;  %v8462_v40 = vld [vmem:[%s8675_s14 + $0x334] sm:$0xf0]  ;;  %v8458_v5 = vld [vmem:[%s8675_s14 + $0x31c] sm:$0xf] }
 0x255   : > { %v7571_v56 = vor.u32 %v8462_v40, %v7570_v55  ;;  %v7575_v12 = vor.u32 %v8458_v5, %v7572_v22  ;;  %v3628_v22 = vld [vmem:[#allocation2 + $0x10] sm:$0xff] }
 0x258   : > { %4531 = vmatpush.bf16.msra.mxu3 %v7627_v41  ;;  %4559 = vmatpush.bf16.msrb.mxu1 %v7631_v62  ;;  %v8454_v41 = vld [vmem:[%s8675_s14 + $0x2f4] sm:$0xf0]  ;;  %v8450_v62 = vld [vmem:[%s8675_s14 + $0x2dc] sm:$0xf] }
 0x259   : > { %v7539_v48 = vor.u32 %v8454_v41, %v7538_v59  ;;  %v7543_v54 = vor.u32 %v8450_v62, %v7540_v57  ;;  %v3623_v59 = vld [vmem:[#allocation2 + $0x68] sm:$0xff] }
 0x25c   : > { %4532 = vmatpush.bf16.msra.mxu3 %v7595_v21  ;;  %4560 = vmatpush.bf16.msrb.mxu1 %v7599_v3  ;;  %v8446_v21 = vld [vmem:[%s8675_s14 + $0x2b4] sm:$0xf0]  ;;  %v8442_v3 = vld [vmem:[%s8675_s14 + $0x29c] sm:$0xf] }
 0x25d   : > { %v7507_v60 = vor.u32 %v8446_v21, %v7506_v2  ;;  %v7511_v25 = vor.u32 %v8442_v3, %v7508_v51  ;;  %v3622_v2 = vld [vmem:[#allocation2 + $0x50] sm:$0xff] }
 0x260   : > { %4533 = vmatpush.bf16.msra.mxu3 %v7563_v39  ;;  %4561 = vmatpush.bf16.msrb.mxu1 %v7567_v61  ;;  %v8438_v39 = vld [vmem:[%s8675_s14 + $0x274] sm:$0xf0]  ;;  %v8434_v61 = vld [vmem:[%s8675_s14 + $0x25c] sm:$0xf] }
 0x261   : > { %v7475_v37 = vor.u32 %v8438_v39, %v7474_v46  ;;  %v7479_v44 = vor.u32 %v8434_v61, %v7476_v63 }
 0x262   : > { %v4441_v33 = vpop.f32.mrf.mxu0 }
 0x263   : > { %4482 = vmatmul.bf16.vlgmr.msrb.gmra.mxu3 %v11667_v29  ;;  %4510 = vmatmul.bf16.vlgmr.msra.gmra.mxu1 %v11667_v29 }
 0x264   : > { %4534 = vmatpush.bf16.msra.mxu3 %v7531_v0  ;;  %4562 = vmatpush.bf16.msrb.mxu1 %v7535_v6  ;;  %v8430_v0 = vld [vmem:[%s8675_s14 + $0x234] sm:$0xf0]  ;;  %v8426_v6 = vld [vmem:[%s8675_s14 + $0x21c] sm:$0xf] }
 0x265   : > { %v7443_v43 = vor.u32 %v8430_v0, %v7442_v38  ;;  %v7447_v52 = vor.u32 %v8426_v6, %v7444_v42  ;;  %v3625_v42 = vld [vmem:[#allocation2 + $0x48] sm:$0xff] }
 0x268   : > { %4535 = vmatpush.bf16.msra.mxu3 %v7499_v16  ;;  %4563 = vmatpush.bf16.msrb.mxu1 %v7503_v19  ;;  %v4413_v16 = vpop.f32.mrf.mxu2  ;;  %v3619_v19 = vld [vmem:[#allocation2] sm:$0xff] }
 0x26a   : > { %v4443_v35 = vpop.f32.mrf.mxu0 }
 0x26c   : > { %4536 = vmatpush.bf16.msra.mxu3 %v7467_v1  ;;  %4564 = vmatpush.bf16.msrb.mxu1 %v7471_v10  ;;  %v3618_v1 = vld [vmem:[#allocation2 + $0x30] sm:$0xff] }
 0x270   : > { %4537 = vmatpush.bf16.msra.mxu3 %v7435_v30  ;;  %4565 = vmatpush.bf16.msrb.mxu1 %v7439_v47  ;;  %v4415_v9 = vpop.f32.mrf.mxu2 }
 0x273   : > { %4538 = vmatmul.bf16.vlgmr.msra.gmra.mxu3 %v11667_v29  ;;  %4566 = vmatmul.bf16.vlgmr.msrb.gmra.mxu1 %v11667_v29 }
 0x274   : > { %4586 = vmatpush.bf16.msrb.mxu3 %v7667_v31  ;;  %4614 = vmatpush.bf16.msra.mxu1 %v7671_v26  ;;  %v3621_v31 = vld [vmem:[#allocation2 + $0x18] sm:$0xff] }
 0x278   : > { %4587 = vmatpush.bf16.msrb.mxu3 %v7635_v34  ;;  %4615 = vmatpush.bf16.msra.mxu1 %v7639_v32  ;;  %v4469_v8 = vpop.f32.mrf.mxu2  ;;  %v3620_v32 = vld [vmem:[#allocation2 + $0x58] sm:$0xff] }
 0x27c   : > { %4588 = vmatpush.bf16.msrb.mxu3 %v7603_v18  ;;  %4616 = vmatpush.bf16.msra.mxu1 %v7607_v28 }
 0x280   : > { %4589 = vmatpush.bf16.msrb.mxu3 %v7571_v56  ;;  %4617 = vmatpush.bf16.msra.mxu1 %v7575_v12  ;;  %v4471_v40 = vpop.f32.mrf.mxu2 }
 0x282   : > { %v4497_v36 = vpop.f32.mrf.mxu0 }
 0x284   : > { %4590 = vmatpush.bf16.msrb.mxu3 %v7539_v48  ;;  %4618 = vmatpush.bf16.msra.mxu1 %v7543_v54 }
 0x288   : > { %4591 = vmatpush.bf16.msrb.mxu3 %v7507_v60  ;;  %4619 = vmatpush.bf16.msra.mxu1 %v7511_v25  ;;  %v3631_v60 = vld [vmem:[#allocation2 + $0x70] sm:$0xff] }
 0x28a   : > { %v4499_v34 = vpop.f32.mrf.mxu0  ;;  %v4525_v54 = vpop.f32.mrf.mxu2 }
 0x28c   : > { %4592 = vmatpush.bf16.msrb.mxu3 %v7475_v37  ;;  %4620 = vmatpush.bf16.msra.mxu1 %v7479_v44  ;;  %v3630_v37 = vld [vmem:[#allocation2 + $0x60] sm:$0xff] }
 0x290   : > { %4593 = vmatpush.bf16.msrb.mxu3 %v7443_v43  ;;  %4621 = vmatpush.bf16.msra.mxu1 %v7447_v52 }
 0x292   : > { %v4527_v63 = vpop.f32.mrf.mxu2 }
 0x293   : > { %4594 = vmatmul.bf16.vlgmr.msrb.gmra.mxu3 %v11667_v29  ;;  %4622 = vmatmul.bf16.vlgmr.msra.gmra.mxu1 %v11667_v29  ;;  %v3626_v29 = vld [vmem:[#allocation2 + $0x40] sm:$0xff] }
 0x2a2   : > { %v4553_v5 = vpop.f32.mrf.mxu0 }
 0x2aa   : > { %v4555_v51 = vpop.f32.mrf.mxu0 }
 0x2c2   : > { %v4609_v6 = vpop.f32.mrf.mxu0 }
 0x2d0   : > { %v4455_v17 = vpop.f32.mrf.mxu1 }
 0x2d1   : > { %v4456_v45 = vadd.f32 %v4455_v17, %v4441_v33 }
 0x2d3   : > { %v4629_v4 = vadd.f32 %v4456_v45, %v3619_v19  ;;  %v3624_v19 = vld [vmem:[#allocation2 + $0x8] sm:$0xff] }
 0x2d5   : > { %4645 = vst [vmem:[#allocation2] sm:$0xff] %v4629_v4  ;;  %v4611_v4 = vpop.f32.mrf.mxu0 }
 0x2d6   : > { %v4427_v10 = vpop.f32.mrf.mxu3 }
 0x2d7   : > { %v4428_v20 = vadd.f32 %v4427_v10, %v4413_v16  ;;  %v4581_v16 = vpop.f32.mrf.mxu2 }
 0x2d8   : > { %v4457_v7 = vpop.f32.mrf.mxu1 }
 0x2d9   : > { %v4628_v49 = vadd.f32 %v4428_v20, %v3618_v1  ;;  %v4458_v58 = vadd.f32 %v4457_v7, %v4443_v35  ;;  %v3633_v35 = vld [vmem:[#allocation2 + $0x28] sm:$0xff] }
 0x2db   : > { %4644 = vst [vmem:[#allocation2 + $0x30] sm:$0xff] %v4628_v49  ;;  %v4637_v14 = vadd.f32 %v4458_v58, %v3627_v23  ;;  %v3632_v49 = vld [vmem:[#allocation2 + $0x78] sm:$0xff] }
 0x2dd   : > { %4653 = vst [vmem:[#allocation2 + $0x20] sm:$0xff] %v4637_v14 }
 0x2de   : > { %v4429_v30 = vpop.f32.mrf.mxu3 }
 0x2df   : > { %v4430_v47 = vadd.f32 %v4429_v30, %v4415_v9  ;;  %v4583_v7 = vpop.f32.mrf.mxu2 }
 0x2e0   : > { %v4511_v26 = vpop.f32.mrf.mxu1 }
 0x2e1   : > { %v4636_v24 = vadd.f32 %v4430_v47, %v3626_v29  ;;  %v4512_v13 = vadd.f32 %v4511_v26, %v4497_v36 }
 0x2e3   : > { %4652 = vst [vmem:[#allocation2 + $0x40] sm:$0xff] %v4636_v24  ;;  %v4631_v27 = vadd.f32 %v4512_v13, %v3621_v31 }
 0x2e5   : > { %4647 = vst [vmem:[#allocation2 + $0x18] sm:$0xff] %v4631_v27 }
 0x2e6   : > { %v4483_v50 = vpop.f32.mrf.mxu3 }
 0x2e7   : > { %v4484_v11 = vadd.f32 %v4483_v50, %v4469_v8 }
 0x2e8   : > { %v4513_v15 = vpop.f32.mrf.mxu1 }
 0x2e9   : > { %v4630_v18 = vadd.f32 %v4484_v11, %v3620_v32  ;;  %v4514_v28 = vadd.f32 %v4513_v15, %v4499_v34 }
 0x2eb   : > { %4646 = vst [vmem:[#allocation2 + $0x58] sm:$0xff] %v4630_v18  ;;  %v4639_v55 = vadd.f32 %v4514_v28, %v3629_v53 }
 0x2ed   : > { %4655 = vst [vmem:[#allocation2 + $0x38] sm:$0xff] %v4639_v55 }
 0x2ee   : > { %v4485_v56 = vpop.f32.mrf.mxu3 }
 0x2ef   : > { %v4486_v12 = vadd.f32 %v4485_v56, %v4471_v40 }
 0x2f0   : > { %v4567_v41 = vpop.f32.mrf.mxu1 }
 0x2f1   : > { %v4638_v62 = vadd.f32 %v4486_v12, %v3628_v22  ;;  %v4568_v57 = vadd.f32 %v4567_v41, %v4553_v5 }
 0x2f3   : > { %4654 = vst [vmem:[#allocation2 + $0x10] sm:$0xff] %v4638_v62  ;;  %v4633_v48 = vadd.f32 %v4568_v57, %v3623_v59 }
 0x2f5   : > { %4649 = vst [vmem:[#allocation2 + $0x68] sm:$0xff] %v4633_v48 }
 0x2f6   : > { %v4539_v21 = vpop.f32.mrf.mxu3 }
 0x2f7   : > { %v4540_v3 = vadd.f32 %v4539_v21, %v4525_v54 }
 0x2f8   : > { %v4569_v25 = vpop.f32.mrf.mxu1 }
 0x2f9   : > { %v4632_v46 = vadd.f32 %v4540_v3, %v3622_v2  ;;  %v4570_v39 = vadd.f32 %v4569_v25, %v4555_v51 }
 0x2fb   : > { %4648 = vst [vmem:[#allocation2 + $0x50] sm:$0xff] %v4632_v46  ;;  %v4641_v61 = vadd.f32 %v4570_v39, %v3631_v60 }
 0x2fd   : > { %4657 = vst [vmem:[#allocation2 + $0x70] sm:$0xff] %v4641_v61 }
 0x2fe   : > { %v4541_v44 = vpop.f32.mrf.mxu3 }
 0x2ff   : > { %v4542_v38 = vadd.f32 %v4541_v44, %v4527_v63 }
 0x301   : > { %v4640_v0 = vadd.f32 %v4542_v38, %v3630_v37 }
 0x303   : > { %4656 = vst [vmem:[#allocation2 + $0x60] sm:$0xff] %v4640_v0 }
 0x310   : > { %v4623_v43 = vpop.f32.mrf.mxu1 }
 0x311   : > { %v4624_v52 = vadd.f32 %v4623_v43, %v4609_v6 }
 0x313   : > { %v4635_v33 = vadd.f32 %v4624_v52, %v3625_v42 }
 0x315   : > { %4651 = vst [vmem:[#allocation2 + $0x48] sm:$0xff] %v4635_v33 }
 0x316   : > { %v4595_v17 = vpop.f32.mrf.mxu3 }
 0x317   : > { %v4596_v45 = vadd.f32 %v4595_v17, %v4581_v16 }
 0x318   : > { %v4625_v1 = vpop.f32.mrf.mxu1 }
 0x319   : > { %v4634_v10 = vadd.f32 %v4596_v45, %v3624_v19  ;;  %v4626_v20 = vadd.f32 %v4625_v1, %v4611_v4 }
 0x31b   : > { %4650 = vst [vmem:[#allocation2 + $0x8] sm:$0xff] %v4634_v10  ;;  %v4643_v23 = vadd.f32 %v4626_v20, %v3633_v35 }
 0x31d   : > { %4659 = vst [vmem:[#allocation2 + $0x28] sm:$0xff] %v4643_v23 }
 0x31e   : > { %v4597_v58 = vpop.f32.mrf.mxu3 }
 0x31f   : > { %v4598_v9 = vadd.f32 %v4597_v58, %v4583_v7  ;;  %4663 = sbr.rel (%p7672_p7) target bundleno = 1015 (0x3f7), region = 56 }
 0x321   : > { %v4642_v14 = vadd.f32 %v4598_v9, %v3632_v49 }
 0x323   : > { %4658 = vst [vmem:[#allocation2 + $0x78] sm:$0xff] %v4642_v14 }
 0x324   : > { %v8494_v36 = vld [vmem:[%s11965_s5 + $0x38] sm:$0xff]  ;;  %v8493_v31 = vld [vmem:[%s11965_s5 + $0x30] sm:$0xff]  ;;  %v8492_v8 = vld [vmem:[%s11965_s5 + $0x28] sm:$0xff] }
 0x325   : > { %v8502_v29 = vld [vmem:[%s11965_s5 + $0x78] sm:$0xff]  ;;  %5254 = vmatpush.bf16.msra.mxu0 %v8494_v36  ;;  %v8501_v26 = vld [vmem:[%s11965_s5 + $0x70] sm:$0xff]  ;;  %v8500_v27 = vld [vmem:[%s11965_s5 + $0x68] sm:$0xff] }
 0x326   : > { %v8510_v30 = vld [vmem:[%s11965_s5 + $0xb8] sm:$0xff]  ;;  %5268 = vmatpush.bf16.msra.mxu1 %v8502_v29  ;;  %v8509_v24 = vld [vmem:[%s11965_s5 + $0xb0] sm:$0xff]  ;;  %v8508_v34 = vld [vmem:[%s11965_s5 + $0xa8] sm:$0xff] }
 0x327   : > { %v8518_v47 = vld [vmem:[%s11965_s5 + $0xf8] sm:$0xff]  ;;  %5282 = vmatpush.bf16.msra.mxu2 %v8510_v30  ;;  %v8517_v13 = vld [vmem:[%s11965_s5 + $0xf0] sm:$0xff]  ;;  %v8516_v32 = vld [vmem:[%s11965_s5 + $0xe8] sm:$0xff] }
 0x328   : > { %5296 = vmatpush.bf16.msra.mxu3 %v8518_v47  ;;  %v8491_v50 = vld [vmem:[%s11965_s5 + $0x20] sm:$0xff]  ;;  %v8490_v18 = vld [vmem:[%s11965_s5 + $0x18] sm:$0xff]  ;;  %v8489_v22 = vld [vmem:[%s11965_s5 + $0x10] sm:$0xff] }
 0x329   : > { %5255 = vmatpush.bf16.msra.mxu0 %v8493_v31  ;;  %v8499_v11 = vld [vmem:[%s11965_s5 + $0x60] sm:$0xff]  ;;  %v8498_v28 = vld [vmem:[%s11965_s5 + $0x58] sm:$0xff]  ;;  %v8497_v56 = vld [vmem:[%s11965_s5 + $0x50] sm:$0xff] }
 0x32a   : > { %5269 = vmatpush.bf16.msra.mxu1 %v8501_v26  ;;  %v8507_v53 = vld [vmem:[%s11965_s5 + $0xa0] sm:$0xff]  ;;  %v8506_v40 = vld [vmem:[%s11965_s5 + $0x98] sm:$0xff]  ;;  %v8505_v12 = vld [vmem:[%s11965_s5 + $0x90] sm:$0xff] }
 0x32b   : > { %5283 = vmatpush.bf16.msra.mxu2 %v8509_v24  ;;  %v8515_v15 = vld [vmem:[%s11965_s5 + $0xe0] sm:$0xff]  ;;  %v8514_v5 = vld [vmem:[%s11965_s5 + $0xd8] sm:$0xff]  ;;  %v8513_v41 = vld [vmem:[%s11965_s5 + $0xd0] sm:$0xff] }
 0x32c   : > { %5297 = vmatpush.bf16.msra.mxu3 %v8517_v13  ;;  %v11794_v55 = vld [vmem:[%s11964_s4] sm:$0xff]  ;;  %v4666_v62 = vld [vmem:[#allocation2 + $0x58] sm:$0xff]  ;;  %v4674_v57 = vld [vmem:[#allocation2 + $0x10] sm:$0xff] }
 0x32d   : > { %5256 = vmatpush.bf16.msra.mxu0 %v8492_v8  ;;  %v4684_v59 = vperm.slane %v11794_v55, 2  ;;  %v4682_v48 = vperm.slane %v11794_v55, 0  ;;  %v4685_v54 = vperm.slane %v11794_v55, 3  ;;  %v4664_v2 = vld [vmem:[#allocation2 + $0x30] sm:$0xff]  ;;  %v4672_v21 = vld [vmem:[#allocation2 + $0x40] sm:$0xff]  ;;  %v4667_v3 = vld [vmem:[#allocation2 + $0x18] sm:$0xff] }
 0x32e   : > { %5270 = vmatpush.bf16.msra.mxu1 %v8500_v27  ;;  %v4683_v51 = vperm.slane %v11794_v55, 1  ;;  %v4675_v60 = vld [vmem:[#allocation2 + $0x38] sm:$0xff]  ;;  %v4665_v25 = vld [vmem:[#allocation2] sm:$0xff]  ;;  %v8488_v63 = vld [vmem:[%s11965_s5 + $0x8] sm:$0xff] }
 0x32f   : > { %5284 = vmatpush.bf16.msra.mxu2 %v8508_v34  ;;  %v4673_v46 = vld [vmem:[#allocation2 + $0x20] sm:$0xff]  ;;  %v4700_v39 = vadd.f32 %v4684_v59, %v4666_v62  ;;  %v4708_v61 = vadd.f32 %v4684_v59, %v4674_v57  ;;  %v8496_v37 = vld [vmem:[%s11965_s5 + $0x48] sm:$0xff]  ;;  %v4698_v44 = vadd.f32 %v4682_v48, %v4664_v2  ;;  %v4706_v38 = vadd.f32 %v4682_v48, %v4672_v21  ;;  %v8526_v58 = vld [vmem:[%s11965_s5 + $0x138] sm:$0xff] }
 0x330   : > { %5298 = vmatpush.bf16.msra.mxu3 %v8516_v32  ;;  %v4701_v0 = vadd.f32 %v4685_v54, %v4667_v3  ;;  %v8504_v6 = vld [vmem:[%s11965_s5 + $0x88] sm:$0xff]  ;;  %v4709_v43 = vadd.f32 %v4685_v54, %v4675_v60  ;;  %v4699_v52 = vadd.f32 %v4683_v51, %v4665_v25  ;;  %v4707_v33 = vadd.f32 %v4683_v51, %v4673_v46  ;;  %v8487_v16 = vld [vmem:[%s11965_s5] sm:$0xff]  ;;  %v8534_v9 = vld [vmem:[%s11965_s5 + $0x178] sm:$0xff] }
 0x331   : > { %5257 = vmatpush.bf16.msra.mxu0 %v8491_v50  ;;  %v8512_v42 = vld [vmem:[%s11965_s5 + $0xc8] sm:$0xff]  ;;  %v8495_v19 = vld [vmem:[%s11965_s5 + $0x40] sm:$0xff]  ;;  %v4716_v17 = vmax.f32 %v4700_v39, 0.0  ;;  %v4724_v45 = vmax.f32 %v4708_v61, 0.0  ;;  %v4714_v4 = vmax.f32 %v4698_v44, 0.0  ;;  %v4722_v35 = vmax.f32 %v4706_v38, 0.0 }
 0x332   : > { %5271 = vmatpush.bf16.msra.mxu1 %v8499_v11  ;;  %v8503_v1 = vld [vmem:[%s11965_s5 + $0x80] sm:$0xff]  ;;  %v4717_v20 = vmax.f32 %v4701_v0, 0.0  ;;  %v4725_v23 = vmax.f32 %v4709_v43, 0.0  ;;  %v4715_v7 = vmax.f32 %v4699_v52, 0.0  ;;  %v4723_v49 = vmax.f32 %v4707_v33, 0.0  ;;  %v8542_v14 = vld [vmem:[%s11965_s5 + $0x1b8] sm:$0xff] }
 0x333   : > { %5285 = vmatpush.bf16.msra.mxu2 %v8507_v53  ;;  %v8511_v10 = vld [vmem:[%s11965_s5 + $0xc0] sm:$0xff]  ;;  %v8550_v36 = vld [vmem:[%s11965_s5 + $0x1f8] sm:$0xff]  ;;  %v4732_v29 = vpack.c.bf16 %v4724_v45, %v4716_v17  ;;  %v4730_v30 = vpack.c.bf16 %v4722_v35, %v4714_v4  ;;  %v8525_v26 = vld [vmem:[%s11965_s5 + $0x130] sm:$0xff]  ;;  %v4686_v59 = vperm.slane %v11794_v55, 4  ;;  %v4687_v54 = vperm.slane %v11794_v55, 5 }
 0x334   : > { %5299 = vmatpush.bf16.msra.mxu3 %v8515_v15  ;;  %v4733_v47 = vpack.c.bf16 %v4725_v23, %v4717_v20  ;;  %v4731_v31 = vpack.c.bf16 %v4723_v49, %v4715_v7  ;;  %v8533_v24 = vld [vmem:[%s11965_s5 + $0x170] sm:$0xff]  ;;  %v8524_v27 = vld [vmem:[%s11965_s5 + $0x128] sm:$0xff]  ;;  %v8523_v11 = vld [vmem:[%s11965_s5 + $0x120] sm:$0xff]  ;;  %v4688_v2 = vperm.slane %v11794_v55, 6  ;;  %v4689_v60 = vperm.slane %v11794_v55, 7 }
 0x335   : > { %5258 = vmatpush.bf16.msra.mxu0 %v8490_v18  ;;  %v8541_v13 = vld [vmem:[%s11965_s5 + $0x1b0] sm:$0xff]  ;;  %v8532_v34 = vld [vmem:[%s11965_s5 + $0x168] sm:$0xff]  ;;  %v8531_v53 = vld [vmem:[%s11965_s5 + $0x160] sm:$0xff] }
 0x336   : > { %5272 = vmatpush.bf16.msra.mxu1 %v8498_v28  ;;  %v8549_v8 = vld [vmem:[%s11965_s5 + $0x1f0] sm:$0xff]  ;;  %v8540_v32 = vld [vmem:[%s11965_s5 + $0x1a8] sm:$0xff]  ;;  %v8539_v15 = vld [vmem:[%s11965_s5 + $0x1a0] sm:$0xff] }
 0x337   : > { %5286 = vmatpush.bf16.msra.mxu2 %v8506_v40  ;;  %v8548_v50 = vld [vmem:[%s11965_s5 + $0x1e8] sm:$0xff]  ;;  %v8547_v18 = vld [vmem:[%s11965_s5 + $0x1e0] sm:$0xff]  ;;  %v8522_v28 = vld [vmem:[%s11965_s5 + $0x118] sm:$0xff] }
 0x338   : > { %5300 = vmatpush.bf16.msra.mxu3 %v8514_v5  ;;  %v8530_v40 = vld [vmem:[%s11965_s5 + $0x158] sm:$0xff]  ;;  %v8545_v62 = vld [vmem:[%s11965_s5 + $0x1d0] sm:$0xff]  ;;  %v4676_v48 = vld [vmem:[#allocation2 + $0x60] sm:$0xff] }
 0x339   : > { %5259 = vmatpush.bf16.msra.mxu0 %v8489_v22  ;;  %v8538_v5 = vld [vmem:[%s11965_s5 + $0x198] sm:$0xff]  ;;  %v4668_v57 = vld [vmem:[#allocation2 + $0x50] sm:$0xff]  ;;  %v4669_v21 = vld [vmem:[#allocation2 + $0x68] sm:$0xff] }
 0x33a   : > { %5273 = vmatpush.bf16.msra.mxu1 %v8497_v56  ;;  %v8546_v22 = vld [vmem:[%s11965_s5 + $0x1d8] sm:$0xff]  ;;  %v8521_v56 = vld [vmem:[%s11965_s5 + $0x110] sm:$0xff]  ;;  %v4670_v51 = vld [vmem:[#allocation2 + $0x8] sm:$0xff]  ;;  %v4702_v61 = vadd.f32 %v4686_v59, %v4668_v57 }
 0x33b   : > { %5287 = vmatpush.bf16.msra.mxu2 %v8505_v12  ;;  %v8529_v12 = vld [vmem:[%s11965_s5 + $0x150] sm:$0xff]  ;;  %v4678_v25 = vld [vmem:[#allocation2 + $0x78] sm:$0xff]  ;;  %v4671_v46 = vld [vmem:[#allocation2 + $0x48] sm:$0xff]  ;;  %v4704_v38 = vadd.f32 %v4688_v2, %v4670_v51 }
 0x33c   : > { %5301 = vmatpush.bf16.msra.mxu3 %v8513_v41  ;;  %v8537_v41 = vld [vmem:[%s11965_s5 + $0x190] sm:$0xff]  ;;  %v4679_v39 = vld [vmem:[#allocation2 + $0x28] sm:$0xff]  ;;  %v8519_v4 = vld [vmem:[%s11965_s5 + $0x100] sm:$0xff] }
 0x33d   : > { %5260 = vmatpush.bf16.msra.mxu0 %v8488_v63  ;;  %v4677_v3 = vld [vmem:[#allocation2 + $0x70] sm:$0xff]  ;;  %v4710_v63 = vadd.f32 %v4686_v59, %v4676_v48  ;;  %v8520_v0 = vld [vmem:[%s11965_s5 + $0x108] sm:$0xff]  ;;  %v4713_v43 = vadd.f32 %v4689_v60, %v4679_v39  ;;  %v8527_v35 = vld [vmem:[%s11965_s5 + $0x140] sm:$0xff] }
 0x33e   : > { %5274 = vmatpush.bf16.msra.mxu1 %v8496_v37  ;;  %v4703_v37 = vadd.f32 %v4687_v54, %v4669_v21  ;;  %v4711_v44 = vadd.f32 %v4687_v54, %v4677_v3  ;;  %v8528_v55 = vld [vmem:[%s11965_s5 + $0x148] sm:$0xff]  ;;  %v8535_v7 = vld [vmem:[%s11965_s5 + $0x180] sm:$0xff] }
 0x33f   : > { %5288 = vmatpush.bf16.msra.mxu2 %v8504_v6  ;;  %v4712_v6 = vadd.f32 %v4688_v2, %v4678_v25  ;;  %v8536_v52 = vld [vmem:[%s11965_s5 + $0x188] sm:$0xff]  ;;  %v4729_v23 = vmax.f32 %v4713_v43, 0.0  ;;  %v8543_v49 = vld [vmem:[%s11965_s5 + $0x1c0] sm:$0xff] }
 0x340   : > { %5302 = vmatpush.bf16.msra.mxu3 %v8512_v42  ;;  %v4705_v42 = vadd.f32 %v4689_v60, %v4671_v46  ;;  %v8544_v33 = vld [vmem:[%s11965_s5 + $0x1c8] sm:$0xff]  ;;  %v4719_v17 = vmax.f32 %v4703_v37, 0.0  ;;  %v4727_v45 = vmax.f32 %v4711_v44, 0.0 }
 0x341   : > { %5261 = vmatpush.bf16.msra.mxu0 %v8487_v16  ;;  %v4718_v16 = vmax.f32 %v4702_v61, 0.0 }
 0x342   : > { %5275 = vmatpush.bf16.msra.mxu1 %v8495_v19  ;;  %v4726_v19 = vmax.f32 %v4710_v63, 0.0  ;;  %v4721_v20 = vmax.f32 %v4705_v42, 0.0 }
 0x343   : > { %5289 = vmatpush.bf16.msra.mxu2 %v8503_v1  ;;  %v4720_v1 = vmax.f32 %v4704_v38, 0.0 }
 0x344   : > { %5303 = vmatpush.bf16.msra.mxu3 %v8511_v10  ;;  %5262 = vmatmul.bf16.vlgmr.msra.gmra.mxu0 %v4730_v30  ;;  %v4728_v10 = vmax.f32 %v4712_v6, 0.0  ;;  %v8578_v30 = vld [vmem:[%s11966_s6] ss:$0 sm:$0xff] }
 0x345   : > { %5310 = vmatpush.bf16.msrb.mxu0 %v8526_v58  ;;  %5276 = vmatmul.bf16.vlgmr.msra.gmra.mxu1 %v4731_v31  ;;  %v4734_v58 = vpack.c.bf16 %v4726_v19, %v4718_v16 }
 0x346   : > { %5324 = vmatpush.bf16.msrb.mxu1 %v8534_v9  ;;  %5290 = vmatmul.bf16.vlgmr.msra.gmra.mxu2 %v4732_v29  ;;  %v4735_v9 = vpack.c.bf16 %v4727_v45, %v4719_v17 }
 0x347   : > { %5338 = vmatpush.bf16.msrb.mxu2 %v8542_v14  ;;  %5304 = vmatmul.bf16.vlgmr.msra.gmra.mxu3 %v4733_v47  ;;  %v4736_v14 = vpack.c.bf16 %v4728_v10, %v4720_v1 }
 0x348   : > { %5352 = vmatpush.bf16.msrb.mxu3 %v8550_v36  ;;  %v4737_v36 = vpack.c.bf16 %v4729_v23, %v4721_v20 }
 0x349   : > { %5311 = vmatpush.bf16.msrb.mxu0 %v8525_v26 }
 0x34a   : > { %5325 = vmatpush.bf16.msrb.mxu1 %v8533_v24 }
 0x34b   : > { %5339 = vmatpush.bf16.msrb.mxu2 %v8541_v13 }
 0x34c   : > { %5353 = vmatpush.bf16.msrb.mxu3 %v8549_v8 }
 0x34d   : > { %5312 = vmatpush.bf16.msrb.mxu0 %v8524_v27 }
 0x34e   : > { %5326 = vmatpush.bf16.msrb.mxu1 %v8532_v34 }
 0x34f   : > { %5340 = vmatpush.bf16.msrb.mxu2 %v8540_v32 }
 0x350   : > { %5354 = vmatpush.bf16.msrb.mxu3 %v8548_v50 }
 0x351   : > { %5313 = vmatpush.bf16.msrb.mxu0 %v8523_v11 }
 0x352   : > { %5327 = vmatpush.bf16.msrb.mxu1 %v8531_v53 }
 0x353   : > { %5341 = vmatpush.bf16.msrb.mxu2 %v8539_v15 }
 0x354   : > { %5355 = vmatpush.bf16.msrb.mxu3 %v8547_v18 }
 0x355   : > { %5314 = vmatpush.bf16.msrb.mxu0 %v8522_v28 }
 0x356   : > { %5328 = vmatpush.bf16.msrb.mxu1 %v8530_v40 }
 0x357   : > { %5342 = vmatpush.bf16.msrb.mxu2 %v8538_v5 }
 0x358   : > { %5356 = vmatpush.bf16.msrb.mxu3 %v8546_v22 }
 0x359   : > { %5315 = vmatpush.bf16.msrb.mxu0 %v8521_v56 }
 0x35a   : > { %5329 = vmatpush.bf16.msrb.mxu1 %v8529_v12 }
 0x35b   : > { %5343 = vmatpush.bf16.msrb.mxu2 %v8537_v41 }
 0x35c   : > { %5357 = vmatpush.bf16.msrb.mxu3 %v8545_v62 }
 0x35d   : > { %5316 = vmatpush.bf16.msrb.mxu0 %v8520_v0 }
 0x35e   : > { %5330 = vmatpush.bf16.msrb.mxu1 %v8528_v55 }
 0x35f   : > { %5344 = vmatpush.bf16.msrb.mxu2 %v8536_v52 }
 0x360   : > { %5358 = vmatpush.bf16.msrb.mxu3 %v8544_v33 }
 0x361   : > { %5317 = vmatpush.bf16.msrb.mxu0 %v8519_v4 }
 0x362   : > { %5331 = vmatpush.bf16.msrb.mxu1 %v8527_v35 }
 0x363   : > { %5345 = vmatpush.bf16.msrb.mxu2 %v8535_v7 }
 0x364   : > { %5359 = vmatpush.bf16.msrb.mxu3 %v8543_v49  ;;  %5318 = vmatmul.bf16.vlgmr.msrb.gmra.mxu0 %v4734_v58 }
 0x365   : > { %5332 = vmatmul.bf16.vlgmr.msrb.gmra.mxu1 %v4735_v9 }
 0x366   : > { %5346 = vmatmul.bf16.vlgmr.msrb.gmra.mxu2 %v4736_v14 }
 0x367   : > { %5360 = vmatmul.bf16.vlgmr.msrb.gmra.mxu3 %v4737_v36 }
 0x3c1   : > { %v5263_v29 = vpop.f32.mrf.mxu0 }
 0x3c2   : > { %v5277_v47 = vpop.f32.mrf.mxu1  ;;  %v5264_v31 = vadd.f32 %v8578_v30, %v5263_v29 }
 0x3c4   : > { %v5278_v13 = vadd.f32 %v5277_v47, %v5264_v31 }
 0x3c9   : > { %v5291_v26 = vpop.f32.mrf.mxu2  ;;  %v5265_v8 = vpop.f32.mrf.mxu0 }
 0x3ca   : > { %v5305_v24 = vpop.f32.mrf.mxu3  ;;  %v5279_v27 = vpop.f32.mrf.mxu1  ;;  %v5292_v34 = vadd.f32 %v5291_v26, %v5278_v13  ;;  %v5266_v32 = vadd.f32 %v8578_v30, %v5265_v8 }
 0x3cc   : > { %v5306_v53 = vadd.f32 %v5305_v24, %v5292_v34  ;;  %v5280_v15 = vadd.f32 %v5279_v27, %v5266_v32 }
 0x3d1   : > { %v5293_v50 = vpop.f32.mrf.mxu2 }
 0x3d2   : > { %v5307_v11 = vpop.f32.mrf.mxu3  ;;  %v5294_v5 = vadd.f32 %v5293_v50, %v5280_v15 }
 0x3d4   : > { %v5308_v59 = vadd.f32 %v5307_v11, %v5294_v5 }
 0x3e1   : > { %v5319_v18 = vpop.f32.mrf.mxu0 }
 0x3e2   : > { %v5320_v28 = vadd.f32 %v5319_v18, %v5306_v53  ;;  %v5333_v40 = vpop.f32.mrf.mxu1 }
 0x3e4   : > { %v5334_v22 = vadd.f32 %v5333_v40, %v5320_v28 }
 0x3e9   : > { %v5347_v56 = vpop.f32.mrf.mxu2  ;;  %v5321_v62 = vpop.f32.mrf.mxu0 }
 0x3ea   : > { %v5361_v12 = vpop.f32.mrf.mxu3  ;;  %v5348_v41 = vadd.f32 %v5347_v56, %v5334_v22  ;;  %v5322_v48 = vadd.f32 %v5321_v62, %v5308_v59  ;;  %v5335_v54 = vpop.f32.mrf.mxu1 }
 0x3ec   : > { %v5362_v57 = vadd.f32 %v5361_v12, %v5348_v41  ;;  %v5336_v2 = vadd.f32 %v5335_v54, %v5322_v48 }
 0x3ee   : > { %5366 = vst [vmem:[%s11967_s7] sm:$0xff] %v5362_v57 }
 0x3f1   : > { %v5349_v21 = vpop.f32.mrf.mxu2 }
 0x3f2   : > { %v5350_v3 = vadd.f32 %v5349_v21, %v5336_v2  ;;  %v5363_v51 = vpop.f32.mrf.mxu3 }
 0x3f4   : > { %v5364_v60 = vadd.f32 %v5363_v51, %v5350_v3 }
 0x3f6   : > { %5367 = vst [vmem:[%s11967_s7 + $0x8] sm:$0xff] %v5364_v60 }
 0x3f7 PF: > { %s17_s26 = sadd.s32 1, %s8601_s26   ;;  %s11968_s24 = smov %s8597_s25 }
 0x3f8   : > { %p14_p8 = scmp.ge.s32.totalorder %s17_s26, 18   ;;  %s11969_s25 = smov %s11971_s27 }
 0x3fa   :  { %16 = sbr.rel (!%p14_p8) target bundleno = 2 (0x2), region = 89 }

</bundles_post_ra>
